<compile_context>
chip_gen: v7x
topology: tpu7x:2x2x1
jax: 0.10.0
libtpu: 0.0.40
codegen_flags: <defaults>
</compile_context>

<pallas_src>
import functools

import jax
import jax.numpy as jnp
from jax import lax
from jax.experimental import pallas as pl
from jax.experimental.pallas import tpu as pltpu


# ----------------------------------------------------------------------------
# Per-generation VMEM budget: ~80% of physical, capped at 110 MiB.
#   v5e/v6e (128 MiB physical) -> ~102 MiB, v7x (64 MiB) -> ~51 MiB.
# Never request the full physical capacity (compiler scratch + double-buffered
# pipeline blocks need headroom).
# ----------------------------------------------------------------------------
def _vmem_limit_bytes():
    try:
        cap = int(pltpu.get_tpu_info().vmem_capacity_bytes)
    except Exception:
        cap = 64 * 1024 * 1024          # conservative fallback
    return min(int(cap * 0.8), 110 * 1024 * 1024)


# ----------------------------------------------------------------------------
# In-kernel helper: 3x3 SAME conv via 3 accumulating MXU matmuls (one per ky).
#   xpad_ref : VMEM scratch (H+2, W+2, C) bf16 whose 1-pixel border is zero
#              (written once per pallas_call) -> provides SAME padding for
#              every fused layer.
#   inp_hwc  : (H, W, C) activation (any float dtype; cast to bf16 once here).
#   w_flat   : (9*C, Cout) bf16 flattened in (ky, kx, cin) order.
#   bias     : (1, Cout) f32.
# Returns (H*W, Cout) f32.
# ----------------------------------------------------------------------------
def _conv3x3(xpad_ref, inp_hwc, w_flat, bias, relu):
    Hp2, Wp2, C = xpad_ref.shape
    H, W = Hp2 - 2, Wp2 - 2
    K3 = 3 * C
    # Interior write (border stays zero).  This is the only f32->bf16 cast:
    # it happens on the 1x input, not the 3x im2col patch.
    xpad_ref[1:H + 1, 1:W + 1, :] = inp_hwc.astype(xpad_ref.dtype)
    # Concatenate only the 3 kx-shifted views once (K = 3*C); the ky offsets
    # below are free leading-dim views -> 3x less im2col materialization than
    # a full 9x patch.
    big = jnp.concatenate(
        [xpad_ref[:, dx:dx + W, :] for dx in range(3)], axis=-1)  # (H+2, W, 3C)
    acc = bias                                                    # (1, Cout) f32
    for dy in range(3):
        patch = big[dy:dy + H].reshape(H * W, K3)                 # bf16, cheap
        acc = acc + jnp.dot(patch, w_flat[dy * K3:(dy + 1) * K3, :],
                            preferred_element_type=jnp.float32)
    if relu:
        acc = jnp.maximum(acc, 0.0)
    return acc                                                    # (H*W, Cout) f32


# ----------------------------------------------------------------------------
# Fused kernel: head conv + n_resblocks ResBlocks + body-tail conv + global
# skip (+ optionally the upsampler's n_feats -> 4*n_feats conv).  Everything
# stays in VMEM; only the input image and the final feature map touch HBM.
# ----------------------------------------------------------------------------
def _edsr_core_kernel(*refs, n_resblocks, res_scale, upsample):
    if upsample:
        x_ref, w_ref, b_ref, wu_ref, bu_ref, o_ref, xpad_ref = refs
    else:
        x_ref, w_ref, b_ref, o_ref, xpad_ref = refs

    H, W, C = x_ref.shape[1], x_ref.shape[2], x_ref.shape[3]

    # Zero the halo scratch once (first grid step only); the interior is fully
    # overwritten by every fused conv and the border is never touched again.
    @pl.when(pl.program_id(0) == 0)
    def _():
        xpad_ref[...] = jnp.zeros_like(xpad_ref)

    def conv(inp_hwc, w_flat, bias, relu):
        return _conv3x3(xpad_ref, inp_hwc, w_flat, bias, relu)

    # Head conv (input channels were zero-padded to C in the wrapper).
    x0 = conv(x_ref[0], w_ref[0], b_ref[0], relu=False)        # (H*W, C) f32

    # Residual body: fori_loop keeps code size & vreg live ranges bounded for
    # real configs (16-32 ResBlocks); weights are indexed dynamically.
    def res_block(i, res):
        h = conv(res.reshape(H, W, C), w_ref[2 * i + 1], b_ref[2 * i + 1],
                 relu=True)
        y = conv(h.reshape(H, W, C), w_ref[2 * i + 2], b_ref[2 * i + 2],
                 relu=False)
        return y * res_scale + res                             # ResBlock skip

    res = lax.fori_loop(0, n_resblocks, res_block, x0)

    # Body-tail conv + global skip (f32).
    last = 1 + 2 * n_resblocks
    res = conv(res.reshape(H, W, C), w_ref[last], b_ref[last],
               relu=False) + x0

    if upsample:
        up = conv(res.reshape(H, W, C), wu_ref[...], bu_ref[...], relu=False)
        o_ref[...] = up.reshape(1, H, W, 4 * C).astype(o_ref.dtype)
    else:
        # NCHW-style (C, H*W) output: lane-dense store (H*W lanes) and no
        # wrapper-side transpose needed.
        o_ref[...] = jnp.transpose(res, (1, 0)).reshape(1, C, H * W).astype(
            o_ref.dtype)


def edsr_core(x_nhwc, body_ws, body_bs, up_w=None, up_b=None, *,
              n_resblocks, res_scale):
    """One fused pallas_call: head + body (+ optional up-conv).

    x_nhwc  : (N, H, W, C) bf16 image, channels zero-padded to n_feats
    body_ws : (L, 9*C, C) bf16, L = 2 + 2*n_resblocks, rows in (ky,kx,cin) order
    body_bs : (L, 1, C) f32
    up_w/up_b : optional (9*C, 4*C) bf16 / (1, 4*C) f32
    Returns (N, H, W, 4C) bf16 if upsampling, else (N, C, H*W) f32 (NCHW-flat).
    """
    N, H, W, C = x_nhwc.shape
    L = body_ws.shape[0]
    upsample = up_w is not None

    kernel = functools.partial(
        _edsr_core_kernel, n_resblocks=n_resblocks,
        res_scale=float(res_scale), upsample=upsample)

    in_specs = [
        pl.BlockSpec((1, H, W, C), lambda n: (n, 0, 0, 0)),
        pl.BlockSpec((L, 9 * C, C), lambda n: (0, 0, 0)),
        pl.BlockSpec((L, 1, C), lambda n: (0, 0, 0)),
    ]
    args = [x_nhwc, body_ws, body_bs]
    if upsample:
        in_specs += [
            pl.BlockSpec((9 * C, 4 * C), lambda n: (0, 0)),
            pl.BlockSpec((1, 4 * C), lambda n: (0, 0)),
        ]
        args += [up_w, up_b]
        out_shape = jax.ShapeDtypeStruct((N, H, W, 4 * C), jnp.bfloat16)
        out_spec = pl.BlockSpec((1, H, W, 4 * C), lambda n: (n, 0, 0, 0))
        out_bytes = N * H * W * 4 * C * 2
    else:
        out_shape = jax.ShapeDtypeStruct((N, C, H * W), jnp.float32)
        out_spec = pl.BlockSpec((1, C, H * W), lambda n: (n, 0, 0))
        out_bytes = N * C * H * W * 4

    flops = 2 * 9 * H * W * C * C * L * N
    if upsample:
        flops += 2 * 9 * H * W * C * (4 * C) * N
    bytes_accessed = (
        x_nhwc.size * x_nhwc.dtype.itemsize
        + body_ws.size * 2 + body_bs.size * 4
        + ((up_w.size * 2 + up_b.size * 4) if upsample else 0)
        + out_bytes)

    return pl.pallas_call(
        kernel,
        out_shape=out_shape,
        grid=(N,),
        in_specs=in_specs,
        out_specs=out_spec,
        scratch_shapes=[pltpu.VMEM((H + 2, W + 2, C), jnp.bfloat16)],
        compiler_params=pltpu.CompilerParams(
            dimension_semantics=("parallel",),
            vmem_limit_bytes=_vmem_limit_bytes()),
        cost_estimate=pl.CostEstimate(
            flops=int(flops), transcendentals=0,
            bytes_accessed=int(bytes_accessed)),
    )(*args)


# ----------------------------------------------------------------------------
# Tail conv kernel: 3x3 SAME conv, NHWC input -> lane-dense NCHW-flat output
# (N, Cout, H*W).  Output channels are padded to 8 lanes for the matmul /
# small transpose and dropped before the store.
# ----------------------------------------------------------------------------
def _tail_conv_kernel(x_ref, w_ref, b_ref, o_ref, xpad_ref):
    H, W = x_ref.shape[1], x_ref.shape[2]
    n_out = o_ref.shape[1]

    @pl.when(pl.program_id(0) == 0)
    def _():
        xpad_ref[...] = jnp.zeros_like(xpad_ref)

    acc = _conv3x3(xpad_ref, x_ref[0], w_ref[...], b_ref[...], relu=False)
    # (H*W, 8) -> (8, H*W): small XLU transpose; drop padded channels and
    # store a lane-dense (n_out, H*W) NCHW block (H*W lanes, unmasked).
    acc_t = jnp.transpose(acc, (1, 0))
    o_ref[...] = acc_t[:n_out].reshape(1, n_out, H * W).astype(o_ref.dtype)


def conv3x3_nchw(x, w, b, *, out_dtype=jnp.float32, cout_pad=8):
    """3x3 SAME conv, NHWC input -> (N, Cout, H*W) output (reshape to NCHW)."""
    N, H, W, Cin = x.shape
    Cout = w.shape[-1]
    cp = max(cout_pad, Cout)
    wf = jnp.pad(w.reshape(9 * Cin, Cout), ((0, 0), (0, cp - Cout)))
    wf = wf.astype(jnp.bfloat16)
    b2 = jnp.pad(b, (0, cp - Cout)).reshape(1, cp).astype(jnp.float32)

    flops = 2 * 9 * H * W * Cin * Cout * N
    bytes_accessed = (x.size * x.dtype.itemsize + wf.size * 2 + b2.size * 4
                      + N * Cout * H * W * jnp.dtype(out_dtype).itemsize)

    return pl.pallas_call(
        _tail_conv_kernel,
        out_shape=jax.ShapeDtypeStruct((N, Cout, H * W), out_dtype),
        grid=(N,),
        in_specs=[
            pl.BlockSpec((1, H, W, Cin), lambda n: (n, 0, 0, 0)),
            pl.BlockSpec((9 * Cin, cp), lambda n: (0, 0)),
            pl.BlockSpec((1, cp), lambda n: (0, 0)),
        ],
        out_specs=pl.BlockSpec((1, Cout, H * W), lambda n: (n, 0, 0)),
        scratch_shapes=[pltpu.VMEM((H + 2, W + 2, Cin), jnp.bfloat16)],
        compiler_params=pltpu.CompilerParams(
            dimension_semantics=("parallel",),
            vmem_limit_bytes=_vmem_limit_bytes()),
        cost_estimate=pl.CostEstimate(
            flops=int(flops), transcendentals=0,
            bytes_accessed=int(bytes_accessed)),
    )(x, wf, b2)


# ----------------------------------------------------------------------------
# Plain-JAX glue: pixel shuffle (pure layout reshuffle, no compute).
# ----------------------------------------------------------------------------
def pixel_shuffle_nhwc(x, r):
    # matches torch.nn.PixelShuffle semantics, translated to NHWC
    N, H, W, C = x.shape
    c = C // (r * r)
    x = x.reshape(N, H, W, c, r, r)
    x = jnp.transpose(x, (0, 1, 4, 2, 5, 3))  # N, H, dy, W, dx, c
    return x.reshape(N, H * r, W * r, c)


# ----------------------------------------------------------------------------
# EDSR model (forward only).  The PyTorch forward does NOT apply
# sub_mean / add_mean, so neither do we.
# ----------------------------------------------------------------------------
def init_edsr_params(key, n_colors, n_feats, n_resblocks, scale):
    def conv_params(k, cin, cout):
        kw, kb = jax.random.split(k)
        fan_in = 9 * cin
        w = jax.random.normal(kw, (3, 3, cin, cout), jnp.float32) / jnp.sqrt(fan_in)
        b = 0.01 * jax.random.normal(kb, (cout,), jnp.float32)
        return w, b

    keys = jax.random.split(key, 4 + 2 * n_resblocks)
    ki = iter(keys)
    params = {}
    params["head"] = conv_params(next(ki), n_colors, n_feats)
    params["blocks"] = []
    for _ in range(n_resblocks):
        w1, b1 = conv_params(next(ki), n_feats, n_feats)
        w2, b2 = conv_params(next(ki), n_feats, n_feats)
        params["blocks"].append((w1, b1, w2, b2))
    params["body_tail"] = conv_params(next(ki), n_feats, n_feats)
    assert scale == 2, "demo covers scale=2 (single upsampler stage)"
    kt = jax.random.split(next(ki), 2)
    params["up"] = conv_params(kt[0], n_feats, 4 * n_feats)
    params["tail"] = conv_params(kt[1], n_feats, n_colors)
    return params


def edsr_forward(x_nchw, params, *, res_scale=1.0, no_upsampling=False, scale=2):
    C = params["head"][0].shape[-1]            # n_feats
    x = jnp.transpose(x_nchw, (0, 2, 3, 1))    # NCHW -> NHWC (tiny LR input)
    n_colors = x.shape[-1]
    N, H, W, _ = x.shape

    # Pad image channels to n_feats (with zero weights for the pad channels)
    # so the head conv shares the fused stacked-weight layout; cast to bf16.
    x = jnp.pad(x, ((0, 0), (0, 0), (0, 0), (0, C - n_colors)))
    x = x.astype(jnp.bfloat16)

    def flat(w):  # (3,3,Cin,Cout) -> (9*Cin, Cout), order (ky, kx, cin)
        return w.reshape(-1, w.shape[-1])

    hw, hb = params["head"]
    hw = jnp.pad(hw, ((0, 0), (0, 0), (0, C - hw.shape[2]), (0, 0)))
    ws, bs = [flat(hw)], [hb]
    for (w1, b1, w2, b2) in params["blocks"]:
        ws += [flat(w1), flat(w2)]
        bs += [b1, b2]
    bw, bb = params["body_tail"]
    ws.append(flat(bw))
    bs.append(bb)
    body_ws = jnp.stack(ws).astype(jnp.bfloat16)                 # (L, 9C, C)
    body_bs = jnp.stack([b.reshape(1, C) for b in bs]).astype(jnp.float32)

    n_resblocks = len(params["blocks"])

    if no_upsampling:
        out = edsr_core(x, body_ws, body_bs,
                        n_resblocks=n_resblocks, res_scale=res_scale)
        return out.reshape(N, C, H, W)                           # already NCHW

    uw, ub = params["up"]
    up_w = flat(uw).astype(jnp.bfloat16)                         # (9C, 4C)
    up_b = ub.reshape(1, -1).astype(jnp.float32)
    t = edsr_core(x, body_ws, body_bs, up_w, up_b,
                  n_resblocks=n_resblocks, res_scale=res_scale)  # (N,H,W,4C) bf16
    t = pixel_shuffle_nhwc(t, scale)                             # (N,2H,2W,C) bf16
    tw, tb = params["tail"]
    out = conv3x3_nchw(t, tw, tb, out_dtype=jnp.float32)         # (N,3,4HW)
    return out.reshape(N, n_colors, H * scale, W * scale)        # NCHW, no transpose


# ----------------------------------------------------------------------------
# Pure-JAX reference (matches the kernel's bf16-matmul / f32-accumulate setup).
# ----------------------------------------------------------------------------
def _ref_conv(x, w, b, relu=False):
    y = jax.lax.conv_general_dilated(
        x.astype(jnp.bfloat16), w.astype(jnp.bfloat16), (1, 1), "SAME",
        dimension_numbers=("NHWC", "HWIO", "NHWC"),
        preferred_element_type=jnp.float32) + b
    return jnp.maximum(y, 0.0) if relu else y


def edsr_reference(x_nchw, params, *, res_scale=1.0, no_upsampling=False, scale=2):
    x = jnp.transpose(x_nchw, (0, 2, 3, 1))
    hw, hb = params["head"]
    x = _ref_conv(x, hw, hb)
    res = x
    for (w1, b1, w2, b2) in params["blocks"]:
        h = _ref_conv(res, w1, b1, relu=True)
        res = _ref_conv(h, w2, b2) * res_scale + res
    bw, bb = params["body_tail"]
    res = _ref_conv(res, bw, bb) + x
    if no_upsampling:
        out = res
    else:
        uw, ub = params["up"]
        t = _ref_conv(res, uw, ub)
        t = pixel_shuffle_nhwc(t, scale)
        tw, tb = params["tail"]
        out = _ref_conv(t, tw, tb)
    return jnp.transpose(out, (0, 3, 1, 2))


if __name__ == "__main__":
    # args: n_resblocks=2, n_feats=16, n_colors=3, scale=(2,), res_scale=1.0,
    #       rgb_range=1, no_upsampling=False
    N, n_colors, H, W = 2, 3, 16, 16
    n_feats, n_resblocks, scale, res_scale = 16, 2, 2, 1.0

    key = jax.random.PRNGKey(0)
    kx, kp = jax.random.split(key)
    x = jax.random.normal(kx, (N, n_colors, H, W), jnp.float32)
    params = init_edsr_params(kp, n_colors, n_feats, n_resblocks, scale)

    y = edsr_forward(x, params, res_scale=res_scale,
                     no_upsampling=False, scale=scale)
    y = jax.block_until_ready(y)

    y_ref = edsr_reference(x, params, res_scale=res_scale,
                           no_upsampling=False, scale=scale)
    y_ref = jax.block_until_ready(y_ref)

    assert y.shape == (N, n_colors, H * scale, W * scale), y.shape
    max_err = float(jnp.max(jnp.abs(y - y_ref)))
    assert jnp.allclose(y, y_ref, rtol=1e-2, atol=1e-2), max_err

    print("KERNEL_OK")
</pallas_src>

<mosaic_0001>
module attributes {stable_mosaic.version = 11 : i64} {
  func.func @_edsr_core_kernel(%arg0: i32, %arg1: memref<1x16x16x16xbf16, #tpu.memory_space<vmem>>, %arg2: memref<6x144x16xbf16, #tpu.memory_space<vmem>>, %arg3: memref<6x1x16xf32, #tpu.memory_space<vmem>>, %arg4: memref<144x64xbf16, #tpu.memory_space<vmem>>, %arg5: memref<1x64xf32, #tpu.memory_space<vmem>>, %arg6: memref<1x16x16x64xbf16, #tpu.memory_space<vmem>>, %arg7: memref<18x18x16xbf16, #tpu.memory_space<vmem>>) attributes {dimension_semantics = [#tpu.dimension_semantics<parallel>], iteration_bounds = array<i64: 2>, scalar_prefetch = 0 : i64, scratch_operands = 1 : i64, tpu.core_type = #tpu.core_type<tc>, window_params = [{transform_indices = @transform_0, window_bounds = array<i64: 1, 16, 16, 16>}, {pipeline_mode = #tpu.pipeline_mode<synchronous>, transform_indices = @transform_1, window_bounds = array<i64: 6, 144, 16>}, {pipeline_mode = #tpu.pipeline_mode<synchronous>, transform_indices = @transform_2, window_bounds = array<i64: 6, 1, 16>}, {pipeline_mode = #tpu.pipeline_mode<synchronous>, transform_indices = @transform_3, window_bounds = array<i64: 144, 64>}, {pipeline_mode = #tpu.pipeline_mode<synchronous>, transform_indices = @transform_4, window_bounds = array<i64: 1, 64>}, {transform_indices = @transform_5, window_bounds = array<i64: 1, 16, 16, 64>}]} {
    %c0_i32 = arith.constant 0 : i32
    %0 = arith.cmpi eq, %arg0, %c0_i32 : i32
    %1 = arith.extui %0 : i1 to i32
    %c0_i32_0 = arith.constant 0 : i32
    %2 = arith.cmpi ne, %1, %c0_i32_0 : i32
    scf.if %2 {
      %cst_67 = arith.constant 0.000000e+00 : bf16
      %88 = vector.broadcast %cst_67 : bf16 to vector<18x18x16xbf16>
      %c0_68 = arith.constant 0 : index
      %c0_69 = arith.constant 0 : index
      %c0_70 = arith.constant 0 : index
      %89 = vector.load %arg7[%c0_68, %c0_69, %c0_70] : memref<18x18x16xbf16, #tpu.memory_space<vmem>>, vector<18x18x16xbf16>
      tpu.vector_store %arg7[%c0_68, %c0_69, %c0_70], %88 {strides = array<i32>} : memref<18x18x16xbf16, #tpu.memory_space<vmem>>, vector<18x18x16xbf16>,
    } else {
    }
    %c0 = arith.constant 0 : index
    %c0_1 = arith.constant 0 : index
    %c0_2 = arith.constant 0 : index
    %c0_3 = arith.constant 0 : index
    %3 = vector.load %arg1[%c0, %c0_1, %c0_2, %c0_3] : memref<1x16x16x16xbf16, #tpu.memory_space<vmem>>, vector<1x16x16x16xbf16>
    %4 = vector.shape_cast %3 : vector<1x16x16x16xbf16> to vector<16x16x16xbf16>
    %c0_4 = arith.constant 0 : index
    %c0_5 = arith.constant 0 : index
    %c0_6 = arith.constant 0 : index
    %5 = vector.load %arg2[%c0_4, %c0_5, %c0_6] : memref<6x144x16xbf16, #tpu.memory_space<vmem>>, vector<1x144x16xbf16>
    %6 = vector.shape_cast %5 : vector<1x144x16xbf16> to vector<144x16xbf16>
    %c0_7 = arith.constant 0 : index
    %c0_8 = arith.constant 0 : index
    %c0_9 = arith.constant 0 : index
    %7 = vector.load %arg3[%c0_7, %c0_8, %c0_9] : memref<6x1x16xf32, #tpu.memory_space<vmem>>, vector<1x1x16xf32>
    %8 = vector.shape_cast %7 : vector<1x1x16xf32> to vector<1x16xf32>
    %c1 = arith.constant 1 : index
    %c1_10 = arith.constant 1 : index
    %c0_11 = arith.constant 0 : index
    %9 = vector.load %arg7[%c1, %c1_10, %c0_11] : memref<18x18x16xbf16, #tpu.memory_space<vmem>>, vector<16x16x16xbf16>
    tpu.vector_store %arg7[%c1, %c1_10, %c0_11], %4 {strides = array<i32>} : memref<18x18x16xbf16, #tpu.memory_space<vmem>>, vector<16x16x16xbf16>,
    %c0_12 = arith.constant 0 : index
    %c0_13 = arith.constant 0 : index
    %c0_14 = arith.constant 0 : index
    %10 = vector.load %arg7[%c0_12, %c0_13, %c0_14] : memref<18x18x16xbf16, #tpu.memory_space<vmem>>, vector<18x16x16xbf16>
    %c0_15 = arith.constant 0 : index
    %c1_16 = arith.constant 1 : index
    %c0_17 = arith.constant 0 : index
    %11 = vector.load %arg7[%c0_15, %c1_16, %c0_17] : memref<18x18x16xbf16, #tpu.memory_space<vmem>>, vector<18x16x16xbf16>
    %c0_18 = arith.constant 0 : index
    %c2 = arith.constant 2 : index
    %c0_19 = arith.constant 0 : index
    %12 = vector.load %arg7[%c0_18, %c2, %c0_19] : memref<18x18x16xbf16, #tpu.memory_space<vmem>>, vector<18x16x16xbf16>
    %13 = tpu.concatenate %10, %11, %12 in 2 : vector<18x16x16xbf16>, vector<18x16x16xbf16>, vector<18x16x16xbf16> -> vector<18x16x48xbf16>
    %14 = vector.extract_strided_slice %13 {offsets = [0, 0, 0], sizes = [16, 16, 48], strides = [1, 1, 1]} : vector<18x16x48xbf16> to vector<16x16x48xbf16>
    %15 = vector.shape_cast %14 : vector<16x16x48xbf16> to vector<256x48xbf16>
    %16 = vector.extract_strided_slice %6 {offsets = [0, 0], sizes = [48, 16], strides = [1, 1]} : vector<144x16xbf16> to vector<48x16xbf16>
    %cst = arith.constant dense<0.000000e+00> : vector<256x16xf32>
    %17 = tpu.matmul %15, %16, %cst {dimension_numbers = #tpu.dot_dimension_numbers<[1], [0], [0], [1], [0, 0, 1, 1], [], []>} : vector<256x48xbf16>, vector<48x16xbf16>, vector<256x16xf32> -> vector<256x16xf32>
    %18 = vector.broadcast %8 : vector<1x16xf32> to vector<256x16xf32>
    %19 = arith.addf %18, %17 : vector<256x16xf32>
    %20 = vector.extract_strided_slice %13 {offsets = [1, 0, 0], sizes = [16, 16, 48], strides = [1, 1, 1]} : vector<18x16x48xbf16> to vector<16x16x48xbf16>
    %21 = vector.shape_cast %20 : vector<16x16x48xbf16> to vector<256x48xbf16>
    %22 = vector.extract_strided_slice %6 {offsets = [48, 0], sizes = [48, 16], strides = [1, 1]} : vector<144x16xbf16> to vector<48x16xbf16>
    %cst_20 = arith.constant dense<0.000000e+00> : vector<256x16xf32>
    %23 = tpu.matmul %21, %22, %cst_20 {dimension_numbers = #tpu.dot_dimension_numbers<[1], [0], [0], [1], [0, 0, 1, 1], [], []>} : vector<256x48xbf16>, vector<48x16xbf16>, vector<256x16xf32> -> vector<256x16xf32>
    %24 = arith.addf %19, %23 : vector<256x16xf32>
    %25 = vector.extract_strided_slice %13 {offsets = [2, 0, 0], sizes = [16, 16, 48], strides = [1, 1, 1]} : vector<18x16x48xbf16> to vector<16x16x48xbf16>
    %26 = vector.shape_cast %25 : vector<16x16x48xbf16> to vector<256x48xbf16>
    %27 = vector.extract_strided_slice %6 {offsets = [96, 0], sizes = [48, 16], strides = [1, 1]} : vector<144x16xbf16> to vector<48x16xbf16>
    %cst_21 = arith.constant dense<0.000000e+00> : vector<256x16xf32>
    %28 = tpu.matmul %26, %27, %cst_21 {dimension_numbers = #tpu.dot_dimension_numbers<[1], [0], [0], [1], [0, 0, 1, 1], [], []>} : vector<256x48xbf16>, vector<48x16xbf16>, vector<256x16xf32> -> vector<256x16xf32>
    %29 = arith.addf %24, %28 : vector<256x16xf32>
    %c0_i32_22 = arith.constant 0 : i32
    %c2_i32 = arith.constant 2 : i32
    %30 = arith.addi %c0_i32_22, %c2_i32 : i32
    %c1_i32 = arith.constant 1 : i32
    %31 = scf.for %arg8 = %c0_i32_22 to %30 step %c1_i32 iter_args(%arg9 = %29) -> (vector<256x16xf32>)  : i32 {
      %88 = vector.shape_cast %arg9 : vector<256x16xf32> to vector<16x16x16xf32>
      %c2_i32_67 = arith.constant 2 : i32
      %89 = arith.muli %c2_i32_67, %arg8 : i32
      %c1_i32_68 = arith.constant 1 : i32
      %90 = arith.addi %89, %c1_i32_68 : i32
      %91 = arith.index_cast %90 : i32 to index
      %c0_69 = arith.constant 0 : index
      %c0_70 = arith.constant 0 : index
      %92 = vector.load %arg2[%91, %c0_69, %c0_70] : memref<6x144x16xbf16, #tpu.memory_space<vmem>>, vector<1x144x16xbf16>
      %93 = vector.shape_cast %92 : vector<1x144x16xbf16> to vector<144x16xbf16>
      %c2_i32_71 = arith.constant 2 : i32
      %94 = arith.muli %c2_i32_71, %arg8 : i32
      %c1_i32_72 = arith.constant 1 : i32
      %95 = arith.addi %94, %c1_i32_72 : i32
      %96 = arith.index_cast %95 : i32 to index
      %c0_73 = arith.constant 0 : index
      %c0_74 = arith.constant 0 : index
      %97 = vector.load %arg3[%96, %c0_73, %c0_74] : memref<6x1x16xf32, #tpu.memory_space<vmem>>, vector<1x1x16xf32>
      %98 = vector.shape_cast %97 : vector<1x1x16xf32> to vector<1x16xf32>
      %99 = arith.truncf %88 : vector<16x16x16xf32> to vector<16x16x16xbf16>
      %c1_75 = arith.constant 1 : index
      %c1_76 = arith.constant 1 : index
      %c0_77 = arith.constant 0 : index
      %100 = vector.load %arg7[%c1_75, %c1_76, %c0_77] : memref<18x18x16xbf16, #tpu.memory_space<vmem>>, vector<16x16x16xbf16>
      tpu.vector_store %arg7[%c1_75, %c1_76, %c0_77], %99 {strides = array<i32>} : memref<18x18x16xbf16, #tpu.memory_space<vmem>>, vector<16x16x16xbf16>,
      %c0_78 = arith.constant 0 : index
      %c0_79 = arith.constant 0 : index
      %c0_80 = arith.constant 0 : index
      %101 = vector.load %arg7[%c0_78, %c0_79, %c0_80] : memref<18x18x16xbf16, #tpu.memory_space<vmem>>, vector<18x16x16xbf16>
      %c0_81 = arith.constant 0 : index
      %c1_82 = arith.constant 1 : index
      %c0_83 = arith.constant 0 : index
      %102 = vector.load %arg7[%c0_81, %c1_82, %c0_83] : memref<18x18x16xbf16, #tpu.memory_space<vmem>>, vector<18x16x16xbf16>
      %c0_84 = arith.constant 0 : index
      %c2_85 = arith.constant 2 : index
      %c0_86 = arith.constant 0 : index
      %103 = vector.load %arg7[%c0_84, %c2_85, %c0_86] : memref<18x18x16xbf16, #tpu.memory_space<vmem>>, vector<18x16x16xbf16>
      %104 = tpu.concatenate %101, %102, %103 in 2 : vector<18x16x16xbf16>, vector<18x16x16xbf16>, vector<18x16x16xbf16> -> vector<18x16x48xbf16>
      %105 = vector.extract_strided_slice %104 {offsets = [0, 0, 0], sizes = [16, 16, 48], strides = [1, 1, 1]} : vector<18x16x48xbf16> to vector<16x16x48xbf16>
      %106 = vector.shape_cast %105 : vector<16x16x48xbf16> to vector<256x48xbf16>
      %107 = vector.extract_strided_slice %93 {offsets = [0, 0], sizes = [48, 16], strides = [1, 1]} : vector<144x16xbf16> to vector<48x16xbf16>
      %cst_87 = arith.constant dense<0.000000e+00> : vector<256x16xf32>
      %108 = tpu.matmul %106, %107, %cst_87 {dimension_numbers = #tpu.dot_dimension_numbers<[1], [0], [0], [1], [0, 0, 1, 1], [], []>} : vector<256x48xbf16>, vector<48x16xbf16>, vector<256x16xf32> -> vector<256x16xf32>
      %109 = vector.broadcast %98 : vector<1x16xf32> to vector<256x16xf32>
      %110 = arith.addf %109, %108 : vector<256x16xf32>
      %111 = vector.extract_strided_slice %104 {offsets = [1, 0, 0], sizes = [16, 16, 48], strides = [1, 1, 1]} : vector<18x16x48xbf16> to vector<16x16x48xbf16>
      %112 = vector.shape_cast %111 : vector<16x16x48xbf16> to vector<256x48xbf16>
      %113 = vector.extract_strided_slice %93 {offsets = [48, 0], sizes = [48, 16], strides = [1, 1]} : vector<144x16xbf16> to vector<48x16xbf16>
      %cst_88 = arith.constant dense<0.000000e+00> : vector<256x16xf32>
      %114 = tpu.matmul %112, %113, %cst_88 {dimension_numbers = #tpu.dot_dimension_numbers<[1], [0], [0], [1], [0, 0, 1, 1], [], []>} : vector<256x48xbf16>, vector<48x16xbf16>, vector<256x16xf32> -> vector<256x16xf32>
      %115 = arith.addf %110, %114 : vector<256x16xf32>
      %116 = vector.extract_strided_slice %104 {offsets = [2, 0, 0], sizes = [16, 16, 48], strides = [1, 1, 1]} : vector<18x16x48xbf16> to vector<16x16x48xbf16>
      %117 = vector.shape_cast %116 : vector<16x16x48xbf16> to vector<256x48xbf16>
      %118 = vector.extract_strided_slice %93 {offsets = [96, 0], sizes = [48, 16], strides = [1, 1]} : vector<144x16xbf16> to vector<48x16xbf16>
      %cst_89 = arith.constant dense<0.000000e+00> : vector<256x16xf32>
      %119 = tpu.matmul %117, %118, %cst_89 {dimension_numbers = #tpu.dot_dimension_numbers<[1], [0], [0], [1], [0, 0, 1, 1], [], []>} : vector<256x48xbf16>, vector<48x16xbf16>, vector<256x16xf32> -> vector<256x16xf32>
      %120 = arith.addf %115, %119 : vector<256x16xf32>
      %cst_90 = arith.constant 0.000000e+00 : f32
      %121 = vector.broadcast %cst_90 : f32 to vector<256x16xf32>
      %122 = arith.maximumf %120, %121 : vector<256x16xf32>
      %123 = vector.shape_cast %122 : vector<256x16xf32> to vector<16x16x16xf32>
      %c2_i32_91 = arith.constant 2 : i32
      %124 = arith.muli %c2_i32_91, %arg8 : i32
      %c2_i32_92 = arith.constant 2 : i32
      %125 = arith.addi %124, %c2_i32_92 : i32
      %126 = arith.index_cast %125 : i32 to index
      %c0_93 = arith.constant 0 : index
      %c0_94 = arith.constant 0 : index
      %127 = vector.load %arg2[%126, %c0_93, %c0_94] : memref<6x144x16xbf16, #tpu.memory_space<vmem>>, vector<1x144x16xbf16>
      %128 = vector.shape_cast %127 : vector<1x144x16xbf16> to vector<144x16xbf16>
      %c2_i32_95 = arith.constant 2 : i32
      %129 = arith.muli %c2_i32_95, %arg8 : i32
      %c2_i32_96 = arith.constant 2 : i32
      %130 = arith.addi %129, %c2_i32_96 : i32
      %131 = arith.index_cast %130 : i32 to index
      %c0_97 = arith.constant 0 : index
      %c0_98 = arith.constant 0 : index
      %132 = vector.load %arg3[%131, %c0_97, %c0_98] : memref<6x1x16xf32, #tpu.memory_space<vmem>>, vector<1x1x16xf32>
      %133 = vector.shape_cast %132 : vector<1x1x16xf32> to vector<1x16xf32>
      %134 = arith.truncf %123 : vector<16x16x16xf32> to vector<16x16x16xbf16>
      %c1_99 = arith.constant 1 : index
      %c1_100 = arith.constant 1 : index
      %c0_101 = arith.constant 0 : index
      %135 = vector.load %arg7[%c1_99, %c1_100, %c0_101] : memref<18x18x16xbf16, #tpu.memory_space<vmem>>, vector<16x16x16xbf16>
      tpu.vector_store %arg7[%c1_99, %c1_100, %c0_101], %134 {strides = array<i32>} : memref<18x18x16xbf16, #tpu.memory_space<vmem>>, vector<16x16x16xbf16>,
      %c0_102 = arith.constant 0 : index
      %c0_103 = arith.constant 0 : index
      %c0_104 = arith.constant 0 : index
      %136 = vector.load %arg7[%c0_102, %c0_103, %c0_104] : memref<18x18x16xbf16, #tpu.memory_space<vmem>>, vector<18x16x16xbf16>
      %c0_105 = arith.constant 0 : index
      %c1_106 = arith.constant 1 : index
      %c0_107 = arith.constant 0 : index
      %137 = vector.load %arg7[%c0_105, %c1_106, %c0_107] : memref<18x18x16xbf16, #tpu.memory_space<vmem>>, vector<18x16x16xbf16>
      %c0_108 = arith.constant 0 : index
      %c2_109 = arith.constant 2 : index
      %c0_110 = arith.constant 0 : index
      %138 = vector.load %arg7[%c0_108, %c2_109, %c0_110] : memref<18x18x16xbf16, #tpu.memory_space<vmem>>, vector<18x16x16xbf16>
      %139 = tpu.concatenate %136, %137, %138 in 2 : vector<18x16x16xbf16>, vector<18x16x16xbf16>, vector<18x16x16xbf16> -> vector<18x16x48xbf16>
      %140 = vector.extract_strided_slice %139 {offsets = [0, 0, 0], sizes = [16, 16, 48], strides = [1, 1, 1]} : vector<18x16x48xbf16> to vector<16x16x48xbf16>
      %141 = vector.shape_cast %140 : vector<16x16x48xbf16> to vector<256x48xbf16>
      %142 = vector.extract_strided_slice %128 {offsets = [0, 0], sizes = [48, 16], strides = [1, 1]} : vector<144x16xbf16> to vector<48x16xbf16>
      %cst_111 = arith.constant dense<0.000000e+00> : vector<256x16xf32>
      %143 = tpu.matmul %141, %142, %cst_111 {dimension_numbers = #tpu.dot_dimension_numbers<[1], [0], [0], [1], [0, 0, 1, 1], [], []>} : vector<256x48xbf16>, vector<48x16xbf16>, vector<256x16xf32> -> vector<256x16xf32>
      %144 = vector.broadcast %133 : vector<1x16xf32> to vector<256x16xf32>
      %145 = arith.addf %144, %143 : vector<256x16xf32>
      %146 = vector.extract_strided_slice %139 {offsets = [1, 0, 0], sizes = [16, 16, 48], strides = [1, 1, 1]} : vector<18x16x48xbf16> to vector<16x16x48xbf16>
      %147 = vector.shape_cast %146 : vector<16x16x48xbf16> to vector<256x48xbf16>
      %148 = vector.extract_strided_slice %128 {offsets = [48, 0], sizes = [48, 16], strides = [1, 1]} : vector<144x16xbf16> to vector<48x16xbf16>
      %cst_112 = arith.constant dense<0.000000e+00> : vector<256x16xf32>
      %149 = tpu.matmul %147, %148, %cst_112 {dimension_numbers = #tpu.dot_dimension_numbers<[1], [0], [0], [1], [0, 0, 1, 1], [], []>} : vector<256x48xbf16>, vector<48x16xbf16>, vector<256x16xf32> -> vector<256x16xf32>
      %150 = arith.addf %145, %149 : vector<256x16xf32>
      %151 = vector.extract_strided_slice %139 {offsets = [2, 0, 0], sizes = [16, 16, 48], strides = [1, 1, 1]} : vector<18x16x48xbf16> to vector<16x16x48xbf16>
      %152 = vector.shape_cast %151 : vector<16x16x48xbf16> to vector<256x48xbf16>
      %153 = vector.extract_strided_slice %128 {offsets = [96, 0], sizes = [48, 16], strides = [1, 1]} : vector<144x16xbf16> to vector<48x16xbf16>
      %cst_113 = arith.constant dense<0.000000e+00> : vector<256x16xf32>
      %154 = tpu.matmul %152, %153, %cst_113 {dimension_numbers = #tpu.dot_dimension_numbers<[1], [0], [0], [1], [0, 0, 1, 1], [], []>} : vector<256x48xbf16>, vector<48x16xbf16>, vector<256x16xf32> -> vector<256x16xf32>
      %155 = arith.addf %150, %154 : vector<256x16xf32>
      %cst_114 = arith.constant 1.000000e+00 : f32
      %156 = vector.broadcast %cst_114 : f32 to vector<256x16xf32>
      %157 = arith.mulf %155, %156 : vector<256x16xf32>
      %158 = arith.addf %157, %arg9 : vector<256x16xf32>
      scf.yield %158 : vector<256x16xf32>
    }
    %c2_i32_23 = arith.constant 2 : i32
    %32 = vector.shape_cast %31 : vector<256x16xf32> to vector<16x16x16xf32>
    %c5 = arith.constant 5 : index
    %c0_24 = arith.constant 0 : index
    %c0_25 = arith.constant 0 : index
    %33 = vector.load %arg2[%c5, %c0_24, %c0_25] : memref<6x144x16xbf16, #tpu.memory_space<vmem>>, vector<1x144x16xbf16>
    %34 = vector.shape_cast %33 : vector<1x144x16xbf16> to vector<144x16xbf16>
    %c5_26 = arith.constant 5 : index
    %c0_27 = arith.constant 0 : index
    %c0_28 = arith.constant 0 : index
    %35 = vector.load %arg3[%c5_26, %c0_27, %c0_28] : memref<6x1x16xf32, #tpu.memory_space<vmem>>, vector<1x1x16xf32>
    %36 = vector.shape_cast %35 : vector<1x1x16xf32> to vector<1x16xf32>
    %37 = arith.truncf %32 : vector<16x16x16xf32> to vector<16x16x16xbf16>
    %c1_29 = arith.constant 1 : index
    %c1_30 = arith.constant 1 : index
    %c0_31 = arith.constant 0 : index
    %38 = vector.load %arg7[%c1_29, %c1_30, %c0_31] : memref<18x18x16xbf16, #tpu.memory_space<vmem>>, vector<16x16x16xbf16>
    tpu.vector_store %arg7[%c1_29, %c1_30, %c0_31], %37 {strides = array<i32>} : memref<18x18x16xbf16, #tpu.memory_space<vmem>>, vector<16x16x16xbf16>,
    %c0_32 = arith.constant 0 : index
    %c0_33 = arith.constant 0 : index
    %c0_34 = arith.constant 0 : index
    %39 = vector.load %arg7[%c0_32, %c0_33, %c0_34] : memref<18x18x16xbf16, #tpu.memory_space<vmem>>, vector<18x16x16xbf16>
    %c0_35 = arith.constant 0 : index
    %c1_36 = arith.constant 1 : index
    %c0_37 = arith.constant 0 : index
    %40 = vector.load %arg7[%c0_35, %c1_36, %c0_37] : memref<18x18x16xbf16, #tpu.memory_space<vmem>>, vector<18x16x16xbf16>
    %c0_38 = arith.constant 0 : index
    %c2_39 = arith.constant 2 : index
    %c0_40 = arith.constant 0 : index
    %41 = vector.load %arg7[%c0_38, %c2_39, %c0_40] : memref<18x18x16xbf16, #tpu.memory_space<vmem>>, vector<18x16x16xbf16>
    %42 = tpu.concatenate %39, %40, %41 in 2 : vector<18x16x16xbf16>, vector<18x16x16xbf16>, vector<18x16x16xbf16> -> vector<18x16x48xbf16>
    %43 = vector.extract_strided_slice %42 {offsets = [0, 0, 0], sizes = [16, 16, 48], strides = [1, 1, 1]} : vector<18x16x48xbf16> to vector<16x16x48xbf16>
    %44 = vector.shape_cast %43 : vector<16x16x48xbf16> to vector<256x48xbf16>
    %45 = vector.extract_strided_slice %34 {offsets = [0, 0], sizes = [48, 16], strides = [1, 1]} : vector<144x16xbf16> to vector<48x16xbf16>
    %cst_41 = arith.constant dense<0.000000e+00> : vector<256x16xf32>
    %46 = tpu.matmul %44, %45, %cst_41 {dimension_numbers = #tpu.dot_dimension_numbers<[1], [0], [0], [1], [0, 0, 1, 1], [], []>} : vector<256x48xbf16>, vector<48x16xbf16>, vector<256x16xf32> -> vector<256x16xf32>
    %47 = vector.broadcast %36 : vector<1x16xf32> to vector<256x16xf32>
    %48 = arith.addf %47, %46 : vector<256x16xf32>
    %49 = vector.extract_strided_slice %42 {offsets = [1, 0, 0], sizes = [16, 16, 48], strides = [1, 1, 1]} : vector<18x16x48xbf16> to vector<16x16x48xbf16>
    %50 = vector.shape_cast %49 : vector<16x16x48xbf16> to vector<256x48xbf16>
    %51 = vector.extract_strided_slice %34 {offsets = [48, 0], sizes = [48, 16], strides = [1, 1]} : vector<144x16xbf16> to vector<48x16xbf16>
    %cst_42 = arith.constant dense<0.000000e+00> : vector<256x16xf32>
    %52 = tpu.matmul %50, %51, %cst_42 {dimension_numbers = #tpu.dot_dimension_numbers<[1], [0], [0], [1], [0, 0, 1, 1], [], []>} : vector<256x48xbf16>, vector<48x16xbf16>, vector<256x16xf32> -> vector<256x16xf32>
    %53 = arith.addf %48, %52 : vector<256x16xf32>
    %54 = vector.extract_strided_slice %42 {offsets = [2, 0, 0], sizes = [16, 16, 48], strides = [1, 1, 1]} : vector<18x16x48xbf16> to vector<16x16x48xbf16>
    %55 = vector.shape_cast %54 : vector<16x16x48xbf16> to vector<256x48xbf16>
    %56 = vector.extract_strided_slice %34 {offsets = [96, 0], sizes = [48, 16], strides = [1, 1]} : vector<144x16xbf16> to vector<48x16xbf16>
    %cst_43 = arith.constant dense<0.000000e+00> : vector<256x16xf32>
    %57 = tpu.matmul %55, %56, %cst_43 {dimension_numbers = #tpu.dot_dimension_numbers<[1], [0], [0], [1], [0, 0, 1, 1], [], []>} : vector<256x48xbf16>, vector<48x16xbf16>, vector<256x16xf32> -> vector<256x16xf32>
    %58 = arith.addf %53, %57 : vector<256x16xf32>
    %59 = arith.addf %58, %29 : vector<256x16xf32>
    %60 = vector.shape_cast %59 : vector<256x16xf32> to vector<16x16x16xf32>
    %c0_44 = arith.constant 0 : index
    %c0_45 = arith.constant 0 : index
    %61 = vector.load %arg4[%c0_44, %c0_45] : memref<144x64xbf16, #tpu.memory_space<vmem>>, vector<144x64xbf16>
    %c0_46 = arith.constant 0 : index
    %c0_47 = arith.constant 0 : index
    %62 = vector.load %arg5[%c0_46, %c0_47] : memref<1x64xf32, #tpu.memory_space<vmem>>, vector<1x64xf32>
    %63 = arith.truncf %60 : vector<16x16x16xf32> to vector<16x16x16xbf16>
    %c1_48 = arith.constant 1 : index
    %c1_49 = arith.constant 1 : index
    %c0_50 = arith.constant 0 : index
    %64 = vector.load %arg7[%c1_48, %c1_49, %c0_50] : memref<18x18x16xbf16, #tpu.memory_space<vmem>>, vector<16x16x16xbf16>
    tpu.vector_store %arg7[%c1_48, %c1_49, %c0_50], %63 {strides = array<i32>} : memref<18x18x16xbf16, #tpu.memory_space<vmem>>, vector<16x16x16xbf16>,
    %c0_51 = arith.constant 0 : index
    %c0_52 = arith.constant 0 : index
    %c0_53 = arith.constant 0 : index
    %65 = vector.load %arg7[%c0_51, %c0_52, %c0_53] : memref<18x18x16xbf16, #tpu.memory_space<vmem>>, vector<18x16x16xbf16>
    %c0_54 = arith.constant 0 : index
    %c1_55 = arith.constant 1 : index
    %c0_56 = arith.constant 0 : index
    %66 = vector.load %arg7[%c0_54, %c1_55, %c0_56] : memref<18x18x16xbf16, #tpu.memory_space<vmem>>, vector<18x16x16xbf16>
    %c0_57 = arith.constant 0 : index
    %c2_58 = arith.constant 2 : index
    %c0_59 = arith.constant 0 : index
    %67 = vector.load %arg7[%c0_57, %c2_58, %c0_59] : memref<18x18x16xbf16, #tpu.memory_space<vmem>>, vector<18x16x16xbf16>
    %68 = tpu.concatenate %65, %66, %67 in 2 : vector<18x16x16xbf16>, vector<18x16x16xbf16>, vector<18x16x16xbf16> -> vector<18x16x48xbf16>
    %69 = vector.extract_strided_slice %68 {offsets = [0, 0, 0], sizes = [16, 16, 48], strides = [1, 1, 1]} : vector<18x16x48xbf16> to vector<16x16x48xbf16>
    %70 = vector.shape_cast %69 : vector<16x16x48xbf16> to vector<256x48xbf16>
    %71 = vector.extract_strided_slice %61 {offsets = [0, 0], sizes = [48, 64], strides = [1, 1]} : vector<144x64xbf16> to vector<48x64xbf16>
    %cst_60 = arith.constant dense<0.000000e+00> : vector<256x64xf32>
    %72 = tpu.matmul %70, %71, %cst_60 {dimension_numbers = #tpu.dot_dimension_numbers<[1], [0], [0], [1], [0, 0, 1, 1], [], []>} : vector<256x48xbf16>, vector<48x64xbf16>, vector<256x64xf32> -> vector<256x64xf32>
    %73 = vector.broadcast %62 : vector<1x64xf32> to vector<256x64xf32>
    %74 = arith.addf %73, %72 : vector<256x64xf32>
    %75 = vector.extract_strided_slice %68 {offsets = [1, 0, 0], sizes = [16, 16, 48], strides = [1, 1, 1]} : vector<18x16x48xbf16> to vector<16x16x48xbf16>
    %76 = vector.shape_cast %75 : vector<16x16x48xbf16> to vector<256x48xbf16>
    %77 = vector.extract_strided_slice %61 {offsets = [48, 0], sizes = [48, 64], strides = [1, 1]} : vector<144x64xbf16> to vector<48x64xbf16>
    %cst_61 = arith.constant dense<0.000000e+00> : vector<256x64xf32>
    %78 = tpu.matmul %76, %77, %cst_61 {dimension_numbers = #tpu.dot_dimension_numbers<[1], [0], [0], [1], [0, 0, 1, 1], [], []>} : vector<256x48xbf16>, vector<48x64xbf16>, vector<256x64xf32> -> vector<256x64xf32>
    %79 = arith.addf %74, %78 : vector<256x64xf32>
    %80 = vector.extract_strided_slice %68 {offsets = [2, 0, 0], sizes = [16, 16, 48], strides = [1, 1, 1]} : vector<18x16x48xbf16> to vector<16x16x48xbf16>
    %81 = vector.shape_cast %80 : vector<16x16x48xbf16> to vector<256x48xbf16>
    %82 = vector.extract_strided_slice %61 {offsets = [96, 0], sizes = [48, 64], strides = [1, 1]} : vector<144x64xbf16> to vector<48x64xbf16>
    %cst_62 = arith.constant dense<0.000000e+00> : vector<256x64xf32>
    %83 = tpu.matmul %81, %82, %cst_62 {dimension_numbers = #tpu.dot_dimension_numbers<[1], [0], [0], [1], [0, 0, 1, 1], [], []>} : vector<256x48xbf16>, vector<48x64xbf16>, vector<256x64xf32> -> vector<256x64xf32>
    %84 = arith.addf %79, %83 : vector<256x64xf32>
    %85 = vector.shape_cast %84 : vector<256x64xf32> to vector<1x16x16x64xf32>
    %86 = arith.truncf %85 : vector<1x16x16x64xf32> to vector<1x16x16x64xbf16>
    %c0_63 = arith.constant 0 : index
    %c0_64 = arith.constant 0 : index
    %c0_65 = arith.constant 0 : index
    %c0_66 = arith.constant 0 : index
    %87 = vector.load %arg6[%c0_63, %c0_64, %c0_65, %c0_66] : memref<1x16x16x64xbf16, #tpu.memory_space<vmem>>, vector<1x16x16x64xbf16>
    tpu.vector_store %arg6[%c0_63, %c0_64, %c0_65, %c0_66], %86 {strides = array<i32>} : memref<1x16x16x64xbf16, #tpu.memory_space<vmem>>, vector<1x16x16x64xbf16>,
    return
  }
  func.func @transform_0(%arg0: i32) -> (i32, i32, i32, i32) {
    %c0_i32 = arith.constant 0 : i32
    %c0_i32_0 = arith.constant 0 : i32
    %c0_i32_1 = arith.constant 0 : i32
    %c0_i32_2 = arith.constant 0 : i32
    return %arg0, %c0_i32, %c0_i32_0, %c0_i32_1 : i32, i32, i32, i32
  }
  func.func @transform_1(%arg0: i32) -> (i32, i32, i32) {
    %c0_i32 = arith.constant 0 : i32
    %c0_i32_0 = arith.constant 0 : i32
    %c0_i32_1 = arith.constant 0 : i32
    %c0_i32_2 = arith.constant 0 : i32
    return %c0_i32, %c0_i32_0, %c0_i32_1 : i32, i32, i32
  }
  func.func @transform_2(%arg0: i32) -> (i32, i32, i32) {
    %c0_i32 = arith.constant 0 : i32
    %c0_i32_0 = arith.constant 0 : i32
    %c0_i32_1 = arith.constant 0 : i32
    %c0_i32_2 = arith.constant 0 : i32
    return %c0_i32, %c0_i32_0, %c0_i32_1 : i32, i32, i32
  }
  func.func @transform_3(%arg0: i32) -> (i32, i32) {
    %c0_i32 = arith.constant 0 : i32
    %c0_i32_0 = arith.constant 0 : i32
    %c0_i32_1 = arith.constant 0 : i32
    return %c0_i32, %c0_i32_0 : i32, i32
  }
  func.func @transform_4(%arg0: i32) -> (i32, i32) {
    %c0_i32 = arith.constant 0 : i32
    %c0_i32_0 = arith.constant 0 : i32
    %c0_i32_1 = arith.constant 0 : i32
    return %c0_i32, %c0_i32_0 : i32, i32
  }
  func.func @transform_5(%arg0: i32) -> (i32, i32, i32, i32) {
    %c0_i32 = arith.constant 0 : i32
    %c0_i32_0 = arith.constant 0 : i32
    %c0_i32_1 = arith.constant 0 : i32
    %c0_i32_2 = arith.constant 0 : i32
    return %arg0, %c0_i32, %c0_i32_0, %c0_i32_1 : i32, i32, i32, i32
  }
}

</mosaic_0001>

<bundles_post_ra>
// kernel: tpu_custom_call.1
= control target key start
LH: loop header
LB: loop body
LE: loop exit
PB: predicated region body
PF: predicated region fallthrough
CT: control target
= control target key end

     0   :  { %10 = vsyncpa [#allocation4], 0  ;;  %s17197_s0 = inlined_call_operand.vmem [shape: bf16[2,16,16,16], index: 0, kind: input, shape index: {}]   ;;  %s17198_s1 = inlined_call_operand.vmem [shape: bf16[6,144,16], index: 1, kind: input, shape index: {}]   ;;  %s17199_s2 = inlined_call_operand.vmem [shape: f32[6,1,16], index: 2, kind: input, shape index: {}]   ;;  %s17200_s3 = inlined_call_operand.vmem [shape: bf16[144,64], index: 3, kind: input, shape index: {}]   ;;  %s17201_s4 = inlined_call_operand.vmem [shape: f32[1,64], index: 4, kind: input, shape index: {}]   ;;  %s17202_s5 = inlined_call_operand.hbm [shape: bf16[2,16,16,64], index: 5, kind: output, shape index: {}]  }
   0x1   :  { %12 = vsyncpa [#allocation4 + $0x1], 0  ;;  %s13527_s18 = smov 0   ;;  %s13529_s19 = smov 0  }
   0x2   :  { %s13531_s20 = smov 0   ;;  %s13533_s21 = smov 0  }
   0x3 LB: > { %s13548_s22 = sadd.s32 4294967295, %s13355_s21   ;;  %s10264_s23 = sadd.s32 4294967294, %s13355_s21   ;;  %s13355_s21 = sphi %s13533_s21, %s17504_s21   ;;  %s13351_s20 = sphi %s13531_s20, %s17503_s20   ;;  %s13347_s19 = sphi %s13529_s19, %s17502_s19   ;;  %s13343_s18 = sphi %s13527_s18, %s17501_s18  }
   0x4   : > { %s13552_s24 = sadd.s32 1, %s13355_s21   ;;  %s135_s25 = sadd.s32 1, %s13351_s20 }
   0x5   : > { %s132_s26 = ssub.s32 %s13355_s21, %s13552_s24  ;;  %p145_p0 = scmp.ne.s32.totalorder %s13351_s20, %s13347_s19 }
   0x6   : > { %p133_p1 = scmp.eq.s32.totalorder %s132_s26, 0  ;;  %p146_p2 = scmp.eq.s32.totalorder %s13548_s22, 1 }
   0x7   : > { %p151_p3 = scmp.ne.s32.totalorder %s13347_s19, %s13343_s18  ;;  %p152_p4 = scmp.eq.s32.totalorder %s10264_s23, 1 }
   0x8   : > { %s13563_s27 = scalar_select %p133_p1, %s13351_s20, %s135_s25  }
   0x9   : > { %p13565_p5 = por %p146_p2, %p145_p0  ;;  %p13569_p6 = por %p152_p4, %p151_p3 }
   0xa   : > { %p10267_p7 = scmp.ge.s32.totalorder %s13355_s21, 1  ;;  %p190_p8 = scmp.lt.s32.totalorder %s13355_s21, 3 }
   0xc   : > { %p191_p9 = pnand %p10267_p7, %p190_p8 }
   0xe   : > { %194 = sbr.rel (%p191_p9) target bundleno = 2826 (0xb0a), region = 40 }
  0x15   : > { %s215_s30 = sand.u32 1, %s13347_s19   ;;  %p218_p10 = scmp.lt.s32.totalorder %s13548_s22, 1 }
  0x16   : > { %s10268_s6 = sshll.u32 %s215_s30, 7  ;;  %p10271_p11 = scmp.ne.s32.totalorder %s13548_s22, 0 }
  0x17   : > { %s219_s7 = scalar_select %p218_p10, %s13548_s22, 1 }
  0x18   : > { %s13585_s12 = scalar_lea.vmem [#allocation3], %s10268_s6  ;;  %227 = sbr.rel (%p10271_p11) target bundleno = 52 (0x34), region = 44  ;;  %vm228_vm0 = vcmask (!%p10271_p11), 125952   ;;  %vm231_vm1 = vcmask (!%p10271_p11), 122880   ;;  %v13489_v0 = vmov (!%p10271_p11), 0  }
  0x19   : > { %s11060_s8 = sshll.u32 %s219_s7, 7  ;;  %229 = vst.msk [vmem:[#allocation2] sm:$0xf] (!%p10271_p11), %vm228_vm0, %v13489_v0  ;;  %230 = vst.msk [vmem:[#allocation2 + $0x4] sm:$0xf] (!%p10271_p11), %vm228_vm0, %v13489_v0 }
  0x1a   : > { %s13583_s11 = scalar_lea.vmem %s17197_s0, %s11060_s8  ;;  %233 = vst.msk [vmem:[#allocation2 + $0xc] sm:$0xf] (!%p10271_p11), %vm228_vm0, %v13489_v0  ;;  %234 = vst.msk [vmem:[#allocation2 + $0x10] sm:$0xf] (!%p10271_p11), %vm228_vm0, %v13489_v0 }
  0x1b   : > { %236 = vst.msk [vmem:[#allocation2 + $0x18] sm:$0xf] (!%p10271_p11), %vm228_vm0, %v13489_v0  ;;  %237 = vst.msk [vmem:[#allocation2 + $0x1c] sm:$0xf] (!%p10271_p11), %vm228_vm0, %v13489_v0 }
  0x1c   : > { %239 = vst.msk [vmem:[#allocation2 + $0x24] sm:$0xf] (!%p10271_p11), %vm228_vm0, %v13489_v0  ;;  %240 = vst.msk [vmem:[#allocation2 + $0x28] sm:$0xf] (!%p10271_p11), %vm228_vm0, %v13489_v0 }
  0x1d   : > { %242 = vst.msk [vmem:[#allocation2 + $0x30] sm:$0xf] (!%p10271_p11), %vm228_vm0, %v13489_v0  ;;  %243 = vst.msk [vmem:[#allocation2 + $0x34] sm:$0xf] (!%p10271_p11), %vm228_vm0, %v13489_v0 }
  0x1e   : > { %245 = vst.msk [vmem:[#allocation2 + $0x3c] sm:$0xf] (!%p10271_p11), %vm228_vm0, %v13489_v0  ;;  %246 = vst.msk [vmem:[#allocation2 + $0x40] sm:$0xf] (!%p10271_p11), %vm228_vm0, %v13489_v0 }
  0x1f   : > { %248 = vst.msk [vmem:[#allocation2 + $0x48] sm:$0xf] %vm228_vm0, %v13489_v0  ;;  %249 = vst.msk [vmem:[#allocation2 + $0x4c] sm:$0xf] %vm228_vm0, %v13489_v0 }
  0x20   : > { %251 = vst.msk [vmem:[#allocation2 + $0x54] sm:$0xf] %vm228_vm0, %v13489_v0  ;;  %252 = vst.msk [vmem:[#allocation2 + $0x58] sm:$0xf] %vm228_vm0, %v13489_v0 }
  0x21   : > { %254 = vst.msk [vmem:[#allocation2 + $0x60] sm:$0xf] %vm228_vm0, %v13489_v0  ;;  %255 = vst.msk [vmem:[#allocation2 + $0x64] sm:$0xf] %vm228_vm0, %v13489_v0 }
  0x22   : > { %257 = vst.msk [vmem:[#allocation2 + $0x6c] sm:$0xf] %vm228_vm0, %v13489_v0  ;;  %258 = vst.msk [vmem:[#allocation2 + $0x70] sm:$0xf] %vm228_vm0, %v13489_v0 }
  0x23   : > { %260 = vst.msk [vmem:[#allocation2 + $0x78] sm:$0xf] %vm228_vm0, %v13489_v0  ;;  %261 = vst.msk [vmem:[#allocation2 + $0x7c] sm:$0xf] %vm228_vm0, %v13489_v0 }
  0x24   : > { %263 = vst.msk [vmem:[#allocation2 + $0x84] sm:$0xf] %vm228_vm0, %v13489_v0  ;;  %264 = vst.msk [vmem:[#allocation2 + $0x88] sm:$0xf] %vm228_vm0, %v13489_v0 }
  0x25   : > { %266 = vst.msk [vmem:[#allocation2 + $0x90] sm:$0xf] %vm228_vm0, %v13489_v0  ;;  %267 = vst.msk [vmem:[#allocation2 + $0x94] sm:$0xf] %vm228_vm0, %v13489_v0 }
  0x26   : > { %269 = vst.msk [vmem:[#allocation2 + $0x9c] sm:$0xf] %vm228_vm0, %v13489_v0  ;;  %270 = vst.msk [vmem:[#allocation2 + $0xa0] sm:$0xf] %vm228_vm0, %v13489_v0 }
  0x27   : > { %272 = vst.msk [vmem:[#allocation2 + $0xa8] sm:$0xf] %vm228_vm0, %v13489_v0  ;;  %273 = vst.msk [vmem:[#allocation2 + $0xac] sm:$0xf] %vm228_vm0, %v13489_v0 }
  0x28   : > { %275 = vst.msk [vmem:[#allocation2 + $0xb4] sm:$0xf] %vm228_vm0, %v13489_v0  ;;  %276 = vst.msk [vmem:[#allocation2 + $0xb8] sm:$0xf] %vm228_vm0, %v13489_v0 }
  0x29   : > { %278 = vst.msk [vmem:[#allocation2 + $0xc0] sm:$0xf] %vm228_vm0, %v13489_v0  ;;  %279 = vst.msk [vmem:[#allocation2 + $0xc4] sm:$0xf] %vm228_vm0, %v13489_v0 }
  0x2a   : > { %281 = vst.msk [vmem:[#allocation2 + $0xcc] sm:$0xf] %vm228_vm0, %v13489_v0  ;;  %282 = vst.msk [vmem:[#allocation2 + $0xd0] sm:$0xf] %vm228_vm0, %v13489_v0 }
  0x2b   : > { %232 = vst.msk [vmem:[#allocation2 + $0x8] sm:$0x1] %vm231_vm1, %v13489_v0  ;;  %235 = vst.msk [vmem:[#allocation2 + $0x14] sm:$0x1] %vm231_vm1, %v13489_v0 }
  0x2c   : > { %238 = vst.msk [vmem:[#allocation2 + $0x20] sm:$0x1] %vm231_vm1, %v13489_v0  ;;  %241 = vst.msk [vmem:[#allocation2 + $0x2c] sm:$0x1] %vm231_vm1, %v13489_v0 }
  0x2d   : > { %244 = vst.msk [vmem:[#allocation2 + $0x38] sm:$0x1] %vm231_vm1, %v13489_v0  ;;  %247 = vst.msk [vmem:[#allocation2 + $0x44] sm:$0x1] %vm231_vm1, %v13489_v0 }
  0x2e   : > { %250 = vst.msk [vmem:[#allocation2 + $0x50] sm:$0x1] %vm231_vm1, %v13489_v0  ;;  %253 = vst.msk [vmem:[#allocation2 + $0x5c] sm:$0x1] %vm231_vm1, %v13489_v0 }
  0x2f   : > { %256 = vst.msk [vmem:[#allocation2 + $0x68] sm:$0x1] %vm231_vm1, %v13489_v0  ;;  %259 = vst.msk [vmem:[#allocation2 + $0x74] sm:$0x1] %vm231_vm1, %v13489_v0 }
  0x30   : > { %262 = vst.msk [vmem:[#allocation2 + $0x80] sm:$0x1] %vm231_vm1, %v13489_v0  ;;  %265 = vst.msk [vmem:[#allocation2 + $0x8c] sm:$0x1] %vm231_vm1, %v13489_v0 }
  0x31   : > { %268 = vst.msk [vmem:[#allocation2 + $0x98] sm:$0x1] %vm231_vm1, %v13489_v0  ;;  %271 = vst.msk [vmem:[#allocation2 + $0xa4] sm:$0x1] %vm231_vm1, %v13489_v0 }
  0x32   : > { %274 = vst.msk [vmem:[#allocation2 + $0xb0] sm:$0x1] %vm231_vm1, %v13489_v0  ;;  %277 = vst.msk [vmem:[#allocation2 + $0xbc] sm:$0x1] %vm231_vm1, %v13489_v0 }
  0x33   : > { %280 = vst.msk [vmem:[#allocation2 + $0xc8] sm:$0x1] %vm231_vm1, %v13489_v0  ;;  %283 = vst.msk [vmem:[#allocation2 + $0xd4] sm:$0x1] %vm231_vm1, %v13489_v0 }
  0x34 PF: > { %v12873_v3 = vld [vmem:[#allocation2 + $0x8] ss:$0 sps:$4 sm:$0x11]   ;;  %vm1300_vm2 = vcmask 1046528   ;;  %vm993_vm3 = vsmask.f32 7424 }
  0x35   : > { %v778_v1 = vld [vmem:[#allocation2 + $0x4] sm:$0xf]  ;;  %v831_v2 = vld [vmem:[#allocation2] sm:$0xe]  ;;  %v1302_v8 = vrot.slane %v12873_v3, 1  ;;  %v1002_v10 = vshll.u32 %v12873_v3, 16 }
  0x36   : > { %v10308_v4 = vcombine.low %v831_v2, %v778_v1  ;;  %v777_v5 = vld [vmem:[#allocation2] sm:$0xf]  ;;  %v285_v11 = vld [vmem:[%s13583_s11 + $0x4] sm:$0xf]  ;;  %vm335_vm4 = vsmask.f32 256 }
  0x37   : > { %v284_v6 = vld [vmem:[%s13583_s11] sm:$0xf]  ;;  %v13643_v9 = vcombine.low %v777_v5, %v778_v1  ;;  %vm336_vm5 = vsmask.f32 4368  ;;  %v1004_v18 = vrot.slane %v1002_v10, 1  ;;  %v13655_v19 = vld [vmem:[%s17198_s1 + $0x18] sm:$0xff]  }
  0x38   : > { %v1301_v7 = vrot.slane %v10308_v4, 1  ;;  %v12924_v12 = vld [vmem:[%s17198_s1] sm:$0xff]   ;;  %v339_v13 = vshrl.u32 %v284_v6, 16  ;;  %v342_v14 = vshll.u32 %v284_v6, 16  ;;  %s13490_s17 = smov 32   ;;  %v347_v21 = vshrl.u32 %v285_v11, 16  ;;  %vm13660_vm7 = vmor %vm335_vm4, %vm336_vm5  ;;  %11545 = vmatprep.subr.bf16.mxu0 %v13655_v19 }
  0x39   : > { %v995_v16 = vshrl.u32 %v13643_v9, 16  ;;  %v997_v17 = vshll.u32 %v13643_v9, 16  ;;  %11507 = vmatprep.subr.bf16.mxu1 %v12924_v12  ;;  %v350_v22 = vshll.u32 %v285_v11, 16  ;;  %vm659_vm6 = vcmask 125952   ;;  %v662_v23 = vld [vmem:[#allocation2 + $0xc] sm:$0xf]  ;;  %11546 = vmatpush3.bf16.msra.mxu0 %v13655_v19 }
  0x3a   : > { %v1303_v15 = vsel %vm1300_vm2, %v1301_v7, %v1302_v8  ;;  %v341_v20 = vrot.slane %v339_v13, 7  ;;  %11508 = vmatpush3.bf16.msra.mxu1 %v12924_v12  ;;  %v17270_v25 = vmov 0  ;;  %vm660_vm8 = vsmask.f32 7938  ;;  %v286_v26 = vld [vmem:[%s13583_s11 + $0x8] sm:$0xf] }
  0x3b   : > { %1355 = vrot.lane.b32.xlu1 %v1303_v15, %s13490_s17  ;;  %v999_v24 = vrot.slane %v997_v17, 1  ;;  %v17271_v25 = vsel %vm13660_vm7, 4294967295, %v17270_v25  ;;  %vm667_vm9 = vcmask 122880   ;;  %v349_v29 = vrot.slane %v347_v21, 7  ;;  %vm13667_vm10 = vmand %vm659_vm6, %vm660_vm8  ;;  %v287_v31 = vld [vmem:[%s13583_s11 + $0xc] sm:$0xf] }
  0x3c   : > { %17272 = vst [vmem:[#allocation6_spill] sm:$0xff] %v17271_v25  ;;  %v344_v27 = vor.u32 %v342_v14, %v341_v20  ;;  %v345_v28 = vrot.slane %v341_v20, 4  ;;  %v17273_v30 = vmov 0  ;;  %v356_v32 = vshrl.u32 %v286_v26, 16  ;;  %v12926_v33 = vld [vmem:[%s17198_s1 + $0x8] sm:$0xff]   ;;  %vm13677_vm11 = vmand %vm667_vm9, %vm335_vm4  ;;  %v12927_v40 = vld [vmem:[%s17198_s1 + $0x20] sm:$0xff]  }
  0x3d   : > { %v17274_v30 = vsel %vm13667_vm10, 4294967295, %v17273_v30  ;;  %v1000_v34 = vor.u32 %v999_v24, %v995_v16  ;;  %v17276_v35 = vmov 0  ;;  %v669_v36 = vld [vmem:[#allocation2 + $0x14] sm:$0x1]  ;;  %v359_v37 = vshll.u32 %v286_v26, 16  ;;  %11509 = vmatprep.subr.bf16.mxu1 %v12926_v33  ;;  %11547 = vmatprep.subr.bf16.mxu0 %v12927_v40  ;;  %s13491_s9 = smov 16  }
  0x3e   : > { %17275 = vst [vmem:[#allocation7_spill] sm:$0xff] %v17274_v30  ;;  %v17277_v35 = vsel %vm13677_vm11, 4294967295, %v17276_v35  ;;  %v364_v38 = vshrl.u32 %v287_v31, 16  ;;  %v367_v39 = vshll.u32 %v287_v31, 16  ;;  %v352_v41 = vor.u32 %v350_v22, %v349_v29  ;;  %v672_v45 = vld [vmem:[#allocation2 + $0x18] sm:$0xf]  ;;  %11510 = vmatpush3.bf16.msra.mxu1 %v12926_v33  ;;  %11548 = vmatpush3.bf16.msra.mxu0 %v12927_v40 }
  0x3f   : > { %17278 = vst [vmem:[#allocation8_spill] sm:$0xff] %v17277_v35  ;;  %v354_v42 = vrot.slane %v349_v29, 4  ;;  %v663_v43 = vsel %vm13667_vm10, %v344_v27, %v662_v23  ;;  %v358_v44 = vrot.slane %v356_v32, 7  ;;  %v288_v46 = vld [vmem:[%s13583_s11 + $0x10] sm:$0xf]  ;;  %v1005_v47 = vsel %vm993_vm3, %v1000_v34, %v1004_v18  ;;  %s14317_s23 = smov 0  }
  0x40   : > { %664 = vst [vmem:[#allocation2 + $0xc] sm:$0xf] %v663_v43  ;;  %v366_v48 = vrot.slane %v364_v38, 7  ;;  %v289_v49 = vld [vmem:[%s13583_s11 + $0x14] sm:$0xf]  ;;  %v373_v50 = vshrl.u32 %v288_v46, 16  ;;  %1210 = vrot.lane.b32.xlu0 %v1005_v47, %s13491_s9  ;;  %v353_v53 = vsel %vm13660_vm7, %v345_v28, %v352_v41 }
  0x41   : > { %v376_v51 = vshll.u32 %v288_v46, 16  ;;  %v12928_v52 = vld [vmem:[%s17198_s1 + $0x10] sm:$0xff]   ;;  %v670_v54 = vsel %vm13677_vm11, %v354_v42, %v669_v36  ;;  %v361_v55 = vor.u32 %v359_v37, %v358_v44  ;;  %v362_v56 = vrot.slane %v358_v44, 4  ;;  %v676_v57 = vld [vmem:[#allocation2 + $0x20] sm:$0x1] }
  0x42   : > { %v679_v58 = vld [vmem:[#allocation2 + $0x24] sm:$0xf]  ;;  %666 = vst.msk [vmem:[#allocation2 + $0x10] sm:$0xf] %vm659_vm6, %v353_v53  ;;  %671 = vst [vmem:[#allocation2 + $0x14] sm:$0x1] %v670_v54  ;;  %v369_v59 = vor.u32 %v367_v39, %v366_v48  ;;  %11511 = vmatprep.subr.bf16.mxu1 %v12928_v52 }
  0x43   : > { %v371_v60 = vrot.slane %v366_v48, 4  ;;  %v375_v61 = vrot.slane %v373_v50, 7  ;;  %v381_v62 = vshrl.u32 %v289_v49, 16  ;;  %v290_v63 = vld [vmem:[%s13583_s11 + $0x18] sm:$0xf]  ;;  %v673_v0 = vsel %vm13667_vm10, %v361_v55, %v672_v45  ;;  %11512 = vmatpush3.bf16.msra.mxu1 %v12928_v52 }
  0x44   : > { %v384_v1 = vshll.u32 %v289_v49, 16  ;;  %v291_v2 = vld [vmem:[%s13583_s11 + $0x1c] sm:$0xf]  ;;  %v390_v3 = vshrl.u32 %v290_v63, 16  ;;  %v393_v4 = vshll.u32 %v290_v63, 16  ;;  %v370_v5 = vsel %vm13660_vm7, %v362_v56, %v369_v59  ;;  %12077 = vmatprep.subr.bf16.mxu1 %v13655_v19 }
  0x45   : > { %674 = vst [vmem:[#allocation2 + $0x18] sm:$0xf] %v673_v0  ;;  %v677_v6 = vsel %vm13677_vm11, %v371_v60, %v676_v57  ;;  %v378_v7 = vor.u32 %v376_v51, %v375_v61  ;;  %v683_v8 = vld [vmem:[#allocation2 + $0x2c] sm:$0x1]  ;;  %675 = vst.msk [vmem:[#allocation2 + $0x1c] sm:$0xf] %vm659_vm6, %v370_v5 }
  0x46   : > { %678 = vst [vmem:[#allocation2 + $0x20] sm:$0x1] %v677_v6  ;;  %v379_v10 = vrot.slane %v375_v61, 4  ;;  %v383_v11 = vrot.slane %v381_v62, 7  ;;  %v392_v12 = vrot.slane %v390_v3, 7  ;;  %v398_v13 = vshrl.u32 %v291_v2, 16 }
  0x47   : > { %v292_v14 = vld [vmem:[%s13583_s11 + $0x20] sm:$0xf]  ;;  %v680_v15 = vsel %vm13667_vm10, %v378_v7, %v679_v58  ;;  %v401_v16 = vshll.u32 %v291_v2, 16  ;;  %v686_v17 = vld [vmem:[#allocation2 + $0x30] sm:$0xf]  ;;  %v12929_v0 = vld [vmem:[%s17198_s1 + $0x28] sm:$0xff]  }
  0x48   : > { %v293_v18 = vld [vmem:[%s13583_s11 + $0x24] sm:$0xf]  ;;  %v407_v20 = vshrl.u32 %v292_v14, 16  ;;  %v832_v21 = vld [vmem:[#allocation2 + $0xc] sm:$0xe]  ;;  %v386_v23 = vor.u32 %v384_v1, %v383_v11  ;;  %v388_v24 = vrot.slane %v383_v11, 4  ;;  %v395_v26 = vor.u32 %v393_v4, %v392_v12  ;;  %11549 = vmatprep.subr.bf16.mxu0 %v12929_v0 }
  0x49   : > { %v779_v22 = vld [vmem:[#allocation2 + $0xc] sm:$0xf]  ;;  %681 = vst [vmem:[#allocation2 + $0x24] sm:$0xf] %v680_v15  ;;  %v410_v27 = vshll.u32 %v292_v14, 16  ;;  %v396_v28 = vrot.slane %v392_v12, 4  ;;  %11550 = vmatpush3.bf16.msra.mxu0 %v12929_v0 }
  0x4a   : > { %v400_v29 = vrot.slane %v398_v13, 7  ;;  %v409_v31 = vrot.slane %v407_v20, 7  ;;  %v415_v32 = vshrl.u32 %v293_v18, 16  ;;  %v780_v33 = vld [vmem:[#allocation2 + $0x10] sm:$0xf]  ;;  %v387_v19 = vsel %vm13660_vm7, %v379_v10, %v386_v23 }
  0x4b   : > { %v684_v34 = vsel %vm13677_vm11, %v388_v24, %v683_v8  ;;  %v687_v36 = vsel %vm13667_vm10, %v395_v26, %v686_v17  ;;  %v418_v37 = vshll.u32 %v293_v18, 16  ;;  %v12876_v38 = vld [vmem:[#allocation2 + $0x14] ss:$0 sps:$4 sm:$0x11]   ;;  %v10309_v39 = vcombine.low %v832_v21, %v780_v33  ;;  %682 = vst.msk [vmem:[#allocation2 + $0x28] sm:$0xf] %vm659_vm6, %v387_v19 }
  0x4c   : > { %v13718_v40 = vcombine.low %v779_v22, %v780_v33  ;;  %685 = vst [vmem:[#allocation2 + $0x2c] sm:$0x1] %v684_v34  ;;  %v403_v41 = vor.u32 %v401_v16, %v400_v29  ;;  %v405_v42 = vrot.slane %v400_v29, 4  ;;  %688 = vst [vmem:[#allocation2 + $0x30] sm:$0xf] %v687_v36  ;;  %v412_v46 = vor.u32 %v410_v27, %v409_v31  ;;  %v12930_v24 = vld [vmem:[%s17198_s1 + $0x30] sm:$0xff]  }
  0x4d   : > { %v690_v43 = vld [vmem:[#allocation2 + $0x38] sm:$0x1]  ;;  %v833_v45 = vld [vmem:[#allocation2 + $0x18] sm:$0xe]  ;;  %v413_v47 = vrot.slane %v409_v31, 4  ;;  %v13721_v48 = vrot.slane %v415_v32, 7  ;;  %11583 = vmatprep.subr.bf16.mxu0 %v12930_v24 }
  0x4e   : > { %v781_v44 = vld [vmem:[#allocation2 + $0x18] sm:$0xf]  ;;  %v1304_v49 = vrot.slane %v10309_v39, 1  ;;  %v1305_v50 = vrot.slane %v12876_v38, 1  ;;  %v1007_v51 = vshrl.u32 %v13718_v40, 16  ;;  %v1009_v52 = vshll.u32 %v13718_v40, 16 }
  0x4f   : > { %v782_v53 = vld [vmem:[#allocation2 + $0x1c] sm:$0xf]  ;;  %v1014_v54 = vshll.u32 %v12876_v38, 16  ;;  %v12880_v56 = vld [vmem:[#allocation2 + $0x20] ss:$0 sps:$4 sm:$0x11]   ;;  %v404_v58 = vsel %vm13660_vm7, %v396_v28, %v403_v41  ;;  %v691_v61 = vsel %vm13677_vm11, %v405_v42, %v690_v43  ;;  %v420_v62 = vor.u32 %v418_v37, %v13721_v48 }
  0x50   : > { %v13725_v55 = vcombine.low %v781_v44, %v782_v53  ;;  %v10310_v57 = vcombine.low %v833_v45, %v782_v53  ;;  %v1306_v59 = vsel %vm1300_vm2, %v1304_v49, %v1305_v50  ;;  %v1011_v60 = vrot.slane %v1009_v52, 1  ;;  %689 = vst.msk [vmem:[#allocation2 + $0x34] sm:$0xf] %vm659_vm6, %v404_v58  ;;  %v693_v63 = vld [vmem:[#allocation2 + $0x3c] sm:$0xf] }
  0x51   : > { %1357 = vrot.lane.b32.xlu1 %v1306_v59, %s13490_s17  ;;  %v1016_v1 = vrot.slane %v1014_v54, 1  ;;  %v1308_v3 = vrot.slane %v12880_v56, 1  ;;  %v783_v5 = vld [vmem:[#allocation2 + $0x24] sm:$0xf]  ;;  %692 = vst [vmem:[#allocation2 + $0x38] sm:$0x1] %v691_v61  ;;  %v421_v11 = vsel %vm13660_vm7, %v413_v47, %v420_v62  ;;  %v694_v17 = vsel %vm13667_vm10, %v412_v46, %v693_v63 }
  0x52   : > { %v1307_v2 = vrot.slane %v10310_v57, 1  ;;  %v1019_v4 = vshrl.u32 %v13725_v55, 16  ;;  %v1012_v6 = vor.u32 %v1011_v60, %v1007_v51  ;;  %v1021_v7 = vshll.u32 %v13725_v55, 16  ;;  %v834_v10 = vld [vmem:[#allocation2 + $0x24] sm:$0xe] }
  0x53   : > { %v1026_v8 = vshll.u32 %v12880_v56, 16  ;;  %v697_v12 = vld [vmem:[#allocation2 + $0x44] sm:$0x1]  ;;  %v294_v13 = vld [vmem:[%s13583_s11 + $0x28] sm:$0xf]  ;;  %v422_v28 = vrot.slane %v13721_v48, 4 }
  0x54   : > { %v1309_v14 = vsel %vm1300_vm2, %v1307_v2, %v1308_v3  ;;  %v784_v15 = vld [vmem:[#allocation2 + $0x28] sm:$0xf]  ;;  %v785_v16 = vld [vmem:[#allocation2 + $0x30] sm:$0xf]  ;;  %696 = vst.msk [vmem:[#allocation2 + $0x40] sm:$0xf] %vm659_vm6, %v421_v11  ;;  %v1017_v18 = vsel %vm993_vm3, %v1012_v6, %v1016_v1 }
  0x55   : > { %v1023_v20 = vrot.slane %v1021_v7, 1  ;;  %v1028_v21 = vrot.slane %v1026_v8, 1  ;;  %v13748_v22 = vcombine.low %v783_v5, %v784_v15  ;;  %v12883_v23 = vld [vmem:[#allocation2 + $0x2c] ss:$0 sps:$4 sm:$0x11]   ;;  %1212 = vrot.lane.b32.xlu0 %v1017_v18, %s13491_s9  ;;  %1359 = vrot.lane.b32.xlu1 %v1309_v14, %s13490_s17  ;;  %v10311_v26 = vcombine.low %v834_v10, %v784_v15 }
  0x56   : > { %695 = vst [vmem:[#allocation2 + $0x3c] sm:$0xf] %v694_v17  ;;  %v835_v27 = vld [vmem:[#allocation2 + $0x30] sm:$0xe]  ;;  %v424_v29 = vshrl.u32 %v294_v13, 16  ;;  %v427_v31 = vshll.u32 %v294_v13, 16  ;;  %v698_v41 = vsel %vm13677_vm11, %v422_v28, %v697_v12 }
  0x57   : > { %v1024_v32 = vor.u32 %v1023_v20, %v1019_v4  ;;  %v1311_v33 = vrot.slane %v12883_v23, 1  ;;  %v1031_v19 = vshrl.u32 %v13748_v22, 16  ;;  %v1033_v34 = vshll.u32 %v13748_v22, 16  ;;  %v700_v36 = vld [vmem:[#allocation2 + $0x48] sm:$0xf] }
  0x58   : > { %v1310_v37 = vrot.slane %v10311_v26, 1  ;;  %v1038_v38 = vshll.u32 %v12883_v23, 16  ;;  %v786_v39 = vld [vmem:[#allocation2 + $0x34] sm:$0xf]  ;;  %v13760_v42 = vrot.slane %v424_v29, 7  ;;  %vm1391_vm12 = vcmask 130048  }
  0x59   : > { %v1029_v43 = vsel %vm993_vm3, %v1024_v32, %v1028_v21  ;;  %v1035_v44 = vrot.slane %v1033_v34, 1  ;;  %v13763_v45 = vcombine.low %v785_v16, %v786_v39  ;;  %v12886_v46 = vld [vmem:[#allocation2 + $0x38] ss:$0 sps:$4 sm:$0x11]   ;;  %v10312_v47 = vcombine.low %v835_v27, %v786_v39  ;;  %699 = vst [vmem:[#allocation2 + $0x44] sm:$0x1] %v698_v41 }
  0x5a   : > { %1214 = vrot.lane.b32.xlu0 %v1029_v43, %s13491_s9  ;;  %v1312_v48 = vsel %vm1300_vm2, %v1310_v37, %v1311_v33  ;;  %v1040_v49 = vrot.slane %v1038_v38, 1  ;;  %v295_v50 = vld [vmem:[%s13583_s11 + $0x2c] sm:$0xf]  ;;  %v429_v51 = vor.u32 %v427_v31, %v13760_v42  ;;  %v430_v52 = vrot.slane %v13760_v42, 4  ;;  %v296_v53 = vld [vmem:[%s13583_s11 + $0x30] sm:$0xf] }
  0x5b   : > { %1361 = vrot.lane.b32.xlu1 %v1312_v48, %s13490_s17  ;;  %v1036_v54 = vor.u32 %v1035_v44, %v1031_v19  ;;  %v1313_v56 = vrot.slane %v10312_v47, 1  ;;  %v1314_v57 = vrot.slane %v12886_v46, 1  ;;  %v1043_v58 = vshrl.u32 %v13763_v45, 16  ;;  %v788_v59 = vld [vmem:[#allocation2 + $0x40] sm:$0xf] }
  0x5c   : > { %v1045_v60 = vshll.u32 %v13763_v45, 16  ;;  %v1050_v61 = vshll.u32 %v12886_v46, 16  ;;  %v701_v0 = vsel %vm13667_vm10, %v429_v51, %v700_v36  ;;  %v432_v7 = vshrl.u32 %v295_v50, 16  ;;  %v297_v10 = vld [vmem:[%s13583_s11 + $0x34] sm:$0xf] }
  0x5d   : > { %v787_v62 = vld [vmem:[#allocation2 + $0x3c] sm:$0xf]  ;;  %v1041_v1 = vsel %vm993_vm3, %v1036_v54, %v1040_v49  ;;  %v1315_v2 = vsel %vm1300_vm2, %v1313_v56, %v1314_v57  ;;  %702 = vst [vmem:[#allocation2 + $0x48] sm:$0xf] %v701_v0  ;;  %v435_v8 = vshll.u32 %v295_v50, 16  ;;  %v441_v14 = vshrl.u32 %v296_v53, 16 }
  0x5e   : > { %v836_v63 = vld [vmem:[#allocation2 + $0x3c] sm:$0xe]  ;;  %v13778_v3 = vcombine.low %v787_v62, %v788_v59  ;;  %1216 = vrot.lane.b32.xlu0 %v1041_v1, %s13491_s9  ;;  %v1047_v5 = vrot.slane %v1045_v60, 1  ;;  %v1052_v6 = vrot.slane %v1050_v61, 1  ;;  %v434_v17 = vrot.slane %v432_v7, 7 }
  0x5f   : > { %v10313_v4 = vcombine.low %v836_v63, %v788_v59  ;;  %1363 = vrot.lane.b32.xlu1 %v1315_v2, %s13490_s17  ;;  %v704_v20 = vld [vmem:[#allocation2 + $0x50] sm:$0x1]  ;;  %v443_v21 = vrot.slane %v441_v14, 7  ;;  %v444_v23 = vshll.u32 %v296_v53, 16  ;;  %v449_v24 = vshrl.u32 %v297_v10, 16 }
  0x60   : > { %v1055_v12 = vshrl.u32 %v13778_v3, 16  ;;  %v1057_v13 = vshll.u32 %v13778_v3, 16  ;;  %v1048_v15 = vor.u32 %v1047_v5, %v1043_v58  ;;  %v12889_v16 = vld [vmem:[#allocation2 + $0x44] ss:$0 sps:$4 sm:$0x11]   ;;  %v437_v29 = vor.u32 %v435_v8, %v434_v17 }
  0x61   : > { %v1316_v11 = vrot.slane %v10313_v4, 1  ;;  %v1317_v27 = vrot.slane %v12889_v16, 1  ;;  %v1062_v28 = vshll.u32 %v12889_v16, 16  ;;  %v707_v31 = vld [vmem:[#allocation2 + $0x54] sm:$0xf]  ;;  %v439_v19 = vrot.slane %v434_v17, 4 }
  0x62   : > { %v1059_v18 = vrot.slane %v1057_v13, 1  ;;  %v1053_v26 = vsel %vm993_vm3, %v1048_v15, %v1052_v6  ;;  %v298_v32 = vld [vmem:[%s13583_s11 + $0x38] sm:$0xf]  ;;  %v446_v34 = vor.u32 %v444_v23, %v443_v21  ;;  %v447_v36 = vrot.slane %v443_v21, 4  ;;  %v299_v37 = vld [vmem:[%s13583_s11 + $0x3c] sm:$0xf] }
  0x63   : > { %1218 = vrot.lane.b32.xlu0 %v1053_v26, %s13491_s9  ;;  %v1318_v38 = vsel %vm1300_vm2, %v1316_v11, %v1317_v27  ;;  %v1064_v39 = vrot.slane %v1062_v28, 1  ;;  %v438_v41 = vsel %vm13660_vm7, %v430_v52, %v437_v29  ;;  %v451_v42 = vrot.slane %v449_v24, 7  ;;  %v300_v43 = vld [vmem:[%s13583_s11 + $0x40] sm:$0xf]  ;;  %v711_v48 = vld [vmem:[#allocation2 + $0x5c] sm:$0x1] }
  0x64   : > { %v1060_v33 = vor.u32 %v1059_v18, %v1055_v12  ;;  %1365 = vrot.lane.b32.xlu1 %v1318_v38, %s13490_s17  ;;  %703 = vst.msk [vmem:[#allocation2 + $0x4c] sm:$0xf] %vm659_vm6, %v438_v41  ;;  %v705_v44 = vsel %vm13677_vm11, %v439_v19, %v704_v20  ;;  %v452_v46 = vshll.u32 %v297_v10, 16  ;;  %v708_v47 = vsel %vm13667_vm10, %v446_v34, %v707_v31  ;;  %v301_v50 = vld [vmem:[%s13583_s11 + $0x44] sm:$0xf] }
  0x65   : > { %v458_v49 = vshrl.u32 %v298_v32, 16  ;;  %706 = vst [vmem:[#allocation2 + $0x50] sm:$0x1] %v705_v44  ;;  %v456_v52 = vrot.slane %v451_v42, 4  ;;  %709 = vst [vmem:[#allocation2 + $0x54] sm:$0xf] %v708_v47 }
  0x66   : > { %v1065_v51 = vsel %vm993_vm3, %v1060_v33, %v1064_v39  ;;  %v461_v53 = vshll.u32 %v298_v32, 16  ;;  %v466_v54 = vshrl.u32 %v299_v37, 16  ;;  %v714_v56 = vld [vmem:[#allocation2 + $0x60] sm:$0xf]  ;;  %v454_v57 = vor.u32 %v452_v46, %v451_v42  ;;  %v718_v60 = vld [vmem:[#allocation2 + $0x68] sm:$0x1] }
  0x67   : > { %1220 = vrot.lane.b32.xlu0 %v1065_v51, %s13491_s9  ;;  %v460_v58 = vrot.slane %v458_v49, 7  ;;  %v469_v59 = vshll.u32 %v299_v37, 16  ;;  %v475_v61 = vshrl.u32 %v300_v43, 16  ;;  %v712_v62 = vsel %vm13677_vm11, %v456_v52, %v711_v48  ;;  %v304_v2 = vld [vmem:[%s13583_s11 + $0x50] sm:$0xf] }
  0x68   : > { %v468_v63 = vrot.slane %v466_v54, 7  ;;  %v478_v0 = vshll.u32 %v300_v43, 16  ;;  %v483_v1 = vshrl.u32 %v301_v50, 16  ;;  %v789_v4 = vld [vmem:[#allocation2 + $0x48] sm:$0xf]  ;;  %v455_v5 = vsel %vm13660_vm7, %v447_v36, %v454_v57 }
  0x69   : > { %713 = vst [vmem:[#allocation2 + $0x5c] sm:$0x1] %v712_v62  ;;  %v463_v6 = vor.u32 %v461_v53, %v460_v58  ;;  %v464_v7 = vrot.slane %v460_v58, 4  ;;  %v477_v8 = vrot.slane %v475_v61, 7  ;;  %v721_v10 = vld [vmem:[#allocation2 + $0x6c] sm:$0xf] }
  0x6a   : > { %v837_v11 = vld [vmem:[#allocation2 + $0x48] sm:$0xe]  ;;  %710 = vst.msk [vmem:[#allocation2 + $0x58] sm:$0xf] %vm659_vm6, %v455_v5  ;;  %v471_v12 = vor.u32 %v469_v59, %v468_v63  ;;  %v473_v13 = vrot.slane %v468_v63, 4  ;;  %v485_v14 = vrot.slane %v483_v1, 7 }
  0x6b   : > { %v486_v15 = vshll.u32 %v301_v50, 16  ;;  %v715_v16 = vsel %vm13667_vm10, %v463_v6, %v714_v56  ;;  %v480_v17 = vor.u32 %v478_v0, %v477_v8  ;;  %v481_v18 = vrot.slane %v477_v8, 4  ;;  %v725_v20 = vld [vmem:[#allocation2 + $0x74] sm:$0x1]  ;;  %v790_v24 = vld [vmem:[#allocation2 + $0x4c] sm:$0xf] }
  0x6c   : > { %v13811_v21 = vld [vmem:[%s13583_s11 + $0x54] sm:$0xf]  ;;  %v509_v23 = vshrl.u32 %v304_v2, 16  ;;  %v472_v26 = vsel %vm13660_vm7, %v464_v7, %v471_v12  ;;  %716 = vst [vmem:[#allocation2 + $0x60] sm:$0xf] %v715_v16  ;;  %v719_v27 = vsel %vm13677_vm11, %v473_v13, %v718_v60  ;;  %v490_v29 = vrot.slane %v485_v14, 4 }
  0x6d   : > { %v488_v28 = vor.u32 %v486_v15, %v485_v14  ;;  %v13817_v31 = vcombine.low %v789_v4, %v790_v24  ;;  %v12892_v32 = vld [vmem:[#allocation2 + $0x50] ss:$0 sps:$4 sm:$0x11]   ;;  %v10314_v33 = vcombine.low %v837_v11, %v790_v24  ;;  %717 = vst.msk [vmem:[#allocation2 + $0x64] sm:$0xf] %vm659_vm6, %v472_v26  ;;  %v722_v19 = vsel %vm13667_vm10, %v480_v17, %v721_v10 }
  0x6e   : > { %720 = vst [vmem:[#allocation2 + $0x68] sm:$0x1] %v719_v27  ;;  %v13822_v34 = vrot.slane %v509_v23, 7  ;;  %v791_v36 = vld [vmem:[#allocation2 + $0x54] sm:$0xf]  ;;  %v726_v38 = vsel %vm13677_vm11, %v490_v29, %v725_v20  ;;  %v512_v39 = vshll.u32 %v304_v2, 16 }
  0x6f   : > { %v489_v37 = vsel %vm13660_vm7, %v481_v18, %v488_v28  ;;  %723 = vst [vmem:[#allocation2 + $0x6c] sm:$0xf] %v722_v19  ;;  %v517_v41 = vshrl.u32 %v13811_v21, 16  ;;  %v735_v42 = vld [vmem:[#allocation2 + $0x84] sm:$0xf]  ;;  %v1319_v43 = vrot.slane %v10314_v33, 1 }
  0x70   : > { %v1320_v44 = vrot.slane %v12892_v32, 1  ;;  %v1067_v46 = vshrl.u32 %v13817_v31, 16  ;;  %v1069_v47 = vshll.u32 %v13817_v31, 16  ;;  %v838_v48 = vld [vmem:[#allocation2 + $0x54] sm:$0xe]  ;;  %v1074_v49 = vshll.u32 %v12892_v32, 16 }
  0x71   : > { %724 = vst.msk [vmem:[#allocation2 + $0x70] sm:$0xf] %vm659_vm6, %v489_v37  ;;  %727 = vst [vmem:[#allocation2 + $0x74] sm:$0x1] %v726_v38  ;;  %v514_v51 = vor.u32 %v512_v39, %v13822_v34  ;;  %v792_v54 = vld [vmem:[#allocation2 + $0x58] sm:$0xf] }
  0x72   : > { %v12895_v50 = vld [vmem:[#allocation2 + $0x5c] ss:$0 sps:$4 sm:$0x11]   ;;  %v1321_v52 = vsel %vm1300_vm2, %v1319_v43, %v1320_v44  ;;  %v1071_v53 = vrot.slane %v1069_v47, 1  ;;  %v515_v56 = vrot.slane %v13822_v34, 4  ;;  %v519_v57 = vrot.slane %v517_v41, 7 }
  0x73   : > { %1367 = vrot.lane.b32.xlu1 %v1321_v52, %s13490_s17  ;;  %v1076_v58 = vrot.slane %v1074_v49, 1  ;;  %v13836_v59 = vcombine.low %v791_v36, %v792_v54  ;;  %v10315_v60 = vcombine.low %v838_v48, %v792_v54  ;;  %v1323_v61 = vrot.slane %v12895_v50, 1  ;;  %v739_v62 = vld [vmem:[#allocation2 + $0x8c] sm:$0x1]  ;;  %v793_v1 = vld [vmem:[#allocation2 + $0x60] sm:$0xf] }
  0x74   : > { %v1072_v63 = vor.u32 %v1071_v53, %v1067_v46  ;;  %v1086_v0 = vshll.u32 %v12895_v50, 16  ;;  %v839_v2 = vld [vmem:[#allocation2 + $0x60] sm:$0xe]  ;;  %v520_v4 = vshll.u32 %v13811_v21, 16  ;;  %v736_v5 = vsel %vm13667_vm10, %v514_v51, %v735_v42  ;;  %v794_v10 = vld [vmem:[#allocation2 + $0x64] sm:$0xf] }
  0x75   : > { %v1322_v6 = vrot.slane %v10315_v60, 1  ;;  %v1079_v7 = vshrl.u32 %v13836_v59, 16  ;;  %v1081_v8 = vshll.u32 %v13836_v59, 16  ;;  %v524_v11 = vrot.slane %v519_v57, 4  ;;  %737 = vst [vmem:[#allocation2 + $0x84] sm:$0xf] %v736_v5 }
  0x76   : > { %v302_v12 = vld [vmem:[%s13583_s11 + $0x48] sm:$0xf]  ;;  %v1077_v13 = vsel %vm993_vm3, %v1072_v63, %v1076_v58  ;;  %v1088_v14 = vrot.slane %v1086_v0, 1  ;;  %v13845_v15 = vcombine.low %v793_v1, %v794_v10  ;;  %v10316_v17 = vcombine.low %v839_v2, %v794_v10  ;;  %v795_v21 = vld [vmem:[#allocation2 + $0x6c] sm:$0xf] }
  0x77   : > { %v12898_v16 = vld [vmem:[#allocation2 + $0x68] ss:$0 sps:$4 sm:$0x11]   ;;  %1222 = vrot.lane.b32.xlu0 %v1077_v13, %s13491_s9  ;;  %v1324_v18 = vsel %vm1300_vm2, %v1322_v6, %v1323_v61  ;;  %v1083_v20 = vrot.slane %v1081_v8, 1  ;;  %v522_v24 = vor.u32 %v520_v4, %v519_v57  ;;  %v740_v26 = vsel %vm13677_vm11, %v524_v11, %v739_v62  ;;  %v840_v34 = vld [vmem:[#allocation2 + $0x6c] sm:$0xe] }
  0x78   : > { %v796_v23 = vld [vmem:[#allocation2 + $0x70] sm:$0xf]  ;;  %1369 = vrot.lane.b32.xlu1 %v1324_v18, %s13490_s17  ;;  %v1325_v27 = vrot.slane %v10316_v17, 1  ;;  %v1326_v28 = vrot.slane %v12898_v16, 1  ;;  %v1091_v29 = vshrl.u32 %v13845_v15, 16  ;;  %v1093_v32 = vshll.u32 %v13845_v15, 16 }
  0x79   : > { %741 = vst [vmem:[#allocation2 + $0x8c] sm:$0x1] %v740_v26  ;;  %v1084_v33 = vor.u32 %v1083_v20, %v1079_v7  ;;  %v1098_v19 = vshll.u32 %v12898_v16, 16  ;;  %v13854_v36 = vcombine.low %v795_v21, %v796_v23  ;;  %v12901_v37 = vld [vmem:[#allocation2 + $0x74] ss:$0 sps:$4 sm:$0x11]   ;;  %v523_v38 = vsel %vm13660_vm7, %v515_v56, %v522_v24 }
  0x7a   : > { %v1327_v39 = vsel %vm1300_vm2, %v1325_v27, %v1326_v28  ;;  %v1095_v41 = vrot.slane %v1093_v32, 1  ;;  %v10317_v42 = vcombine.low %v840_v34, %v796_v23  ;;  %738 = vst.msk [vmem:[#allocation2 + $0x88] sm:$0xf] %vm659_vm6, %v523_v38  ;;  %v303_v43 = vld [vmem:[%s13583_s11 + $0x4c] sm:$0xf]  ;;  %v492_v44 = vshrl.u32 %v302_v12, 16 }
  0x7b   : > { %v1089_v46 = vsel %vm993_vm3, %v1084_v33, %v1088_v14  ;;  %v1100_v47 = vrot.slane %v1098_v19, 1  ;;  %v1329_v48 = vrot.slane %v12901_v37, 1  ;;  %v1103_v49 = vshrl.u32 %v13854_v36, 16  ;;  %v728_v54 = vld [vmem:[#allocation2 + $0x78] sm:$0xf] }
  0x7c   : > { %1224 = vrot.lane.b32.xlu0 %v1089_v46, %s13491_s9  ;;  %1371 = vrot.lane.b32.xlu1 %v1327_v39, %s13490_s17  ;;  %v1096_v50 = vor.u32 %v1095_v41, %v1091_v29  ;;  %v1328_v51 = vrot.slane %v10317_v42, 1  ;;  %v1105_v52 = vshll.u32 %v13854_v36, 16  ;;  %v1110_v53 = vshll.u32 %v12901_v37, 16  ;;  %v308_v61 = vld [vmem:[%s13583_s11 + $0x60] sm:$0xf] }
  0x7d   : > { %v494_v56 = vrot.slane %v492_v44, 7  ;;  %v495_v57 = vshll.u32 %v302_v12, 16  ;;  %v500_v58 = vshrl.u32 %v303_v43, 16  ;;  %v503_v60 = vshll.u32 %v303_v43, 16  ;;  %v799_v2 = vld [vmem:[#allocation2 + $0x84] sm:$0xf] }
  0x7e   : > { %v1101_v62 = vsel %vm993_vm3, %v1096_v50, %v1100_v47  ;;  %v1330_v63 = vsel %vm1300_vm2, %v1328_v51, %v1329_v48  ;;  %v1107_v0 = vrot.slane %v1105_v52, 1  ;;  %v1112_v1 = vrot.slane %v1110_v53, 1  ;;  %v309_v4 = vld [vmem:[%s13583_s11 + $0x64] sm:$0xf]  ;;  %v732_v7 = vld [vmem:[#allocation2 + $0x80] sm:$0x1] }
  0x7f   : > { %v497_v6 = vor.u32 %v495_v57, %v494_v56  ;;  %v498_v10 = vrot.slane %v494_v56, 4  ;;  %v502_v11 = vrot.slane %v500_v58, 7  ;;  %v842_v12 = vld [vmem:[#allocation2 + $0x84] sm:$0xe]  ;;  %v543_v13 = vshrl.u32 %v308_v61, 16 }
  0x80   : > { %v13870_v5 = vld [vmem:[#allocation2 + $0x8c] ss:$0 sps:$4 sm:$0x11]   ;;  %1226 = vrot.lane.b32.xlu0 %v1101_v62, %s13491_s9  ;;  %1373 = vrot.lane.b32.xlu1 %v1330_v63, %s13490_s17  ;;  %v1108_v8 = vor.u32 %v1107_v0, %v1103_v49  ;;  %v546_v18 = vshll.u32 %v308_v61, 16  ;;  %v551_v20 = vshrl.u32 %v309_v4, 16  ;;  %v554_v46 = vshll.u32 %v309_v4, 16 }
  0x81   : > { %v800_v14 = vld [vmem:[#allocation2 + $0x88] sm:$0xf]  ;;  %v1134_v16 = vshll.u32 %v13870_v5, 16  ;;  %v729_v17 = vsel %vm13667_vm10, %v497_v6, %v728_v54  ;;  %v505_v24 = vor.u32 %v503_v60, %v502_v11  ;;  %v507_v26 = vrot.slane %v502_v11, 4  ;;  %v306_v33 = vld [vmem:[%s13583_s11 + $0x58] sm:$0xf] }
  0x82   : > { %v1113_v21 = vsel %vm993_vm3, %v1108_v8, %v1112_v1  ;;  %v13878_v23 = vcombine.low %v799_v2, %v800_v14  ;;  %730 = vst [vmem:[#allocation2 + $0x78] sm:$0xf] %v729_v17  ;;  %v10319_v27 = vcombine.low %v842_v12, %v800_v14  ;;  %v1335_v28 = vrot.slane %v13870_v5, 1  ;;  %v749_v39 = vld [vmem:[#allocation2 + $0x9c] sm:$0xf] }
  0x83   : > { %v545_v29 = vrot.slane %v543_v13, 7  ;;  %v553_v32 = vrot.slane %v551_v20, 7  ;;  %v506_v37 = vsel %vm13660_vm7, %v498_v10, %v505_v24  ;;  %v733_v38 = vsel %vm13677_vm11, %v507_v26, %v732_v7  ;;  %v307_v41 = vld [vmem:[%s13583_s11 + $0x5c] sm:$0xf]  ;;  %v753_v47 = vld [vmem:[#allocation2 + $0xa4] sm:$0x1] }
  0x84   : > { %1228 = vrot.lane.b32.xlu0 %v1113_v21, %s13491_s9  ;;  %v1127_v19 = vshrl.u32 %v13878_v23, 16  ;;  %v1129_v34 = vshll.u32 %v13878_v23, 16  ;;  %v1136_v42 = vrot.slane %v1134_v16, 1  ;;  %731 = vst.msk [vmem:[#allocation2 + $0x7c] sm:$0xf] %vm659_vm6, %v506_v37  ;;  %v526_v50 = vshrl.u32 %v306_v33, 16 }
  0x85   : > { %734 = vst [vmem:[#allocation2 + $0x80] sm:$0x1] %v733_v38  ;;  %v548_v43 = vor.u32 %v546_v18, %v545_v29  ;;  %v549_v44 = vrot.slane %v545_v29, 4  ;;  %v558_v49 = vrot.slane %v553_v32, 4  ;;  %v529_v51 = vshll.u32 %v306_v33, 16 }
  0x86   : > { %v1131_v48 = vrot.slane %v1129_v34, 1  ;;  %v312_v52 = vld [vmem:[%s13583_s11 + $0x70] sm:$0xf]  ;;  %v1334_v53 = vrot.slane %v10319_v27, 1  ;;  %v556_v54 = vor.u32 %v554_v46, %v553_v32  ;;  %v534_v57 = vshrl.u32 %v307_v41, 16 }
  0x87   : > { %v750_v56 = vsel %vm13667_vm10, %v548_v43, %v749_v39  ;;  %v742_v58 = vld [vmem:[#allocation2 + $0x90] sm:$0xf]  ;;  %v754_v61 = vsel %vm13677_vm11, %v558_v49, %v753_v47  ;;  %v528_v62 = vrot.slane %v526_v50, 7  ;;  %v537_v63 = vshll.u32 %v307_v41, 16  ;;  %v746_v0 = vld [vmem:[#allocation2 + $0x98] sm:$0x1] }
  0x88   : > { %v1132_v60 = vor.u32 %v1131_v48, %v1127_v19  ;;  %751 = vst [vmem:[#allocation2 + $0x9c] sm:$0xf] %v750_v56  ;;  %v313_v1 = vld [vmem:[%s13583_s11 + $0x74] sm:$0xf]  ;;  %v557_v4 = vsel %vm13660_vm7, %v549_v44, %v556_v54  ;;  %755 = vst [vmem:[#allocation2 + $0xa4] sm:$0x1] %v754_v61  ;;  %v1336_v24 = vsel %vm1300_vm2, %v1334_v53, %v1335_v28 }
  0x89   : > { %v797_v2 = vld [vmem:[#allocation2 + $0x78] sm:$0xf]  ;;  %v536_v5 = vrot.slane %v534_v57, 7  ;;  %v577_v6 = vshrl.u32 %v312_v52, 16  ;;  %v13900_v7 = vld [vmem:[%s13583_s11 + $0x68] sm:$0xf]  ;;  %v531_v11 = vor.u32 %v529_v51, %v528_v62 }
  0x8a   : > { %v1137_v8 = vsel %vm993_vm3, %v1132_v60, %v1136_v42  ;;  %v841_v10 = vld [vmem:[#allocation2 + $0x78] sm:$0xe]  ;;  %752 = vst.msk [vmem:[#allocation2 + $0xa0] sm:$0xf] %vm659_vm6, %v557_v4  ;;  %v532_v12 = vrot.slane %v528_v62, 4  ;;  %v580_v13 = vshll.u32 %v312_v52, 16 }
  0x8b   : > { %1232 = vrot.lane.b32.xlu1 %v1137_v8, %s13491_s9  ;;  %v539_v14 = vor.u32 %v537_v63, %v536_v5  ;;  %v541_v16 = vrot.slane %v536_v5, 4  ;;  %v579_v17 = vrot.slane %v577_v6, 7  ;;  %v585_v18 = vshrl.u32 %v313_v1, 16  ;;  %v763_v20 = vld [vmem:[#allocation2 + $0xb4] sm:$0xf] }
  0x8c   : > { %v798_v21 = vld [vmem:[#allocation2 + $0x7c] sm:$0xf]  ;;  %v743_v26 = vsel %vm13667_vm10, %v531_v11, %v742_v58  ;;  %v588_v27 = vshll.u32 %v313_v1, 16  ;;  %v560_v29 = vshrl.u32 %v13900_v7, 16  ;;  %v311_v62 = vld [vmem:[%s13583_s11 + $0x6c] sm:$0xf] }
  0x8d   : > { %v13909_v32 = vcombine.low %v797_v2, %v798_v21  ;;  %v12906_v33 = vld [vmem:[#allocation2 + $0x80] ss:$0 sps:$4 sm:$0x11]   ;;  %v10318_v19 = vcombine.low %v841_v10, %v798_v21  ;;  %v540_v34 = vsel %vm13660_vm7, %v532_v12, %v539_v14  ;;  %744 = vst [vmem:[#allocation2 + $0x90] sm:$0xf] %v743_v26  ;;  %v747_v37 = vsel %vm13677_vm11, %v541_v16, %v746_v0 }
  0x8e   : > { %745 = vst.msk [vmem:[#allocation2 + $0x94] sm:$0xf] %vm659_vm6, %v540_v34  ;;  %748 = vst [vmem:[#allocation2 + $0x98] sm:$0x1] %v747_v37  ;;  %v582_v28 = vor.u32 %v580_v13, %v579_v17  ;;  %v583_v38 = vrot.slane %v579_v17, 4  ;;  %v587_v39 = vrot.slane %v585_v18, 7 }
  0x8f   : > { %v1115_v41 = vshrl.u32 %v13909_v32, 16  ;;  %v1117_v42 = vshll.u32 %v13909_v32, 16  ;;  %v1122_v43 = vshll.u32 %v12906_v33, 16  ;;  %1377 = vrot.lane.b32.xlu1 %v1336_v24, %s13490_s17  ;;  %v803_v44 = vld [vmem:[#allocation2 + $0x9c] sm:$0xf]  ;;  %v13919_v46 = vrot.slane %v560_v29, 7 }
  0x90   : > { %v1331_v47 = vrot.slane %v10318_v19, 1  ;;  %v12909_v48 = vld [vmem:[#allocation2 + $0xa4] ss:$0 sps:$4 sm:$0x11]   ;;  %v590_v49 = vor.u32 %v588_v27, %v587_v39  ;;  %v764_v50 = vsel %vm13667_vm10, %v582_v28, %v763_v20  ;;  %v767_v51 = vld [vmem:[#allocation2 + $0xbc] sm:$0x1] }
  0x91   : > { %v1119_v52 = vrot.slane %v1117_v42, 1  ;;  %v1124_v53 = vrot.slane %v1122_v43, 1  ;;  %v804_v54 = vld [vmem:[#allocation2 + $0xa0] sm:$0xf]  ;;  %v844_v56 = vld [vmem:[#allocation2 + $0x9c] sm:$0xe] }
  0x92   : > { %765 = vst [vmem:[#allocation2 + $0xb4] sm:$0xf] %v764_v50  ;;  %v1332_v57 = vrot.slane %v12906_v33, 1  ;;  %v13923_v58 = vcombine.low %v803_v44, %v804_v54  ;;  %v1158_v60 = vshll.u32 %v12909_v48, 16  ;;  %v10321_v61 = vcombine.low %v844_v56, %v804_v54  ;;  %v314_v16 = vld [vmem:[%s13583_s11 + $0x78] sm:$0xf] }
  0x93   : > { %v1120_v63 = vor.u32 %v1119_v52, %v1115_v41  ;;  %v1341_v0 = vrot.slane %v12909_v48, 1  ;;  %v591_v1 = vsel %vm13660_vm7, %v583_v38, %v590_v49  ;;  %v592_v2 = vrot.slane %v587_v39, 4  ;;  %v756_v24 = vld [vmem:[#allocation2 + $0xa8] sm:$0xf]  ;;  %v760_v38 = vld [vmem:[#allocation2 + $0xb0] sm:$0x1] }
  0x94   : > { %v1151_v4 = vshrl.u32 %v13923_v58, 16  ;;  %v1153_v5 = vshll.u32 %v13923_v58, 16  ;;  %v1160_v6 = vrot.slane %v1158_v60, 1  ;;  %v801_v8 = vld [vmem:[#allocation2 + $0x90] sm:$0xf]  ;;  %v1340_v10 = vrot.slane %v10321_v61, 1 }
  0x95   : > { %766 = vst.msk [vmem:[#allocation2 + $0xb8] sm:$0xf] %vm659_vm6, %v591_v1  ;;  %v1125_v11 = vsel %vm993_vm3, %v1120_v63, %v1124_v53  ;;  %v802_v12 = vld [vmem:[#allocation2 + $0x94] sm:$0xf]  ;;  %v843_v13 = vld [vmem:[#allocation2 + $0x90] sm:$0xe]  ;;  %v768_v14 = vsel %vm13677_vm11, %v592_v2, %v767_v51  ;;  %v1333_v17 = vsel %vm1300_vm2, %v1331_v47, %v1332_v57 }
  0x96   : > { %1230 = vrot.lane.b32.xlu0 %v1125_v11, %s13491_s9  ;;  %v1155_v18 = vrot.slane %v1153_v5, 1  ;;  %v13937_v20 = vcombine.low %v801_v8, %v802_v12  ;;  %v12911_v21 = vld [vmem:[#allocation2 + $0x98] ss:$0 sps:$4 sm:$0x11]   ;;  %769 = vst [vmem:[#allocation2 + $0xbc] sm:$0x1] %v768_v14  ;;  %v10320_v26 = vcombine.low %v843_v13, %v802_v12  ;;  %v1342_v39 = vsel %vm1300_vm2, %v1340_v10, %v1341_v0 }
  0x97   : > { %v563_v27 = vshll.u32 %v13900_v7, 16  ;;  %v568_v29 = vshrl.u32 %v311_v62, 16  ;;  %v571_v33 = vshll.u32 %v311_v62, 16  ;;  %v1146_v28 = vshll.u32 %v12911_v21, 16  ;;  %v315_v57 = vld [vmem:[%s13583_s11 + $0x7c] sm:$0xf] }
  0x98   : > { %v1156_v19 = vor.u32 %v1155_v18, %v1151_v4  ;;  %v1139_v34 = vshrl.u32 %v13937_v20, 16  ;;  %v1141_v37 = vshll.u32 %v13937_v20, 16  ;;  %v566_v43 = vrot.slane %v13919_v46, 4  ;;  %v770_v10 = vld [vmem:[#allocation2 + $0xc0] sm:$0xf] }
  0x99   : > { %v807_v41 = vld [vmem:[#allocation2 + $0xb4] sm:$0xf]  ;;  %v565_v42 = vor.u32 %v563_v27, %v13919_v46  ;;  %v570_v44 = vrot.slane %v568_v29, 7  ;;  %v1148_v49 = vrot.slane %v1146_v28, 1  ;;  %v594_v50 = vshrl.u32 %v314_v16, 16 }
  0x9a   : > { %v846_v47 = vld [vmem:[#allocation2 + $0xb4] sm:$0xe]  ;;  %1375 = vrot.lane.b32.xlu0 %v1333_v17, %s13490_s17  ;;  %v1161_v7 = vsel %vm993_vm3, %v1156_v19, %v1160_v6  ;;  %v1143_v48 = vrot.slane %v1141_v37, 1  ;;  %v1337_v51 = vrot.slane %v10320_v26, 1  ;;  %v1338_v60 = vrot.slane %v12911_v21, 1 }
  0x9b   : > { %1236 = vrot.lane.b32.xlu1 %v1161_v7, %s13491_s9  ;;  %v573_v53 = vor.u32 %v571_v33, %v570_v44  ;;  %v575_v54 = vrot.slane %v570_v44, 4  ;;  %v757_v56 = vsel %vm13667_vm10, %v565_v42, %v756_v24  ;;  %v596_v62 = vrot.slane %v594_v50, 7 }
  0x9c   : > { %v808_v52 = vld [vmem:[#allocation2 + $0xb8] sm:$0xf]  ;;  %v1144_v46 = vor.u32 %v1143_v48, %v1139_v34  ;;  %758 = vst [vmem:[#allocation2 + $0xa8] sm:$0xf] %v757_v56  ;;  %v597_v4 = vshll.u32 %v314_v16, 16  ;;  %v1339_v13 = vsel %vm1300_vm2, %v1337_v51, %v1338_v60  ;;  %v602_v16 = vshrl.u32 %v315_v57, 16 }
  0x9d   : > { %v13951_v61 = vcombine.low %v807_v41, %v808_v52  ;;  %v12914_v63 = vld [vmem:[#allocation2 + $0xbc] ss:$0 sps:$4 sm:$0x11]   ;;  %v574_v0 = vsel %vm13660_vm7, %v566_v43, %v573_v53  ;;  %v761_v1 = vsel %vm13677_vm11, %v575_v54, %v760_v38  ;;  %v10323_v2 = vcombine.low %v846_v47, %v808_v52  ;;  %v774_v34 = vld [vmem:[#allocation2 + $0xc8] sm:$0x1] }
  0x9e   : > { %v1149_v5 = vsel %vm993_vm3, %v1144_v46, %v1148_v49  ;;  %759 = vst.msk [vmem:[#allocation2 + $0xac] sm:$0xf] %vm659_vm6, %v574_v0  ;;  %762 = vst [vmem:[#allocation2 + $0xb0] sm:$0x1] %v761_v1  ;;  %v1182_v11 = vshll.u32 %v12914_v63, 16  ;;  %v599_v12 = vor.u32 %v597_v4, %v596_v62  ;;  %v605_v17 = vshll.u32 %v315_v57, 16 }
  0x9f   : > { %v1175_v6 = vshrl.u32 %v13951_v61, 16  ;;  %v1177_v8 = vshll.u32 %v13951_v61, 16  ;;  %1234 = vrot.lane.b32.xlu0 %v1149_v5, %s13491_s9  ;;  %1381 = vrot.lane.b32.xlu1 %v1342_v39, %s13490_s17  ;;  %v1346_v21 = vrot.slane %v10323_v2, 1  ;;  %v1347_v27 = vrot.slane %v12914_v63, 1  ;;  %v811_v39 = vld [vmem:[#allocation2 + $0xcc] sm:$0xf] }
  0xa0   : > { %v1184_v18 = vrot.slane %v1182_v11, 1  ;;  %v771_v24 = vsel %vm13667_vm10, %v599_v12, %v770_v10  ;;  %v600_v29 = vrot.slane %v596_v62, 4  ;;  %v604_v33 = vrot.slane %v602_v16, 7  ;;  %v812_v41 = vld [vmem:[#allocation2 + $0xd0] sm:$0xf] }
  0xa1   : > { %v1179_v14 = vrot.slane %v1177_v8, 1  ;;  %772 = vst [vmem:[#allocation2 + $0xc0] sm:$0xf] %v771_v24  ;;  %v1348_v7 = vsel %vm1300_vm2, %v1346_v21, %v1347_v27  ;;  %v13977_v50 = vcombine.low %v811_v39, %v812_v41  ;;  %v12922_v46 = vld [vmem:[#allocation2 + $0xd4] ss:$0 sps:$4 sm:$0x11]  }
  0xa2   : > { %v607_v28 = vor.u32 %v605_v17, %v604_v33  ;;  %v609_v38 = vrot.slane %v604_v33, 4  ;;  %v848_v62 = vld [vmem:[#allocation2 + $0xcc] sm:$0xe]  ;;  %v1206_v17 = vshll.u32 %v12922_v46, 16  ;;  %v1353_v33 = vrot.slane %v12922_v46, 1 }
  0xa3   : > { %v1180_v26 = vor.u32 %v1179_v14, %v1175_v6  ;;  %1379 = vrot.lane.b32.xlu0 %v1339_v13, %s13490_s17  ;;  %v805_v19 = vld [vmem:[#allocation2 + $0xa8] sm:$0xf]  ;;  %v1201_v60 = vshll.u32 %v13977_v50, 16  ;;  %v10325_v8 = vcombine.low %v848_v62, %v812_v41  ;;  %v1199_v14 = vshrl.u32 %v13977_v50, 16  ;;  %v12934_v62 = vld [vmem:[%s17198_s1 + $0x20] sm:$0xff]  }
  0xa4   : > { %v845_v43 = vld [vmem:[#allocation2 + $0xa8] sm:$0xe]  ;;  %v608_v48 = vsel %vm13660_vm7, %v600_v29, %v607_v28  ;;  %v775_v49 = vsel %vm13677_vm11, %v609_v38, %v774_v34  ;;  %v1208_v39 = vrot.slane %v1206_v17, 1  ;;  %vm1428_vm13 = vcmask 261120  }
  0xa5   : > { %v1185_v37 = vsel %vm993_vm3, %v1180_v26, %v1184_v18  ;;  %v806_v42 = vld [vmem:[#allocation2 + $0xac] sm:$0xf]  ;;  %v12916_v47 = vld [vmem:[#allocation2 + $0xb0] ss:$0 sps:$4 sm:$0x11]   ;;  %v1203_v16 = vrot.slane %v1201_v60, 1 }
  0xa6   : > { %1240 = vrot.lane.b32.xlu1 %v1185_v37, %s13491_s9  ;;  %v13969_v44 = vcombine.low %v805_v19, %v806_v42  ;;  %773 = vst.msk [vmem:[#allocation2 + $0xc4] sm:$0xf] %vm659_vm6, %v608_v48  ;;  %776 = vst [vmem:[#allocation2 + $0xc8] sm:$0x1] %v775_v49  ;;  %v1170_v53 = vshll.u32 %v12916_v47, 16  ;;  %v10322_v54 = vcombine.low %v845_v43, %v806_v42  ;;  %v1344_v1 = vrot.slane %v12916_v47, 1 }
  0xa7   : > { %v1352_v29 = vrot.slane %v10325_v8, 1  ;;  %v1204_v38 = vor.u32 %v1203_v16, %v1199_v14  ;;  %vm1483_vm14 = vcmask 392192  }
  0xa8   : > { %v1163_v51 = vshrl.u32 %v13969_v44, 16  ;;  %v1165_v52 = vshll.u32 %v13969_v44, 16  ;;  %v1172_v57 = vrot.slane %v1170_v53, 1  ;;  %v1343_v0 = vrot.slane %v10322_v54, 1  ;;  %v809_v2 = vld [vmem:[#allocation2 + $0xc0] sm:$0xf] }
  0xa9   : > { %v847_v4 = vld [vmem:[#allocation2 + $0xc0] sm:$0xe]  ;;  %v1354_v41 = vsel %vm1300_vm2, %v1352_v29, %v1353_v33  ;;  %v1209_v48 = vsel %vm993_vm3, %v1204_v38, %v1208_v39 }
  0xaa   : > { %1385 = vrot.lane.b32.xlu1 %v1348_v7, %s13490_s17  ;;  %v1167_v56 = vrot.slane %v1165_v52, 1  ;;  %v1345_v13 = vsel %vm1300_vm2, %v1343_v0, %v1344_v1 }
  0xac   : > { %v1168_v63 = vor.u32 %v1167_v56, %v1163_v51 }
  0xad   : > { %v810_v6 = vld [vmem:[#allocation2 + $0xc4] sm:$0xf]  ;;  %v12919_v11 = vld [vmem:[#allocation2 + $0xc8] ss:$0 sps:$4 sm:$0x11]   ;;  %v1356_v42 = vpop.permute.xlu1 %1355 }
  0xae   : > { %v1173_v5 = vsel %vm993_vm3, %v1168_v63, %v1172_v57  ;;  %v13985_v10 = vcombine.low %v809_v2, %v810_v6  ;;  %v10324_v12 = vcombine.low %v847_v4, %v810_v6  ;;  %v1194_v24 = vshll.u32 %v12919_v11, 16  ;;  %v12933_v57 = vld [vmem:[%s17198_s1 + $0x18] sm:$0xff]   ;;  %v12932_v2 = vld [vmem:[%s17198_s1 + $0x40] sm:$0xff]   ;;  %v12936_v4 = vld [vmem:[%s17198_s1 + $0x28] sm:$0xff]  }
  0xaf   : > { %1238 = vrot.lane.b32.xlu0 %v1173_v5, %s13491_s9  ;;  %v1350_v27 = vrot.slane %v12919_v11, 1 }
  0xb0   : > { %v1187_v18 = vshrl.u32 %v13985_v10, 16  ;;  %v1189_v21 = vshll.u32 %v13985_v10, 16  ;;  %v1349_v26 = vrot.slane %v10324_v12, 1  ;;  %v1196_v34 = vrot.slane %v1194_v24, 1 }
  0xb2   : > { %v1191_v19 = vrot.slane %v1189_v21, 1  ;;  %v1351_v37 = vsel %vm1300_vm2, %v1349_v26, %v1350_v27  ;;  %v1211_v47 = vpop.permute.xlu0 %1210 }
  0xb3   : > { %1383 = vrot.lane.b32.xlu0 %v1345_v13, %s13490_s17  ;;  %1387 = vrot.lane.b32.xlu1 %v1351_v37, %s13490_s17  ;;  %v1393_v7 = vsel %vm1391_vm12, %v13643_v9, %v1211_v47 }
  0xb4   : > { %v1192_v28 = vor.u32 %v1191_v19, %v1187_v18  ;;  %v1430_v49 = vsel %vm1428_vm13, %v1393_v7, %v1356_v42 }
  0xb5   : > { %11513 = vmatprep.mubr.msk.bf16.mxu1 %vm1483_vm14, %v1430_v49 }
  0xb6   : > { %v1197_v43 = vsel %vm993_vm3, %v1192_v28, %v1196_v34 }
  0xb7   : > { %1242 = vrot.lane.b32.xlu0 %v1197_v43, %s13491_s9  ;;  %1389 = vrot.lane.b32.xlu1 %v1354_v41, %s13490_s17 }
  0xbb   : > { %1244 = vrot.lane.b32.xlu0 %v1209_v48, %s13491_s9 }
  0xc3   : > { %v1358_v51 = vpop.permute.xlu1 %1357 }
  0xc7   : > { %v1213_v52 = vpop.permute.xlu0 %1212  ;;  %v1360_v53 = vpop.permute.xlu1 %1359 }
  0xc8   : > { %v1395_v54 = vsel %vm1391_vm12, %v13718_v40, %v1213_v52  ;;  %v12931_v40 = vld [vmem:[%s17198_s1 + $0x38] sm:$0xff]  }
  0xc9   : > { %v1432_v56 = vsel %vm1428_vm13, %v1395_v54, %v1358_v51 }
  0xca   : > { %11514 = vmatmul.mubr.msk.bf16.vlgmr.msra.gmra.mrb[0].mxu1 %vm1483_vm14, %v1432_v56  ;;  %11551 = vmatprep.mubr.msk.bf16.mxu0 %vm1483_vm14, %v1432_v56 }
  0xcb   : > { %12080 = vmatpush3.bf16.msra.mxu1 %v12933_v57 }
  0xcc   : > { %v1215_v9 = vpop.permute.xlu0 %1214  ;;  %12078 = vmatprep.subr.bf16.mxu1 %v12934_v62 }
  0xcd   : > { %v1397_v46 = vsel %vm1391_vm12, %v13725_v55, %v1215_v9  ;;  %v1362_v60 = vpop.permute.xlu1 %1361  ;;  %v12935_v55 = vld [vmem:[%s17198_s1 + $0x30] sm:$0xff]  }
  0xce   : > { %v1434_v63 = vsel %vm1428_vm13, %v1397_v46, %v1360_v53 }
  0xcf   : > { %11517 = vmatprep.mubr.msk.bf16.mxu1 %vm1483_vm14, %v1434_v63  ;;  %11552 = vmatmul.mubr.msk.bf16.vlgmr.msra.gmra.mrb[0].mxu0 %vm1483_vm14, %v1434_v63 }
  0xd0   : > { %11584 = vmatpush3.bf16.msra.mxu0 %v12935_v55  ;;  %v1217_v0 = vpop.permute.xlu0 %1216  ;;  %12081 = vmatpush3.bf16.msra.mxu1 %v12934_v62 }
  0xd1   : > { %v1399_v1 = vsel %vm1391_vm12, %v13748_v22, %v1217_v0  ;;  %11585 = vmatprep.subr.bf16.mxu0 %v12931_v40  ;;  %12079 = vmatprep.subr.bf16.mxu1 %v12936_v4  ;;  %v1364_v6 = vpop.permute.xlu1 %1363 }
  0xd2   : > { %v1436_v5 = vsel %vm1428_vm13, %v1399_v1, %v1362_v60 }
  0xd3   : > { %11518 = vmatmul.mubr.msk.bf16.gmra.mrb[4].mxu1 %vm1483_vm14, %v1436_v5  ;;  %11555 = vmatprep.mubr.msk.bf16.mxu0 %vm1483_vm14, %v1436_v5 }
  0xd4   : > { %11586 = vmatpush3.bf16.msra.mxu0 %v12931_v40  ;;  %12082 = vmatpush3.bf16.msra.mxu1 %v12936_v4 }
  0xd5   : > { %v1219_v22 = vpop.permute.xlu0 %1218  ;;  %11587 = vmatprep.subr.bf16.mxu0 %v12932_v2 }
  0xd6   : > { %v1401_v8 = vsel %vm1391_vm12, %v13763_v45, %v1219_v22  ;;  %v1366_v12 = vpop.permute.xlu1 %1365 }
  0xd7   : > { %v1438_v11 = vsel %vm1428_vm13, %v1401_v8, %v1364_v6 }
  0xd8   : > { %11521 = vmatprep.mubr.msk.bf16.mxu1 %vm1483_vm14, %v1438_v11  ;;  %11556 = vmatmul.mubr.msk.bf16.gmra.mrb[4].mxu0 %vm1483_vm14, %v1438_v11 }
  0xd9   : > { %v1221_v13 = vpop.permute.xlu0 %1220  ;;  %11588 = vmatpush3.bf16.msra.mxu0 %v12932_v2 }
  0xda   : > { %v1403_v14 = vsel %vm1391_vm12, %v13778_v3, %v1221_v13 }
  0xdb   : > { %v1440_v16 = vsel %vm1428_vm13, %v1403_v14, %v1366_v12 }
  0xdc   : > { %11522 = vmatmul.mubr.msk.bf16.gmra.mrb[8].mxu1 %vm1483_vm14, %v1440_v16  ;;  %11559 = vmatprep.mubr.msk.bf16.mxu0 %vm1483_vm14, %v1440_v16 }
  0xe5   : > { %v1368_v17 = vpop.permute.xlu1 %1367 }
  0xe9   : > { %v1223_v45 = vpop.permute.xlu0 %1222 }
  0xea   : > { %v1405_v18 = vsel %vm1391_vm12, %v13817_v31, %v1223_v45  ;;  %v1370_v21 = vpop.permute.xlu1 %1369 }
  0xeb   : > { %v1442_v24 = vsel %vm1428_vm13, %v1405_v18, %v1368_v17 }
  0xec   : > { %11525 = vmatprep.mubr.msk.bf16.mxu1 %vm1483_vm14, %v1442_v24  ;;  %11560 = vmatmul.mubr.msk.bf16.gmra.mrb[8].mxu0 %vm1483_vm14, %v1442_v24 }
  0xee   : > { %v1225_v26 = vpop.permute.xlu0 %1224  ;;  %v1372_v27 = vpop.permute.xlu1 %1371 }
  0xef   : > { %v1407_v3 = vsel %vm1391_vm12, %v13836_v59, %v1225_v26 }
  0xf0   : > { %v1444_v29 = vsel %vm1428_vm13, %v1407_v3, %v1370_v21  ;;  %v14123_v21 = vld [vmem:[%s17199_s2] ss:$0 sm:$0xff] }
  0xf1   : > { %11526 = vmatmul.mubr.msk.bf16.gmra.mrb[12].mxu1 %vm1483_vm14, %v1444_v29  ;;  %11563 = vmatprep.mubr.msk.bf16.mxu0 %vm1483_vm14, %v1444_v29 }
  0xf2   : > { %v1227_v33 = vpop.permute.xlu0 %1226  ;;  %v1374_v34 = vpop.permute.xlu1 %1373 }
  0xf3   : > { %v1409_v31 = vsel %vm1391_vm12, %v13845_v15, %v1227_v33 }
  0xf4   : > { %v1446_v19 = vsel %vm1428_vm13, %v1409_v31, %v1372_v27 }
  0xf5   : > { %11529 = vmatprep.mubr.msk.bf16.mxu1 %vm1483_vm14, %v1446_v19  ;;  %11564 = vmatmul.mubr.msk.bf16.gmra.mrb[12].mxu0 %vm1483_vm14, %v1446_v19 }
  0xf6   : > { %11589 = vmatprep.mubr.msk.bf16.mxu0 %vm1483_vm14, %v1434_v63  ;;  %v1229_v59 = vpop.permute.xlu0 %1228 }
  0xf7   : > { %v1411_v37 = vsel %vm1391_vm12, %v13854_v36, %v1229_v59 }
  0xf8   : > { %v1448_v28 = vsel %vm1428_vm13, %v1411_v37, %v1374_v34 }
  0xf9   : > { %11530 = vmatmul.mubr.msk.bf16.gmra.mrb[16].mxu1 %vm1483_vm14, %v1448_v28 }
  0xfd   : > { %11590 = vmatmul.mubr.msk.bf16.vlgmr.msra.gmra.mrb[0].mxu0 %vm1483_vm14, %v1436_v5  ;;  %v1233_v15 = vpop.permute.xlu1 %1232 }
  0xfe   : > { %11593 = vmatprep.mubr.msk.bf16.mxu0 %vm1483_vm14, %v1438_v11  ;;  %v1415_v41 = vsel %vm1391_vm12, %v13878_v23, %v1233_v15 }
 0x101   : > { %v1378_v38 = vpop.permute.xlu1 %1377 }
 0x102   : > { %v1452_v42 = vsel %vm1428_vm13, %v1415_v41, %v1378_v38 }
 0x105   : > { %11594 = vmatmul.mubr.msk.bf16.gmra.mrb[4].mxu0 %vm1483_vm14, %v1440_v16 }
 0x106   : > { %11597 = vmatprep.mubr.msk.bf16.mxu0 %vm1483_vm14, %v1442_v24 }
 0x108   : > { %v1231_v39 = vpop.permute.xlu0 %1230 }
 0x109   : > { %v1413_v36 = vsel %vm1391_vm12, %v13909_v32, %v1231_v39 }
 0x10c   : > { %v1376_v43 = vpop.permute.xlu0 %1375 }
 0x10d   : > { %v1450_v47 = vsel %vm1428_vm13, %v1413_v36, %v1376_v43  ;;  %v1237_v7 = vpop.permute.xlu1 %1236  ;;  %11598 = vmatmul.mubr.msk.bf16.gmra.mrb[8].mxu0 %vm1483_vm14, %v1444_v29 }
 0x10e   : > { %11533 = vmatprep.mubr.msk.bf16.mxu1 %vm1483_vm14, %v1450_v47  ;;  %11601 = vmatprep.mubr.msk.bf16.mxu0 %vm1483_vm14, %v1446_v19  ;;  %v1419_v23 = vsel %vm1391_vm12, %v13923_v58, %v1237_v7 }
 0x10f   : > { %11534 = vmatmul.mubr.msk.bf16.gmra.mrb[20].mxu1 %vm1483_vm14, %v1452_v42 }
 0x111   : > { %v1235_v48 = vpop.permute.xlu0 %1234  ;;  %v1382_v49 = vpop.permute.xlu1 %1381 }
 0x112   : > { %v1417_v32 = vsel %vm1391_vm12, %v13937_v20, %v1235_v48  ;;  %v1456_v51 = vsel %vm1428_vm13, %v1419_v23, %v1382_v49 }
 0x115   : > { %v1380_v52 = vpop.permute.xlu0 %1379  ;;  %11602 = vmatmul.mubr.msk.bf16.gmra.mrb[12].mxu0 %vm1483_vm14, %v1448_v28 }
 0x116   : > { %v1454_v53 = vsel %vm1428_vm13, %v1417_v32, %v1380_v52  ;;  %11605 = vmatprep.mubr.msk.bf16.mxu0 %vm1483_vm14, %v1450_v47 }
 0x117   : > { %11537 = vmatprep.mubr.msk.bf16.mxu1 %vm1483_vm14, %v1454_v53 }
 0x118   : > { %11538 = vmatmul.mubr.msk.bf16.gmra.mrb[24].mxu1 %vm1483_vm14, %v1456_v51  ;;  %v1241_v54 = vpop.permute.xlu1 %1240 }
 0x119   : > { %v1423_v20 = vsel %vm1391_vm12, %v13951_v61, %v1241_v54 }
 0x11c   : > { %v1386_v56 = vpop.permute.xlu1 %1385 }
 0x11d   : > { %11606 = vmatmul.mubr.msk.bf16.gmra.mrb[16].mxu0 %vm1483_vm14, %v1452_v42  ;;  %v1460_v57 = vsel %vm1428_vm13, %v1423_v20, %v1386_v56 }
 0x11e   : > { %11609 = vmatprep.mubr.msk.bf16.mxu0 %vm1483_vm14, %v1454_v53 }
 0x121   : > { %v1239_v58 = vpop.permute.xlu0 %1238 }
 0x122   : > { %v1421_v9 = vsel %vm1391_vm12, %v13969_v44, %v1239_v58 }
 0x125   : > { %v1384_v46 = vpop.permute.xlu0 %1383  ;;  %11610 = vmatmul.mubr.msk.bf16.gmra.mrb[20].mxu0 %vm1483_vm14, %v1456_v51  ;;  %v1388_v61 = vpop.permute.xlu1 %1387 }
 0x126   : > { %v1458_v60 = vsel %vm1428_vm13, %v1421_v9, %v1384_v46 }
 0x127   : > { %11541 = vmatprep.mubr.msk.bf16.mxu1 %vm1483_vm14, %v1458_v60  ;;  %11613 = vmatprep.mubr.msk.bf16.mxu0 %vm1483_vm14, %v1458_v60 }
 0x128   : > { %11542 = vmatmul.mubr.msk.bf16.gmra.mrb[28].mxu1 %vm1483_vm14, %v1460_v57 }
 0x129   : > { %11567 = vmatprep.mubr.msk.bf16.mxu1 %vm1483_vm14, %v1448_v28  ;;  %v1243_v40 = vpop.permute.xlu0 %1242  ;;  %v1390_v0 = vpop.permute.xlu1 %1389 }
 0x12a   : > { %v1425_v44 = vsel %vm1391_vm12, %v13985_v10, %v1243_v40 }
 0x12b   : > { %v1462_v62 = vsel %vm1428_vm13, %v1425_v44, %v1388_v61 }
 0x12d   : > { %11614 = vmatmul.mubr.msk.bf16.gmra.mrb[24].mxu0 %vm1483_vm14, %v1460_v57  ;;  %v1245_v63 = vpop.permute.xlu0 %1244 }
 0x12e   : > { %11617 = vmatprep.mubr.msk.bf16.mxu0 %vm1483_vm14, %v1462_v62  ;;  %v1427_v55 = vsel %vm1391_vm12, %v13977_v50, %v1245_v63 }
 0x12f   : > { %v1464_v1 = vsel %vm1428_vm13, %v1427_v55, %v1390_v0 }
 0x130   : > { %11568 = vmatmul.mubr.msk.bf16.vlgmr.msra.gmra.mrb[16].mxu1 %vm1483_vm14, %v1450_v47 }
 0x131   : > { %11571 = vmatprep.mubr.msk.bf16.mxu1 %vm1483_vm14, %v1452_v42 }
 0x135   : > { %11618 = vmatmul.mubr.msk.bf16.gmra.mrb[28].mxu0 %vm1483_vm14, %v1464_v1 }
 0x138   : > { %11572 = vmatmul.mubr.msk.bf16.gmra.mrb[20].mxu1 %vm1483_vm14, %v1454_v53 }
 0x139   : > { %11575 = vmatprep.mubr.msk.bf16.mxu1 %vm1483_vm14, %v1456_v51 }
 0x140   : > { %11576 = vmatmul.mubr.msk.bf16.gmra.mrb[24].mxu1 %vm1483_vm14, %v1458_v60 }
 0x141   : > { %11579 = vmatprep.mubr.msk.bf16.mxu1 %vm1483_vm14, %v1460_v57 }
 0x148   : > { %11580 = vmatmul.mubr.msk.bf16.gmra.mrb[28].mxu1 %vm1483_vm14, %v1462_v62 }
 0x19d   : > { %v11515_v50 = vpop.f32.mrb[0].mxu1 }
 0x19e   : > { %v1550_v10 = vpop.f32.mrb[1].mxu1  ;;  %v1685_v24 = vadd.f32 %v11515_v50, %v14123_v21 }
 0x19f   : > { %v11516_v2 = vpop.f32.mrb[2].mxu1  ;;  %v1683_v26 = vadd.f32 %v14123_v21, %v1550_v10 }
 0x1a0   : > { %v1553_v4 = vpop.f32.mrb[3].mxu1  ;;  %v1686_v27 = vadd.f32 %v11516_v2, %v14123_v21 }
 0x1a1   : > { %v1684_v31 = vadd.f32 %v14123_v21, %v1553_v4 }
 0x1a6   : > { %v11519_v5 = vpop.f32.mrb[4].mxu1 }
 0x1a7   : > { %v1566_v6 = vpop.f32.mrb[5].mxu1  ;;  %v1689_v15 = vadd.f32 %v11519_v5, %v14123_v21 }
 0x1a8   : > { %v11520_v22 = vpop.f32.mrb[6].mxu1  ;;  %v1687_v38 = vadd.f32 %v14123_v21, %v1566_v6 }
 0x1a9   : > { %v1569_v8 = vpop.f32.mrb[7].mxu1  ;;  %v1690_v41 = vadd.f32 %v11520_v22, %v14123_v21 }
 0x1aa   : > { %v1688_v43 = vadd.f32 %v14123_v21, %v1569_v8 }
 0x1af   : > { %v11523_v11 = vpop.f32.mrb[8].mxu1 }
 0x1b0   : > { %v1582_v12 = vpop.f32.mrb[9].mxu1  ;;  %v1693_v32 = vadd.f32 %v11523_v11, %v14123_v21 }
 0x1b1   : > { %v11524_v13 = vpop.f32.mrb[10].mxu1  ;;  %v1691_v51 = vadd.f32 %v14123_v21, %v1582_v12 }
 0x1b2   : > { %v1585_v14 = vpop.f32.mrb[11].mxu1  ;;  %v1694_v53 = vadd.f32 %v11524_v13, %v14123_v21 }
 0x1b3   : > { %v1692_v20 = vadd.f32 %v14123_v21, %v1585_v14 }
 0x1c4   : > { %v11527_v16 = vpop.f32.mrb[12].mxu1 }
 0x1c5   : > { %v1598_v17 = vpop.f32.mrb[13].mxu1  ;;  %v1697_v61 = vadd.f32 %v11527_v16, %v14123_v21 }
 0x1c6   : > { %v11528_v45 = vpop.f32.mrb[14].mxu1  ;;  %v1695_v40 = vadd.f32 %v14123_v21, %v1598_v17 }
 0x1c7   : > { %v1601_v18 = vpop.f32.mrb[15].mxu1  ;;  %v1698_v62 = vadd.f32 %v11528_v45, %v14123_v21 }
 0x1c8   : > { %v1696_v0 = vadd.f32 %v14123_v21, %v1601_v18 }
 0x1d0   : > { %v11591_v3 = vpop.f32.mrb[0].mxu0 }
 0x1d1   : > { %v14128_v29 = vadd.f32 %v11591_v3, %v1685_v24   ;;  %v1982_v33 = vpop.f32.mrb[1].mxu0 }
 0x1d2   : > { %v14131_v19 = vadd.f32 %v1982_v33, %v1683_v26   ;;  %v11592_v34 = vpop.f32.mrb[2].mxu0 }
 0x1d3   : > { %17279 = vst [vmem:[#allocation9_spill] sm:$0xff] %v14128_v29  ;;  %v14133_v59 = vadd.f32 %v11592_v34, %v1686_v27   ;;  %v1985_v37 = vpop.f32.mrb[3].mxu0 }
 0x1d4   : > { %17280 = vst [vmem:[#allocation10_spill] sm:$0xff] %v14131_v19  ;;  %v14135_v28 = vadd.f32 %v1985_v37, %v1684_v31  }
 0x1d5   : > { %17281 = vst [vmem:[#allocation11_spill] sm:$0xff] %v14133_v59 }
 0x1d6   : > { %17282 = vst [vmem:[#allocation12_spill] sm:$0xff] %v14135_v28 }
 0x1d8   : > { %v11595_v39 = vpop.f32.mrb[4].mxu0 }
 0x1d9   : > { %v14140_v36 = vadd.f32 %v11595_v39, %v1689_v15   ;;  %v1998_v42 = vpop.f32.mrb[5].mxu0 }
 0x1da   : > { %v14143_v47 = vadd.f32 %v1998_v42, %v1687_v38   ;;  %v11596_v7 = vpop.f32.mrb[6].mxu0 }
 0x1db   : > { %17283 = vst [vmem:[#allocation13_spill] sm:$0xff] %v14140_v36  ;;  %v14145_v48 = vadd.f32 %v11596_v7, %v1690_v41   ;;  %v2001_v23 = vpop.f32.mrb[7].mxu0 }
 0x1dc   : > { %17284 = vst [vmem:[#allocation14_spill] sm:$0xff] %v14143_v47  ;;  %v14147_v49 = vadd.f32 %v2001_v23, %v1688_v43  }
 0x1dd   : > { %17285 = vst [vmem:[#allocation15_spill] sm:$0xff] %v14145_v48 }
 0x1de   : > { %17286 = vst [vmem:[#allocation16_spill] sm:$0xff] %v14147_v49 }
 0x1e0   : > { %v11599_v52 = vpop.f32.mrb[8].mxu0 }
 0x1e1   : > { %v14152_v54 = vadd.f32 %v11599_v52, %v1693_v32   ;;  %v2014_v58 = vpop.f32.mrb[9].mxu0 }
 0x1e2   : > { %v14155_v56 = vadd.f32 %v2014_v58, %v1691_v51   ;;  %v11600_v9 = vpop.f32.mrb[10].mxu0 }
 0x1e3   : > { %17287 = vst [vmem:[#allocation17_spill] sm:$0xff] %v14152_v54  ;;  %v14157_v57 = vadd.f32 %v11600_v9, %v1694_v53   ;;  %v2017_v46 = vpop.f32.mrb[11].mxu0 }
 0x1e4   : > { %17288 = vst [vmem:[#allocation18_spill] sm:$0xff] %v14155_v56  ;;  %v14159_v60 = vadd.f32 %v2017_v46, %v1692_v20  }
 0x1e5   : > { %17289 = vst [vmem:[#allocation19_spill] sm:$0xff] %v14157_v57 }
 0x1e6   : > { %17290 = vst [vmem:[#allocation20_spill] sm:$0xff] %v14159_v60 }
 0x1e8   : > { %v11603_v44 = vpop.f32.mrb[12].mxu0 }
 0x1e9   : > { %v14164_v63 = vadd.f32 %v11603_v44, %v1697_v61   ;;  %v2030_v55 = vpop.f32.mrb[13].mxu0 }
 0x1ea   : > { %v14167_v1 = vadd.f32 %v2030_v55, %v1695_v40   ;;  %v11604_v50 = vpop.f32.mrb[14].mxu0 }
 0x1eb   : > { %17291 = vst [vmem:[#allocation21_spill] sm:$0xff] %v14164_v63  ;;  %v14169_v10 = vadd.f32 %v11604_v50, %v1698_v62   ;;  %v2033_v2 = vpop.f32.mrb[15].mxu0 }
 0x1ec   : > { %17292 = vst [vmem:[#allocation22_spill] sm:$0xff] %v14167_v1  ;;  %v14171_v4 = vadd.f32 %v2033_v2, %v1696_v0  }
 0x1ed   : > { %17293 = vst [vmem:[#allocation23_spill] sm:$0xff] %v14169_v10 }
 0x1ee   : > { %17294 = vst [vmem:[#allocation24_spill] sm:$0xff] %v14171_v4 }
 0x1f0   : > { %v11607_v5 = vpop.f32.mrb[16].mxu0 }
 0x1f1   : > { %v2046_v6 = vpop.f32.mrb[17].mxu0 }
 0x1f2   : > { %v11608_v22 = vpop.f32.mrb[18].mxu0 }
 0x1f3   : > { %v2049_v8 = vpop.f32.mrb[19].mxu0 }
 0x1f8   : > { %v11611_v11 = vpop.f32.mrb[20].mxu0 }
 0x1f9   : > { %v2062_v12 = vpop.f32.mrb[21].mxu0 }
 0x1fa   : > { %v11612_v13 = vpop.f32.mrb[22].mxu0 }
 0x1fb   : > { %v2065_v14 = vpop.f32.mrb[23].mxu0 }
 0x200   : > { %v11615_v16 = vpop.f32.mrb[24].mxu0 }
 0x201   : > { %v2078_v17 = vpop.f32.mrb[25].mxu0 }
 0x202   : > { %v11616_v45 = vpop.f32.mrb[26].mxu0 }
 0x203   : > { %v11569_v18 = vpop.f32.mrb[16].mxu1  ;;  %v2081_v24 = vpop.f32.mrb[27].mxu0 }
 0x204   : > { %v12115_v26 = vadd.f32 %v11569_v18, %v14123_v21  ;;  %v1833_v3 = vpop.f32.mrb[17].mxu1 }
 0x205   : > { %v12117_v27 = vadd.f32 %v14123_v21, %v1833_v3  ;;  %v11570_v33 = vpop.f32.mrb[18].mxu1 }
 0x206   : > { %v12119_v31 = vadd.f32 %v11570_v33, %v14123_v21  ;;  %v1836_v34 = vpop.f32.mrb[19].mxu1  ;;  %v14176_v37 = vadd.f32 %v12115_v26, %v11607_v5  }
 0x207   : > { %v12121_v15 = vadd.f32 %v14123_v21, %v1836_v34  ;;  %v14179_v38 = vadd.f32 %v12117_v27, %v2046_v6  }
 0x208   : > { %17295 = vst [vmem:[#allocation25_spill] sm:$0xff] %v14176_v37  ;;  %v14181_v39 = vadd.f32 %v12119_v31, %v11608_v22   ;;  %v11619_v41 = vpop.f32.mrb[28].mxu0 }
 0x209   : > { %17296 = vst [vmem:[#allocation26_spill] sm:$0xff] %v14179_v38  ;;  %v14183_v42 = vadd.f32 %v12121_v15, %v2049_v8   ;;  %v2094_v43 = vpop.f32.mrb[29].mxu0 }
 0x20a   : > { %17297 = vst [vmem:[#allocation27_spill] sm:$0xff] %v14181_v39  ;;  %v11620_v7 = vpop.f32.mrb[30].mxu0 }
 0x20b   : > { %17298 = vst [vmem:[#allocation28_spill] sm:$0xff] %v14183_v42  ;;  %v11573_v23 = vpop.f32.mrb[20].mxu1  ;;  %v2097_v32 = vpop.f32.mrb[31].mxu0 }
 0x20c   : > { %v12123_v51 = vadd.f32 %v11573_v23, %v14123_v21  ;;  %v1849_v52 = vpop.f32.mrb[21].mxu1 }
 0x20d   : > { %v12125_v53 = vadd.f32 %v14123_v21, %v1849_v52  ;;  %v11574_v58 = vpop.f32.mrb[22].mxu1 }
 0x20e   : > { %v12127_v20 = vadd.f32 %v11574_v58, %v14123_v21  ;;  %v1852_v9 = vpop.f32.mrb[23].mxu1  ;;  %v14188_v46 = vadd.f32 %v12123_v51, %v11611_v11  }
 0x20f   : > { %v12129_v61 = vadd.f32 %v14123_v21, %v1852_v9  ;;  %v14191_v40 = vadd.f32 %v12125_v53, %v2062_v12  }
 0x210   : > { %17299 = vst [vmem:[#allocation29_spill] sm:$0xff] %v14188_v46  ;;  %v14193_v44 = vadd.f32 %v12127_v20, %v11612_v13   ;;  %v17320_v58 = vmov %v14188_v46 }
 0x211   : > { %17300 = vst [vmem:[#allocation30_spill] sm:$0xff] %v14191_v40  ;;  %v14195_v62 = vadd.f32 %v12129_v61, %v2065_v14   ;;  %v17322_v9 = vmov %v14191_v40  ;;  %v17323_v61 = vmov %v14181_v39 }
 0x212   : > { %17301 = vst [vmem:[#allocation31_spill] sm:$0xff] %v14193_v44  ;;  %v17319_v53 = vmov %v14193_v44 }
 0x213   : > { %17302 = vst [vmem:[#allocation32_spill] sm:$0xff] %v14195_v62  ;;  %v11577_v55 = vpop.f32.mrb[24].mxu1  ;;  %v17321_v20 = vmov %v14195_v62 }
 0x214   : > { %v12131_v0 = vadd.f32 %v11577_v55, %v14123_v21  ;;  %v1865_v50 = vpop.f32.mrb[25].mxu1  ;;  %v17324_v55 = vmov %v14176_v37 }
 0x215   : > { %v12133_v2 = vadd.f32 %v14123_v21, %v1865_v50  ;;  %v11578_v5 = vpop.f32.mrb[26].mxu1  ;;  %v17326_v50 = vmov %v14179_v38 }
 0x216   : > { %v12135_v6 = vadd.f32 %v11578_v5, %v14123_v21  ;;  %v1868_v22 = vpop.f32.mrb[27].mxu1  ;;  %v14200_v8 = vadd.f32 %v12131_v0, %v11615_v16   ;;  %v17325_v0 = vmov %v14183_v42  ;;  %v17328_v5 = vmov %v14164_v63 }
 0x217   : > { %v12137_v11 = vadd.f32 %v14123_v21, %v1868_v22  ;;  %v14203_v12 = vadd.f32 %v12133_v2, %v2078_v17   ;;  %v17327_v2 = vmov %v14169_v10  ;;  %v17330_v22 = vmov %v14167_v1 }
 0x218   : > { %17303 = vst [vmem:[#allocation33_spill] sm:$0xff] %v14200_v8  ;;  %v14205_v13 = vadd.f32 %v12135_v6, %v11616_v45   ;;  %v17329_v6 = vmov %v14171_v4 }
 0x219   : > { %17304 = vst [vmem:[#allocation34_spill] sm:$0xff] %v14203_v12  ;;  %v14207_v14 = vadd.f32 %v12137_v11, %v2081_v24   ;;  %v17331_v11 = vmov %v14157_v57 }
 0x21a   : > { %17305 = vst [vmem:[#allocation35_spill] sm:$0xff] %v14205_v13 }
 0x21b   : > { %17306 = vst [vmem:[#allocation36_spill] sm:$0xff] %v14207_v14  ;;  %v11581_v18 = vpop.f32.mrb[28].mxu1 }
 0x21c   : > { %v12139_v26 = vadd.f32 %v11581_v18, %v14123_v21  ;;  %v1881_v3 = vpop.f32.mrb[29].mxu1  ;;  %v17332_v18 = vmov %v14152_v54 }
 0x21d   : > { %v12141_v27 = vadd.f32 %v14123_v21, %v1881_v3  ;;  %v11582_v33 = vpop.f32.mrb[30].mxu1  ;;  %v17334_v3 = vmov %v14155_v56 }
 0x21e   : > { %v12143_v31 = vadd.f32 %v11582_v33, %v14123_v21  ;;  %v1884_v34 = vpop.f32.mrb[31].mxu1  ;;  %v14212_v16 = vadd.f32 %v12139_v26, %v11619_v41   ;;  %v17333_v26 = vmov %v14159_v60  ;;  %v17336_v33 = vmov %v14140_v36 }
 0x21f   : > { %v12145_v15 = vadd.f32 %v14123_v21, %v1884_v34  ;;  %v14215_v17 = vadd.f32 %v12141_v27, %v2094_v43   ;;  %v17315_v21 = vmov %v14205_v13  ;;  %v17316_v43 = vmov %v14200_v8 }
 0x220   : > { %17307 = vst [vmem:[#allocation37_spill] sm:$0xff] %v14212_v16  ;;  %v14217_v45 = vadd.f32 %v12143_v31, %v11620_v7   ;;  %v17312_v51 = vmov %v14212_v16  ;;  %v17317_v7 = vmov %v14207_v14  ;;  %v17335_v27 = vmov %v14145_v48 }
 0x221   : > { %17308 = vst [vmem:[#allocation38_spill] sm:$0xff] %v14215_v17  ;;  %v14219_v24 = vadd.f32 %v12145_v15, %v2097_v32   ;;  %v17314_v41 = vmov %v14215_v17  ;;  %v17318_v32 = vmov %v14203_v12  ;;  %v17337_v31 = vmov %v14147_v49 }
 0x222   : > { %17309 = vst [vmem:[#allocation39_spill] sm:$0xff] %v14217_v45  ;;  %v17311_v23 = vmov %v14217_v45  ;;  %v17338_v34 = vmov %v14143_v47  ;;  %v17339_v15 = vmov %v14133_v59  ;;  %v17341_v45 = vmov %v14135_v28 }
 0x223   : > { %17310 = vst [vmem:[#allocation40_spill] sm:$0xff] %v14219_v24  ;;  %v17313_v52 = vmov %v14219_v24  ;;  %v17340_v24 = vmov %v14128_v29  ;;  %v17342_v17 = vmov %v14131_v19 }
 0x224 LB: >> { %17346 = vst [vmem:[#allocation41_spill] sm:$0xff] %v13359_v23  ;;  %17347 = vst [vmem:[#allocation42_spill] sm:$0xff] %v13363_v51  ;;  %v2733_v16 = vld [vmem:[#allocation2 + $0x4] sm:$0xf]  ;;  %v2786_v14 = vld [vmem:[#allocation2] sm:$0xe]  ;;  %v11061_v44 = vpack.c.bf16 %v13483_v17, %v13483_v17  ;;  %v11062_v40 = vpack.c.bf16 %v13479_v45, %v13479_v45  ;;  %v11065_v38 = vpack.c.bf16 %v13467_v34, %v13467_v34  ;;  %v13367_v52 = vphi %v17313_v52, %v17423_v52   ;;  %v13363_v51 = vphi %v17312_v51, %v17421_v51   ;;  %v13359_v23 = vphi %v17311_v23, %v17419_v23   ;;  %s13487_s23 = sphi %s14317_s23, %s17454_s23   ;;  %v13483_v17 = vphi %v17342_v17, %v17453_v17   ;;  %v13479_v45 = vphi %v17341_v45, %v17452_v45   ;;  %v13475_v24 = vphi %v17340_v24, %v17451_v24   ;;  %v13471_v15 = vphi %v17339_v15, %v17450_v15   ;;  %v13467_v34 = vphi %v17338_v34, %v17449_v34   ;;  %v13463_v31 = vphi %v17337_v31, %v17448_v31   ;;  %v13459_v33 = vphi %v17336_v33, %v17447_v33   ;;  %v13455_v27 = vphi %v17335_v27, %v17446_v27   ;;  %v13451_v3 = vphi %v17334_v3, %v17445_v3   ;;  %v13447_v26 = vphi %v17333_v26, %v17444_v26   ;;  %v13443_v18 = vphi %v17332_v18, %v17443_v18   ;;  %v13439_v11 = vphi %v17331_v11, %v17442_v11   ;;  %v13435_v22 = vphi %v17330_v22, %v17441_v22   ;;  %v13431_v6 = vphi %v17329_v6, %v17440_v6   ;;  %v13427_v5 = vphi %v17328_v5, %v17439_v5   ;;  %v13423_v2 = vphi %v17327_v2, %v17438_v2   ;;  %v13419_v50 = vphi %v17326_v50, %v17437_v50   ;;  %v13415_v0 = vphi %v17325_v0, %v17436_v0   ;;  %v13411_v55 = vphi %v17324_v55, %v17435_v55   ;;  %v13407_v61 = vphi %v17323_v61, %v17434_v61   ;;  %v13403_v9 = vphi %v17322_v9, %v17433_v9   ;;  %v13399_v20 = vphi %v17321_v20, %v17432_v20   ;;  %v13395_v58 = vphi %v17320_v58, %v17431_v58   ;;  %v13391_v53 = vphi %v17319_v53, %v17430_v53   ;;  %v13387_v32 = vphi %v17318_v32, %v17429_v32   ;;  %v13383_v7 = vphi %v17317_v7, %v17428_v7   ;;  %v13379_v43 = vphi %v17316_v43, %v17426_v43   ;;  %v13375_v21 = vphi %v17315_v21, %v17425_v21   ;;  %v13371_v41 = vphi %v17314_v41, %v17424_v41  }
 0x225   : >> { %17348 = vst [vmem:[#allocation43_spill] sm:$0xff] %v13367_v52  ;;  %17349 = vst [vmem:[#allocation44_spill] sm:$0xff] %v13371_v41  ;;  %v12937_v13 = vld [vmem:[#allocation2 + $0x8] ss:$0 sps:$4 sm:$0x11]   ;;  %v10474_v12 = vcombine.low %v2786_v14, %v2733_v16  ;;  %s13492_s25 = smov 32  }
 0x226   : >> { %17350 = vst [vmem:[#allocation45_spill] sm:$0xff] %v13375_v21  ;;  %17351 = vst [vmem:[#allocation46_spill] sm:$0xff] %v13383_v7  ;;  %v2732_v8 = vld [vmem:[#allocation2] sm:$0xf]  ;;  %v3255_v42 = vrot.slane %v12937_v13, 1  ;;  %v2956_v39 = vshll.u32 %v12937_v13, 16  ;;  %v11066_v13 = vpack.c.bf16 %v13463_v31, %v13463_v31 }
 0x227   : >> { %17352 = vst [vmem:[#allocation47_spill] sm:$0xff] %v13387_v32  ;;  %17353 = vst [vmem:[#allocation48_spill] sm:$0xff] %v13415_v0  ;;  %v14418_v62 = vcombine.low %v2732_v8, %v2733_v16  ;;  %v3254_v46 = vrot.slane %v10474_v12, 1  ;;  %v2301_v14 = vshrl.u32 %v11061_v44, 16  ;;  %v2304_v10 = vshll.u32 %v11061_v44, 16  ;;  %s10385_s26 = smul.u32 144, %s13487_s23 }
 0x228   : >> { %17354 = vst [vmem:[#allocation49_spill] sm:$0xff] %v13419_v50  ;;  %17355 = vst [vmem:[#allocation50_spill] sm:$0xff] %v13423_v2  ;;  %v2958_v16 = vrot.slane %v2956_v39, 1  ;;  %v2309_v1 = vshrl.u32 %v11062_v40, 16  ;;  %v2312_v63 = vshll.u32 %v11062_v40, 16  ;;  %v2335_v57 = vshrl.u32 %v11065_v38, 16 }
 0x229   : >> { %17356 = vst [vmem:[#allocation51_spill] sm:$0xff] %v13427_v5  ;;  %17357 = vst [vmem:[#allocation52_spill] sm:$0xff] %v13431_v6  ;;  %v2949_v37 = vshrl.u32 %v14418_v62, 16  ;;  %v2951_v4 = vshll.u32 %v14418_v62, 16  ;;  %v3256_v8 = vsel %vm1300_vm2, %v3254_v46, %v3255_v42  ;;  %v2303_v60 = vrot.slane %v2301_v14, 7  ;;  %s13493_s6 = smov 16   ;;  %s14449_s10 = scalar_lea.vmem %s17198_s1, %s10385_s26 }
 0x22a   : >> { %17358 = vst [vmem:[#allocation53_spill] sm:$0xff] %v13435_v22  ;;  %17359 = vst [vmem:[#allocation54_spill] sm:$0xff] %v13447_v26  ;;  %3308 = vrot.lane.b32.xlu1 %v3256_v8, %s13492_s25  ;;  %v2311_v56 = vrot.slane %v2309_v1, 7  ;;  %v2620_v54 = vld [vmem:[#allocation2 + $0xc] sm:$0xf]  ;;  %v2338_v49 = vshll.u32 %v11065_v38, 16 }
 0x22b   : >> { %17360 = vst [vmem:[#allocation55_spill] sm:$0xff] %v13451_v3  ;;  %v2953_v12 = vrot.slane %v2951_v4, 1  ;;  %v2306_v44 = vor.u32 %v2304_v10, %v2303_v60  ;;  %v2307_v47 = vrot.slane %v2303_v60, 4  ;;  %v2624_v42 = vld [vmem:[#allocation2 + $0x14] sm:$0x1]  ;;  %v2337_v39 = vrot.slane %v2335_v57, 7 }
 0x22c   : >> { %v2314_v46 = vor.u32 %v2312_v63, %v2311_v56  ;;  %v2316_v40 = vrot.slane %v2311_v56, 4  ;;  %v2343_v36 = vshrl.u32 %v11066_v13, 16  ;;  %v2346_v28 = vshll.u32 %v11066_v13, 16  ;;  %v2634_v8 = vld [vmem:[#allocation2 + $0x24] sm:$0xf]  ;;  %v12978_v10 = vld [vmem:[%s14449_s10 + $0x48] sm:$0xff]  }
 0x22d   : >> { %v2954_v48 = vor.u32 %v2953_v12, %v2949_v37  ;;  %v2621_v14 = vsel %vm13667_vm10, %v2306_v44, %v2620_v54  ;;  %v2340_v59 = vor.u32 %v2338_v49, %v2337_v39  ;;  %v2341_v1 = vrot.slane %v2337_v39, 4  ;;  %v2638_v49 = vld [vmem:[#allocation2 + $0x2c] sm:$0x1]  ;;  %11621 = vmatprep.subr.bf16.mxu0 %v12978_v10  ;;  %v12979_v39 = vld [vmem:[%s14449_s10 + $0x50] sm:$0xff]   ;;  %v2652_v29 = vld [vmem:[#allocation2 + $0x44] sm:$0x1] }
 0x22e   : >> { %v2315_v60 = vsel %vm13660_vm7, %v2307_v47, %v2314_v46  ;;  %2622 = vst [vmem:[#allocation2 + $0xc] sm:$0xf] %v2621_v14  ;;  %v2625_v56 = vsel %vm13677_vm11, %v2316_v40, %v2624_v42  ;;  %v2345_v57 = vrot.slane %v2343_v36, 7  ;;  %v11063_v54 = vpack.c.bf16 %v13475_v24, %v13475_v24  ;;  %11622 = vmatpush3.bf16.msra.mxu0 %v12978_v10  ;;  %v2627_v40 = vld [vmem:[#allocation2 + $0x18] sm:$0xf]  ;;  %s10404_s13 = sshll.u32 %s13487_s23, 1 }
 0x22f   : >> { %v2959_v4 = vsel %vm993_vm3, %v2954_v48, %v2958_v16  ;;  %2623 = vst.msk [vmem:[#allocation2 + $0x10] sm:$0xf] %vm659_vm6, %v2315_v60  ;;  %2626 = vst [vmem:[#allocation2 + $0x14] sm:$0x1] %v2625_v56  ;;  %v2635_v48 = vsel %vm13667_vm10, %v2340_v59, %v2634_v8  ;;  %v11064_v36 = vpack.c.bf16 %v13471_v15, %v13471_v15  ;;  %v2631_v8 = vld [vmem:[#allocation2 + $0x20] sm:$0x1]  ;;  %11623 = vmatprep.subr.bf16.mxu0 %v12979_v39  ;;  %s14924_s11 = scalar_lea.vmem %s17199_s2, %s10404_s13 }
 0x230   : >> { %3164 = vrot.lane.b32.xlu0 %v2959_v4, %s13493_s6  ;;  %v2348_v47 = vor.u32 %v2346_v28, %v2345_v57  ;;  %v2350_v63 = vrot.slane %v2345_v57, 4  ;;  %2636 = vst [vmem:[#allocation2 + $0x24] sm:$0xf] %v2635_v48  ;;  %v2318_v37 = vshrl.u32 %v11063_v54, 16  ;;  %v2321_v59 = vshll.u32 %v11063_v54, 16  ;;  %v12980_v4 = vld [vmem:[%s14449_s10 + $0x58] sm:$0xff]  }
 0x231   : >> { %v2326_v12 = vshrl.u32 %v11064_v36, 16  ;;  %v2329_v13 = vshll.u32 %v11064_v36, 16  ;;  %v11069_v44 = vpack.c.bf16 %v13451_v3, %v13451_v3  ;;  %v14463_v42 = vpack.c.bf16 %v13447_v26, %v13447_v26  ;;  %s2146_s16 = sadd.s32 1, %s13487_s23  }
 0x232   : >> { %v2349_v38 = vsel %vm13660_vm7, %v2341_v1, %v2348_v47  ;;  %v2639_v16 = vsel %vm13677_vm11, %v2350_v63, %v2638_v49  ;;  %v2320_v28 = vrot.slane %v2318_v37, 7  ;;  %v14469_v63 = vpack.c.bf16 %v13459_v33, %v13459_v33  ;;  %11624 = vmatpush3.bf16.msra.mxu0 %v12979_v39  ;;  %p15686_p12 = scmp.ge.s32.totalorder %s2146_s16, 2   ;;  %s17454_s23 = smov %s2146_s16 }
 0x233   : >> { %2637 = vst.msk [vmem:[#allocation2 + $0x28] sm:$0xf] %vm659_vm6, %v2349_v38  ;;  %2640 = vst [vmem:[#allocation2 + $0x2c] sm:$0x1] %v2639_v16  ;;  %v2328_v46 = vrot.slane %v2326_v12, 7  ;;  %v2369_v57 = vshrl.u32 %v11069_v44, 16  ;;  %11625 = vmatprep.subr.bf16.mxu0 %v12980_v4 }
 0x234   : >> { %v2323_v60 = vor.u32 %v2321_v59, %v2320_v28  ;;  %v2324_v56 = vrot.slane %v2320_v28, 4  ;;  %v2372_v47 = vshll.u32 %v11069_v44, 16  ;;  %v2377_v44 = vshrl.u32 %v14463_v42, 16  ;;  %s11221_s13 = sshll.u32 (%p15686_p12), %s13548_s22, 11  ;;  %s10087_s14 = sshll.u32 (%p15686_p12), %s13585_s12, 4  ;;  %s17146_s14 = int_to_ptr.vmem [resolvable:$true] %s10087_s14 }
 0x235   : >> { %v2734_v14 = vld [vmem:[#allocation2 + $0xc] sm:$0xf]  ;;  %v2331_v49 = vor.u32 %v2329_v13, %v2328_v46  ;;  %v2333_v54 = vrot.slane %v2328_v46, 4  ;;  %v2371_v16 = vrot.slane %v2369_v57, 7  ;;  %v2380_v46 = vshll.u32 %v14463_v42, 16  ;;  %s17156_s22 = scalar_lea.sflag (%p15686_p12), [#allocation4], %s215_s30 }
 0x236   : >> { %v2787_v1 = vld [vmem:[#allocation2 + $0xc] sm:$0xe]  ;;  %v2735_v48 = vld [vmem:[#allocation2 + $0x10] sm:$0xf]  ;;  %v2628_v38 = vsel %vm13667_vm10, %v2323_v60, %v2627_v40  ;;  %v2648_v60 = vld [vmem:[#allocation2 + $0x3c] sm:$0xf]  ;;  %11626 = vmatpush3.bf16.msra.mxu0 %v12980_v4 }
 0x237   : >> { %v12940_v36 = vld [vmem:[#allocation2 + $0x14] ss:$0 sps:$4 sm:$0x11]   ;;  %v10475_v10 = vcombine.low %v2787_v1, %v2735_v48  ;;  %v14471_v37 = vcombine.low %v2734_v14, %v2735_v48  ;;  %v2738_v59 = vld [vmem:[#allocation2 + $0x24] sm:$0xf]  ;;  %v2332_v12 = vsel %vm13660_vm7, %v2324_v56, %v2331_v49  ;;  %v2632_v13 = vsel %vm13677_vm11, %v2333_v54, %v2631_v8  ;;  %s13494_s16 = smov (%p15686_p12), [#allocation3]  }
 0x238   : >> { %2629 = vst [vmem:[#allocation2 + $0x18] sm:$0xf] %v2628_v38  ;;  %v2789_v28 = vld [vmem:[#allocation2 + $0x24] sm:$0xe]  ;;  %v3258_v1 = vrot.slane %v12940_v36, 1  ;;  %v2968_v56 = vshll.u32 %v12940_v36, 16  ;;  %v2374_v8 = vor.u32 %v2372_v47, %v2371_v16  ;;  %v11068_v49 = vpack.c.bf16 %v13455_v27, %v13455_v27 }
 0x239   : >> { %v3257_v14 = vrot.slane %v10475_v10, 1  ;;  %v2961_v40 = vshrl.u32 %v14471_v37, 16  ;;  %v2963_v39 = vshll.u32 %v14471_v37, 16  ;;  %2630 = vst.msk [vmem:[#allocation2 + $0x1c] sm:$0xf] %vm659_vm6, %v2332_v12  ;;  %v2375_v48 = vrot.slane %v2371_v16, 4 }
 0x23a   : >> { %2633 = vst [vmem:[#allocation2 + $0x20] sm:$0x1] %v2632_v13  ;;  %v2739_v57 = vld [vmem:[#allocation2 + $0x28] sm:$0xf]  ;;  %v2970_v12 = vrot.slane %v2968_v56, 1  ;;  %v2379_v36 = vrot.slane %v2377_v44, 7  ;;  %v2649_v47 = vsel %vm13667_vm10, %v2374_v8, %v2648_v60 }
 0x23b   : >> { %v3259_v42 = vsel %vm1300_vm2, %v3257_v14, %v3258_v1  ;;  %v2965_v54 = vrot.slane %v2963_v39, 1  ;;  %v14487_v10 = vcombine.low %v2738_v59, %v2739_v57  ;;  %v12944_v38 = vld [vmem:[#allocation2 + $0x2c] ss:$0 sps:$4 sm:$0x11]   ;;  %v10477_v19 = vcombine.low %v2789_v28, %v2739_v57  ;;  %v12981_v13 = vld [vmem:[%s14449_s10 + $0x60] sm:$0xff]  }
 0x23c   : >> { %3310 = vrot.lane.b32.xlu1 %v3259_v42, %s13492_s25  ;;  %v2352_v16 = vshrl.u32 %v14469_v63, 16  ;;  %v2992_v1 = vshll.u32 %v12944_v38, 16  ;;  %2650 = vst [vmem:[#allocation2 + $0x3c] sm:$0xf] %v2649_v47  ;;  %v3264_v39 = vrot.slane %v12944_v38, 1  ;;  %v2382_v4 = vor.u32 %v2380_v46, %v2379_v36  ;;  %11659 = vmatprep.subr.bf16.mxu0 %v12981_v13 }
 0x23d   : >> { %v2966_v26 = vor.u32 %v2965_v54, %v2961_v40  ;;  %v2985_v14 = vshrl.u32 %v14487_v10, 16  ;;  %v2987_v59 = vshll.u32 %v14487_v10, 16  ;;  %v3263_v28 = vrot.slane %v10477_v19, 1  ;;  %v2641_v13 = vld [vmem:[#allocation2 + $0x30] sm:$0xf] }
 0x23e   : >> { %v2384_v57 = vrot.slane %v2379_v36, 4  ;;  %v2994_v42 = vrot.slane %v2992_v1, 1  ;;  %v2383_v3 = vsel %vm13660_vm7, %v2375_v48, %v2382_v4  ;;  %v2354_v46 = vrot.slane %v2352_v16, 7 }
 0x23f   : >> { %v2971_v44 = vsel %vm993_vm3, %v2966_v26, %v2970_v12  ;;  %v2989_v56 = vrot.slane %v2987_v59, 1  ;;  %v2736_v60 = vld [vmem:[#allocation2 + $0x18] sm:$0xf]  ;;  %v3265_v54 = vsel %vm1300_vm2, %v3263_v28, %v3264_v39  ;;  %2651 = vst.msk [vmem:[#allocation2 + $0x40] sm:$0xf] %vm659_vm6, %v2383_v3  ;;  %v2355_v47 = vshll.u32 %v14469_v63, 16 }
 0x240   : >> { %v2788_v8 = vld [vmem:[#allocation2 + $0x18] sm:$0xe]  ;;  %3166 = vrot.lane.b32.xlu0 %v2971_v44, %s13493_s6  ;;  %v2737_v40 = vld [vmem:[#allocation2 + $0x1c] sm:$0xf]  ;;  %v2653_v19 = vsel %vm13677_vm11, %v2384_v57, %v2652_v29  ;;  %v2358_v59 = vrot.slane %v2354_v46, 4  ;;  %v2360_v1 = vshrl.u32 %v11068_v49, 16 }
 0x241   : >> { %v2990_v38 = vor.u32 %v2989_v56, %v2985_v14  ;;  %v14503_v36 = vcombine.low %v2736_v60, %v2737_v40  ;;  %v12946_v26 = vld [vmem:[#allocation2 + $0x20] ss:$0 sps:$4 sm:$0x11]   ;;  %v10476_v12 = vcombine.low %v2788_v8, %v2737_v40  ;;  %2654 = vst [vmem:[#allocation2 + $0x44] sm:$0x1] %v2653_v19  ;;  %v2363_v28 = vshll.u32 %v11068_v49, 16 }
 0x242   : >> { %v2980_v16 = vshll.u32 %v12946_v26, 16  ;;  %v3261_v4 = vrot.slane %v12946_v26, 1  ;;  %v2357_v57 = vor.u32 %v2355_v47, %v2354_v46  ;;  %v2362_v3 = vrot.slane %v2360_v1, 7  ;;  %v2645_v63 = vld [vmem:[#allocation2 + $0x38] sm:$0x1] }
 0x243   : >> { %v2995_v48 = vsel %vm993_vm3, %v2990_v38, %v2994_v42  ;;  %v2973_v39 = vshrl.u32 %v14503_v36, 16  ;;  %v2975_v29 = vshll.u32 %v14503_v36, 16  ;;  %v3260_v14 = vrot.slane %v10476_v12, 1  ;;  %v2742_v42 = vld [vmem:[#allocation2 + $0x3c] sm:$0xf] }
 0x244   : >> { %3170 = vrot.lane.b32.xlu1 %v2995_v48, %s13493_s6  ;;  %v2982_v56 = vrot.slane %v2980_v16, 1  ;;  %v11073_v60 = vpack.c.bf16 %v13435_v22, %v13435_v22  ;;  %v2365_v8 = vor.u32 %v2363_v28, %v2362_v3  ;;  %v2367_v40 = vrot.slane %v2362_v3, 4  ;;  %v2791_v38 = vld [vmem:[#allocation2 + $0x3c] sm:$0xe] }
 0x245   : >> { %v2977_v44 = vrot.slane %v2975_v29, 1  ;;  %v3262_v49 = vsel %vm1300_vm2, %v3260_v14, %v3261_v4  ;;  %v2642_v19 = vsel %vm13667_vm10, %v2357_v57, %v2641_v13  ;;  %v11074_v46 = vpack.c.bf16 %v13431_v6, %v13431_v6  ;;  %v2662_v4 = vld [vmem:[#allocation2 + $0x54] sm:$0xf] }
 0x246   : >> { %2643 = vst [vmem:[#allocation2 + $0x30] sm:$0xf] %v2642_v19  ;;  %v2403_v26 = vshrl.u32 %v11073_v60, 16  ;;  %v2406_v12 = vshll.u32 %v11073_v60, 16  ;;  %v2743_v47 = vld [vmem:[#allocation2 + $0x40] sm:$0xf]  ;;  %v2366_v1 = vsel %vm13660_vm7, %v2358_v59, %v2365_v8  ;;  %v2646_v28 = vsel %vm13677_vm11, %v2367_v40, %v2645_v63 }
 0x247   : >> { %v2978_v48 = vor.u32 %v2977_v44, %v2973_v39  ;;  %v14524_v13 = vcombine.low %v2742_v42, %v2743_v47  ;;  %2644 = vst.msk [vmem:[#allocation2 + $0x34] sm:$0xf] %vm659_vm6, %v2366_v1  ;;  %2647 = vst [vmem:[#allocation2 + $0x38] sm:$0x1] %v2646_v28  ;;  %v10479_v16 = vcombine.low %v2791_v38, %v2743_v47  ;;  %v2414_v57 = vshll.u32 %v11074_v46, 16 }
 0x248   : >> { %3314 = vrot.lane.b32.xlu1 %v3265_v54, %s13492_s25  ;;  %v12949_v39 = vld [vmem:[#allocation2 + $0x44] ss:$0 sps:$4 sm:$0x11]   ;;  %v2405_v14 = vrot.slane %v2403_v26, 7  ;;  %v2411_v54 = vshrl.u32 %v11074_v46, 16  ;;  %v11071_v38 = vpack.c.bf16 %v13443_v18, %v13443_v18  ;;  %v11072_v26 = vpack.c.bf16 %v13439_v11, %v13439_v11 }
 0x249   : >> { %v2983_v29 = vsel %vm993_vm3, %v2978_v48, %v2982_v56  ;;  %v3009_v59 = vshrl.u32 %v14524_v13, 16  ;;  %v3011_v3 = vshll.u32 %v14524_v13, 16  ;;  %v3016_v44 = vshll.u32 %v12949_v39, 16  ;;  %v2666_v56 = vld [vmem:[#allocation2 + $0x5c] sm:$0x1] }
 0x24a   : >> { %3168 = vrot.lane.b32.xlu0 %v2983_v29, %s13493_s6  ;;  %v3269_v63 = vrot.slane %v10479_v16, 1  ;;  %v3270_v60 = vrot.slane %v12949_v39, 1  ;;  %v2408_v42 = vor.u32 %v2406_v12, %v2405_v14  ;;  %v2409_v8 = vrot.slane %v2405_v14, 4 }
 0x24b   : >> { %v2413_v40 = vrot.slane %v2411_v54, 7  ;;  %v3013_v19 = vrot.slane %v3011_v3, 1  ;;  %v3018_v48 = vrot.slane %v3016_v44, 1  ;;  %v2386_v16 = vshrl.u32 %v11071_v38, 16 }
 0x24c   : >> { %v3271_v47 = vsel %vm1300_vm2, %v3269_v63, %v3270_v60  ;;  %v2663_v12 = vsel %vm13667_vm10, %v2408_v42, %v2662_v4  ;;  %v2389_v14 = vshll.u32 %v11071_v38, 16  ;;  %v2394_v54 = vshrl.u32 %v11072_v26, 16 }
 0x24d   : >> { %v2740_v46 = vld [vmem:[#allocation2 + $0x30] sm:$0xf]  ;;  %v2416_v28 = vor.u32 %v2414_v57, %v2413_v40  ;;  %v2418_v29 = vrot.slane %v2413_v40, 4  ;;  %v3014_v39 = vor.u32 %v3013_v19, %v3009_v59  ;;  %2664 = vst [vmem:[#allocation2 + $0x54] sm:$0xf] %v2663_v12  ;;  %v2397_v6 = vshll.u32 %v11072_v26, 16 }
 0x24e   : >> { %3312 = vrot.lane.b32.xlu0 %v3262_v49, %s13492_s25  ;;  %v2790_v1 = vld [vmem:[#allocation2 + $0x30] sm:$0xe]  ;;  %v2741_v3 = vld [vmem:[#allocation2 + $0x34] sm:$0xf]  ;;  %v2388_v4 = vrot.slane %v2386_v16, 7  ;;  %v2396_v42 = vrot.slane %v2394_v54, 7 }
 0x24f   : >> { %v2417_v44 = vsel %vm13660_vm7, %v2409_v8, %v2416_v28  ;;  %v2667_v49 = vsel %vm13677_vm11, %v2418_v29, %v2666_v56  ;;  %v3019_v63 = vsel %vm993_vm3, %v3014_v39, %v3018_v48  ;;  %v14543_v57 = vcombine.low %v2740_v46, %v2741_v3  ;;  %v12951_v60 = vld [vmem:[#allocation2 + $0x38] ss:$0 sps:$4 sm:$0x11]   ;;  %v2655_v59 = vld [vmem:[#allocation2 + $0x48] sm:$0xf] }
 0x250   : >> { %v10478_v40 = vcombine.low %v2790_v1, %v2741_v3  ;;  %2665 = vst.msk [vmem:[#allocation2 + $0x58] sm:$0xf] %vm659_vm6, %v2417_v44  ;;  %2668 = vst [vmem:[#allocation2 + $0x5c] sm:$0x1] %v2667_v49  ;;  %3174 = vrot.lane.b32.xlu1 %v3019_v63, %s13493_s6  ;;  %v2659_v19 = vld [vmem:[#allocation2 + $0x50] sm:$0x1]  ;;  %v2391_v46 = vor.u32 %v2389_v14, %v2388_v4  ;;  %v2399_v29 = vor.u32 %v2397_v6, %v2396_v42 }
 0x251   : >> { %v2997_v8 = vshrl.u32 %v14543_v57, 16  ;;  %v2999_v56 = vshll.u32 %v14543_v57, 16  ;;  %v3004_v38 = vshll.u32 %v12951_v60, 16  ;;  %v3267_v48 = vrot.slane %v12951_v60, 1 }
 0x252   : >> { %v3266_v26 = vrot.slane %v10478_v40, 1  ;;  %v2392_v28 = vrot.slane %v2388_v4, 4  ;;  %v2401_v39 = vrot.slane %v2396_v42, 4  ;;  %v2656_v44 = vsel %vm13667_vm10, %v2391_v46, %v2655_v59 }
 0x253   : >> { %v3001_v1 = vrot.slane %v2999_v56, 1  ;;  %v3006_v12 = vrot.slane %v3004_v38, 1  ;;  %v11077_v14 = vpack.c.bf16 %v13419_v50, %v13419_v50  ;;  %2657 = vst [vmem:[#allocation2 + $0x48] sm:$0xf] %v2656_v44  ;;  %v11076_v46 = vpack.c.bf16 %v13423_v2, %v13423_v2 }
 0x254   : >> { %3318 = vrot.lane.b32.xlu1 %v3271_v47, %s13492_s25  ;;  %v3268_v16 = vsel %vm1300_vm2, %v3266_v26, %v3267_v48  ;;  %v2746_v3 = vld [vmem:[#allocation2 + $0x54] sm:$0xf]  ;;  %v2400_v54 = vsel %vm13660_vm7, %v2392_v28, %v2399_v29  ;;  %v2660_v6 = vsel %vm13677_vm11, %v2401_v39, %v2659_v19  ;;  %v11078_v47 = vpack.c.bf16 %v13415_v0, %v13415_v0  ;;  %v2676_v39 = vld [vmem:[#allocation2 + $0x6c] sm:$0xf] }
 0x255   : >> { %v2793_v49 = vld [vmem:[#allocation2 + $0x54] sm:$0xe]  ;;  %v3002_v63 = vor.u32 %v3001_v1, %v2997_v8  ;;  %2658 = vst.msk [vmem:[#allocation2 + $0x4c] sm:$0xf] %vm659_vm6, %v2400_v54  ;;  %2661 = vst [vmem:[#allocation2 + $0x50] sm:$0x1] %v2660_v6  ;;  %v11075_v19 = vpack.c.bf16 %v13427_v5, %v13427_v5 }
 0x256   : >> { %v2437_v40 = vshrl.u32 %v11077_v14, 16  ;;  %v2440_v4 = vshll.u32 %v11077_v14, 16  ;;  %v2445_v8 = vshrl.u32 %v11078_v47, 16  ;;  %v2448_v48 = vshll.u32 %v11078_v47, 16  ;;  %v2680_v6 = vld [vmem:[#allocation2 + $0x74] sm:$0x1] }
 0x257   : >> { %v2747_v60 = vld [vmem:[#allocation2 + $0x58] sm:$0xf]  ;;  %v3007_v59 = vsel %vm993_vm3, %v3002_v63, %v3006_v12  ;;  %v12954_v56 = vld [vmem:[#allocation2 + $0x5c] ss:$0 sps:$4 sm:$0x11]   ;;  %v2420_v47 = vshrl.u32 %v11075_v19, 16 }
 0x258   : >> { %v14563_v42 = vcombine.low %v2746_v3, %v2747_v60  ;;  %v10481_v38 = vcombine.low %v2793_v49, %v2747_v60  ;;  %3172 = vrot.lane.b32.xlu0 %v3007_v59, %s13493_s6  ;;  %v2439_v26 = vrot.slane %v2437_v40, 7  ;;  %v3040_v1 = vshll.u32 %v12954_v56, 16 }
 0x259   : >> { %v3276_v3 = vrot.slane %v12954_v56, 1  ;;  %v2447_v49 = vrot.slane %v2445_v8, 7  ;;  %v2423_v60 = vshll.u32 %v11075_v19, 16  ;;  %vm10040_vm15 = vcmask (%p15686_p12), 519168  }
 0x25a   : >> { %v3033_v28 = vshrl.u32 %v14563_v42, 16  ;;  %v3035_v29 = vshll.u32 %v14563_v42, 16  ;;  %v3275_v12 = vrot.slane %v10481_v38, 1  ;;  %v2442_v54 = vor.u32 %v2440_v4, %v2439_v26  ;;  %v2744_v40 = vld [vmem:[#allocation2 + $0x48] sm:$0xf] }
 0x25b   : >> { %v2443_v44 = vrot.slane %v2439_v26, 4  ;;  %v3042_v63 = vrot.slane %v3040_v1, 1  ;;  %v2792_v0 = vld [vmem:[#allocation2 + $0x48] sm:$0xe]  ;;  %v2450_v50 = vor.u32 %v2448_v48, %v2447_v49  ;;  %v2452_v8 = vrot.slane %v2447_v49, 4 }
 0x25c   : >> { %v3037_v14 = vrot.slane %v3035_v29, 1  ;;  %3316 = vrot.lane.b32.xlu0 %v3268_v16, %s13492_s25  ;;  %v2745_v59 = vld [vmem:[#allocation2 + $0x4c] sm:$0xf]  ;;  %v2677_v2 = vsel %vm13667_vm10, %v2442_v54, %v2676_v39  ;;  %v12956_v4 = vld [vmem:[#allocation2 + $0x50] ss:$0 sps:$4 sm:$0x11]  }
 0x25d   : >> { %v14575_v22 = vcombine.low %v2744_v40, %v2745_v59  ;;  %v10480_v56 = vcombine.low %v2792_v0, %v2745_v59  ;;  %2678 = vst [vmem:[#allocation2 + $0x6c] sm:$0xf] %v2677_v2  ;;  %v2669_v26 = vld [vmem:[#allocation2 + $0x60] sm:$0xf]  ;;  %v2451_v19 = vsel %vm13660_vm7, %v2443_v44, %v2450_v50  ;;  %v2422_v29 = vrot.slane %v2420_v47, 7 }
 0x25e   : >> { %v3038_v38 = vor.u32 %v3037_v14, %v3033_v28  ;;  %v2428_v16 = vshrl.u32 %v11076_v46, 16  ;;  %v2431_v1 = vshll.u32 %v11076_v46, 16  ;;  %v3028_v28 = vshll.u32 %v12956_v4, 16  ;;  %2679 = vst.msk [vmem:[#allocation2 + $0x70] sm:$0xf] %vm659_vm6, %v2451_v19 }
 0x25f   : >> { %v3021_v48 = vshrl.u32 %v14575_v22, 16  ;;  %v3023_v39 = vshll.u32 %v14575_v22, 16  ;;  %v3277_v0 = vsel %vm1300_vm2, %v3275_v12, %v3276_v3  ;;  %v3272_v2 = vrot.slane %v10480_v56, 1  ;;  %v2673_v40 = vld [vmem:[#allocation2 + $0x68] sm:$0x1] }
 0x260   : >> { %v3043_v5 = vsel %vm993_vm3, %v3038_v38, %v3042_v63  ;;  %v2681_v50 = vsel %vm13677_vm11, %v2452_v8, %v2680_v6  ;;  %v2425_v54 = vor.u32 %v2423_v60, %v2422_v29  ;;  %v3030_v46 = vrot.slane %v3028_v28, 1 }
 0x261   : >> { %3178 = vrot.lane.b32.xlu1 %v3043_v5, %s13493_s6  ;;  %v3025_v44 = vrot.slane %v3023_v39, 1  ;;  %2682 = vst [vmem:[#allocation2 + $0x74] sm:$0x1] %v2681_v50  ;;  %v2426_v49 = vrot.slane %v2422_v29, 4  ;;  %v2430_v14 = vrot.slane %v2428_v16, 7  ;;  %v3273_v63 = vrot.slane %v12956_v4, 1 }
 0x262   : >> { %v2670_v47 = vsel %vm13667_vm10, %v2425_v54, %v2669_v26  ;;  %v11081_v6 = vpack.c.bf16 %v13403_v9, %v13403_v9  ;;  %v11082_v60 = vpack.c.bf16 %v13399_v20, %v13399_v20 }
 0x263   : >> { %v3026_v59 = vor.u32 %v3025_v44, %v3021_v48  ;;  %v2433_v38 = vor.u32 %v2431_v1, %v2430_v14  ;;  %v2435_v5 = vrot.slane %v2430_v14, 4  ;;  %2671 = vst [vmem:[#allocation2 + $0x60] sm:$0xf] %v2670_v47  ;;  %v3274_v26 = vsel %vm1300_vm2, %v3272_v2, %v3273_v63  ;;  %v2694_v63 = vld [vmem:[#allocation2 + $0x8c] sm:$0x1] }
 0x264   : >> { %v2750_v12 = vld [vmem:[#allocation2 + $0x6c] sm:$0xf]  ;;  %v2471_v29 = vshrl.u32 %v11081_v6, 16  ;;  %v2474_v16 = vshll.u32 %v11081_v6, 16  ;;  %v2479_v1 = vshrl.u32 %v11082_v60, 16  ;;  %v2482_v28 = vshll.u32 %v11082_v60, 16 }
 0x265   : >> { %3322 = vrot.lane.b32.xlu1 %v3277_v0, %s13492_s25  ;;  %v2795_v3 = vld [vmem:[#allocation2 + $0x6c] sm:$0xe]  ;;  %v3031_v4 = vsel %vm993_vm3, %v3026_v59, %v3030_v46  ;;  %v2434_v56 = vsel %vm13660_vm7, %v2426_v49, %v2433_v38  ;;  %v2674_v8 = vsel %vm13677_vm11, %v2435_v5, %v2673_v40  ;;  %v2751_v19 = vld [vmem:[#allocation2 + $0x70] sm:$0xf]  ;;  %v2690_v0 = vld [vmem:[#allocation2 + $0x84] sm:$0xf]  ;;  %v11079_v44 = vpack.c.bf16 %v13411_v55, %v13411_v55 }
 0x266   : >> { %3176 = vrot.lane.b32.xlu0 %v3031_v4, %s13493_s6  ;;  %2672 = vst.msk [vmem:[#allocation2 + $0x64] sm:$0xf] %vm659_vm6, %v2434_v56  ;;  %2675 = vst [vmem:[#allocation2 + $0x68] sm:$0x1] %v2674_v8  ;;  %v14602_v48 = vcombine.low %v2750_v12, %v2751_v19  ;;  %v10483_v39 = vcombine.low %v2795_v3, %v2751_v19  ;;  %v2473_v54 = vrot.slane %v2471_v29, 7  ;;  %v2481_v14 = vrot.slane %v2479_v1, 7 }
 0x267   : >> { %v11080_v2 = vpack.c.bf16 %v13407_v61, %v13407_v61  ;;  %v2454_v19 = vshrl.u32 %v11079_v44, 16 }
 0x268   : >> { %v12959_v50 = vld [vmem:[#allocation2 + $0x74] ss:$0 sps:$4 sm:$0x11]   ;;  %v3057_v46 = vshrl.u32 %v14602_v48, 16  ;;  %v3059_v49 = vshll.u32 %v14602_v48, 16  ;;  %v3281_v59 = vrot.slane %v10483_v39, 1  ;;  %v2476_v5 = vor.u32 %v2474_v16, %v2473_v54 }
 0x269   : >> { %v3064_v47 = vshll.u32 %v12959_v50, 16  ;;  %v3282_v38 = vrot.slane %v12959_v50, 1  ;;  %v2477_v6 = vrot.slane %v2473_v54, 4  ;;  %v2484_v60 = vor.u32 %v2482_v28, %v2481_v14 }
 0x26a   : >> { %3320 = vrot.lane.b32.xlu0 %v3274_v26, %s13492_s25  ;;  %v2748_v40 = vld [vmem:[#allocation2 + $0x60] sm:$0xf]  ;;  %v3061_v12 = vrot.slane %v3059_v49, 1  ;;  %v2486_v4 = vrot.slane %v2481_v14, 4  ;;  %v2691_v8 = vsel %vm13667_vm10, %v2476_v5, %v2690_v0  ;;  %v2457_v16 = vshll.u32 %v11079_v44, 16 }
 0x26b   : >> { %v2794_v3 = vld [vmem:[#allocation2 + $0x60] sm:$0xe]  ;;  %v3066_v56 = vrot.slane %v3064_v47, 1  ;;  %v2485_v26 = vsel %vm13660_vm7, %v2477_v6, %v2484_v60  ;;  %2692 = vst [vmem:[#allocation2 + $0x84] sm:$0xf] %v2691_v8  ;;  %v2456_v49 = vrot.slane %v2454_v19, 7  ;;  %v11085_v47 = vpack.c.bf16 %v13387_v32, %v13387_v32 }
 0x26c   : >> { %v3062_v29 = vor.u32 %v3061_v12, %v3057_v46  ;;  %v2695_v39 = vsel %vm13677_vm11, %v2486_v4, %v2694_v63  ;;  %2693 = vst.msk [vmem:[#allocation2 + $0x88] sm:$0xf] %vm659_vm6, %v2485_v26  ;;  %v2462_v0 = vshrl.u32 %v11080_v2, 16  ;;  %v2465_v14 = vshll.u32 %v11080_v2, 16  ;;  %v2683_v12 = vld [vmem:[#allocation2 + $0x78] sm:$0xf] }
 0x26d   : >> { %v2749_v1 = vld [vmem:[#allocation2 + $0x64] sm:$0xf]  ;;  %v12961_v54 = vld [vmem:[#allocation2 + $0x68] ss:$0 sps:$4 sm:$0x11]   ;;  %v3283_v5 = vsel %vm1300_vm2, %v3281_v59, %v3282_v38  ;;  %v2459_v6 = vor.u32 %v2457_v16, %v2456_v49  ;;  %v2460_v60 = vrot.slane %v2456_v49, 4  ;;  %v11086_v19 = vpack.c.bf16 %v13383_v7, %v13383_v7 }
 0x26e   : >> { %v14617_v50 = vcombine.low %v2748_v40, %v2749_v1  ;;  %v10482_v28 = vcombine.low %v2794_v3, %v2749_v1  ;;  %2696 = vst [vmem:[#allocation2 + $0x8c] sm:$0x1] %v2695_v39  ;;  %v3067_v46 = vsel %vm993_vm3, %v3062_v29, %v3066_v56  ;;  %v3052_v40 = vshll.u32 %v12961_v54, 16  ;;  %v2687_v2 = vld [vmem:[#allocation2 + $0x80] sm:$0x1] }
 0x26f   : >> { %3182 = vrot.lane.b32.xlu1 %v3067_v46, %s13493_s6  ;;  %v2464_v4 = vrot.slane %v2462_v0, 7  ;;  %v2505_v29 = vshrl.u32 %v11085_v47, 16  ;;  %v3279_v1 = vrot.slane %v12961_v54, 1  ;;  %v2684_v46 = vsel %vm13667_vm10, %v2459_v6, %v2683_v12 }
 0x270   : >> { %v3045_v63 = vshrl.u32 %v14617_v50, 16  ;;  %v3047_v44 = vshll.u32 %v14617_v50, 16  ;;  %v3278_v3 = vrot.slane %v10482_v28, 1  ;;  %v3054_v56 = vrot.slane %v3052_v40, 1  ;;  %2685 = vst [vmem:[#allocation2 + $0x78] sm:$0xf] %v2684_v46 }
 0x271   : >> { %v2467_v26 = vor.u32 %v2465_v14, %v2464_v4  ;;  %v2469_v39 = vrot.slane %v2464_v4, 4  ;;  %v2507_v16 = vrot.slane %v2505_v29, 7  ;;  %v2508_v28 = vshll.u32 %v11085_v47, 16  ;;  %v2704_v47 = vld [vmem:[#allocation2 + $0x9c] sm:$0xf] }
 0x272   : >> { %v3049_v8 = vrot.slane %v3047_v44, 1  ;;  %v2754_v59 = vld [vmem:[#allocation2 + $0x84] sm:$0xf]  ;;  %v2513_v14 = vshrl.u32 %v11086_v19, 16  ;;  %v2516_v44 = vshll.u32 %v11086_v19, 16 }
 0x273   : >> { %3326 = vrot.lane.b32.xlu1 %v3283_v5, %s13492_s25  ;;  %v2797_v38 = vld [vmem:[#allocation2 + $0x84] sm:$0xe]  ;;  %v2755_v49 = vld [vmem:[#allocation2 + $0x88] sm:$0xf]  ;;  %v2468_v0 = vsel %vm13660_vm7, %v2460_v60, %v2467_v26  ;;  %v2688_v54 = vsel %vm13677_vm11, %v2469_v39, %v2687_v2  ;;  %v2510_v6 = vor.u32 %v2508_v28, %v2507_v16  ;;  %v2511_v4 = vrot.slane %v2507_v16, 4 }
 0x274   : >> { %v3050_v32 = vor.u32 %v3049_v8, %v3045_v63  ;;  %v14637_v12 = vcombine.low %v2754_v59, %v2755_v49  ;;  %2686 = vst.msk [vmem:[#allocation2 + $0x7c] sm:$0xf] %vm659_vm6, %v2468_v0  ;;  %2689 = vst [vmem:[#allocation2 + $0x80] sm:$0x1] %v2688_v54  ;;  %v10485_v5 = vcombine.low %v2797_v38, %v2755_v49  ;;  %v2515_v60 = vrot.slane %v2513_v14, 7 }
 0x275   : >> { %v12964_v63 = vld [vmem:[#allocation2 + $0x8c] ss:$0 sps:$4 sm:$0x11]   ;;  %v3280_v8 = vsel %vm1300_vm2, %v3278_v3, %v3279_v1  ;;  %v2705_v46 = vsel %vm13667_vm10, %v2510_v6, %v2704_v47  ;;  %v11084_v16 = vpack.c.bf16 %v13391_v53, %v13391_v53  ;;  %v11083_v54 = vpack.c.bf16 %v13395_v58, %v13395_v58 }
 0x276   : >> { %v3055_v40 = vsel %vm993_vm3, %v3050_v32, %v3054_v56  ;;  %v3081_v2 = vshrl.u32 %v14637_v12, 16  ;;  %v3083_v19 = vshll.u32 %v14637_v12, 16  ;;  %v3088_v32 = vshll.u32 %v12964_v63, 16  ;;  %v2708_v56 = vld [vmem:[#allocation2 + $0xa4] sm:$0x1] }
 0x277   : >> { %3180 = vrot.lane.b32.xlu0 %v3055_v40, %s13493_s6  ;;  %v3287_v29 = vrot.slane %v10485_v5, 1  ;;  %v2518_v26 = vor.u32 %v2516_v44, %v2515_v60  ;;  %v2520_v39 = vrot.slane %v2515_v60, 4  ;;  %2706 = vst [vmem:[#allocation2 + $0x9c] sm:$0xf] %v2705_v46  ;;  %v2752_v3 = vld [vmem:[#allocation2 + $0x78] sm:$0xf] }
 0x278   : >> { %v3085_v59 = vrot.slane %v3083_v19, 1  ;;  %v3090_v38 = vrot.slane %v3088_v32, 1  ;;  %v3288_v1 = vrot.slane %v12964_v63, 1  ;;  %v2796_v28 = vld [vmem:[#allocation2 + $0x78] sm:$0xe]  ;;  %v2496_v44 = vshrl.u32 %v11084_v16, 16 }
 0x279   : >> { %v2519_v49 = vsel %vm13660_vm7, %v2511_v4, %v2518_v26  ;;  %v2709_v0 = vsel %vm13677_vm11, %v2520_v39, %v2708_v56  ;;  %v2499_v40 = vshll.u32 %v11084_v16, 16  ;;  %v2488_v6 = vshrl.u32 %v11083_v54, 16  ;;  %v2697_v56 = vld [vmem:[#allocation2 + $0x90] sm:$0xf] }
 0x27a   : >> { %v3086_v14 = vor.u32 %v3085_v59, %v3081_v2  ;;  %2707 = vst.msk [vmem:[#allocation2 + $0xa0] sm:$0xf] %vm659_vm6, %v2519_v49  ;;  %2710 = vst [vmem:[#allocation2 + $0xa4] sm:$0x1] %v2709_v0  ;;  %v2491_v47 = vshll.u32 %v11083_v54, 16  ;;  %v2498_v19 = vrot.slane %v2496_v44, 7  ;;  %v3289_v32 = vsel %vm1300_vm2, %v3287_v29, %v3288_v1 }
 0x27b   : >> { %3324 = vrot.lane.b32.xlu0 %v3280_v8, %s13492_s25  ;;  %v2753_v5 = vld [vmem:[#allocation2 + $0x7c] sm:$0xf]  ;;  %v12966_v4 = vld [vmem:[#allocation2 + $0x80] ss:$0 sps:$4 sm:$0x11]   ;;  %v2490_v2 = vrot.slane %v2488_v6, 7  ;;  %v11090_v26 = vpack.c.bf16 %v13367_v52, %v13367_v52  ;;  %v11089_v1 = vpack.c.bf16 %v13371_v41, %v13371_v41 }
 0x27c   : >> { %v3091_v63 = vsel %vm993_vm3, %v3086_v14, %v3090_v38  ;;  %v14657_v60 = vcombine.low %v2752_v3, %v2753_v5  ;;  %v10484_v8 = vcombine.low %v2796_v28, %v2753_v5  ;;  %v3076_v59 = vshll.u32 %v12966_v4, 16  ;;  %v2701_v38 = vld [vmem:[#allocation2 + $0x98] sm:$0x1] }
 0x27d   : >> { %3186 = vrot.lane.b32.xlu1 %v3091_v63, %s13493_s6  ;;  %v2493_v49 = vor.u32 %v2491_v47, %v2490_v2  ;;  %v2494_v28 = vrot.slane %v2490_v2, 4  ;;  %v2501_v0 = vor.u32 %v2499_v40, %v2498_v19  ;;  %v2503_v29 = vrot.slane %v2498_v19, 4 }
 0x27e   : >> { %v3069_v39 = vshrl.u32 %v14657_v60, 16  ;;  %v3071_v46 = vshll.u32 %v14657_v60, 16  ;;  %v3284_v16 = vrot.slane %v10484_v8, 1  ;;  %v2758_v3 = vld [vmem:[#allocation2 + $0x9c] sm:$0xf]  ;;  %v3078_v44 = vrot.slane %v3076_v59, 1 }
 0x27f   : >> { %v2799_v54 = vld [vmem:[#allocation2 + $0x9c] sm:$0xe]  ;;  %v3285_v5 = vrot.slane %v12966_v4, 1  ;;  %v2502_v63 = vsel %vm13660_vm7, %v2494_v28, %v2501_v0  ;;  %v2698_v8 = vsel %vm13667_vm10, %v2493_v49, %v2697_v56  ;;  %v2547_v47 = vshrl.u32 %v11090_v26, 16 }
 0x280   : >> { %v3073_v14 = vrot.slane %v3071_v46, 1  ;;  %2699 = vst [vmem:[#allocation2 + $0x90] sm:$0xf] %v2698_v8  ;;  %2700 = vst.msk [vmem:[#allocation2 + $0x94] sm:$0xf] %vm659_vm6, %v2502_v63  ;;  %v2702_v19 = vsel %vm13677_vm11, %v2503_v29, %v2701_v38  ;;  %v2539_v4 = vshrl.u32 %v11089_v1, 16 }
 0x281   : >> { %3330 = vrot.lane.b32.xlu1 %v3289_v32, %s13492_s25  ;;  %v2759_v6 = vld [vmem:[#allocation2 + $0xa0] sm:$0xf]  ;;  %v12969_v46 = vld [vmem:[#allocation2 + $0xa4] ss:$0 sps:$4 sm:$0x11]   ;;  %v2542_v59 = vshll.u32 %v11089_v1, 16  ;;  %v3286_v49 = vsel %vm1300_vm2, %v3284_v16, %v3285_v5 }
 0x282   : >> { %v3074_v2 = vor.u32 %v3073_v14, %v3069_v39  ;;  %v14672_v40 = vcombine.low %v2758_v3, %v2759_v6  ;;  %v10487_v32 = vcombine.low %v2799_v54, %v2759_v6  ;;  %2703 = vst [vmem:[#allocation2 + $0x98] sm:$0x1] %v2702_v19  ;;  %v2549_v52 = vrot.slane %v2547_v47, 7  ;;  %v2722_v54 = vld [vmem:[#allocation2 + $0xbc] sm:$0x1] }
 0x283   : >> { %v2550_v28 = vshll.u32 %v11090_v26, 16  ;;  %v3112_v3 = vshll.u32 %v12969_v46, 16  ;;  %v2541_v63 = vrot.slane %v2539_v4, 7  ;;  %v2718_v8 = vld [vmem:[#allocation2 + $0xb4] sm:$0xf]  ;;  %v3294_v26 = vrot.slane %v12969_v46, 1 }
 0x284   : >> { %v3079_v0 = vsel %vm993_vm3, %v3074_v2, %v3078_v44  ;;  %v3105_v56 = vshrl.u32 %v14672_v40, 16  ;;  %v3107_v39 = vshll.u32 %v14672_v40, 16  ;;  %v3293_v14 = vrot.slane %v10487_v32, 1 }
 0x285   : >> { %3184 = vrot.lane.b32.xlu0 %v3079_v0, %s13493_s6  ;;  %v2552_v38 = vor.u32 %v2550_v28, %v2549_v52  ;;  %v3114_v6 = vrot.slane %v3112_v3, 1  ;;  %v2554_v1 = vrot.slane %v2549_v52, 4  ;;  %v2544_v47 = vor.u32 %v2542_v59, %v2541_v63 }
 0x286   : >> { %v3109_v29 = vrot.slane %v3107_v39, 1  ;;  %v2545_v44 = vrot.slane %v2541_v63, 4  ;;  %v11087_v0 = vpack.c.bf16 %v13379_v43, %v13379_v43  ;;  %v11088_v46 = vpack.c.bf16 %v13375_v21, %v13375_v21 }
 0x287   : >> { %v2723_v19 = vsel %vm13677_vm11, %v2554_v1, %v2722_v54  ;;  %v2756_v16 = vld [vmem:[#allocation2 + $0x90] sm:$0xf]  ;;  %v2757_v5 = vld [vmem:[#allocation2 + $0x94] sm:$0xf]  ;;  %v2719_v52 = vsel %vm13667_vm10, %v2544_v47, %v2718_v8 }
 0x288   : >> { %v3110_v2 = vor.u32 %v3109_v29, %v3105_v56  ;;  %v2798_v32 = vld [vmem:[#allocation2 + $0x90] sm:$0xe]  ;;  %v2553_v4 = vsel %vm13660_vm7, %v2545_v44, %v2552_v38  ;;  %2724 = vst [vmem:[#allocation2 + $0xbc] sm:$0x1] %v2723_v19  ;;  %v14694_v28 = vcombine.low %v2756_v16, %v2757_v5  ;;  %2720 = vst [vmem:[#allocation2 + $0xb4] sm:$0xf] %v2719_v52 }
 0x289   : >> { %3328 = vrot.lane.b32.xlu0 %v3286_v49, %s13492_s25  ;;  %v12971_v56 = vld [vmem:[#allocation2 + $0x98] ss:$0 sps:$4 sm:$0x11]   ;;  %v10486_v39 = vcombine.low %v2798_v32, %v2757_v5  ;;  %2721 = vst.msk [vmem:[#allocation2 + $0xb8] sm:$0xf] %vm659_vm6, %v2553_v4  ;;  %v2522_v3 = vshrl.u32 %v11087_v0, 16 }
 0x28a   : >> { %v3115_v59 = vsel %vm993_vm3, %v3110_v2, %v3114_v6  ;;  %v2525_v49 = vshll.u32 %v11087_v0, 16  ;;  %v2530_v63 = vshrl.u32 %v11088_v46, 16  ;;  %v2533_v38 = vshll.u32 %v11088_v46, 16  ;;  %v2711_v5 = vld [vmem:[#allocation2 + $0xa8] sm:$0xf] }
 0x28b   : >> { %3190 = vrot.lane.b32.xlu1 %v3115_v59, %s13493_s6  ;;  %v3093_v54 = vshrl.u32 %v14694_v28, 16  ;;  %v3095_v29 = vshll.u32 %v14694_v28, 16  ;;  %v3100_v1 = vshll.u32 %v12971_v56, 16  ;;  %v3295_v6 = vsel %vm1300_vm2, %v3293_v14, %v3294_v26  ;;  %v2715_v52 = vld [vmem:[#allocation2 + $0xb0] sm:$0x1] }
 0x28c   : >> { %v3290_v8 = vrot.slane %v10486_v39, 1  ;;  %v2524_v47 = vrot.slane %v2522_v3, 7  ;;  %v2532_v44 = vrot.slane %v2530_v63, 7  ;;  %v3291_v16 = vrot.slane %v12971_v56, 1 }
 0x28d   : >> { %v3097_v2 = vrot.slane %v3095_v29, 1  ;;  %v3102_v19 = vrot.slane %v3100_v1, 1  ;;  %v11091_v46 = vpack.c.bf16 %v13363_v51, %v13363_v51  ;;  %v11092_v14 = vpack.c.bf16 %v13359_v23, %v13359_v23 }
 0x28e   : >> { %v2527_v32 = vor.u32 %v2525_v49, %v2524_v47  ;;  %v2528_v0 = vrot.slane %v2524_v47, 4  ;;  %v2535_v4 = vor.u32 %v2533_v38, %v2532_v44  ;;  %v2537_v7 = vrot.slane %v2532_v44, 4 }
 0x28f   : >> { %3334 = vrot.lane.b32.xlu1 %v3295_v6, %s13492_s25  ;;  %v3098_v59 = vor.u32 %v3097_v2, %v3093_v54  ;;  %v12974_v41 = vld [vmem:[#allocation2 + $0xbc] ss:$0 sps:$4 sm:$0x11]   ;;  %v2762_v26 = vld [vmem:[#allocation2 + $0xb4] sm:$0xf]  ;;  %v2556_v6 = vshrl.u32 %v11091_v46, 16  ;;  %v3292_v44 = vsel %vm1300_vm2, %v3290_v8, %v3291_v16 }
 0x290   : >> { %v2763_v39 = vld [vmem:[#allocation2 + $0xb8] sm:$0xf]  ;;  %v2536_v56 = vsel %vm13660_vm7, %v2528_v0, %v2535_v4  ;;  %v2712_v3 = vsel %vm13667_vm10, %v2527_v32, %v2711_v5  ;;  %v2801_v49 = vld [vmem:[#allocation2 + $0xb4] sm:$0xe]  ;;  %v3136_v29 = vshll.u32 %v12974_v41, 16  ;;  %v2716_v54 = vsel %vm13677_vm11, %v2537_v7, %v2715_v52 }
 0x291   : >> { %v3103_v63 = vsel %vm993_vm3, %v3098_v59, %v3102_v19  ;;  %v14711_v38 = vcombine.low %v2762_v26, %v2763_v39  ;;  %2713 = vst [vmem:[#allocation2 + $0xa8] sm:$0xf] %v2712_v3  ;;  %2714 = vst.msk [vmem:[#allocation2 + $0xac] sm:$0xf] %vm659_vm6, %v2536_v56  ;;  %v10489_v1 = vcombine.low %v2801_v49, %v2763_v39  ;;  %v2559_v47 = vshll.u32 %v11091_v46, 16 }
 0x292   : >> { %3188 = vrot.lane.b32.xlu0 %v3103_v63, %s13493_s6  ;;  %2717 = vst [vmem:[#allocation2 + $0xb0] sm:$0x1] %v2716_v54  ;;  %v2564_v5 = vshrl.u32 %v11092_v14, 16  ;;  %v2558_v32 = vrot.slane %v2556_v6, 7  ;;  %v2567_v0 = vshll.u32 %v11092_v14, 16  ;;  %v3138_v59 = vrot.slane %v3136_v29, 1 }
 0x293   : >> { %v3129_v2 = vshrl.u32 %v14711_v38, 16  ;;  %v3131_v19 = vshll.u32 %v14711_v38, 16  ;;  %v2725_v56 = vld [vmem:[#allocation2 + $0xc0] sm:$0xf]  ;;  %v3299_v7 = vrot.slane %v10489_v1, 1  ;;  %v3300_v52 = vrot.slane %v12974_v41, 1 }
 0x294   : >> { %v2566_v26 = vrot.slane %v2564_v5, 7  ;;  %v2561_v39 = vor.u32 %v2559_v47, %v2558_v32  ;;  %v2562_v3 = vrot.slane %v2558_v32, 4  ;;  %v2729_v16 = vld [vmem:[#allocation2 + $0xc8] sm:$0x1] }
 0x295   : >> { %v3133_v4 = vrot.slane %v3131_v19, 1  ;;  %v3301_v1 = vsel %vm1300_vm2, %v3299_v7, %v3300_v52 }
 0x296   : >> { %3332 = vrot.lane.b32.xlu0 %v3292_v44, %s13492_s25  ;;  %v2569_v49 = vor.u32 %v2567_v0, %v2566_v26  ;;  %v2571_v8 = vrot.slane %v2566_v26, 4  ;;  %v2726_v14 = vsel %vm13667_vm10, %v2561_v39, %v2725_v56  ;;  %v2766_v26 = vld [vmem:[#allocation2 + $0xcc] sm:$0xf]  ;;  %v2767_v56 = vld [vmem:[#allocation2 + $0xd0] sm:$0xf] }
 0x297   : >> { %v3134_v46 = vor.u32 %v3133_v4, %v3129_v2  ;;  %2727 = vst [vmem:[#allocation2 + $0xc0] sm:$0xf] %v2726_v14 }
 0x298   : >> { %v2760_v63 = vld [vmem:[#allocation2 + $0xa8] sm:$0xf]  ;;  %v2761_v54 = vld [vmem:[#allocation2 + $0xac] sm:$0xf]  ;;  %v2570_v41 = vsel %vm13660_vm7, %v2562_v3, %v2569_v49  ;;  %v2730_v47 = vsel %vm13677_vm11, %v2571_v8, %v2729_v16  ;;  %v14738_v3 = vcombine.low %v2766_v26, %v2767_v56 }
 0x299   : >> { %v2800_v23 = vld [vmem:[#allocation2 + $0xa8] sm:$0xe]  ;;  %v3139_v29 = vsel %vm993_vm3, %v3134_v46, %v3138_v59  ;;  %v14724_v6 = vcombine.low %v2760_v63, %v2761_v54  ;;  %v12976_v19 = vld [vmem:[#allocation2 + $0xb0] ss:$0 sps:$4 sm:$0x11]  }
 0x29a   : >> { %3194 = vrot.lane.b32.xlu1 %v3139_v29, %s13493_s6  ;;  %2728 = vst.msk [vmem:[#allocation2 + $0xc4] sm:$0xf] %vm659_vm6, %v2570_v41  ;;  %v3124_v5 = vshll.u32 %v12976_v19, 16  ;;  %v10488_v32 = vcombine.low %v2800_v23, %v2761_v54  ;;  %2731 = vst [vmem:[#allocation2 + $0xc8] sm:$0x1] %v2730_v47  ;;  %v3297_v49 = vrot.slane %v12976_v19, 1 }
 0x29b   : >> { %v3117_v44 = vshrl.u32 %v14724_v6, 16  ;;  %v3119_v2 = vshll.u32 %v14724_v6, 16  ;;  %v12989_v8 = vld [vmem:[#allocation2 + $0xd4] ss:$0 sps:$4 sm:$0x11]   ;;  %v3155_v16 = vshll.u32 %v14738_v3, 16 }
 0x29c   : >> { %v3309_v4 = vpop.permute.xlu1 %3308  ;;  %v3126_v52 = vrot.slane %v3124_v5, 1  ;;  %v3296_v23 = vrot.slane %v10488_v32, 1  ;;  %v3160_v19 = vshll.u32 %v12989_v8, 16  ;;  %v2803_v5 = vld [vmem:[#allocation2 + $0xcc] sm:$0xe] }
 0x29d   : >> { %v3121_v7 = vrot.slane %v3119_v2, 1  ;;  %v3157_v2 = vrot.slane %v3155_v16, 1 }
 0x29e   : >> { %3338 = vrot.lane.b32.xlu1 %v3301_v1, %s13492_s25  ;;  %v2764_v63 = vld [vmem:[#allocation2 + $0xc0] sm:$0xf]  ;;  %v3298_v1 = vsel %vm1300_vm2, %v3296_v23, %v3297_v49 }
 0x29f   : >> { %v3122_v46 = vor.u32 %v3121_v7, %v3117_v44  ;;  %v3153_v44 = vshrl.u32 %v14738_v3, 16  ;;  %v10491_v7 = vcombine.low %v2803_v5, %v2767_v56 }
 0x2a1   : >> { %v3127_v54 = vsel %vm993_vm3, %v3122_v46, %v3126_v52  ;;  %v2765_v14 = vld [vmem:[#allocation2 + $0xc4] sm:$0xf]  ;;  %v12983_v41 = vld [vmem:[#allocation2 + $0xc8] ss:$0 sps:$4 sm:$0x11]   ;;  %v3306_v52 = vrot.slane %v12989_v8, 1 }
 0x2a2   : >> { %v3165_v0 = vpop.permute.xlu0 %3164  ;;  %3192 = vrot.lane.b32.xlu0 %v3127_v54, %s13493_s6  ;;  %v14745_v29 = vcombine.low %v2764_v63, %v2765_v14  ;;  %v3303_v26 = vrot.slane %v12983_v41, 1  ;;  %v3305_v49 = vrot.slane %v10491_v7, 1  ;;  %v3158_v63 = vor.u32 %v3157_v2, %v3153_v44  ;;  %v13047_v2 = vld [vmem:[%s14449_s10 + $0x60] sm:$0xff]  }
 0x2a3   : >> { %v3345_v59 = vsel %vm1391_vm12, %v14418_v62, %v3165_v0  ;;  %v2802_v62 = vld [vmem:[#allocation2 + $0xc0] sm:$0xe] }
 0x2a4   : >> { %v3381_v39 = vsel %vm1428_vm13, %v3345_v59, %v3309_v4  ;;  %v10490_v47 = vcombine.low %v2802_v62, %v2765_v14  ;;  %v3141_v32 = vshrl.u32 %v14745_v29, 16  ;;  %v3143_v0 = vshll.u32 %v14745_v29, 16 }
 0x2a5   : >> { %11627 = vmatprep.mubr.msk.bf16.mxu0 %vm1483_vm14, %v3381_v39  ;;  %v3148_v4 = vshll.u32 %v12983_v41, 16  ;;  %v3162_v62 = vrot.slane %v3160_v19, 1  ;;  %v3307_v54 = vsel %vm1300_vm2, %v3305_v49, %v3306_v52  ;;  %v12986_v19 = vld [vmem:[%s14449_s10 + $0x70] sm:$0xff]  }
 0x2a6   : >> { %v3302_v59 = vrot.slane %v10490_v47, 1  ;;  %3336 = vrot.lane.b32.xlu0 %v3298_v1, %s13492_s25  ;;  %v3145_v39 = vrot.slane %v3143_v0, 1  ;;  %v12985_v1 = vld [vmem:[%s14449_s10 + $0x68] sm:$0xff]  }
 0x2a7   : >> { %v3150_v46 = vrot.slane %v3148_v4, 1  ;;  %v3163_v8 = vsel %vm993_vm3, %v3158_v63, %v3162_v62 }
 0x2a8   : >> { %v3304_v23 = vsel %vm1300_vm2, %v3302_v59, %v3303_v26  ;;  %v3146_v16 = vor.u32 %v3145_v39, %v3141_v32  ;;  %v14771_v32 = vld [vmem:[%s14449_s10 + $0x78] sm:$0xff]  }
 0x2a9   : >> { %3340 = vrot.lane.b32.xlu1 %v3304_v23, %s13492_s25 }
 0x2aa   : >> { %v3151_v56 = vsel %vm993_vm3, %v3146_v16, %v3150_v46 }
 0x2ab   : >> { %3196 = vrot.lane.b32.xlu0 %v3151_v56, %s13493_s6 }
 0x2ad   : >> { %3342 = vrot.lane.b32.xlu1 %v3307_v54, %s13492_s25 }
 0x2ae   : >> { %v3311_v41 = vpop.permute.xlu1 %3310 }
 0x2af   : >> { %3198 = vrot.lane.b32.xlu0 %v3163_v8, %s13493_s6 }
 0x2b2   : >> { %v3167_v14 = vpop.permute.xlu0 %3166 }
 0x2b3   : >> { %v3347_v47 = vsel %vm1391_vm12, %v14471_v37, %v3167_v14 }
 0x2b4   : >> { %v14763_v44 = vsel %vm1428_vm13, %v3347_v47, %v3311_v41 }
 0x2b5   : >> { %11628 = vmatmul.mubr.msk.bf16.vlgmr.msra.gmra.mrb[0].mxu0 %vm1483_vm14, %v14763_v44 }
 0x2b6   : >> { %11660 = vmatpush3.bf16.msra.mxu0 %v13047_v2  ;;  %v3171_v5 = vpop.permute.xlu1 %3170 }
 0x2b7   : >> { %11661 = vmatprep.subr.bf16.mxu0 %v12985_v1  ;;  %v3351_v37 = vsel %vm1391_vm12, %v14487_v10, %v3171_v5 }
 0x2ba   : >> { %11662 = vmatpush3.bf16.msra.mxu0 %v12985_v1  ;;  %v3315_v4 = vpop.permute.xlu1 %3314 }
 0x2bb   : >> { %11663 = vmatprep.subr.bf16.mxu0 %v12986_v19  ;;  %v14782_v52 = vsel %vm1428_vm13, %v3351_v37, %v3315_v4 }
 0x2bc   : >> { %v3169_v0 = vpop.permute.xlu0 %3168 }
 0x2bd   : >> { %v3349_v59 = vsel %vm1391_vm12, %v14503_v36, %v3169_v0 }
 0x2be   : >> { %11664 = vmatpush3.bf16.msra.mxu0 %v12986_v19 }
 0x2bf   : >> { %11697 = vmatprep.subr.bf16.mxu0 %v14771_v32 }
 0x2c0   : >> { %v3313_v26 = vpop.permute.xlu0 %3312 }
 0x2c1   : >> { %v14779_v7 = vsel %vm1428_vm13, %v3349_v59, %v3313_v26 }
 0x2c2   : >> { %11631 = vmatprep.mubr.msk.bf16.mxu0 %vm1483_vm14, %v14779_v7  ;;  %v3175_v10 = vpop.permute.xlu1 %3174 }
 0x2c3   : >> { %11632 = vmatmul.mubr.msk.bf16.gmra.mrb[4].mxu0 %vm1483_vm14, %v14782_v52  ;;  %v3355_v46 = vsel %vm1391_vm12, %v14524_v13, %v3175_v10 }
 0x2c6   : >> { %v3319_v23 = vpop.permute.xlu1 %3318 }
 0x2c7   : >> { %v14796_v63 = vsel %vm1428_vm13, %v3355_v46, %v3319_v23 }
 0x2ca   : >> { %v3173_v39 = vpop.permute.xlu0 %3172 }
 0x2cb   : >> { %v3353_v36 = vsel %vm1391_vm12, %v14543_v57, %v3173_v39 }
 0x2ce   : >> { %v3317_v49 = vpop.permute.xlu0 %3316 }
 0x2cf   : >> { %v14793_v16 = vsel %vm1428_vm13, %v3353_v36, %v3317_v49 }
 0x2d0   : >> { %11635 = vmatprep.mubr.msk.bf16.mxu0 %vm1483_vm14, %v14793_v16 }
 0x2d1   : >> { %11636 = vmatmul.mubr.msk.bf16.gmra.mrb[8].mxu0 %vm1483_vm14, %v14796_v63 }
 0x2d3   : >> { %v3179_v62 = vpop.permute.xlu1 %3178 }
 0x2d4   : >> { %v3359_v13 = vsel %vm1391_vm12, %v14563_v42, %v3179_v62 }
 0x2d7   : >> { %v3323_v56 = vpop.permute.xlu1 %3322 }
 0x2d8   : >> { %v3177_v54 = vpop.permute.xlu0 %3176  ;;  %v14810_v41 = vsel %vm1428_vm13, %v3359_v13, %v3323_v56 }
 0x2d9   : >> { %v3357_v57 = vsel %vm1391_vm12, %v14575_v22, %v3177_v54 }
 0x2dc   : >> { %v3321_v8 = vpop.permute.xlu0 %3320 }
 0x2dd   : >> { %v14807_v14 = vsel %vm1428_vm13, %v3357_v57, %v3321_v8 }
 0x2de   : >> { %11639 = vmatprep.mubr.msk.bf16.mxu0 %vm1483_vm14, %v14807_v14 }
 0x2df   : >> { %11640 = vmatmul.mubr.msk.bf16.gmra.mrb[12].mxu0 %vm1483_vm14, %v14810_v41 }
 0x2e1   : >> { %v3183_v47 = vpop.permute.xlu1 %3182 }
 0x2e2   : >> { %v3363_v42 = vsel %vm1391_vm12, %v14602_v48, %v3183_v47 }
 0x2e5   : >> { %v3327_v2 = vpop.permute.xlu1 %3326 }
 0x2e6   : >> { %v14824_v0 = vsel %vm1428_vm13, %v3363_v42, %v3327_v2  ;;  %v12991_v42 = vld [vmem:[%s14449_s10 + $0x80] sm:$0xff]  }
 0x2e9   : >> { %v3181_v1 = vpop.permute.xlu0 %3180 }
 0x2ea   : >> { %v3361_v22 = vsel %vm1391_vm12, %v14617_v50, %v3181_v1 }
 0x2ed   : >> { %v3325_v19 = vpop.permute.xlu0 %3324 }
 0x2ee   : >> { %v14821_v5 = vsel %vm1428_vm13, %v3361_v22, %v3325_v19  ;;  %v12994_v22 = vld [vmem:[#allocation2 + $0x8] ss:$0 sps:$4 sm:$0x11]  }
 0x2ef   : >> { %11643 = vmatprep.mubr.msk.bf16.mxu0 %vm1483_vm14, %v14821_v5  ;;  %v3187_v37 = vpop.permute.xlu1 %3186 }
 0x2f0   : >> { %11644 = vmatmul.mubr.msk.bf16.gmra.mrb[16].mxu0 %vm1483_vm14, %v14824_v0  ;;  %v3367_v48 = vsel %vm1391_vm12, %v14637_v12, %v3187_v37  ;;  %v4899_v37 = vshll.u32 %v12994_v22, 16 }
 0x2f3   : >> { %v3331_v59 = vpop.permute.xlu1 %3330 }
 0x2f4   : >> { %v3403_v39 = vsel %vm1428_vm13, %v3367_v48, %v3331_v59  ;;  %v4901_v48 = vrot.slane %v4899_v37, 1 }
 0x2f7   : >> { %v3185_v4 = vpop.permute.xlu0 %3184 }
 0x2f8   : >> { %v3365_v50 = vsel %vm1391_vm12, %v14657_v60, %v3185_v4 }
 0x2fb   : >> { %v3329_v26 = vpop.permute.xlu0 %3328 }
 0x2fc   : >> { %v3401_v10 = vsel %vm1428_vm13, %v3365_v50, %v3329_v26 }
 0x2fd   : >> { %11647 = vmatprep.mubr.msk.bf16.mxu0 %vm1483_vm14, %v3401_v10  ;;  %v3191_v46 = vpop.permute.xlu1 %3190 }
 0x2fe   : >> { %11648 = vmatmul.mubr.msk.bf16.gmra.mrb[20].mxu0 %vm1483_vm14, %v3403_v39  ;;  %v3371_v36 = vsel %vm1391_vm12, %v14672_v40, %v3191_v46  ;;  %v14927_v46 = vld [vmem:[%s14924_s11 + $0x1] ss:$0 sm:$0xff] }
 0x301   : >> { %v3335_v49 = vpop.permute.xlu1 %3334 }
 0x302   : >> { %v3407_v54 = vsel %vm1428_vm13, %v3371_v36, %v3335_v49 }
 0x304   : >> { %v3189_v23 = vpop.permute.xlu0 %3188 }
 0x305   : >> { %v3369_v12 = vsel %vm1391_vm12, %v14694_v28, %v3189_v23 }
 0x308   : >> { %v3333_v62 = vpop.permute.xlu0 %3332 }
 0x309   : >> { %v3405_v60 = vsel %vm1428_vm13, %v3369_v12, %v3333_v62 }
 0x30a   : >> { %11651 = vmatprep.mubr.msk.bf16.mxu0 %vm1483_vm14, %v3405_v60 }
 0x30b   : >> { %11652 = vmatmul.mubr.msk.bf16.gmra.mrb[24].mxu0 %vm1483_vm14, %v3407_v54 }
 0x30c   : >> { %v3195_v13 = vpop.permute.xlu1 %3194 }
 0x30d   : >> { %v3375_v40 = vsel %vm1391_vm12, %v14711_v38, %v3195_v13  ;;  %v12992_v38 = vld [vmem:[%s14449_s10 + $0x88] sm:$0xff]  }
 0x310   : >> { %v3339_v57 = vpop.permute.xlu1 %3338 }
 0x311   : >> { %v3411_v1 = vsel %vm1428_vm13, %v3375_v40, %v3339_v57 }
 0x314   : >> { %v3193_v56 = vpop.permute.xlu0 %3192 }
 0x315   : >> { %v3373_v28 = vsel %vm1391_vm12, %v14724_v6, %v3193_v56 }
 0x318   : >> { %v3337_v8 = vpop.permute.xlu0 %3336 }
 0x319   : >> { %v3409_v47 = vsel %vm1428_vm13, %v3373_v28, %v3337_v8 }
 0x31a   : >> { %11655 = vmatprep.mubr.msk.bf16.mxu0 %vm1483_vm14, %v3409_v47 }
 0x31b   : >> { %11656 = vmatmul.mubr.msk.bf16.gmra.mrb[28].mxu0 %vm1483_vm14, %v3411_v1 }
 0x31c   : >> { %11665 = vmatprep.mubr.msk.bf16.mxu0 %vm1483_vm14, %v14763_v44 }
 0x31d   : >> { %v3197_v6 = vpop.permute.xlu0 %3196 }
 0x31e   : >> { %v3377_v44 = vsel %vm1391_vm12, %v14745_v29, %v3197_v6 }
 0x321   : >> { %v3199_v29 = vpop.permute.xlu0 %3198 }
 0x323   : >> { %11666 = vmatmul.mubr.msk.bf16.vlgmr.msra.gmra.mrb[0].mxu0 %vm1483_vm14, %v14779_v7 }
 0x324   : >> { %11698 = vmatpush3.bf16.msra.mxu0 %v14771_v32  ;;  %11669 = vmatprep.mubr.msk.bf16.mxu0 %vm1483_vm14, %v14782_v52  ;;  %v3341_v32 = vpop.permute.xlu1 %3340 }
 0x325   : >> { %11699 = vmatprep.subr.bf16.mxu0 %v12991_v42  ;;  %v3413_v2 = vsel %vm1428_vm13, %v3377_v44, %v3341_v32 }
 0x328   : >> { %11700 = vmatpush3.bf16.msra.mxu0 %v12991_v42 }
 0x329   : >> { %11701 = vmatprep.subr.bf16.mxu0 %v12992_v38 }
 0x32b   : >> { %11670 = vmatmul.mubr.msk.bf16.gmra.mrb[4].mxu0 %vm1483_vm14, %v14793_v16 }
 0x32c   : >> { %11673 = vmatprep.mubr.msk.bf16.mxu0 %vm1483_vm14, %v14796_v63  ;;  %11702 = vmatpush3.bf16.msra.mxu0 %v12992_v38 }
 0x333   : >> { %11674 = vmatmul.mubr.msk.bf16.gmra.mrb[8].mxu0 %vm1483_vm14, %v14807_v14 }
 0x334   : >> { %11677 = vmatprep.mubr.msk.bf16.mxu0 %vm1483_vm14, %v14810_v41 }
 0x33b   : >> { %11678 = vmatmul.mubr.msk.bf16.gmra.mrb[12].mxu0 %vm1483_vm14, %v14821_v5 }
 0x33c   : >> { %11681 = vmatprep.mubr.msk.bf16.mxu0 %vm1483_vm14, %v14824_v0 }
 0x343   : >> { %11682 = vmatmul.mubr.msk.bf16.gmra.mrb[16].mxu0 %vm1483_vm14, %v3401_v10 }
 0x344   : >> { %11685 = vmatprep.mubr.msk.bf16.mxu0 %vm1483_vm14, %v3403_v39 }
 0x34b   : >> { %11686 = vmatmul.mubr.msk.bf16.gmra.mrb[20].mxu0 %vm1483_vm14, %v3405_v60 }
 0x34c   : >> { %11689 = vmatprep.mubr.msk.bf16.mxu0 %vm1483_vm14, %v3407_v54 }
 0x353   : >> { %11690 = vmatmul.mubr.msk.bf16.gmra.mrb[24].mxu0 %vm1483_vm14, %v3409_v47 }
 0x354   : >> { %11693 = vmatprep.mubr.msk.bf16.mxu0 %vm1483_vm14, %v3411_v1 }
 0x35b   : >> { %11694 = vmatmul.mubr.msk.bf16.gmra.mrb[28].mxu0 %vm1483_vm14, %v3413_v2 }
 0x35c   : >> { %11703 = vmatprep.mubr.msk.bf16.mxu0 %vm1483_vm14, %v14779_v7  ;;  %v3379_v7 = vsel %vm1391_vm12, %v14738_v3, %v3199_v29  ;;  %v4729_v3 = vld [vmem:[#allocation2] sm:$0xe] }
 0x363   : >> { %11704 = vmatmul.mubr.msk.bf16.vlgmr.msra.gmra.mrb[0].mxu0 %vm1483_vm14, %v14782_v52  ;;  %v3343_v52 = vpop.permute.xlu1 %3342 }
 0x364   : >> { %11707 = vmatprep.mubr.msk.bf16.mxu0 %vm1483_vm14, %v14793_v16  ;;  %v3415_v16 = vsel %vm1428_vm13, %v3379_v7, %v3343_v52 }
 0x36b   : >> { %11708 = vmatmul.mubr.msk.bf16.gmra.mrb[4].mxu0 %vm1483_vm14, %v14796_v63  ;;  %v4675_v63 = vld [vmem:[#allocation2] sm:$0xf] }
 0x36c   : >> { %11711 = vmatprep.mubr.msk.bf16.mxu0 %vm1483_vm14, %v14807_v14  ;;  %v4676_v14 = vld [vmem:[#allocation2 + $0x4] sm:$0xf] }
 0x36d   : >> { %v10640_v50 = vcombine.low %v4729_v3, %v4676_v14  ;;  %v4563_v3 = vld [vmem:[#allocation2 + $0xc] sm:$0xf] }
 0x36f   : >> { %v5197_v26 = vrot.slane %v10640_v50, 1 }
 0x373   : >> { %11712 = vmatmul.mubr.msk.bf16.gmra.mrb[8].mxu0 %vm1483_vm14, %v14810_v41  ;;  %v14912_v41 = vcombine.low %v4675_v63, %v4676_v14  ;;  %v4570_v14 = vld [vmem:[#allocation2 + $0x18] sm:$0xf] }
 0x374   : >> { %11715 = vmatprep.mubr.msk.bf16.mxu0 %vm1483_vm14, %v14821_v5 }
 0x375   : >> { %v4894_v19 = vshll.u32 %v14912_v41, 16  ;;  %v4892_v5 = vshrl.u32 %v14912_v41, 16 }
 0x37b   : >> { %11716 = vmatmul.mubr.msk.bf16.gmra.mrb[12].mxu0 %vm1483_vm14, %v14824_v0  ;;  %v4896_v0 = vrot.slane %v4894_v19, 1 }
 0x37c   : >> { %11719 = vmatprep.mubr.msk.bf16.mxu0 %vm1483_vm14, %v3401_v10  ;;  %v5198_v10 = vrot.slane %v12994_v22, 1 }
 0x37d   : >> { %v4897_v4 = vor.u32 %v4896_v0, %v4892_v5 }
 0x37f   : >> { %v4902_v59 = vsel %vm993_vm3, %v4897_v4, %v4901_v48 }
 0x380   : >> { %5107 = vrot.lane.b32.xlu0 %v4902_v59, %s13493_s6 }
 0x383   : >> { %11720 = vmatmul.mubr.msk.bf16.gmra.mrb[16].mxu0 %vm1483_vm14, %v3403_v39  ;;  %v5199_v39 = vsel %vm1300_vm2, %v5197_v26, %v5198_v10 }
 0x384   : >> { %11723 = vmatprep.mubr.msk.bf16.mxu0 %vm1483_vm14, %v3405_v60  ;;  %5251 = vrot.lane.b32.xlu0 %v5199_v39, %s13492_s25 }
 0x38b   : >> { %11724 = vmatmul.mubr.msk.bf16.gmra.mrb[20].mxu0 %vm1483_vm14, %v3407_v54 }
 0x38c   : >> { %11727 = vmatprep.mubr.msk.bf16.mxu0 %vm1483_vm14, %v3409_v47 }
 0x393   : >> { %11728 = vmatmul.mubr.msk.bf16.gmra.mrb[24].mxu0 %vm1483_vm14, %v3411_v1 }
 0x394   : >> { %11731 = vmatprep.mubr.msk.bf16.mxu0 %vm1483_vm14, %v3413_v2 }
 0x39b   : >> { %11732 = vmatmul.mubr.msk.bf16.gmra.mrb[28].mxu0 %vm1483_vm14, %v3415_v16 }
 0x436   : >> { %v11705_v23 = vpop.f32.mrb[0].mxu0 }
 0x437   : >> { %v12179_v36 = vadd.f32 %v11705_v23, %v14927_v46  ;;  %v3932_v49 = vpop.f32.mrb[1].mxu0  ;;  %v4574_v23 = vld [vmem:[#allocation2 + $0x20] sm:$0x1] }
 0x438   : >> { %v12180_v12 = vadd.f32 %v14927_v46, %v3932_v49  ;;  %v11706_v62 = vpop.f32.mrb[2].mxu0 }
 0x439   : >> { %v4093_v60 = vmax.f32 %v12179_v36, 0.0  ;;  %v12181_v54 = vadd.f32 %v11706_v62, %v14927_v46  ;;  %v3935_v13 = vpop.f32.mrb[3].mxu0 }
 0x43a   : >> { %v4091_v56 = vmax.f32 %v12180_v12, 0.0  ;;  %v12182_v40 = vadd.f32 %v14927_v46, %v3935_v13 }
 0x43b   : >> { %v11095_v57 = vpack.c.bf16 %v4093_v60, %v4093_v60  ;;  %v4094_v28 = vmax.f32 %v12181_v54, 0.0  ;;  %v4567_v54 = vld [vmem:[#allocation2 + $0x14] sm:$0x1] }
 0x43c   : >> { %v11093_v8 = vpack.c.bf16 %v4091_v56, %v4091_v56  ;;  %v4092_v47 = vmax.f32 %v12182_v40, 0.0 }
 0x43d   : >> { %v4261_v1 = vshrl.u32 %v11095_v57, 16  ;;  %v11096_v42 = vpack.c.bf16 %v4094_v28, %v4094_v28  ;;  %v4264_v38 = vshll.u32 %v11095_v57, 16 }
 0x43e   : >> { %v4244_v6 = vshrl.u32 %v11093_v8, 16  ;;  %v4247_v44 = vshll.u32 %v11093_v8, 16  ;;  %v11094_v32 = vpack.c.bf16 %v4092_v47, %v4092_v47  ;;  %v11709_v2 = vpop.f32.mrb[4].mxu0 }
 0x43f   : >> { %v4263_v29 = vrot.slane %v4261_v1, 7  ;;  %v4269_v7 = vshrl.u32 %v11096_v42, 16  ;;  %v4272_v52 = vshll.u32 %v11096_v42, 16  ;;  %v12183_v16 = vadd.f32 %v11709_v2, %v14927_v46  ;;  %v3948_v63 = vpop.f32.mrb[5].mxu0  ;;  %v13035_v2 = vld [vmem:[%s14449_s10 + $0x90] sm:$0xff]  }
 0x440   : >> { %v4246_v22 = vrot.slane %v4244_v6, 7  ;;  %v4252_v19 = vshrl.u32 %v11094_v32, 16  ;;  %v4255_v5 = vshll.u32 %v11094_v32, 16  ;;  %v12184_v0 = vadd.f32 %v14927_v46, %v3948_v63  ;;  %v11710_v37 = vpop.f32.mrb[6].mxu0  ;;  %11735 = vmatprep.subr.bf16.mxu1 %v13035_v2 }
 0x441   : >> { %v4266_v4 = vor.u32 %v4264_v38, %v4263_v29  ;;  %v4267_v48 = vrot.slane %v4263_v29, 4  ;;  %v4271_v59 = vrot.slane %v4269_v7, 7  ;;  %v4097_v50 = vmax.f32 %v12183_v16, 0.0  ;;  %v3951_v26 = vpop.f32.mrb[7].mxu0  ;;  %v13036_v29 = vld [vmem:[%s14449_s10 + $0x98] sm:$0xff]   ;;  %11736 = vmatpush3.bf16.msra.mxu1 %v13035_v2 }
 0x442   : >> { %v4249_v10 = vor.u32 %v4247_v44, %v4246_v22  ;;  %v4250_v39 = vrot.slane %v4246_v22, 4  ;;  %v4254_v36 = vrot.slane %v4252_v19, 7  ;;  %v4095_v49 = vmax.f32 %v12184_v0, 0.0  ;;  %v4584_v22 = vld [vmem:[#allocation2 + $0x30] sm:$0xf]  ;;  %11737 = vmatprep.subr.bf16.mxu1 %v13036_v29 }
 0x443   : >> { %v4571_v12 = vsel %vm13667_vm10, %v4266_v4, %v4570_v14  ;;  %v4274_v62 = vor.u32 %v4272_v52, %v4271_v59  ;;  %v4276_v60 = vrot.slane %v4271_v59, 4  ;;  %v11099_v13 = vpack.c.bf16 %v4097_v50, %v4097_v50  ;;  %v4577_v59 = vld [vmem:[#allocation2 + $0x24] sm:$0xf] }
 0x444   : >> { %4572 = vst [vmem:[#allocation2 + $0x18] sm:$0xf] %v4571_v12  ;;  %v4564_v56 = vsel %vm13667_vm10, %v4249_v10, %v4563_v3  ;;  %v4257_v40 = vor.u32 %v4255_v5, %v4254_v36  ;;  %v4259_v57 = vrot.slane %v4254_v36, 4  ;;  %v11097_v28 = vpack.c.bf16 %v4095_v49, %v4095_v49 }
 0x445   : >> { %4565 = vst [vmem:[#allocation2 + $0xc] sm:$0xf] %v4564_v56  ;;  %v4275_v8 = vsel %vm13660_vm7, %v4267_v48, %v4274_v62  ;;  %v4575_v47 = vsel %vm13677_vm11, %v4276_v60, %v4574_v23  ;;  %v4295_v1 = vshrl.u32 %v11099_v13, 16  ;;  %v4298_v6 = vshll.u32 %v11099_v13, 16  ;;  %11738 = vmatpush3.bf16.msra.mxu1 %v13036_v29 }
 0x446   : >> { %4573 = vst.msk [vmem:[#allocation2 + $0x1c] sm:$0xf] %vm659_vm6, %v4275_v8  ;;  %4576 = vst [vmem:[#allocation2 + $0x20] sm:$0x1] %v4575_v47  ;;  %v4258_v42 = vsel %vm13660_vm7, %v4250_v39, %v4257_v40  ;;  %v4568_v38 = vsel %vm13677_vm11, %v4259_v57, %v4567_v54  ;;  %v4278_v44 = vshrl.u32 %v11097_v28, 16  ;;  %v11713_v32 = vpop.f32.mrb[8].mxu0  ;;  %v12185_v52 = vadd.f32 %v11710_v37, %v14927_v46 }
 0x447   : >> { %4566 = vst.msk [vmem:[#allocation2 + $0x10] sm:$0xf] %vm659_vm6, %v4258_v42  ;;  %4569 = vst [vmem:[#allocation2 + $0x14] sm:$0x1] %v4568_v38  ;;  %v14951_v7 = vrot.slane %v4295_v1, 7  ;;  %v12186_v16 = vadd.f32 %v14927_v46, %v3951_v26  ;;  %v12187_v63 = vadd.f32 %v11713_v32, %v14927_v46  ;;  %v3964_v14 = vpop.f32.mrb[9].mxu0 }
 0x448   : >> { %v14956_v19 = vrot.slane %v4278_v44, 7  ;;  %v4281_v5 = vshll.u32 %v11097_v28, 16  ;;  %v12188_v0 = vadd.f32 %v14927_v46, %v3964_v14  ;;  %v11714_v4 = vpop.f32.mrb[10].mxu0  ;;  %v4098_v50 = vmax.f32 %v12185_v52, 0.0  ;;  %v4588_v1 = vld [vmem:[#allocation2 + $0x38] sm:$0x1] }
 0x449   : >> { %v4300_v48 = vor.u32 %v4298_v6, %v14951_v7  ;;  %v4301_v3 = vrot.slane %v14951_v7, 4  ;;  %v4096_v37 = vmax.f32 %v12186_v16, 0.0  ;;  %v3967_v10 = vpop.f32.mrb[11].mxu0  ;;  %v4101_v23 = vmax.f32 %v12187_v63, 0.0  ;;  %v4581_v42 = vld [vmem:[#allocation2 + $0x2c] sm:$0x1] }
 0x44a   : >> { %v4283_v26 = vor.u32 %v4281_v5, %v14956_v19  ;;  %v4284_v39 = vrot.slane %v14956_v19, 4  ;;  %v4099_v36 = vmax.f32 %v12188_v0, 0.0  ;;  %v11100_v12 = vpack.c.bf16 %v4098_v50, %v4098_v50  ;;  %v4598_v16 = vld [vmem:[#allocation2 + $0x48] sm:$0xf] }
 0x44b   : >> { %v4585_v49 = vsel %vm13667_vm10, %v4300_v48, %v4584_v22  ;;  %v11098_v62 = vpack.c.bf16 %v4096_v37, %v4096_v37  ;;  %v12189_v60 = vadd.f32 %v11714_v4, %v14927_v46  ;;  %v11103_v13 = vpack.c.bf16 %v4101_v23, %v4101_v23 }
 0x44c   : >> { %4586 = vst [vmem:[#allocation2 + $0x30] sm:$0xf] %v4585_v49  ;;  %v4578_v54 = vsel %vm13667_vm10, %v4283_v26, %v4577_v59  ;;  %v11101_v56 = vpack.c.bf16 %v4099_v36, %v4099_v36  ;;  %v12190_v40 = vadd.f32 %v14927_v46, %v3967_v10  ;;  %v4303_v57 = vshrl.u32 %v11100_v12, 16  ;;  %v4591_v10 = vld [vmem:[#allocation2 + $0x3c] sm:$0xf] }
 0x44d   : >> { %4579 = vst [vmem:[#allocation2 + $0x24] sm:$0xf] %v4578_v54  ;;  %v4306_v28 = vshll.u32 %v11100_v12, 16  ;;  %v4286_v8 = vshrl.u32 %v11098_v62, 16  ;;  %v4289_v47 = vshll.u32 %v11098_v62, 16  ;;  %v4329_v38 = vshrl.u32 %v11103_v13, 16 }
 0x44e   : >> { %v4332_v6 = vshll.u32 %v11103_v13, 16  ;;  %v4312_v44 = vshrl.u32 %v11101_v56, 16  ;;  %v4315_v32 = vshll.u32 %v11101_v56, 16  ;;  %v11717_v2 = vpop.f32.mrb[12].mxu0  ;;  %v4305_v7 = vrot.slane %v4303_v57, 7 }
 0x44f   : >> { %v4288_v52 = vrot.slane %v4286_v8, 7  ;;  %v4102_v63 = vmax.f32 %v12189_v60, 0.0  ;;  %v4100_v14 = vmax.f32 %v12190_v40, 0.0  ;;  %v3980_v22 = vpop.f32.mrb[13].mxu0  ;;  %v14969_v19 = vrot.slane %v4329_v38, 7 }
 0x450   : >> { %v14971_v5 = vrot.slane %v4312_v44, 7  ;;  %v12191_v0 = vadd.f32 %v11717_v2, %v14927_v46  ;;  %v12192_v29 = vadd.f32 %v14927_v46, %v3980_v22  ;;  %v11718_v4 = vpop.f32.mrb[14].mxu0  ;;  %v4308_v48 = vor.u32 %v4306_v28, %v4305_v7  ;;  %v4602_v2 = vld [vmem:[#allocation2 + $0x50] sm:$0x1] }
 0x451   : >> { %v4310_v59 = vrot.slane %v4305_v7, 4  ;;  %v4291_v50 = vor.u32 %v4289_v47, %v4288_v52  ;;  %v4293_v37 = vrot.slane %v4288_v52, 4  ;;  %v3983_v26 = vpop.f32.mrb[15].mxu0  ;;  %v4334_v23 = vor.u32 %v4332_v6, %v14969_v19 }
 0x452   : >> { %v4335_v36 = vrot.slane %v14969_v19, 4  ;;  %v4317_v49 = vor.u32 %v4315_v32, %v14971_v5  ;;  %v4318_v12 = vrot.slane %v14971_v5, 4  ;;  %v4309_v62 = vsel %vm13660_vm7, %v4301_v3, %v4308_v48 }
 0x453   : >> { %v4589_v60 = vsel %vm13677_vm11, %v4310_v59, %v4588_v1  ;;  %v4292_v54 = vsel %vm13660_vm7, %v4284_v39, %v4291_v50  ;;  %v4582_v13 = vsel %vm13677_vm11, %v4293_v37, %v4581_v42  ;;  %4587 = vst.msk [vmem:[#allocation2 + $0x34] sm:$0xf] %vm659_vm6, %v4309_v62  ;;  %v4599_v56 = vsel %vm13667_vm10, %v4334_v23, %v4598_v16  ;;  %v14995_v1 = vld [vmem:[#allocation2 + $0x1c] sm:$0xf] }
 0x454   : >> { %4590 = vst [vmem:[#allocation2 + $0x38] sm:$0x1] %v4589_v60  ;;  %4580 = vst.msk [vmem:[#allocation2 + $0x28] sm:$0xf] %vm659_vm6, %v4292_v54  ;;  %v4592_v3 = vsel %vm13667_vm10, %v4317_v49, %v4591_v10  ;;  %v11104_v40 = vpack.c.bf16 %v4102_v63, %v4102_v63  ;;  %v11102_v57 = vpack.c.bf16 %v4100_v14, %v4100_v14  ;;  %v4105_v39 = vmax.f32 %v12191_v0, 0.0 }
 0x455   : >> { %4583 = vst [vmem:[#allocation2 + $0x2c] sm:$0x1] %v4582_v13  ;;  %4600 = vst [vmem:[#allocation2 + $0x48] sm:$0xf] %v4599_v56  ;;  %v4103_v28 = vmax.f32 %v12192_v29, 0.0  ;;  %v12193_v8 = vadd.f32 %v11718_v4, %v14927_v46  ;;  %v12194_v47 = vadd.f32 %v14927_v46, %v3983_v26 }
 0x456   : >> { %4593 = vst [vmem:[#allocation2 + $0x3c] sm:$0xf] %v4592_v3  ;;  %v4337_v42 = vshrl.u32 %v11104_v40, 16  ;;  %v4340_v38 = vshll.u32 %v11104_v40, 16  ;;  %v4320_v6 = vshrl.u32 %v11102_v57, 16  ;;  %v4323_v44 = vshll.u32 %v11102_v57, 16 }
 0x457   : >> { %v11721_v32 = vpop.f32.mrb[16].mxu0  ;;  %v11107_v7 = vpack.c.bf16 %v4105_v39, %v4105_v39  ;;  %v11105_v52 = vpack.c.bf16 %v4103_v28, %v4103_v28  ;;  %v4106_v16 = vmax.f32 %v12193_v8, 0.0  ;;  %v4104_v63 = vmax.f32 %v12194_v47, 0.0  ;;  %v4679_v14 = vld [vmem:[#allocation2 + $0x18] sm:$0xf] }
 0x458   : >> { %v3996_v22 = vpop.f32.mrb[17].mxu0  ;;  %v4339_v19 = vrot.slane %v4337_v42, 7  ;;  %v4322_v5 = vrot.slane %v4320_v6, 7  ;;  %v4595_v0 = vld [vmem:[#allocation2 + $0x44] sm:$0x1]  ;;  %v12195_v29 = vadd.f32 %v11721_v32, %v14927_v46  ;;  %v14999_v4 = vcombine.low %v4679_v14, %v14995_v1 }
 0x459   : >> { %v15001_v48 = vpop.f32.mrb[18].mxu0  ;;  %v4363_v59 = vshrl.u32 %v11107_v7, 16  ;;  %v4366_v50 = vshll.u32 %v11107_v7, 16  ;;  %v4346_v37 = vshrl.u32 %v11105_v52, 16  ;;  %v4349_v10 = vshll.u32 %v11105_v52, 16 }
 0x45a   : >> { %v15003_v26 = vpop.f32.mrb[19].mxu0  ;;  %v4342_v23 = vor.u32 %v4340_v38, %v4339_v19  ;;  %v4344_v49 = vrot.slane %v4339_v19, 4  ;;  %v4325_v62 = vor.u32 %v4323_v44, %v4322_v5  ;;  %v4327_v60 = vrot.slane %v4322_v5, 4  ;;  %v4612_v54 = vld [vmem:[#allocation2 + $0x60] sm:$0xf] }
 0x45b   : >> { %v4365_v13 = vrot.slane %v4363_v59, 7  ;;  %v4348_v56 = vrot.slane %v4346_v37, 7  ;;  %v4605_v3 = vld [vmem:[#allocation2 + $0x54] sm:$0xf]  ;;  %v11108_v40 = vpack.c.bf16 %v4106_v16, %v4106_v16  ;;  %v11106_v57 = vpack.c.bf16 %v4104_v63, %v4104_v63  ;;  %v4677_v59 = vld [vmem:[#allocation2 + $0xc] sm:$0xf] }
 0x45c   : >> { %v4343_v39 = vsel %vm13660_vm7, %v4335_v36, %v4342_v23  ;;  %v4603_v28 = vsel %vm13677_vm11, %v4344_v49, %v4602_v2  ;;  %v4326_v8 = vsel %vm13660_vm7, %v4318_v12, %v4325_v62  ;;  %v4596_v47 = vsel %vm13677_vm11, %v4327_v60, %v4595_v0  ;;  %v15013_v42 = vld [vmem:[#allocation2 + $0x20] ss:$0 sps:$4 sm:$0x11]   ;;  %v15015_v38 = vld [vmem:[#allocation2 + $0x14] ss:$0 sps:$4 sm:$0x11]  }
 0x45d   : >> { %4601 = vst.msk [vmem:[#allocation2 + $0x4c] sm:$0xf] %vm659_vm6, %v4343_v39  ;;  %4604 = vst [vmem:[#allocation2 + $0x50] sm:$0x1] %v4603_v28  ;;  %v4368_v36 = vor.u32 %v4366_v50, %v4365_v13  ;;  %v4369_v6 = vrot.slane %v4365_v13, 4  ;;  %v4351_v44 = vor.u32 %v4349_v10, %v4348_v56  ;;  %v4352_v32 = vrot.slane %v4348_v56, 4 }
 0x45e   : >> { %4594 = vst.msk [vmem:[#allocation2 + $0x40] sm:$0xf] %vm659_vm6, %v4326_v8  ;;  %4597 = vst [vmem:[#allocation2 + $0x44] sm:$0x1] %v4596_v47  ;;  %v15019_v2 = vld [vmem:[#allocation2 + $0x10] sm:$0xf] }
 0x45f   : >> { %v4371_v12 = vshrl.u32 %v11108_v40, 16  ;;  %v4374_v7 = vshll.u32 %v11108_v40, 16  ;;  %v4354_v52 = vshrl.u32 %v11106_v57, 16  ;;  %v4357_v16 = vshll.u32 %v11106_v57, 16  ;;  %v15021_v63 = vpop.f32.mrb[20].mxu0  ;;  %v13037_v60 = vld [vmem:[%s14449_s10 + $0xa0] sm:$0xff]  }
 0x460   : >> { %v4613_v14 = vsel %vm13667_vm10, %v4368_v36, %v4612_v54  ;;  %v4606_v19 = vsel %vm13667_vm10, %v4351_v44, %v4605_v3  ;;  %v4109_v5 = vmax.f32 %v12195_v29, 0.0  ;;  %v4916_v0 = vshrl.u32 %v14999_v4, 16  ;;  %v15028_v50 = vpop.f32.mrb[21].mxu0  ;;  %v4616_v54 = vld [vmem:[#allocation2 + $0x68] sm:$0x1]  ;;  %11739 = vmatprep.subr.bf16.mxu1 %v13037_v60 }
 0x461   : >> { %4614 = vst [vmem:[#allocation2 + $0x60] sm:$0xf] %v4613_v14  ;;  %4607 = vst [vmem:[#allocation2 + $0x54] sm:$0xf] %v4606_v19  ;;  %v4373_v37 = vrot.slane %v4371_v12, 7  ;;  %v4356_v10 = vrot.slane %v4354_v52, 7  ;;  %v12196_v29 = vadd.f32 %v14927_v46, %v3996_v22  ;;  %v15037_v3 = vcombine.low %v4677_v59, %v15019_v2  ;;  %11740 = vmatpush3.bf16.msra.mxu1 %v13037_v60 }
 0x462   : >> { %v4918_v23 = vshll.u32 %v14999_v4, 16  ;;  %v4923_v49 = vshll.u32 %v15013_v42, 16  ;;  %v15032_v62 = vpop.f32.mrb[22].mxu0  ;;  %v4609_v13 = vld [vmem:[#allocation2 + $0x5c] sm:$0x1]  ;;  %v11111_v56 = vpack.c.bf16 %v4109_v5, %v4109_v5  ;;  %v4911_v40 = vshll.u32 %v15015_v38, 16 }
 0x463   : >> { %v15040_v57 = vpop.f32.mrb[23].mxu0  ;;  %v4376_v39 = vor.u32 %v4374_v7, %v4373_v37  ;;  %v4378_v28 = vrot.slane %v4373_v37, 4  ;;  %v4359_v8 = vor.u32 %v4357_v16, %v4356_v10  ;;  %v4361_v47 = vrot.slane %v4356_v10, 4  ;;  %v4626_v5 = vld [vmem:[#allocation2 + $0x78] sm:$0xf] }
 0x464   : >> { %v4397_v36 = vshrl.u32 %v11111_v56, 16  ;;  %v4400_v44 = vshll.u32 %v11111_v56, 16  ;;  %v4920_v12 = vrot.slane %v4918_v23, 1  ;;  %v4925_v52 = vrot.slane %v4923_v49, 1 }
 0x465   : >> { %v4377_v22 = vsel %vm13660_vm7, %v4369_v6, %v4376_v39  ;;  %v4617_v14 = vsel %vm13677_vm11, %v4378_v28, %v4616_v54  ;;  %v4360_v19 = vsel %vm13660_vm7, %v4352_v32, %v4359_v8  ;;  %v4610_v7 = vsel %vm13677_vm11, %v4361_v47, %v4609_v13  ;;  %v15063_v54 = vld [vmem:[%s14449_s10 + $0xa8] sm:$0xff]   ;;  %v4731_v39 = vld [vmem:[#allocation2 + $0x18] sm:$0xe] }
 0x466   : >> { %4615 = vst.msk [vmem:[#allocation2 + $0x64] sm:$0xf] %vm659_vm6, %v4377_v22  ;;  %4618 = vst [vmem:[#allocation2 + $0x68] sm:$0x1] %v4617_v14  ;;  %v15052_v16 = vrot.slane %v4397_v36, 7  ;;  %v4921_v6 = vor.u32 %v4920_v12, %v4916_v0  ;;  %v4107_v59 = vmax.f32 %v12196_v29, 0.0  ;;  %v12197_v23 = vadd.f32 %v15001_v48, %v14927_v46  ;;  %11773 = vmatprep.subr.bf16.mxu1 %v15063_v54 }
 0x467   : >> { %4608 = vst.msk [vmem:[#allocation2 + $0x58] sm:$0xf] %vm659_vm6, %v4360_v19  ;;  %4611 = vst [vmem:[#allocation2 + $0x5c] sm:$0x1] %v4610_v7  ;;  %v4904_v37 = vshrl.u32 %v15037_v3, 16  ;;  %v4906_v10 = vshll.u32 %v15037_v3, 16  ;;  %v12198_v49 = vadd.f32 %v14927_v46, %v15003_v26  ;;  %v10642_v26 = vcombine.low %v4731_v39, %v14995_v1 }
 0x468   : >> { %v4913_v32 = vrot.slane %v4911_v40, 1  ;;  %v15060_v60 = vpop.f32.mrb[24].mxu0  ;;  %v4402_v13 = vor.u32 %v4400_v44, %v15052_v16  ;;  %v4926_v56 = vsel %vm993_vm3, %v4921_v6, %v4925_v52  ;;  %v11109_v29 = vpack.c.bf16 %v4107_v59, %v4107_v59  ;;  %v4619_v14 = vld [vmem:[#allocation2 + $0x6c] sm:$0xf]  ;;  %v15111_v0 = vld [vmem:[#allocation2 + $0x28] sm:$0xf] }
 0x469   : >> { %v15068_v28 = vpop.f32.mrb[25].mxu0  ;;  %5111 = vrot.lane.b32.xlu0 %v4926_v56, %s13493_s6  ;;  %v4908_v48 = vrot.slane %v4906_v10, 1  ;;  %v4110_v40 = vmax.f32 %v12197_v23, 0.0  ;;  %v4108_v8 = vmax.f32 %v12198_v49, 0.0  ;;  %v5204_v52 = vrot.slane %v15013_v42, 1 }
 0x46a   : >> { %v15072_v47 = vpop.f32.mrb[26].mxu0  ;;  %v4627_v36 = vsel %vm13667_vm10, %v4402_v13, %v4626_v5  ;;  %v4380_v44 = vshrl.u32 %v11109_v29, 16  ;;  %v4383_v12 = vshll.u32 %v11109_v29, 16  ;;  %v5203_v59 = vrot.slane %v10642_v26, 1  ;;  %v4730_v1 = vld [vmem:[#allocation2 + $0xc] sm:$0xe] }
 0x46b   : >> { %v15078_v22 = vpop.f32.mrb[27].mxu0  ;;  %4628 = vst [vmem:[#allocation2 + $0x78] sm:$0xf] %v4627_v36  ;;  %v4909_v19 = vor.u32 %v4908_v48, %v4904_v37  ;;  %v11112_v7 = vpack.c.bf16 %v4110_v40, %v4110_v40  ;;  %v11110_v6 = vpack.c.bf16 %v4108_v8, %v4108_v8  ;;  %v10641_v23 = vcombine.low %v4730_v1, %v15019_v2  ;;  %v15084_v13 = vld [vmem:[#allocation2 + $0x38] ss:$0 sps:$4 sm:$0x11]  }
 0x46c   : >> { %v4382_v10 = vrot.slane %v4380_v44, 7  ;;  %v5201_v49 = vrot.slane %v15015_v38, 1  ;;  %v12199_v5 = vadd.f32 %v15021_v63, %v14927_v46  ;;  %v15087_v37 = vld [vmem:[#allocation2 + $0x34] sm:$0xf]  ;;  %v4630_v8 = vld [vmem:[#allocation2 + $0x80] sm:$0x1]  ;;  %v5205_v38 = vsel %vm1300_vm2, %v5203_v59, %v5204_v52 }
 0x46d   : >> { %v4914_v42 = vsel %vm993_vm3, %v4909_v19, %v4913_v32  ;;  %v4405_v56 = vshrl.u32 %v11112_v7, 16  ;;  %v4408_v29 = vshll.u32 %v11112_v7, 16  ;;  %v4388_v39 = vshrl.u32 %v11110_v6, 16  ;;  %v4623_v26 = vld [vmem:[#allocation2 + $0x74] sm:$0x1]  ;;  %5255 = vrot.lane.b32.xlu0 %v5205_v38, %s13492_s25 }
 0x46e   : >> { %v4385_v48 = vor.u32 %v4383_v12, %v4382_v10  ;;  %v4386_v40 = vrot.slane %v4382_v10, 4  ;;  %5109 = vrot.lane.b32.xlu1 %v4914_v42, %s13493_s6  ;;  %v4391_v2 = vshll.u32 %v11110_v6, 16  ;;  %v4683_v36 = vld [vmem:[#allocation2 + $0x30] sm:$0xf]  ;;  %v5200_v32 = vrot.slane %v10641_v23, 1  ;;  %v15092_v7 = vpop.f32.mrb[28].mxu0 }
 0x46f   : >> { %v4407_v63 = vrot.slane %v4405_v56, 7  ;;  %v4390_v44 = vrot.slane %v4388_v39, 7  ;;  %v4113_v19 = vmax.f32 %v12199_v5, 0.0  ;;  %v15097_v1 = vcombine.low %v4683_v36, %v15087_v37  ;;  %v15102_v59 = vld [vmem:[#allocation2 + $0x2c] ss:$0 sps:$4 sm:$0x11]  }
 0x470   : >> { %v4620_v12 = vsel %vm13667_vm10, %v4385_v48, %v4619_v14  ;;  %v4947_v6 = vshll.u32 %v15084_v13, 16  ;;  %v12200_v52 = vadd.f32 %v14927_v46, %v15028_v50  ;;  %v15104_v10 = vpop.f32.mrb[29].mxu0  ;;  %v5202_v14 = vsel %vm1300_vm2, %v5200_v32, %v5201_v49 }
 0x471   : >> { %4621 = vst [vmem:[#allocation2 + $0x6c] sm:$0xf] %v4620_v12  ;;  %v4410_v23 = vor.u32 %v4408_v29, %v4407_v63  ;;  %v4412_v5 = vrot.slane %v4407_v63, 4  ;;  %v4393_v42 = vor.u32 %v4391_v2, %v4390_v44  ;;  %v4395_v56 = vrot.slane %v4390_v44, 4  ;;  %v15106_v39 = vpop.f32.mrb[30].mxu0 }
 0x472   : >> { %v11115_v48 = vpack.c.bf16 %v4113_v19, %v4113_v19  ;;  %v4940_v38 = vshrl.u32 %v15097_v1, 16  ;;  %v4942_v36 = vshll.u32 %v15097_v1, 16  ;;  %v15113_v50 = vpop.f32.mrb[31].mxu0  ;;  %v17361_v51 = vrot.slane %v15052_v16, 4  ;;  %5253 = vrot.lane.b32.xlu1 %v5202_v14, %s13492_s25  ;;  %v4681_v19 = vld [vmem:[#allocation2 + $0x24] sm:$0xf] }
 0x473   : >> { %v4631_v2 = vsel %vm13677_vm11, %v4412_v5, %v4630_v8  ;;  %v4394_v49 = vsel %vm13660_vm7, %v4386_v40, %v4393_v42  ;;  %v4624_v63 = vsel %vm13677_vm11, %v4395_v56, %v4623_v26  ;;  %v4949_v32 = vrot.slane %v4947_v6, 1  ;;  %v4640_v6 = vld [vmem:[#allocation2 + $0x90] sm:$0xf] }
 0x474   : >> { %v4411_v29 = vsel %vm13660_vm7, %v17361_v51, %v4410_v23  ;;  %4632 = vst [vmem:[#allocation2 + $0x80] sm:$0x1] %v4631_v2  ;;  %4622 = vst.msk [vmem:[#allocation2 + $0x70] sm:$0xf] %vm659_vm6, %v4394_v49  ;;  %v4431_v16 = vshrl.u32 %v11115_v48, 16  ;;  %v4434_v44 = vshll.u32 %v11115_v48, 16  ;;  %v15129_v12 = vcombine.low %v4681_v19, %v15111_v0 }
 0x475   : >> { %4629 = vst.msk [vmem:[#allocation2 + $0x7c] sm:$0xf] %vm659_vm6, %v4411_v29  ;;  %4625 = vst [vmem:[#allocation2 + $0x74] sm:$0x1] %v4624_v63  ;;  %v4944_v51 = vrot.slane %v4942_v36, 1  ;;  %v4111_v8 = vmax.f32 %v12200_v52, 0.0  ;;  %v12201_v26 = vadd.f32 %v15032_v62, %v14927_v46  ;;  %v12202_v56 = vadd.f32 %v14927_v46, %v15040_v57 }
 0x476   : >> { %v4935_v40 = vshll.u32 %v15102_v59, 16  ;;  %v4733_v23 = vld [vmem:[#allocation2 + $0x30] sm:$0xe]  ;;  %v15134_v5 = vrot.slane %v4431_v16, 7  ;;  %v4928_v52 = vshrl.u32 %v15129_v12, 16  ;;  %v4930_v36 = vshll.u32 %v15129_v12, 16 }
 0x477   : >> { %v4945_v42 = vor.u32 %v4944_v51, %v4940_v38  ;;  %v10644_v14 = vcombine.low %v4733_v23, %v15087_v37  ;;  %v11113_v48 = vpack.c.bf16 %v4111_v8, %v4111_v8  ;;  %v4114_v63 = vmax.f32 %v12201_v26, 0.0  ;;  %v4633_v19 = vld [vmem:[#allocation2 + $0x84] sm:$0xf] }
 0x478   : >> { %v4937_v29 = vrot.slane %v4935_v40, 1  ;;  %v4436_v2 = vor.u32 %v4434_v44, %v15134_v5  ;;  %v4437_v62 = vrot.slane %v15134_v5, 4  ;;  %v4932_v16 = vrot.slane %v4930_v36, 1  ;;  %v4732_v44 = vld [vmem:[#allocation2 + $0x24] sm:$0xe] }
 0x479   : >> { %v4950_v49 = vsel %vm993_vm3, %v4945_v42, %v4949_v32  ;;  %v4414_v38 = vshrl.u32 %v11113_v48, 16  ;;  %v4417_v57 = vshll.u32 %v11113_v48, 16  ;;  %v4112_v37 = vmax.f32 %v12202_v56, 0.0  ;;  %v15149_v42 = vld [vmem:[#allocation2 + $0x50] ss:$0 sps:$4 sm:$0x11]  }
 0x47a   : >> { %5115 = vrot.lane.b32.xlu0 %v4950_v49, %s13493_s6  ;;  %v4641_v51 = vsel %vm13667_vm10, %v4436_v2, %v4640_v6  ;;  %v11116_v8 = vpack.c.bf16 %v4114_v63, %v4114_v63  ;;  %v5209_v23 = vrot.slane %v10644_v14, 1  ;;  %v5210_v40 = vrot.slane %v15084_v13, 1  ;;  %v15153_v2 = vld [vmem:[#allocation2 + $0x4c] sm:$0xf] }
 0x47b   : >> { %4642 = vst [vmem:[#allocation2 + $0x90] sm:$0xf] %v4641_v51  ;;  %v4416_v5 = vrot.slane %v4414_v38, 7  ;;  %v4933_v21 = vor.u32 %v4932_v16, %v4928_v52  ;;  %v11114_v32 = vpack.c.bf16 %v4112_v37, %v4112_v37  ;;  %v10643_v26 = vcombine.low %v4732_v44, %v15111_v0  ;;  %v4687_v37 = vld [vmem:[#allocation2 + $0x48] sm:$0xf] }
 0x47c   : >> { %v4439_v48 = vshrl.u32 %v11116_v8, 16  ;;  %v4442_v36 = vshll.u32 %v11116_v8, 16  ;;  %v5211_v56 = vsel %vm1300_vm2, %v5209_v23, %v5210_v40  ;;  %v5207_v6 = vrot.slane %v15102_v59, 1  ;;  %v4644_v51 = vld [vmem:[#allocation2 + $0x98] sm:$0x1] }
 0x47d   : >> { %v4419_v14 = vor.u32 %v4417_v57, %v4416_v5  ;;  %v4420_v49 = vrot.slane %v4416_v5, 4  ;;  %v4938_v13 = vsel %vm993_vm3, %v4933_v21, %v4937_v29  ;;  %v4422_v63 = vshrl.u32 %v11114_v32, 16  ;;  %v4637_v8 = vld [vmem:[#allocation2 + $0x8c] sm:$0x1] }
 0x47e   : >> { %5259 = vrot.lane.b32.xlu0 %v5211_v56, %s13492_s25  ;;  %5113 = vrot.lane.b32.xlu1 %v4938_v13, %s13493_s6  ;;  %v4441_v0 = vrot.slane %v4439_v48, 7  ;;  %v4425_v52 = vshll.u32 %v11114_v32, 16  ;;  %v5206_v38 = vrot.slane %v10643_v26, 1  ;;  %v12203_v16 = vadd.f32 %v15060_v60, %v14927_v46  ;;  %v15167_v32 = vld [vmem:[#allocation2 + $0x44] ss:$0 sps:$4 sm:$0x11]  }
 0x47f   : >> { %v4634_v59 = vsel %vm13667_vm10, %v4419_v14, %v4633_v19  ;;  %v4424_v57 = vrot.slane %v4422_v63, 7  ;;  %v15163_v21 = vcombine.low %v4687_v37, %v15153_v2  ;;  %v4971_v29 = vshll.u32 %v15149_v42, 16  ;;  %v15171_v56 = vld [vmem:[#allocation2 + $0x40] sm:$0xf] }
 0x480   : >> { %4635 = vst [vmem:[#allocation2 + $0x84] sm:$0xf] %v4634_v59  ;;  %v4444_v23 = vor.u32 %v4442_v36, %v4441_v0  ;;  %v4446_v40 = vrot.slane %v4441_v0, 4  ;;  %v5208_v44 = vsel %vm1300_vm2, %v5206_v38, %v5207_v6  ;;  %v4117_v5 = vmax.f32 %v12203_v16, 0.0  ;;  %v4685_v38 = vld [vmem:[#allocation2 + $0x3c] sm:$0xf] }
 0x481   : >> { %v4427_v60 = vor.u32 %v4425_v52, %v4424_v57  ;;  %v4429_v26 = vrot.slane %v4424_v57, 4  ;;  %v4964_v19 = vshrl.u32 %v15163_v21, 16  ;;  %v4966_v48 = vshll.u32 %v15163_v21, 16 }
 0x482   : >> { %v4445_v14 = vsel %vm13660_vm7, %v4437_v62, %v4444_v23  ;;  %v4645_v36 = vsel %vm13677_vm11, %v4446_v40, %v4644_v51  ;;  %5257 = vrot.lane.b32.xlu1 %v5208_v44, %s13492_s25  ;;  %v11119_v6 = vpack.c.bf16 %v4117_v5, %v4117_v5  ;;  %v4973_v13 = vrot.slane %v4971_v29, 1  ;;  %v4654_v5 = vld [vmem:[#allocation2 + $0xa8] sm:$0xf] }
 0x483   : >> { %4643 = vst.msk [vmem:[#allocation2 + $0x94] sm:$0xf] %vm659_vm6, %v4445_v14  ;;  %4646 = vst [vmem:[#allocation2 + $0x98] sm:$0x1] %v4645_v36  ;;  %v4428_v63 = vsel %vm13660_vm7, %v4420_v49, %v4427_v60  ;;  %v4638_v0 = vsel %vm13677_vm11, %v4429_v26, %v4637_v8  ;;  %v4968_v52 = vrot.slane %v4966_v48, 1  ;;  %v12204_v62 = vadd.f32 %v14927_v46, %v15068_v28 }
 0x484   : >> { %4636 = vst.msk [vmem:[#allocation2 + $0x88] sm:$0xf] %vm659_vm6, %v4428_v63  ;;  %4639 = vst [vmem:[#allocation2 + $0x8c] sm:$0x1] %v4638_v0  ;;  %v4465_v16 = vshrl.u32 %v11119_v6, 16  ;;  %v4468_v37 = vshll.u32 %v11119_v6, 16  ;;  %v15187_v59 = vcombine.low %v4685_v38, %v15171_v56  ;;  %v12205_v8 = vadd.f32 %v15072_v47, %v14927_v46 }
 0x485   : >> { %v4959_v51 = vshll.u32 %v15167_v32, 16  ;;  %v4969_v57 = vor.u32 %v4968_v52, %v4964_v19  ;;  %v4115_v49 = vmax.f32 %v12204_v62, 0.0  ;;  %v12206_v29 = vadd.f32 %v14927_v46, %v15078_v22  ;;  %v4735_v19 = vld [vmem:[#allocation2 + $0x48] sm:$0xe] }
 0x486   : >> { %v4467_v28 = vrot.slane %v4465_v16, 7  ;;  %v4952_v23 = vshrl.u32 %v15187_v59, 16  ;;  %v4954_v40 = vshll.u32 %v15187_v59, 16  ;;  %v4118_v48 = vmax.f32 %v12205_v8, 0.0  ;;  %v4647_v16 = vld [vmem:[#allocation2 + $0x9c] sm:$0xf] }
 0x487   : >> { %v4961_v44 = vrot.slane %v4959_v51, 1  ;;  %v4974_v60 = vsel %vm993_vm3, %v4969_v57, %v4973_v13  ;;  %v11117_v26 = vpack.c.bf16 %v4115_v49, %v4115_v49  ;;  %v4116_v14 = vmax.f32 %v12206_v29, 0.0  ;;  %v4734_v49 = vld [vmem:[#allocation2 + $0x3c] sm:$0xe] }
 0x488   : >> { %v4470_v36 = vor.u32 %v4468_v37, %v4467_v28  ;;  %v4471_v6 = vrot.slane %v4467_v28, 4  ;;  %5119 = vrot.lane.b32.xlu0 %v4974_v60, %s13493_s6  ;;  %v4956_v47 = vrot.slane %v4954_v40, 1  ;;  %v10646_v22 = vcombine.low %v4735_v19, %v15153_v2  ;;  %v15202_v40 = vld [vmem:[#allocation2 + $0x64] sm:$0xf]  ;;  %v4658_v60 = vld [vmem:[#allocation2 + $0xb0] sm:$0x1] }
 0x489   : >> { %v4448_v63 = vshrl.u32 %v11117_v26, 16  ;;  %v4451_v0 = vshll.u32 %v11117_v26, 16  ;;  %v11120_v52 = vpack.c.bf16 %v4118_v48, %v4118_v48  ;;  %v11118_v62 = vpack.c.bf16 %v4116_v14, %v4116_v14 }
 0x48a   : >> { %v4655_v38 = vsel %vm13667_vm10, %v4470_v36, %v4654_v5  ;;  %v4957_v13 = vor.u32 %v4956_v47, %v4952_v23  ;;  %v5215_v51 = vrot.slane %v10646_v22, 1  ;;  %v5216_v57 = vrot.slane %v15149_v42, 1  ;;  %v4691_v36 = vld [vmem:[#allocation2 + $0x60] sm:$0xf] }
 0x48b   : >> { %4656 = vst [vmem:[#allocation2 + $0xa8] sm:$0xf] %v4655_v38  ;;  %v4450_v37 = vrot.slane %v4448_v63, 7  ;;  %v4473_v8 = vshrl.u32 %v11120_v52, 16  ;;  %v4476_v29 = vshll.u32 %v11120_v52, 16  ;;  %v4456_v28 = vshrl.u32 %v11118_v62, 16 }
 0x48c   : >> { %v4962_v2 = vsel %vm993_vm3, %v4957_v13, %v4961_v44  ;;  %v4459_v26 = vshll.u32 %v11118_v62, 16  ;;  %v5217_v48 = vsel %vm1300_vm2, %v5215_v51, %v5216_v57  ;;  %v10645_v5 = vcombine.low %v4734_v49, %v15171_v56  ;;  %v15215_v52 = vld [vmem:[#allocation2 + $0x68] ss:$0 sps:$4 sm:$0x11]   ;;  %v4651_v13 = vld [vmem:[#allocation2 + $0xa4] sm:$0x1] }
 0x48d   : >> { %v4453_v23 = vor.u32 %v4451_v0, %v4450_v37  ;;  %v4454_v14 = vrot.slane %v4450_v37, 4  ;;  %5117 = vrot.lane.b32.xlu1 %v4962_v2, %s13493_s6  ;;  %v4475_v42 = vrot.slane %v4473_v8, 7  ;;  %v4458_v19 = vrot.slane %v4456_v28, 7  ;;  %5263 = vrot.lane.b32.xlu0 %v5217_v48, %s13492_s25  ;;  %v15219_v51 = vld [vmem:[#allocation2 + $0x5c] ss:$0 sps:$4 sm:$0x11]  }
 0x48e   : >> { %v5212_v47 = vrot.slane %v10645_v5, 1  ;;  %v5213_v22 = vrot.slane %v15167_v32, 1  ;;  %v12207_v44 = vadd.f32 %v15092_v7, %v14927_v46  ;;  %v15213_v63 = vcombine.low %v4691_v36, %v15202_v40  ;;  %v15223_v37 = vld [vmem:[#allocation2 + $0x58] sm:$0xf]  ;;  %v4689_v48 = vld [vmem:[#allocation2 + $0x54] sm:$0xf] }
 0x48f   : >> { %v4648_v56 = vsel %vm13667_vm10, %v4453_v23, %v4647_v16  ;;  %v4478_v0 = vor.u32 %v4476_v29, %v4475_v42  ;;  %v4480_v62 = vrot.slane %v4475_v42, 4  ;;  %v4461_v38 = vor.u32 %v4459_v26, %v4458_v19  ;;  %v13048_v42 = vld [vmem:[%s14924_s11 + $0x1] ss:$0 sm:$0xff] }
 0x490   : >> { %4649 = vst [vmem:[#allocation2 + $0x9c] sm:$0xf] %v4648_v56  ;;  %v4463_v57 = vrot.slane %v4458_v19, 4  ;;  %v5214_v32 = vsel %vm1300_vm2, %v5212_v47, %v5213_v22  ;;  %v4121_v49 = vmax.f32 %v12207_v44, 0.0  ;;  %v4988_v7 = vshrl.u32 %v15213_v63, 16 }
 0x491   : >> { %v4479_v8 = vsel %vm13660_vm7, %v4471_v6, %v4478_v0  ;;  %v4659_v16 = vsel %vm13677_vm11, %v4480_v62, %v4658_v60  ;;  %v4462_v29 = vsel %vm13660_vm7, %v4454_v14, %v4461_v38  ;;  %5261 = vrot.lane.b32.xlu1 %v5214_v32, %s13492_s25  ;;  %v4990_v28 = vshll.u32 %v15213_v63, 16  ;;  %v4737_v32 = vld [vmem:[#allocation2 + $0x60] sm:$0xe] }
 0x492   : >> { %4657 = vst.msk [vmem:[#allocation2 + $0xac] sm:$0xf] %vm659_vm6, %v4479_v8  ;;  %4660 = vst [vmem:[#allocation2 + $0xb0] sm:$0x1] %v4659_v16  ;;  %v4652_v2 = vsel %vm13677_vm11, %v4463_v57, %v4651_v13  ;;  %v11123_v6 = vpack.c.bf16 %v4121_v49, %v4121_v49  ;;  %v4995_v26 = vshll.u32 %v15215_v52, 16  ;;  %v12208_v60 = vadd.f32 %v14927_v46, %v15104_v10 }
 0x493   : >> { %4650 = vst.msk [vmem:[#allocation2 + $0xa0] sm:$0xf] %vm659_vm6, %v4462_v29  ;;  %4653 = vst [vmem:[#allocation2 + $0xa4] sm:$0x1] %v4652_v2  ;;  %v4992_v5 = vrot.slane %v4990_v28, 1  ;;  %v15241_v23 = vcombine.low %v4689_v48, %v15223_v37  ;;  %v4983_v14 = vshll.u32 %v15219_v51, 16  ;;  %v12209_v19 = vadd.f32 %v13048_v42, %v15106_v39 }
 0x494   : >> { %v4499_v36 = vshrl.u32 %v11123_v6, 16  ;;  %v4502_v47 = vshll.u32 %v11123_v6, 16  ;;  %v4997_v22 = vrot.slane %v4995_v26, 1  ;;  %v4119_v44 = vmax.f32 %v12208_v60, 0.0  ;;  %v4668_v49 = vld [vmem:[#allocation2 + $0xc0] sm:$0xf] }
 0x495   : >> { %v4993_v56 = vor.u32 %v4992_v5, %v4988_v7  ;;  %v4976_v0 = vshrl.u32 %v15241_v23, 16  ;;  %v4978_v46 = vshll.u32 %v15241_v23, 16  ;;  %v4985_v10 = vrot.slane %v4983_v14, 1  ;;  %v4736_v26 = vld [vmem:[#allocation2 + $0x54] sm:$0xe] }
 0x496   : >> { %v15248_v62 = vrot.slane %v4499_v36, 7  ;;  %v11121_v38 = vpack.c.bf16 %v4119_v44, %v4119_v44  ;;  %v4122_v13 = vmax.f32 %v12209_v19, 0.0  ;;  %v12210_v57 = vadd.f32 %v13048_v42, %v15113_v50  ;;  %v4661_v60 = vld [vmem:[#allocation2 + $0xb4] sm:$0xf]  ;;  %v15257_v42 = vld [vmem:[#allocation2 + $0x7c] sm:$0xf] }
 0x497   : >> { %v4998_v39 = vsel %vm993_vm3, %v4993_v56, %v4997_v22  ;;  %v4980_v8 = vrot.slane %v4978_v46, 1  ;;  %v10648_v16 = vcombine.low %v4737_v32, %v15202_v40  ;;  %v5222_v7 = vrot.slane %v15215_v52, 1  ;;  %v4694_v46 = vld [vmem:[#allocation2 + $0x70] sm:$0xf]  ;;  %v4695_v32 = vld [vmem:[#allocation2 + $0x78] sm:$0xf] }
 0x498   : >> { %v4504_v29 = vor.u32 %v4502_v47, %v15248_v62  ;;  %v4505_v28 = vrot.slane %v15248_v62, 4  ;;  %5123 = vrot.lane.b32.xlu0 %v4998_v39, %s13493_s6  ;;  %v4482_v2 = vshrl.u32 %v11121_v38, 16  ;;  %v4485_v6 = vshll.u32 %v11121_v38, 16  ;;  %v15263_v47 = vld [vmem:[#allocation2 + $0x80] ss:$0 sps:$4 sm:$0x11]  }
 0x499   : >> { %v4981_v50 = vor.u32 %v4980_v8, %v4976_v0  ;;  %v11124_v48 = vpack.c.bf16 %v4122_v13, %v4122_v13  ;;  %v4120_v5 = vmax.f32 %v12210_v57, 0.0  ;;  %v5221_v14 = vrot.slane %v10648_v16, 1  ;;  %v4672_v16 = vld [vmem:[#allocation2 + $0xc8] sm:$0x1] }
 0x49a   : >> { %v4669_v40 = vsel %vm13667_vm10, %v4504_v29, %v4668_v49  ;;  %v4484_v52 = vrot.slane %v4482_v2, 7  ;;  %v10647_v19 = vcombine.low %v4736_v26, %v15223_v37  ;;  %v5219_v36 = vrot.slane %v15219_v51, 1 }
 0x49b   : >> { %4670 = vst [vmem:[#allocation2 + $0xc0] sm:$0xf] %v4669_v40  ;;  %v4986_v22 = vsel %vm993_vm3, %v4981_v50, %v4985_v10  ;;  %v4507_v44 = vshrl.u32 %v11124_v48, 16  ;;  %v4510_v56 = vshll.u32 %v11124_v48, 16  ;;  %v11122_v0 = vpack.c.bf16 %v4120_v5, %v4120_v5  ;;  %v4693_v10 = vld [vmem:[#allocation2 + $0x6c] sm:$0xf] }
 0x49c   : >> { %v4487_v62 = vor.u32 %v4485_v6, %v4484_v52  ;;  %v4488_v38 = vrot.slane %v4484_v52, 4  ;;  %5121 = vrot.lane.b32.xlu1 %v4986_v22, %s13493_s6  ;;  %v5223_v13 = vsel %vm1300_vm2, %v5221_v14, %v5222_v7  ;;  %v5218_v57 = vrot.slane %v10647_v19, 1  ;;  %v15278_v6 = vld [vmem:[#allocation2 + $0x74] ss:$0 sps:$4 sm:$0x11]  }
 0x49d   : >> { %v4509_v37 = vrot.slane %v4507_v44, 7  ;;  %v4490_v49 = vshrl.u32 %v11122_v0, 16  ;;  %v4493_v51 = vshll.u32 %v11122_v0, 16  ;;  %5267 = vrot.lane.b32.xlu0 %v5223_v13, %s13492_s25  ;;  %v15270_v39 = vcombine.low %v4695_v32, %v15257_v42  ;;  %v4665_v5 = vld [vmem:[#allocation2 + $0xbc] sm:$0x1] }
 0x49e   : >> { %v4662_v8 = vsel %vm13667_vm10, %v4487_v62, %v4661_v60  ;;  %v5220_v29 = vsel %vm1300_vm2, %v5218_v57, %v5219_v36  ;;  %v5019_v2 = vshll.u32 %v15263_v47, 16  ;;  %v15276_v7 = vcombine.low %v4693_v10, %v4694_v46  ;;  %v4739_v36 = vld [vmem:[#allocation2 + $0x78] sm:$0xe]  ;;  %v4738_v62 = vld [vmem:[#allocation2 + $0x6c] sm:$0xe] }
 0x49f   : >> { %4663 = vst [vmem:[#allocation2 + $0xb4] sm:$0xf] %v4662_v8  ;;  %v4512_v26 = vor.u32 %v4510_v56, %v4509_v37  ;;  %v4514_v50 = vrot.slane %v4509_v37, 4  ;;  %v4492_v48 = vrot.slane %v4490_v49, 7  ;;  %v5012_v14 = vshrl.u32 %v15270_v39, 16 }
 0x4a0   : >> { %5265 = vrot.lane.b32.xlu1 %v5220_v29, %s13492_s25  ;;  %v5014_v60 = vshll.u32 %v15270_v39, 16  ;;  %v5021_v40 = vrot.slane %v5019_v2, 1  ;;  %v5000_v52 = vshrl.u32 %v15276_v7, 16  ;;  %v5002_v19 = vshll.u32 %v15276_v7, 16  ;;  %v4700_v13 = vld [vmem:[#allocation2 + $0x94] sm:$0xf] }
 0x4a1   : >> { %v4513_v22 = vsel %vm13660_vm7, %v4505_v28, %v4512_v26  ;;  %v4673_v44 = vsel %vm13677_vm11, %v4514_v50, %v4672_v16  ;;  %v4495_v56 = vor.u32 %v4493_v51, %v4492_v48  ;;  %v4497_v0 = vrot.slane %v4492_v48, 4  ;;  %v15292_v10 = vld [vmem:[#allocation2 + $0x98] ss:$0 sps:$4 sm:$0x11]   ;;  %v4699_v29 = vld [vmem:[#allocation2 + $0x90] sm:$0xf] }
 0x4a2   : >> { %4671 = vst.msk [vmem:[#allocation2 + $0xc4] sm:$0xf] %vm659_vm6, %v4513_v22  ;;  %4674 = vst [vmem:[#allocation2 + $0xc8] sm:$0x1] %v4673_v44  ;;  %v5016_v57 = vrot.slane %v5014_v60, 1  ;;  %v5004_v32 = vrot.slane %v5002_v19, 1  ;;  %v10650_v49 = vcombine.low %v4739_v36, %v15257_v42  ;;  %v10649_v16 = vcombine.low %v4738_v62, %v4694_v46 }
 0x4a3   : >> { %v5007_v37 = vshll.u32 %v15278_v6, 16  ;;  %v4496_v28 = vsel %vm13660_vm7, %v4488_v38, %v4495_v56  ;;  %v4666_v51 = vsel %vm13677_vm11, %v4497_v0, %v4665_v5  ;;  %v5228_v8 = vrot.slane %v15263_v47, 1  ;;  %v4698_v2 = vld [vmem:[#allocation2 + $0x88] sm:$0xf]  ;;  %v4697_v5 = vld [vmem:[#allocation2 + $0x84] sm:$0xf] }
 0x4a4   : >> { %4664 = vst.msk [vmem:[#allocation2 + $0xb8] sm:$0xf] %vm659_vm6, %v4496_v28  ;;  %4667 = vst [vmem:[#allocation2 + $0xbc] sm:$0x1] %v4666_v51  ;;  %v5017_v26 = vor.u32 %v5016_v57, %v5012_v14  ;;  %v5005_v50 = vor.u32 %v5004_v32, %v5000_v52  ;;  %v5227_v42 = vrot.slane %v10650_v49, 1  ;;  %v5224_v19 = vrot.slane %v10649_v16, 1 }
 0x4a5   : >> { %v5009_v48 = vrot.slane %v5007_v37, 1  ;;  %v15300_v60 = vld [vmem:[#allocation2 + $0x8c] ss:$0 sps:$4 sm:$0x11]   ;;  %v5225_v38 = vrot.slane %v15278_v6, 1  ;;  %v15303_v36 = vcombine.low %v4699_v29, %v4700_v13  ;;  %v5043_v22 = vshll.u32 %v15292_v10, 16 }
 0x4a6   : >> { %v5022_v47 = vsel %vm993_vm3, %v5017_v26, %v5021_v40  ;;  %v15308_v44 = vcombine.low %v4697_v5, %v4698_v2  ;;  %v4741_v14 = vld [vmem:[#allocation2 + $0x90] sm:$0xe]  ;;  %v4740_v52 = vld [vmem:[#allocation2 + $0x84] sm:$0xe]  ;;  %v4703_v6 = vld [vmem:[#allocation2 + $0xa8] sm:$0xf]  ;;  %v5229_v40 = vsel %vm1300_vm2, %v5227_v42, %v5228_v8 }
 0x4a7   : >> { %v5010_v46 = vsel %vm993_vm3, %v5005_v50, %v5009_v48  ;;  %5127 = vrot.lane.b32.xlu0 %v5022_v47, %s13493_s6  ;;  %v5038_v56 = vshll.u32 %v15303_v36, 16  ;;  %v15313_v0 = vld [vmem:[#allocation2 + $0xac] sm:$0xf]  ;;  %v15315_v62 = vld [vmem:[#allocation2 + $0xb0] ss:$0 sps:$4 sm:$0x11]   ;;  %v10652_v37 = vcombine.low %v4741_v14, %v4700_v13  ;;  %v5226_v51 = vsel %vm1300_vm2, %v5224_v19, %v5225_v38 }
 0x4a8   : >> { %5125 = vrot.lane.b32.xlu1 %v5010_v46, %s13493_s6  ;;  %v5026_v57 = vshll.u32 %v15308_v44, 16  ;;  %v5031_v32 = vshll.u32 %v15300_v60, 16  ;;  %v4701_v49 = vld [vmem:[#allocation2 + $0x9c] sm:$0xf]  ;;  %v4702_v28 = vld [vmem:[#allocation2 + $0xa0] sm:$0xf]  ;;  %v10651_v26 = vcombine.low %v4740_v52, %v4698_v2  ;;  %v15326_v8 = vcombine.low %v4703_v6, %v15313_v0 }
 0x4a9   : >> { %v5036_v16 = vshrl.u32 %v15303_v36, 16  ;;  %v5040_v29 = vrot.slane %v5038_v56, 1  ;;  %v15322_v50 = vld [vmem:[#allocation2 + $0xa4] ss:$0 sps:$4 sm:$0x11]   ;;  %v5045_v48 = vrot.slane %v5043_v22, 1  ;;  %v15331_v38 = vcombine.low %v4701_v49, %v4702_v28 }
 0x4aa   : >> { %v5024_v5 = vshrl.u32 %v15308_v44, 16  ;;  %v5028_v47 = vrot.slane %v5026_v57, 1  ;;  %v5233_v42 = vrot.slane %v10652_v37, 1  ;;  %v5234_v19 = vrot.slane %v15292_v10, 1  ;;  %v15338_v57 = vld [vmem:[#allocation2 + $0xc4] sm:$0xf] }
 0x4ab   : >> { %5271 = vrot.lane.b32.xlu0 %v5229_v40, %s13492_s25  ;;  %v5041_v13 = vor.u32 %v5040_v29, %v5036_v16  ;;  %v5033_v46 = vrot.slane %v5031_v32, 1  ;;  %v5231_v22 = vrot.slane %v15300_v60, 1  ;;  %v5062_v14 = vshll.u32 %v15326_v8, 16  ;;  %v4743_v16 = vld [vmem:[#allocation2 + $0xa8] sm:$0xe] }
 0x4ac   : >> { %5269 = vrot.lane.b32.xlu1 %v5226_v51, %s13492_s25  ;;  %v5029_v2 = vor.u32 %v5028_v47, %v5024_v5  ;;  %v5230_v56 = vrot.slane %v10651_v26, 1  ;;  %v5060_v6 = vshrl.u32 %v15326_v8, 16  ;;  %v5067_v40 = vshll.u32 %v15315_v62, 16  ;;  %v4706_v51 = vld [vmem:[#allocation2 + $0xb8] sm:$0xf] }
 0x4ad   : >> { %v5046_v52 = vsel %vm993_vm3, %v5041_v13, %v5045_v48  ;;  %v5064_v10 = vrot.slane %v5062_v14, 1  ;;  %v5050_v49 = vshll.u32 %v15331_v38, 16  ;;  %v5055_v32 = vshll.u32 %v15322_v50, 16  ;;  %v4707_v29 = vld [vmem:[#allocation2 + $0xc0] sm:$0xf] }
 0x4ae   : >> { %v5034_v37 = vsel %vm993_vm3, %v5029_v2, %v5033_v46  ;;  %v5235_v60 = vsel %vm1300_vm2, %v5233_v42, %v5234_v19  ;;  %v5048_v48 = vshrl.u32 %v15331_v38, 16  ;;  %v4742_v47 = vld [vmem:[#allocation2 + $0x9c] sm:$0xe]  ;;  %v15348_v13 = vcombine.low %v4707_v29, %v15338_v57  ;;  %v4705_v2 = vld [vmem:[#allocation2 + $0xb4] sm:$0xf]  ;;  %v5108_v46 = vpop.permute.xlu0 %5107 }
 0x4af   : >> { %5131 = vrot.lane.b32.xlu0 %v5046_v52, %s13493_s6  ;;  %v5065_v26 = vor.u32 %v5064_v10, %v5060_v6  ;;  %v5052_v5 = vrot.slane %v5050_v49, 1  ;;  %v5232_v14 = vsel %vm1300_vm2, %v5230_v56, %v5231_v22  ;;  %v10654_v52 = vcombine.low %v4743_v16, %v15313_v0  ;;  %v13032_v30 = vld [vmem:[#allocation2 + $0xbc] ss:$0 sps:$4 sm:$0x11]  }
 0x4b0   : >> { %5129 = vrot.lane.b32.xlu1 %v5034_v37, %s13493_s6  ;;  %v10653_v35 = vcombine.low %v4742_v47, %v4702_v28  ;;  %v15352_v37 = vld [vmem:[#allocation2 + $0xc8] ss:$0 sps:$4 sm:$0x11]   ;;  %v15354_v42 = vcombine.low %v4705_v2, %v4706_v51  ;;  %v5069_v19 = vrot.slane %v5067_v40, 1  ;;  %v5057_v10 = vrot.slane %v5055_v32, 1 }
 0x4b1   : >> { %v5053_v6 = vor.u32 %v5052_v5, %v5048_v48  ;;  %v5086_v49 = vshll.u32 %v15348_v13, 16  ;;  %v5240_v29 = vrot.slane %v15315_v62, 1  ;;  %v5237_v22 = vrot.slane %v15322_v50, 1 }
 0x4b2   : >> { %v5070_v0 = vsel %vm993_vm3, %v5065_v26, %v5069_v19  ;;  %v5074_v40 = vshll.u32 %v15354_v42, 16  ;;  %v5239_v16 = vrot.slane %v10654_v52, 1  ;;  %v5236_v32 = vrot.slane %v10653_v35, 1  ;;  %v5252_v50 = vpop.permute.xlu0 %5251  ;;  %v4744_v19 = vld [vmem:[#allocation2 + $0xb4] sm:$0xe] }
 0x4b3   : >> { %5275 = vrot.lane.b32.xlu0 %v5235_v60, %s13492_s25  ;;  %v5058_v28 = vsel %vm993_vm3, %v5053_v6, %v5057_v10  ;;  %v5088_v56 = vrot.slane %v5086_v49, 1  ;;  %v5084_v48 = vshrl.u32 %v15348_v13, 16  ;;  %v5091_v5 = vshll.u32 %v15352_v37, 16 }
 0x4b4   : >> { %5273 = vrot.lane.b32.xlu1 %v5232_v14, %s13492_s25  ;;  %v5072_v60 = vshrl.u32 %v15354_v42, 16  ;;  %v5076_v47 = vrot.slane %v5074_v40, 1  ;;  %v5079_v2 = vshll.u32 %v13032_v30, 16  ;;  %v5288_v62 = vsel %vm1391_vm12, %v14912_v41, %v5108_v46 }
 0x4b5   : >> { %v5324_v26 = vsel %vm1428_vm13, %v5288_v62, %v5252_v50  ;;  %v5089_v14 = vor.u32 %v5088_v56, %v5084_v48  ;;  %v5241_v52 = vsel %vm1300_vm2, %v5239_v16, %v5240_v29  ;;  %v5238_v6 = vsel %vm1300_vm2, %v5236_v32, %v5237_v22  ;;  %v4709_v29 = vld [vmem:[#allocation2 + $0xcc] sm:$0xf]  ;;  %v4710_v16 = vld [vmem:[#allocation2 + $0xd0] sm:$0xf] }
 0x4b6   : >> { %v5077_v35 = vor.u32 %v5076_v47, %v5072_v60  ;;  %11741 = vmatprep.mubr.msk.bf16.mxu1 %vm1483_vm14, %v5324_v26  ;;  %v5093_v10 = vrot.slane %v5091_v5, 1  ;;  %v5081_v49 = vrot.slane %v5079_v2, 1  ;;  %v10655_v40 = vcombine.low %v4744_v19, %v4706_v51  ;;  %v13043_v22 = vld [vmem:[#allocation2 + $0xd4] ss:$0 sps:$4 sm:$0x11]  }
 0x4b7   : >> { %5135 = vrot.lane.b32.xlu0 %v5070_v0, %s13493_s6  ;;  %v4745_v0 = vld [vmem:[#allocation2 + $0xc0] sm:$0xe]  ;;  %v5243_v56 = vrot.slane %v13032_v30, 1  ;;  %v15382_v51 = vcombine.low %v4709_v29, %v4710_v16  ;;  %v4746_v32 = vld [vmem:[#allocation2 + $0xcc] sm:$0xe]  ;;  %v5103_v62 = vshll.u32 %v13043_v22, 16 }
 0x4b8   : >> { %5133 = vrot.lane.b32.xlu1 %v5058_v28, %s13493_s6  ;;  %v5094_v41 = vsel %vm993_vm3, %v5089_v14, %v5093_v10  ;;  %v5082_v46 = vsel %vm993_vm3, %v5077_v35, %v5081_v49  ;;  %v5242_v28 = vrot.slane %v10655_v40, 1  ;;  %v10656_v48 = vcombine.low %v4745_v0, %v15338_v57  ;;  %v13039_v0 = vld [vmem:[%s14449_s10 + $0xb0] sm:$0xff]  }
 0x4b9   : >> { %v5096_v5 = vshrl.u32 %v15382_v51, 16  ;;  %v5098_v60 = vshll.u32 %v15382_v51, 16  ;;  %v10657_v47 = vcombine.low %v4746_v32, %v4710_v16  ;;  %v5246_v57 = vrot.slane %v15352_v37, 1 }
 0x4ba   : >> { %v5244_v2 = vsel %vm1300_vm2, %v5242_v28, %v5243_v56  ;;  %v5245_v30 = vrot.slane %v10656_v48, 1  ;;  %v5105_v26 = vrot.slane %v5103_v62, 1  ;;  %v5249_v35 = vrot.slane %v13043_v22, 1 }
 0x4bb   : >> { %5279 = vrot.lane.b32.xlu0 %v5241_v52, %s13492_s25  ;;  %v5100_v50 = vrot.slane %v5098_v60, 1  ;;  %v5248_v14 = vrot.slane %v10657_v47, 1 }
 0x4bc   : >> { %5277 = vrot.lane.b32.xlu1 %v5238_v6, %s13492_s25  ;;  %v5247_v19 = vsel %vm1300_vm2, %v5245_v30, %v5246_v57 }
 0x4bd   : >> { %v5101_v52 = vor.u32 %v5100_v50, %v5096_v5  ;;  %v5250_v37 = vsel %vm1300_vm2, %v5248_v14, %v5249_v35 }
 0x4bf   : >> { %5139 = vrot.lane.b32.xlu0 %v5094_v41, %s13493_s6  ;;  %v5106_v6 = vsel %vm993_vm3, %v5101_v52, %v5105_v26 }
 0x4c0   : >> { %5137 = vrot.lane.b32.xlu1 %v5082_v46, %s13493_s6 }
 0x4c3   : >> { %5141 = vrot.lane.b32.xlu0 %v5106_v6, %s13493_s6 }
 0x4c4   : >> { %5281 = vrot.lane.b32.xlu1 %v5244_v2, %s13492_s25 }
 0x4c8   : >> { %5283 = vrot.lane.b32.xlu1 %v5247_v19, %s13492_s25 }
 0x4cc   : >> { %5285 = vrot.lane.b32.xlu1 %v5250_v37, %s13492_s25  ;;  %s13165_s25 = sshll.u32 (%p15686_p12), %s13494_s16, 4  ;;  %s13166_s25 = int_to_ptr.vmem [resolvable:$false] %s13165_s25 }
 0x4cd   : > { %s13167_s23 = scalar_lea.vmem (%p15686_p12), %s13166_s25, 4096  ;;  %p13168_p2 = scmp.lt.s32.totalorder (%p15686_p12), %s17146_s14, %s13166_s25 }
 0x4db   : >> { %v5112_v10 = vpop.permute.xlu0 %5111 }
 0x4dc   : >> { %v5292_v28 = vsel %vm1391_vm12, %v14999_v4, %v5112_v10  ;;  %v15413_v4 = vld [vmem:[%s14449_s10 + $0xc0] sm:$0xff]  }
 0x4df   : >> { %v5256_v40 = vpop.permute.xlu0 %5255 }
 0x4e0   : >> { %v5110_v49 = vpop.permute.xlu1 %5109  ;;  %v15404_v48 = vsel %vm1428_vm13, %v5292_v28, %v5256_v40 }
 0x4e1   : >> { %v5290_v41 = vsel %vm1391_vm12, %v15037_v3, %v5110_v49  ;;  %v13040_v3 = vld [vmem:[%s14449_s10 + $0xb8] sm:$0xff]  }
 0x4e4   : >> { %v5254_v46 = vpop.permute.xlu1 %5253 }
 0x4e5   : >> { %v15401_v56 = vsel %vm1428_vm13, %v5290_v41, %v5254_v46 }
 0x4e6   : >> { %11742 = vmatmul.mubr.msk.bf16.vlgmr.msra.gmra.mrb[0].mxu1 %vm1483_vm14, %v15401_v56 }
 0x4e7   : >> { %11774 = vmatpush3.bf16.msra.mxu1 %v15063_v54  ;;  %11745 = vmatprep.mubr.msk.bf16.mxu1 %vm1483_vm14, %v15404_v48 }
 0x4e8   : >> { %11775 = vmatprep.subr.bf16.mxu1 %v13039_v0 }
 0x4eb   : >> { %11776 = vmatpush3.bf16.msra.mxu1 %v13039_v0 }
 0x4ec   : >> { %v5116_v29 = vpop.permute.xlu0 %5115  ;;  %11777 = vmatprep.subr.bf16.mxu1 %v13040_v3 }
 0x4ed   : >> { %v5296_v54 = vsel %vm1391_vm12, %v15097_v1, %v5116_v29 }
 0x4ef   : >> { %11778 = vmatpush3.bf16.msra.mxu1 %v13040_v3 }
 0x4f0   : >> { %v5114_v16 = vpop.permute.xlu1 %5113  ;;  %11811 = vmatprep.subr.bf16.mxu1 %v15413_v4  ;;  %v5260_v22 = vpop.permute.xlu0 %5259 }
 0x4f1   : >> { %v5294_v32 = vsel %vm1391_vm12, %v15129_v12, %v5114_v16  ;;  %v15424_v47 = vsel %vm1428_vm13, %v5296_v54, %v5260_v22 }
 0x4f4   : >> { %v5258_v5 = vpop.permute.xlu1 %5257 }
 0x4f5   : >> { %v15421_v60 = vsel %vm1428_vm13, %v5294_v32, %v5258_v5 }
 0x4f6   : >> { %11746 = vmatmul.mubr.msk.bf16.gmra.mrb[4].mxu1 %vm1483_vm14, %v15421_v60 }
 0x4f7   : >> { %11749 = vmatprep.mubr.msk.bf16.mxu1 %vm1483_vm14, %v15424_v47 }
 0x4fa   : >> { %v5120_v2 = vpop.permute.xlu0 %5119 }
 0x4fb   : >> { %v5300_v1 = vsel %vm1391_vm12, %v15163_v21, %v5120_v2 }
 0x4ff   : >> { %v5118_v30 = vpop.permute.xlu1 %5117  ;;  %v5264_v57 = vpop.permute.xlu0 %5263 }
 0x500   : >> { %v5298_v12 = vsel %vm1391_vm12, %v15187_v59, %v5118_v30  ;;  %v15438_v26 = vsel %vm1428_vm13, %v5300_v1, %v5264_v57 }
 0x503   : >> { %v5262_v62 = vpop.permute.xlu1 %5261 }
 0x504   : >> { %v15435_v50 = vsel %vm1428_vm13, %v5298_v12, %v5262_v62 }
 0x505   : >> { %11750 = vmatmul.mubr.msk.bf16.gmra.mrb[8].mxu1 %vm1483_vm14, %v15435_v50 }
 0x506   : >> { %11753 = vmatprep.mubr.msk.bf16.mxu1 %vm1483_vm14, %v15438_v26 }
 0x50a   : >> { %v5124_v14 = vpop.permute.xlu0 %5123 }
 0x50b   : >> { %v5304_v21 = vsel %vm1391_vm12, %v15213_v63, %v5124_v14 }
 0x50e   : >> { %v5122_v35 = vpop.permute.xlu1 %5121 }
 0x50f   : >> { %v5268_v52 = vpop.permute.xlu0 %5267  ;;  %v5302_v59 = vsel %vm1391_vm12, %v15241_v23, %v5122_v35  ;;  %v13046_v35 = vld [vmem:[%s14449_s10 + $0xd0] sm:$0xff]  }
 0x510   : >> { %v15452_v37 = vsel %vm1428_vm13, %v5304_v21, %v5268_v52 }
 0x512   : >> { %v5266_v19 = vpop.permute.xlu1 %5265 }
 0x513   : >> { %v15449_v6 = vsel %vm1428_vm13, %v5302_v59, %v5266_v19 }
 0x514   : >> { %11754 = vmatmul.mubr.msk.bf16.gmra.mrb[12].mxu1 %vm1483_vm14, %v15449_v6 }
 0x515   : >> { %11757 = vmatprep.mubr.msk.bf16.mxu1 %vm1483_vm14, %v15452_v37 }
 0x519   : >> { %v5128_v10 = vpop.permute.xlu0 %5127 }
 0x51a   : >> { %v5126_v49 = vpop.permute.xlu1 %5125  ;;  %v5308_v63 = vsel %vm1391_vm12, %v15270_v39, %v5128_v10 }
 0x51b   : >> { %v5306_v23 = vsel %vm1391_vm12, %v15276_v7, %v5126_v49 }
 0x51d   : >> { %v5272_v40 = vpop.permute.xlu0 %5271 }
 0x51e   : >> { %v5270_v41 = vpop.permute.xlu1 %5269  ;;  %v15466_v0 = vsel %vm1428_vm13, %v5308_v63, %v5272_v40 }
 0x51f   : >> { %v15463_v46 = vsel %vm1428_vm13, %v5306_v23, %v5270_v41 }
 0x520   : >> { %11758 = vmatmul.mubr.msk.bf16.gmra.mrb[16].mxu1 %vm1483_vm14, %v15463_v46 }
 0x521   : >> { %11761 = vmatprep.mubr.msk.bf16.mxu1 %vm1483_vm14, %v15466_v0  ;;  %v5132_v28 = vpop.permute.xlu0 %5131 }
 0x522   : >> { %v5130_v3 = vpop.permute.xlu1 %5129  ;;  %v5312_v39 = vsel %vm1391_vm12, %v15303_v36, %v5132_v28 }
 0x523   : >> { %v5310_v7 = vsel %vm1391_vm12, %v15308_v44, %v5130_v3 }
 0x525   : >> { %v5276_v29 = vpop.permute.xlu0 %5275 }
 0x526   : >> { %v5274_v16 = vpop.permute.xlu1 %5273  ;;  %v5348_v32 = vsel %vm1428_vm13, %v5312_v39, %v5276_v29 }
 0x527   : >> { %v5346_v22 = vsel %vm1428_vm13, %v5310_v7, %v5274_v16 }
 0x528   : >> { %11762 = vmatmul.mubr.msk.bf16.gmra.mrb[20].mxu1 %vm1483_vm14, %v5346_v22 }
 0x529   : >> { %11765 = vmatprep.mubr.msk.bf16.mxu1 %vm1483_vm14, %v5348_v32  ;;  %v5136_v5 = vpop.permute.xlu0 %5135 }
 0x52a   : >> { %v5134_v54 = vpop.permute.xlu1 %5133  ;;  %v5316_v57 = vsel %vm1391_vm12, %v15326_v8, %v5136_v5  ;;  %v13045_v8 = vld [vmem:[%s14449_s10 + $0xc8] sm:$0xff]  }
 0x52b   : >> { %v5314_v2 = vsel %vm1391_vm12, %v15331_v38, %v5134_v54 }
 0x52d   : >> { %v5280_v44 = vpop.permute.xlu0 %5279 }
 0x52e   : >> { %v5278_v30 = vpop.permute.xlu1 %5277  ;;  %v5352_v12 = vsel %vm1428_vm13, %v5316_v57, %v5280_v44 }
 0x52f   : >> { %v5350_v36 = vsel %vm1428_vm13, %v5314_v2, %v5278_v30  ;;  %v17371_v2 = vld [vmem:[#allocation55_spill] sm:$0xff] }
 0x530   : >> { %11766 = vmatmul.mubr.msk.bf16.gmra.mrb[24].mxu1 %vm1483_vm14, %v5350_v36 }
 0x531   : >> { %11769 = vmatprep.mubr.msk.bf16.mxu1 %vm1483_vm14, %v5352_v12 }
 0x532   : >> { %v5138_v62 = vpop.permute.xlu1 %5137 }
 0x533   : >> { %v5318_v1 = vsel %vm1391_vm12, %v15354_v42, %v5138_v62  ;;  %v5140_v42 = vpop.permute.xlu0 %5139 }
 0x536   : >> { %v5282_v14 = vpop.permute.xlu1 %5281 }
 0x537   : >> { %v5354_v38 = vsel %vm1428_vm13, %v5318_v1, %v5282_v14 }
 0x538   : >> { %11770 = vmatmul.mubr.msk.bf16.gmra.mrb[28].mxu1 %vm1483_vm14, %v5354_v38 }
 0x539   : >> { %11779 = vmatprep.mubr.msk.bf16.mxu1 %vm1483_vm14, %v15401_v56 }
 0x53a   : >> { %v5284_v56 = vpop.permute.xlu1 %5283 }
 0x540   : >> { %11780 = vmatmul.mubr.msk.bf16.vlgmr.msra.gmra.mrb[0].mxu1 %vm1483_vm14, %v15404_v48 }
 0x541   : >> { %11812 = vmatpush3.bf16.msra.mxu1 %v15413_v4  ;;  %11783 = vmatprep.mubr.msk.bf16.mxu1 %vm1483_vm14, %v15421_v60  ;;  %v5320_v4 = vsel %vm1391_vm12, %v15348_v13, %v5140_v42  ;;  %v5142_v13 = vpop.permute.xlu0 %5141 }
 0x542   : >> { %11813 = vmatprep.subr.bf16.mxu1 %v13045_v8  ;;  %v5356_v52 = vsel %vm1428_vm13, %v5320_v4, %v5284_v56  ;;  %v17378_v56 = vld [vmem:[#allocation53_spill] sm:$0xff] }
 0x545   : >> { %11814 = vmatpush3.bf16.msra.mxu1 %v13045_v8 }
 0x546   : >> { %11815 = vmatprep.subr.bf16.mxu1 %v13046_v35 }
 0x548   : >> { %11784 = vmatmul.mubr.msk.bf16.gmra.mrb[4].mxu1 %vm1483_vm14, %v15424_v47 }
 0x549   : >> { %11787 = vmatprep.mubr.msk.bf16.mxu1 %vm1483_vm14, %v15435_v50  ;;  %11816 = vmatpush3.bf16.msra.mxu1 %v13046_v35 }
 0x550   : >> { %11788 = vmatmul.mubr.msk.bf16.gmra.mrb[8].mxu1 %vm1483_vm14, %v15438_v26 }
 0x551   : >> { %11791 = vmatprep.mubr.msk.bf16.mxu1 %vm1483_vm14, %v15449_v6 }
 0x558   : >> { %11792 = vmatmul.mubr.msk.bf16.gmra.mrb[12].mxu1 %vm1483_vm14, %v15452_v37 }
 0x559   : >> { %11795 = vmatprep.mubr.msk.bf16.mxu1 %vm1483_vm14, %v15463_v46 }
 0x560   : >> { %11796 = vmatmul.mubr.msk.bf16.gmra.mrb[16].mxu1 %vm1483_vm14, %v15466_v0 }
 0x561   : >> { %11799 = vmatprep.mubr.msk.bf16.mxu1 %vm1483_vm14, %v5346_v22 }
 0x568   : >> { %11800 = vmatmul.mubr.msk.bf16.gmra.mrb[20].mxu1 %vm1483_vm14, %v5348_v32 }
 0x569   : >> { %11803 = vmatprep.mubr.msk.bf16.mxu1 %vm1483_vm14, %v5350_v36 }
 0x570   : >> { %11804 = vmatmul.mubr.msk.bf16.gmra.mrb[24].mxu1 %vm1483_vm14, %v5352_v12 }
 0x571   : >> { %11807 = vmatprep.mubr.msk.bf16.mxu1 %vm1483_vm14, %v5354_v38 }
 0x578   : >> { %11808 = vmatmul.mubr.msk.bf16.gmra.mrb[28].mxu1 %vm1483_vm14, %v5356_v52 }
 0x579   : >> { %11817 = vmatprep.mubr.msk.bf16.mxu1 %vm1483_vm14, %v15404_v48  ;;  %v5322_v48 = vsel %vm1391_vm12, %v15382_v51, %v5142_v13 }
 0x580   : >> { %11818 = vmatmul.mubr.msk.bf16.vlgmr.msra.gmra.mrb[0].mxu1 %vm1483_vm14, %v15421_v60  ;;  %v5286_v60 = vpop.permute.xlu1 %5285 }
 0x581   : >> { %11821 = vmatprep.mubr.msk.bf16.mxu1 %vm1483_vm14, %v15424_v47  ;;  %v5358_v47 = vsel %vm1428_vm13, %v5322_v48, %v5286_v60  ;;  %v17382_v48 = vld [vmem:[#allocation52_spill] sm:$0xff] }
 0x588   : >> { %11822 = vmatmul.mubr.msk.bf16.gmra.mrb[4].mxu1 %vm1483_vm14, %v15435_v50  ;;  %v15553_v50 = vld [vmem:[%s14924_s11 + $0x2] ss:$0 sm:$0xff] }
 0x589   : >> { %11825 = vmatprep.mubr.msk.bf16.mxu1 %vm1483_vm14, %v15438_v26 }
 0x590   : >> { %11826 = vmatmul.mubr.msk.bf16.gmra.mrb[8].mxu1 %vm1483_vm14, %v15449_v6 }
 0x591   : >> { %11829 = vmatprep.mubr.msk.bf16.mxu1 %vm1483_vm14, %v15452_v37 }
 0x598   : >> { %11830 = vmatmul.mubr.msk.bf16.gmra.mrb[12].mxu1 %vm1483_vm14, %v15463_v46 }
 0x599   : >> { %11833 = vmatprep.mubr.msk.bf16.mxu1 %vm1483_vm14, %v15466_v0 }
 0x5a0   : >> { %11834 = vmatmul.mubr.msk.bf16.gmra.mrb[16].mxu1 %vm1483_vm14, %v5346_v22 }
 0x5a1   : >> { %11837 = vmatprep.mubr.msk.bf16.mxu1 %vm1483_vm14, %v5348_v32 }
 0x5a8   : >> { %11838 = vmatmul.mubr.msk.bf16.gmra.mrb[20].mxu1 %vm1483_vm14, %v5350_v36 }
 0x5a9   : >> { %11841 = vmatprep.mubr.msk.bf16.mxu1 %vm1483_vm14, %v5352_v12 }
 0x5b0   : >> { %11842 = vmatmul.mubr.msk.bf16.gmra.mrb[24].mxu1 %vm1483_vm14, %v5354_v38  ;;  %v17376_v38 = vld [vmem:[#allocation51_spill] sm:$0xff] }
 0x5b1   : >> { %11845 = vmatprep.mubr.msk.bf16.mxu1 %vm1483_vm14, %v5356_v52  ;;  %v17380_v52 = vld [vmem:[#allocation50_spill] sm:$0xff] }
 0x5b8   : >> { %11846 = vmatmul.mubr.msk.bf16.gmra.mrb[28].mxu1 %vm1483_vm14, %v5358_v47 }
 0x653   : >> { %v11819_v26 = vpop.f32.mrb[0].mxu1 }
 0x654   : >> { %v12211_v59 = vadd.f32 %v11819_v26, %v15553_v50  ;;  %v5875_v19 = vpop.f32.mrb[1].mxu1 }
 0x655   : >> { %v12212_v21 = vadd.f32 %v15553_v50, %v5875_v19  ;;  %v11820_v6 = vpop.f32.mrb[2].mxu1 }
 0x656   : >> { %v15558_v24 = vadd.f32 %v13475_v24, %v12211_v59   ;;  %v12213_v10 = vadd.f32 %v11820_v6, %v15553_v50  ;;  %v5878_v51 = vpop.f32.mrb[3].mxu1 }
 0x657   : >> { %v15562_v17 = vadd.f32 %v13483_v17, %v12212_v21   ;;  %v12214_v23 = vadd.f32 %v15553_v50, %v5878_v51 }
 0x658   : >> { %v17362_v37 = vmov %v15558_v24  ;;  %v15566_v15 = vadd.f32 %v13471_v15, %v12213_v10  }
 0x659   : >> { %17363 = vst [vmem:[#allocation56_spill] sm:$0xff] %v15562_v17  ;;  %v15569_v45 = vadd.f32 %v13479_v45, %v12214_v23  }
 0x65a   : >> { %v17364_v40 = vmov %v15566_v15 }
 0x65b   : >> { %17365 = vst [vmem:[#allocation57_spill] sm:$0xff] %v15569_v45  ;;  %v11823_v41 = vpop.f32.mrb[4].mxu1 }
 0x65c   : >> { %v12215_v46 = vadd.f32 %v11823_v41, %v15553_v50  ;;  %v5891_v0 = vpop.f32.mrb[5].mxu1  ;;  %v17385_v41 = vld [vmem:[#allocation49_spill] sm:$0xff] }
 0x65d   : >> { %v12216_v24 = vadd.f32 %v15553_v50, %v5891_v0  ;;  %v11824_v28 = vpop.f32.mrb[6].mxu1 }
 0x65e   : >> { %v15574_v33 = vadd.f32 %v13459_v33, %v12215_v46   ;;  %v12217_v17 = vadd.f32 %v11824_v28, %v15553_v50  ;;  %v5894_v3 = vpop.f32.mrb[7].mxu1 }
 0x65f   : >> { %v15578_v34 = vadd.f32 %v13467_v34, %v12216_v24   ;;  %v12218_v15 = vadd.f32 %v15553_v50, %v5894_v3 }
 0x660   : >> { %v17366_v29 = vmov %v15574_v33  ;;  %v15582_v27 = vadd.f32 %v13455_v27, %v12217_v17  }
 0x661   : >> { %v17367_v16 = vmov %v15578_v34  ;;  %v15585_v31 = vadd.f32 %v13463_v31, %v12218_v15  }
 0x662   : >> { %v17368_v39 = vmov %v15582_v27 }
 0x663   : >> { %v17369_v54 = vmov %v15585_v31  ;;  %v11827_v45 = vpop.f32.mrb[8].mxu1  ;;  %v17374_v31 = vld [vmem:[#allocation54_spill] sm:$0xff] }
 0x664   : >> { %v12219_v7 = vadd.f32 %v11827_v45, %v15553_v50  ;;  %v5907_v22 = vpop.f32.mrb[9].mxu1 }
 0x665   : >> { %v12220_v33 = vadd.f32 %v15553_v50, %v5907_v22  ;;  %v11828_v32 = vpop.f32.mrb[10].mxu1 }
 0x666   : >> { %v15590_v18 = vadd.f32 %v13443_v18, %v12219_v7   ;;  %v12221_v34 = vadd.f32 %v11828_v32, %v15553_v50  ;;  %v5910_v5 = vpop.f32.mrb[11].mxu1 }
 0x667   : >> { %v15594_v3 = vadd.f32 %v17371_v2, %v12220_v33   ;;  %v12222_v27 = vadd.f32 %v15553_v50, %v5910_v5 }
 0x668   : >> { %v17370_v44 = vmov %v15590_v18  ;;  %v15598_v11 = vadd.f32 %v13439_v11, %v12221_v34  }
 0x669   : >> { %v17372_v30 = vmov %v15594_v3  ;;  %v15601_v26 = vadd.f32 %v17374_v31, %v12222_v27   ;;  %v17399_v27 = vld [vmem:[#allocation45_spill] sm:$0xff] }
 0x66a   : >> { %v17373_v57 = vmov %v15598_v11 }
 0x66b   : >> { %v17375_v36 = vmov %v15601_v26  ;;  %v11831_v12 = vpop.f32.mrb[12].mxu1 }
 0x66c   : >> { %v12223_v62 = vadd.f32 %v11831_v12, %v15553_v50  ;;  %v5923_v1 = vpop.f32.mrb[13].mxu1 }
 0x66d   : >> { %v12224_v18 = vadd.f32 %v15553_v50, %v5923_v1  ;;  %v11832_v14 = vpop.f32.mrb[14].mxu1 }
 0x66e   : >> { %v15606_v5 = vadd.f32 %v17376_v38, %v12223_v62   ;;  %v12225_v35 = vadd.f32 %v11832_v14, %v15553_v50  ;;  %v5926_v42 = vpop.f32.mrb[15].mxu1 }
 0x66f   : >> { %v15610_v22 = vadd.f32 %v17378_v56, %v12224_v18   ;;  %v12226_v11 = vadd.f32 %v15553_v50, %v5926_v42 }
 0x670   : >> { %v17377_v8 = vmov %v15606_v5  ;;  %v15614_v2 = vadd.f32 %v17380_v52, %v12225_v35  }
 0x671   : >> { %v17379_v4 = vmov %v15610_v22  ;;  %v15617_v6 = vadd.f32 %v17382_v48, %v12226_v11  }
 0x672   : >> { %v17381_v13 = vmov %v15614_v2  ;;  %v17397_v2 = vld [vmem:[#allocation47_spill] sm:$0xff] }
 0x673   : >> { %v17383_v60 = vmov %v15617_v6  ;;  %v11835_v47 = vpop.f32.mrb[16].mxu1  ;;  %v17387_v6 = vld [vmem:[#allocation48_spill] sm:$0xff] }
 0x674   : >> { %v12227_v26 = vadd.f32 %v11835_v47, %v15553_v50  ;;  %v5939_v59 = vpop.f32.mrb[17].mxu1  ;;  %v17405_v47 = vld [vmem:[#allocation42_spill] sm:$0xff] }
 0x675   : >> { %v12228_v19 = vadd.f32 %v15553_v50, %v5939_v59  ;;  %v11836_v21 = vpop.f32.mrb[18].mxu1 }
 0x676   : >> { %v15622_v55 = vadd.f32 %v13411_v55, %v12227_v26   ;;  %v12229_v51 = vadd.f32 %v11836_v21, %v15553_v50  ;;  %v5942_v23 = vpop.f32.mrb[19].mxu1 }
 0x677   : >> { %v15626_v46 = vadd.f32 %v17385_v41, %v12228_v19   ;;  %v12230_v0 = vadd.f32 %v15553_v50, %v5942_v23  ;;  %v17408_v23 = vld [vmem:[#allocation44_spill] sm:$0xff] }
 0x678   : >> { %v17384_v10 = vmov %v15622_v55  ;;  %v15630_v61 = vadd.f32 %v13407_v61, %v12229_v51  }
 0x679   : >> { %v15633_v0 = vadd.f32 %v17387_v6, %v12230_v0   ;;  %v17414_v6 = vld [vmem:[#allocation43_spill] sm:$0xff] }
 0x67a   : >> { %v17386_v28 = vmov %v15630_v61 }
 0x67b   : >> { %v17388_v12 = vmov %v15633_v0  ;;  %v11839_v24 = vpop.f32.mrb[20].mxu1  ;;  %v17411_v0 = vld [vmem:[#allocation41_spill] sm:$0xff] }
 0x67c   : >> { %v12231_v17 = vadd.f32 %v11839_v24, %v15553_v50  ;;  %v5955_v3 = vpop.f32.mrb[21].mxu1  ;;  %v17451_v24 = vmov %v17362_v37 }
 0x67d   : >> { %v12232_v55 = vadd.f32 %v15553_v50, %v5955_v3  ;;  %v11840_v15 = vpop.f32.mrb[22].mxu1  ;;  %v17445_v3 = vmov %v17372_v30 }
 0x67e   : >> { %v15638_v58 = vadd.f32 %v13395_v58, %v12231_v17   ;;  %v12233_v45 = vadd.f32 %v11840_v15, %v15553_v50  ;;  %v5958_v7 = vpop.f32.mrb[23].mxu1  ;;  %v17450_v15 = vmov %v17364_v40  ;;  %v17453_v17 = vld [vmem:[#allocation56_spill] sm:$0xff] }
 0x67f   : >> { %v15642_v9 = vadd.f32 %v13403_v9, %v12232_v55   ;;  %v12234_v61 = vadd.f32 %v15553_v50, %v5958_v7  ;;  %v17435_v55 = vmov %v17384_v10  ;;  %v13049_v17 = vld [vmem:[#allocation2 + $0x8] ss:$0 sps:$4 sm:$0x11] (%p15686_p12)  }
 0x680   : >> { %17389 = vst [vmem:[#allocation58_spill] sm:$0xff] %v15638_v58  ;;  %v17390_v62 = vmov %v15638_v58  ;;  %v15646_v53 = vadd.f32 %v13391_v53, %v12233_v45   ;;  %v17452_v45 = vld [vmem:[#allocation57_spill] sm:$0xff]  ;;  %v6839_v55 = vshll.u32 (%p15686_p12), %v13049_v17, 16 }
 0x681   : >> { %v17391_v1 = vmov %v15642_v9  ;;  %v15649_v20 = vadd.f32 %v13399_v20, %v12234_v61   ;;  %v17434_v61 = vmov %v17386_v28 }
 0x682   : >> { %17392 = vst [vmem:[#allocation59_spill] sm:$0xff] %v15646_v53  ;;  %v17393_v14 = vmov %v15646_v53 }
 0x683   : >> { %v17394_v38 = vmov %v15649_v20  ;;  %v11843_v22 = vpop.f32.mrb[24].mxu1  ;;  %v17402_v20 = vld [vmem:[#allocation46_spill] sm:$0xff] }
 0x684   : >> { %v12235_v33 = vadd.f32 %v11843_v22, %v15553_v50  ;;  %v5971_v32 = vpop.f32.mrb[25].mxu1  ;;  %v17441_v22 = vmov %v17379_v4 }
 0x685   : >> { %v12236_v58 = vadd.f32 %v15553_v50, %v5971_v32  ;;  %v11844_v34 = vpop.f32.mrb[26].mxu1  ;;  %v6841_v22 = vrot.slane (%p15686_p12), %v6839_v55, 1 }
 0x686   : >> { %v15654_v43 = vadd.f32 %v13379_v43, %v12235_v33   ;;  %v12237_v9 = vadd.f32 %v11844_v34, %v15553_v50  ;;  %v5974_v5 = vpop.f32.mrb[27].mxu1  ;;  %v17447_v33 = vmov %v17366_v29  ;;  %v17449_v34 = vmov %v17367_v16 }
 0x687   : >> { %v15658_v32 = vadd.f32 %v17397_v2, %v12236_v58   ;;  %v12238_v53 = vadd.f32 %v15553_v50, %v5974_v5  ;;  %v17431_v58 = vmov %v17390_v62  ;;  %v17438_v2 = vmov %v17381_v13  ;;  %v6615_v62 = vld [vmem:[#allocation2] sm:$0xf] (%p15686_p12)  ;;  %v6503_v33 = vld [vmem:[#allocation2 + $0xc] sm:$0xf] (%p15686_p12) }
 0x688   : >> { %17395 = vst [vmem:[#allocation60_spill] sm:$0xff] %v15654_v43  ;;  %v17396_v35 = vmov %v15654_v43  ;;  %v15662_v21 = vadd.f32 %v17399_v27, %v12237_v9   ;;  %v17433_v9 = vmov %v17391_v1  ;;  %v17439_v5 = vmov %v17377_v8 }
 0x689   : >> { %v17398_v42 = vmov %v15658_v32  ;;  %v15665_v7 = vadd.f32 %v17402_v20, %v12238_v53   ;;  %v17430_v53 = vmov %v17393_v14  ;;  %v17432_v20 = vmov %v17394_v38  ;;  %v6507_v5 = vld [vmem:[#allocation2 + $0x14] sm:$0x1] (%p15686_p12) }
 0x68a   : >> { %17400 = vst [vmem:[#allocation61_spill] sm:$0xff] %v15662_v21  ;;  %v17401_v56 = vmov %v15662_v21  ;;  %v17429_v32 = vmov %v17398_v42  ;;  %v17446_v27 = vmov %v17368_v39 }
 0x68b   : >> { %17403 = vst [vmem:[#allocation62_spill] sm:$0xff] %v15665_v7  ;;  %v11847_v31 = vpop.f32.mrb[28].mxu1  ;;  %v17427_v48 = vmov %v15665_v7 }
 0x68c   : >> { %v12239_v18 = vadd.f32 %v11847_v31, %v15553_v50  ;;  %v5987_v11 = vpop.f32.mrb[29].mxu1  ;;  %v17428_v7 = vmov %v17427_v48  ;;  %v17448_v31 = vmov %v17369_v54  ;;  %v15802_v48 = vpack.c.bf16 (%p15686_p12), %v17362_v37, %v17362_v37  ;;  %v13091_v37 = vld [vmem:[%s17198_s1 + $0x170] sm:$0xff] (%p15686_p12)  }
 0x68d   : >> { %v12240_v43 = vadd.f32 %v15553_v50, %v5987_v11  ;;  %v11848_v52 = vpop.f32.mrb[30].mxu1  ;;  %v17442_v11 = vmov %v17373_v57 }
 0x68e   : >> { %v15670_v51 = vadd.f32 %v17405_v47, %v12239_v18   ;;  %v12241_v26 = vadd.f32 %v11848_v52, %v15553_v50  ;;  %v5990_v19 = vpop.f32.mrb[31].mxu1  ;;  %v17443_v18 = vmov %v17370_v44  ;;  %2145 = sbr.rel (!%p15686_p12) target bundleno = 548 (0x224), region = 93  ;;  %v6616_v47 = vld [vmem:[#allocation2 + $0x4] sm:$0xf] (%p15686_p12) }
 0x68f   : >> { %v15674_v41 = vadd.f32 %v17408_v23, %v12240_v43   ;;  %v12242_v21 = vadd.f32 %v15553_v50, %v5990_v19  ;;  %v17426_v43 = vmov %v17396_v35  ;;  %v17437_v50 = vmov %v15626_v46  ;;  %v6669_v19 = vld [vmem:[#allocation2] sm:$0xe] (%p15686_p12) }
 0x690   : >> { %17406 = vst [vmem:[#allocation63_spill] sm:$0xff] %v15670_v51  ;;  %v15678_v23 = vadd.f32 %v17411_v0, %v12241_v26   ;;  %v17420_v59 = vmov %v15670_v51  ;;  %v17436_v0 = vmov %v17388_v12  ;;  %v17444_v26 = vmov %v17375_v36 }
 0x691   : >> { %17409 = vst [vmem:[#allocation64_spill] sm:$0xff] %v15674_v41  ;;  %v17410_v25 = vmov %v15674_v41  ;;  %v15681_v52 = vadd.f32 %v17414_v6, %v12242_v21   ;;  %v17421_v51 = vmov %v17420_v59  ;;  %v17425_v21 = vmov %v17401_v56  ;;  %v17456_v56 = vld [vmem:[#allocation57_spill] sm:$0xff] (%p15686_p12) }
 0x692   : >> { %17412 = vst [vmem:[#allocation65_spill] sm:$0xff] %v15678_v23  ;;  %v17418_v49 = vmov %v15678_v23  ;;  %v17424_v41 = vmov %v17410_v25  ;;  %v17440_v6 = vmov %v17383_v60  ;;  %v11126_v35 = vpack.c.bf16 (%p15686_p12), %v17456_v56, %v17456_v56 }
 0x693   : >> { %17415 = vst [vmem:[#allocation66_spill] sm:$0xff] %v15681_v52  ;;  %v17419_v23 = vmov %v17418_v49  ;;  %v17422_v63 = vmov %v15681_v52  ;;  %v17455_v49 = vld [vmem:[#allocation56_spill] sm:$0xff] (%p15686_p12)  ;;  %v11130_v25 = vpack.c.bf16 (%p15686_p12), %v17369_v54, %v17369_v54  ;;  %v10803_v14 = vcombine.low (%p15686_p12), %v6669_v19, %v6616_v47 }
 0x694   : >> { %v17423_v52 = vmov %v17422_v63  ;;  %v11125_v59 = vpack.c.bf16 (%p15686_p12), %v17455_v49, %v17455_v49  ;;  %v11129_v63 = vpack.c.bf16 (%p15686_p12), %v17367_v16, %v17367_v16  ;;  %v15806_v50 = vpack.c.bf16 (%p15686_p12), %v17364_v40, %v17364_v40  ;;  %v13090_v16 = vld [vmem:[%s17198_s1 + $0x168] sm:$0xff] (%p15686_p12)  }
 0x695   : > { %v15810_v49 = vpack.c.bf16 %v17372_v30, %v17372_v30  ;;  %v15815_v54 = vcombine.low %v6615_v62, %v6616_v47  ;;  %v6192_v24 = vshrl.u32 %v11126_v35, 16  ;;  %v7137_v3 = vrot.slane %v10803_v14, 1  ;;  %11849 = vmatprep.subr.bf16.mxu0 %v13090_v16  ;;  %v6521_v47 = vld [vmem:[#allocation2 + $0x2c] sm:$0x1] }
 0x696   : > { %v6184_v51 = vshrl.u32 %v11125_v59, 16  ;;  %v6187_v41 = vshll.u32 %v11125_v59, 16  ;;  %v7138_v40 = vrot.slane %v13049_v17, 1  ;;  %v6195_v15 = vshll.u32 %v11126_v35, 16  ;;  %11850 = vmatpush3.bf16.msra.mxu0 %v13090_v16  ;;  %v13092_v59 = vld [vmem:[%s17198_s1 + $0x178] sm:$0xff]  }
 0x697   : > { %v6832_v30 = vshrl.u32 %v15815_v54, 16  ;;  %v6834_v45 = vshll.u32 %v15815_v54, 16  ;;  %v6194_v61 = vrot.slane %v6192_v24, 7  ;;  %v6218_v32 = vshrl.u32 %v11129_v63, 16  ;;  %11851 = vmatprep.subr.bf16.mxu0 %v13091_v37 }
 0x698   : > { %v6186_v7 = vrot.slane %v6184_v51, 7  ;;  %v7139_v62 = vsel %vm1300_vm2, %v7137_v3, %v7138_v40  ;;  %v6221_v58 = vshll.u32 %v11129_v63, 16  ;;  %v6226_v27 = vshrl.u32 %v11130_v25, 16  ;;  %v6517_v63 = vld [vmem:[#allocation2 + $0x24] sm:$0xf] }
 0x699   : > { %7191 = vrot.lane.b32.xlu1 %v7139_v62, %s13490_s17  ;;  %v6836_v14 = vrot.slane %v6834_v45, 1  ;;  %v6197_v9 = vor.u32 %v6195_v15, %v6194_v61  ;;  %v6199_v2 = vrot.slane %v6194_v61, 4  ;;  %v6220_v53 = vrot.slane %v6218_v32, 7  ;;  %v6510_v3 = vld [vmem:[#allocation2 + $0x18] sm:$0xf] }
 0x69a   : > { %v6189_v34 = vor.u32 %v6187_v41, %v6186_v7  ;;  %v6190_v35 = vrot.slane %v6186_v7, 4  ;;  %v6229_v56 = vshll.u32 %v11130_v25, 16  ;;  %v6201_v52 = vshrl.u32 %v15802_v48, 16  ;;  %11852 = vmatpush3.bf16.msra.mxu0 %v13091_v37  ;;  %v6514_v7 = vld [vmem:[#allocation2 + $0x20] sm:$0x1] }
 0x69b   : > { %v6837_v20 = vor.u32 %v6836_v14, %v6832_v30  ;;  %v6508_v25 = vsel %vm13677_vm11, %v6199_v2, %v6507_v5  ;;  %v6223_v23 = vor.u32 %v6221_v58, %v6220_v53  ;;  %v6224_v21 = vrot.slane %v6220_v53, 4  ;;  %11853 = vmatprep.subr.bf16.mxu0 %v13092_v59  ;;  %v6531_v14 = vld [vmem:[#allocation2 + $0x3c] sm:$0xf] }
 0x69c   : > { %v6198_v18 = vsel %vm13660_vm7, %v6190_v35, %v6197_v9  ;;  %v6504_v43 = vsel %vm13667_vm10, %v6189_v34, %v6503_v33  ;;  %v6228_v0 = vrot.slane %v6226_v27, 7  ;;  %6509 = vst [vmem:[#allocation2 + $0x14] sm:$0x1] %v6508_v25  ;;  %v6203_v19 = vrot.slane %v6201_v52, 7 }
 0x69d   : > { %6505 = vst [vmem:[#allocation2 + $0xc] sm:$0xf] %v6504_v43  ;;  %6506 = vst.msk [vmem:[#allocation2 + $0x10] sm:$0xf] %vm659_vm6, %v6198_v18  ;;  %v6842_v6 = vsel %vm993_vm3, %v6837_v20, %v6841_v22  ;;  %v6204_v17 = vshll.u32 %v15802_v48, 16  ;;  %v6209_v16 = vshrl.u32 %v15806_v50, 16  ;;  %v6518_v24 = vsel %vm13667_vm10, %v6223_v23, %v6517_v63 }
 0x69e   : > { %7047 = vrot.lane.b32.xlu0 %v6842_v6, %s13491_s9  ;;  %v6231_v51 = vor.u32 %v6229_v56, %v6228_v0  ;;  %v6233_v41 = vrot.slane %v6228_v0, 4  ;;  %v6212_v37 = vshll.u32 %v15806_v50, 16  ;;  %6519 = vst [vmem:[#allocation2 + $0x24] sm:$0xf] %v6518_v24  ;;  %v6207_v55 = vrot.slane %v6203_v19, 4  ;;  %11854 = vmatpush3.bf16.msra.mxu0 %v13092_v59 }
 0x69f   : > { %v6206_v40 = vor.u32 %v6204_v17, %v6203_v19  ;;  %v6211_v15 = vrot.slane %v6209_v16, 7  ;;  %v11134_v48 = vpack.c.bf16 %v17375_v36, %v17375_v36  ;;  %v6252_v61 = vshrl.u32 %v15810_v49, 16 }
 0x6a0   : > { %v6232_v30 = vsel %vm13660_vm7, %v6224_v21, %v6231_v51  ;;  %v6522_v45 = vsel %vm13677_vm11, %v6233_v41, %v6521_v47  ;;  %v6255_v50 = vshll.u32 %v15810_v49, 16  ;;  %v11131_v34 = vpack.c.bf16 %v17366_v29, %v17366_v29  ;;  %v6535_v51 = vld [vmem:[#allocation2 + $0x44] sm:$0x1] }
 0x6a1   : > { %6520 = vst.msk [vmem:[#allocation2 + $0x28] sm:$0xf] %vm659_vm6, %v6232_v30  ;;  %6523 = vst [vmem:[#allocation2 + $0x2c] sm:$0x1] %v6522_v45  ;;  %v6214_v62 = vor.u32 %v6212_v37, %v6211_v15  ;;  %v6216_v22 = vrot.slane %v6211_v15, 4  ;;  %v6511_v36 = vsel %vm13667_vm10, %v6206_v40, %v6510_v3  ;;  %v6260_v33 = vshrl.u32 %v11134_v48, 16 }
 0x6a2   : > { %6512 = vst [vmem:[#allocation2 + $0x18] sm:$0xf] %v6511_v36  ;;  %v6254_v32 = vrot.slane %v6252_v61, 7  ;;  %v6263_v58 = vshll.u32 %v11134_v48, 16  ;;  %v15857_v35 = vpack.c.bf16 %v17368_v39, %v17368_v39  ;;  %v15865_v27 = vpack.c.bf16 %v17379_v4, %v17379_v4  ;;  %v13093_v36 = vld [vmem:[%s17198_s1 + $0x180] sm:$0xff]  }
 0x6a3   : > { %v6215_v2 = vsel %vm13660_vm7, %v6207_v55, %v6214_v62  ;;  %v6515_v53 = vsel %vm13677_vm11, %v6216_v22, %v6514_v7  ;;  %v15869_v29 = vpack.c.bf16 %v17383_v60, %v17383_v60  ;;  %v13052_v56 = vld [vmem:[#allocation2 + $0x14] ss:$0 sps:$4 sm:$0x11]   ;;  %v6262_v63 = vrot.slane %v6260_v33, 7  ;;  %11887 = vmatprep.subr.bf16.mxu0 %v13093_v36 }
 0x6a4   : > { %v6618_v49 = vld [vmem:[#allocation2 + $0x10] sm:$0xf]  ;;  %v6670_v9 = vld [vmem:[#allocation2 + $0xc] sm:$0xe]  ;;  %6513 = vst.msk [vmem:[#allocation2 + $0x1c] sm:$0xf] %vm659_vm6, %v6215_v2  ;;  %v6257_v18 = vor.u32 %v6255_v50, %v6254_v32  ;;  %v15882_v40 = vpack.c.bf16 %v17370_v44, %v17370_v44 }
 0x6a5   : > { %v6617_v5 = vld [vmem:[#allocation2 + $0xc] sm:$0xf]  ;;  %v10804_v39 = vcombine.low %v6670_v9, %v6618_v49  ;;  %6516 = vst [vmem:[#allocation2 + $0x20] sm:$0x1] %v6515_v53  ;;  %v6258_v43 = vrot.slane %v6254_v32, 4  ;;  %v6235_v52 = vshrl.u32 %v11131_v34, 16  ;;  %v6265_v19 = vor.u32 %v6263_v58, %v6262_v63 }
 0x6a6   : > { %v15871_v20 = vcombine.low %v6617_v5, %v6618_v49  ;;  %v6238_v59 = vshll.u32 %v11131_v34, 16  ;;  %v6243_v25 = vshrl.u32 %v15857_v35, 16  ;;  %v7141_v23 = vrot.slane %v13052_v56, 1  ;;  %v6621_v0 = vld [vmem:[#allocation2 + $0x24] sm:$0xf] }
 0x6a7   : > { %v7140_v4 = vrot.slane %v10804_v39, 1  ;;  %v6851_v6 = vshll.u32 %v13052_v56, 16  ;;  %v6672_v47 = vld [vmem:[#allocation2 + $0x24] sm:$0xe]  ;;  %v6267_v17 = vrot.slane %v6262_v63, 4  ;;  %v6532_v16 = vsel %vm13667_vm10, %v6257_v18, %v6531_v14 }
 0x6a8   : > { %v6844_v21 = vshrl.u32 %v15871_v20, 16  ;;  %v6846_v60 = vshll.u32 %v15871_v20, 16  ;;  %v6622_v37 = vld [vmem:[#allocation2 + $0x28] sm:$0xf]  ;;  %6533 = vst [vmem:[#allocation2 + $0x3c] sm:$0xf] %v6532_v16  ;;  %v6266_v7 = vsel %vm13660_vm7, %v6258_v43, %v6265_v19 }
 0x6a9   : > { %v7142_v41 = vsel %vm1300_vm2, %v7140_v4, %v7141_v23  ;;  %v6237_v3 = vrot.slane %v6235_v52, 7  ;;  %v6853_v55 = vrot.slane %v6851_v6, 1  ;;  %v15885_v15 = vcombine.low %v6621_v0, %v6622_v37  ;;  %v13056_v48 = vld [vmem:[#allocation2 + $0x2c] ss:$0 sps:$4 sm:$0x11]  }
 0x6aa   : > { %v6848_v24 = vrot.slane %v6846_v60, 1  ;;  %7193 = vrot.lane.b32.xlu1 %v7142_v41, %s13490_s17  ;;  %v6619_v30 = vld [vmem:[#allocation2 + $0x18] sm:$0xf]  ;;  %v10806_v45 = vcombine.low %v6672_v47, %v6622_v37  ;;  %6534 = vst.msk [vmem:[#allocation2 + $0x40] sm:$0xf] %vm659_vm6, %v6266_v7  ;;  %v6536_v62 = vsel %vm13677_vm11, %v6267_v17, %v6535_v51  ;;  %v6875_v58 = vshll.u32 %v13056_v48, 16 }
 0x6ab   : > { %v6671_v50 = vld [vmem:[#allocation2 + $0x18] sm:$0xe]  ;;  %v6240_v44 = vor.u32 %v6238_v59, %v6237_v3  ;;  %v6241_v22 = vrot.slane %v6237_v3, 4  ;;  %v6868_v33 = vshrl.u32 %v15885_v15, 16  ;;  %v6870_v32 = vshll.u32 %v15885_v15, 16 }
 0x6ac   : > { %v6849_v61 = vor.u32 %v6848_v24, %v6844_v21  ;;  %v6620_v14 = vld [vmem:[#allocation2 + $0x1c] sm:$0xf]  ;;  %v7146_v34 = vrot.slane %v10806_v45, 1  ;;  %6537 = vst [vmem:[#allocation2 + $0x44] sm:$0x1] %v6536_v62  ;;  %v7147_v2 = vrot.slane %v13056_v48, 1 }
 0x6ad   : > { %v15898_v9 = vcombine.low %v6619_v30, %v6620_v14  ;;  %v13058_v5 = vld [vmem:[#allocation2 + $0x20] ss:$0 sps:$4 sm:$0x11]   ;;  %v10805_v53 = vcombine.low %v6671_v50, %v6620_v14  ;;  %v6872_v56 = vrot.slane %v6870_v32, 1  ;;  %v6877_v39 = vrot.slane %v6875_v58, 1 }
 0x6ae   : > { %v6854_v49 = vsel %vm993_vm3, %v6849_v61, %v6853_v55  ;;  %v6245_v18 = vrot.slane %v6243_v25, 7  ;;  %v6246_v43 = vshll.u32 %v15857_v35, 16  ;;  %v6524_v63 = vld [vmem:[#allocation2 + $0x30] sm:$0xf]  ;;  %v6863_v4 = vshll.u32 %v13058_v5, 16 }
 0x6af   : > { %7049 = vrot.lane.b32.xlu0 %v6854_v49, %s13491_s9  ;;  %v6856_v52 = vshrl.u32 %v15898_v9, 16  ;;  %v6858_v59 = vshll.u32 %v15898_v9, 16  ;;  %v7148_v23 = vsel %vm1300_vm2, %v7146_v34, %v7147_v2  ;;  %v6528_v21 = vld [vmem:[#allocation2 + $0x38] sm:$0x1]  ;;  %v6873_v60 = vor.u32 %v6872_v56, %v6868_v33  ;;  %v6625_v47 = vld [vmem:[#allocation2 + $0x3c] sm:$0xf] }
 0x6b0   : > { %v7143_v0 = vrot.slane %v10805_v53, 1  ;;  %v7144_v6 = vrot.slane %v13058_v5, 1  ;;  %v6248_v19 = vor.u32 %v6246_v43, %v6245_v18  ;;  %v6674_v17 = vld [vmem:[#allocation2 + $0x3c] sm:$0xe]  ;;  %v6865_v51 = vrot.slane %v6863_v4, 1 }
 0x6b1   : > { %v6860_v16 = vrot.slane %v6858_v59, 1  ;;  %v6250_v25 = vrot.slane %v6245_v18, 4  ;;  %v6525_v35 = vsel %vm13667_vm10, %v6240_v44, %v6524_v63  ;;  %v6878_v41 = vsel %vm993_vm3, %v6873_v60, %v6877_v39  ;;  %v6626_v37 = vld [vmem:[#allocation2 + $0x40] sm:$0xf]  ;;  %v6545_v36 = vld [vmem:[#allocation2 + $0x54] sm:$0xf] }
 0x6b2   : > { %v7145_v24 = vsel %vm1300_vm2, %v7143_v0, %v7144_v6  ;;  %v6249_v3 = vsel %vm13660_vm7, %v6241_v22, %v6248_v19  ;;  %6526 = vst [vmem:[#allocation2 + $0x30] sm:$0xf] %v6525_v35  ;;  %v6286_v55 = vshrl.u32 %v15865_v27, 16  ;;  %7053 = vrot.lane.b32.xlu1 %v6878_v41, %s13491_s9  ;;  %v15913_v30 = vcombine.low %v6625_v47, %v6626_v37  ;;  %v6538_v6 = vld [vmem:[#allocation2 + $0x48] sm:$0xf] }
 0x6b3   : > { %v6861_v48 = vor.u32 %v6860_v16, %v6856_v52  ;;  %v13061_v45 = vld [vmem:[#allocation2 + $0x44] ss:$0 sps:$4 sm:$0x11]   ;;  %6527 = vst.msk [vmem:[#allocation2 + $0x34] sm:$0xf] %vm659_vm6, %v6249_v3  ;;  %v6529_v7 = vsel %vm13677_vm11, %v6250_v25, %v6528_v21  ;;  %v10808_v61 = vcombine.low %v6674_v17, %v6626_v37  ;;  %v6289_v62 = vshll.u32 %v15865_v27, 16 }
 0x6b4   : > { %6530 = vst [vmem:[#allocation2 + $0x38] sm:$0x1] %v6529_v7  ;;  %v6288_v50 = vrot.slane %v6286_v55, 7  ;;  %v6294_v44 = vshrl.u32 %v15869_v29, 16  ;;  %v6297_v22 = vshll.u32 %v15869_v29, 16  ;;  %v6892_v32 = vshrl.u32 %v15913_v30, 16 }
 0x6b5   : > { %v6866_v33 = vsel %vm993_vm3, %v6861_v48, %v6865_v51  ;;  %v6894_v58 = vshll.u32 %v15913_v30, 16  ;;  %v6899_v14 = vshll.u32 %v13061_v45, 16  ;;  %v7152_v34 = vrot.slane %v10808_v61, 1  ;;  %v6549_v29 = vld [vmem:[#allocation2 + $0x5c] sm:$0x1] }
 0x6b6   : > { %7051 = vrot.lane.b32.xlu0 %v6866_v33, %s13491_s9  ;;  %v7153_v49 = vrot.slane %v13061_v45, 1  ;;  %v6291_v5 = vor.u32 %v6289_v62, %v6288_v50  ;;  %v6292_v2 = vrot.slane %v6288_v50, 4  ;;  %7197 = vrot.lane.b32.xlu1 %v7148_v23, %s13490_s17  ;;  %v6296_v56 = vrot.slane %v6294_v44, 7  ;;  %v6542_v7 = vld [vmem:[#allocation2 + $0x50] sm:$0x1] }
 0x6b7   : > { %v6896_v27 = vrot.slane %v6894_v58, 1  ;;  %v6901_v53 = vrot.slane %v6899_v14, 1  ;;  %v11136_v39 = vpack.c.bf16 %v17373_v57, %v17373_v57  ;;  %v6269_v63 = vshrl.u32 %v15882_v40, 16 }
 0x6b8   : > { %v7154_v18 = vsel %vm1300_vm2, %v7152_v34, %v7153_v49  ;;  %v6546_v43 = vsel %vm13667_vm10, %v6291_v5, %v6545_v36  ;;  %v6272_v52 = vshll.u32 %v15882_v40, 16  ;;  %v6299_v23 = vor.u32 %v6297_v22, %v6296_v56 }
 0x6b9   : > { %v6897_v59 = vor.u32 %v6896_v27, %v6892_v32  ;;  %v6623_v4 = vld [vmem:[#allocation2 + $0x30] sm:$0xf]  ;;  %v6301_v60 = vrot.slane %v6296_v56, 4  ;;  %6547 = vst [vmem:[#allocation2 + $0x54] sm:$0xf] %v6546_v43  ;;  %v6277_v0 = vshrl.u32 %v11136_v39, 16  ;;  %v11141_v17 = vpack.c.bf16 %v15626_v46, %v15626_v46 }
 0x6ba   : > { %v6673_v21 = vld [vmem:[#allocation2 + $0x30] sm:$0xe]  ;;  %7195 = vrot.lane.b32.xlu0 %v7145_v24, %s13490_s17  ;;  %v6624_v57 = vld [vmem:[#allocation2 + $0x34] sm:$0xf]  ;;  %v6271_v47 = vrot.slane %v6269_v63, 7  ;;  %v6280_v19 = vshll.u32 %v11136_v39, 16  ;;  %v11142_v16 = vpack.c.bf16 %v17388_v12, %v17388_v12  ;;  %v6300_v41 = vsel %vm13660_vm7, %v6292_v2, %v6299_v23 }
 0x6bb   : > { %v6902_v40 = vsel %vm993_vm3, %v6897_v59, %v6901_v53  ;;  %v15939_v51 = vcombine.low %v6623_v4, %v6624_v57  ;;  %v13063_v25 = vld [vmem:[#allocation2 + $0x38] ss:$0 sps:$4 sm:$0x11]   ;;  %v10807_v35 = vcombine.low %v6673_v21, %v6624_v57  ;;  %6548 = vst.msk [vmem:[#allocation2 + $0x58] sm:$0xf] %vm659_vm6, %v6300_v41  ;;  %v6550_v24 = vsel %vm13677_vm11, %v6301_v60, %v6549_v29 }
 0x6bc   : > { %7057 = vrot.lane.b32.xlu1 %v6902_v40, %s13491_s9  ;;  %v6274_v46 = vor.u32 %v6272_v52, %v6271_v47  ;;  %v6275_v37 = vrot.slane %v6271_v47, 4  ;;  %v6279_v3 = vrot.slane %v6277_v0, 7  ;;  %v6887_v48 = vshll.u32 %v13063_v25, 16  ;;  %6551 = vst [vmem:[#allocation2 + $0x5c] sm:$0x1] %v6550_v24 }
 0x6bd   : > { %v6880_v12 = vshrl.u32 %v15939_v51, 16  ;;  %v6882_v55 = vshll.u32 %v15939_v51, 16  ;;  %v7149_v45 = vrot.slane %v10807_v35, 1  ;;  %v7150_v61 = vrot.slane %v13063_v25, 1  ;;  %v6559_v27 = vld [vmem:[#allocation2 + $0x6c] sm:$0xf] }
 0x6be   : > { %v6282_v50 = vor.u32 %v6280_v19, %v6279_v3  ;;  %v6284_v62 = vrot.slane %v6279_v3, 4  ;;  %v6539_v44 = vsel %vm13667_vm10, %v6274_v46, %v6538_v6  ;;  %v6889_v36 = vrot.slane %v6887_v48, 1  ;;  %v6563_v43 = vld [vmem:[#allocation2 + $0x74] sm:$0x1] }
 0x6bf   : > { %v6884_v22 = vrot.slane %v6882_v55, 1  ;;  %6540 = vst [vmem:[#allocation2 + $0x48] sm:$0xf] %v6539_v44  ;;  %v6320_v33 = vshrl.u32 %v11141_v17, 16  ;;  %v6323_v32 = vshll.u32 %v11141_v17, 16  ;;  %v7151_v58 = vsel %vm1300_vm2, %v7149_v45, %v7150_v61 }
 0x6c0   : > { %7201 = vrot.lane.b32.xlu1 %v7154_v18, %s13490_s17  ;;  %v6629_v14 = vld [vmem:[#allocation2 + $0x54] sm:$0xf]  ;;  %v6283_v34 = vsel %vm13660_vm7, %v6275_v37, %v6282_v50  ;;  %v6543_v49 = vsel %vm13677_vm11, %v6284_v62, %v6542_v7  ;;  %v6328_v2 = vshrl.u32 %v11142_v16, 16  ;;  %v6331_v29 = vshll.u32 %v11142_v16, 16  ;;  %v6552_v16 = vld [vmem:[#allocation2 + $0x60] sm:$0xf] }
 0x6c1   : > { %v6676_v5 = vld [vmem:[#allocation2 + $0x54] sm:$0xe]  ;;  %v6885_v53 = vor.u32 %v6884_v22, %v6880_v12  ;;  %6541 = vst.msk [vmem:[#allocation2 + $0x4c] sm:$0xf] %vm659_vm6, %v6283_v34  ;;  %6544 = vst [vmem:[#allocation2 + $0x50] sm:$0x1] %v6543_v49  ;;  %v11139_v39 = vpack.c.bf16 %v17377_v8, %v17377_v8  ;;  %v11140_v63 = vpack.c.bf16 %v17381_v13, %v17381_v13 }
 0x6c2   : > { %v6322_v56 = vrot.slane %v6320_v33, 7  ;;  %v6330_v18 = vrot.slane %v6328_v2, 7  ;;  %v15964_v52 = vpack.c.bf16 %v17391_v1, %v17391_v1  ;;  %v15968_v59 = vpack.c.bf16 %v17394_v38, %v17394_v38  ;;  %v6630_v21 = vld [vmem:[#allocation2 + $0x58] sm:$0xf] }
 0x6c3   : > { %v6890_v4 = vsel %vm993_vm3, %v6885_v53, %v6889_v36  ;;  %v6303_v0 = vshrl.u32 %v11139_v39, 16  ;;  %v15972_v8 = vcombine.low %v6629_v14, %v6630_v21  ;;  %v13066_v6 = vld [vmem:[#allocation2 + $0x5c] ss:$0 sps:$4 sm:$0x11]   ;;  %v10810_v13 = vcombine.low %v6676_v5, %v6630_v21  ;;  %v17460_v21 = vld [vmem:[#allocation62_spill] sm:$0xff] }
 0x6c4   : > { %v6325_v23 = vor.u32 %v6323_v32, %v6322_v56  ;;  %v6326_v60 = vrot.slane %v6322_v56, 4  ;;  %7055 = vrot.lane.b32.xlu0 %v6890_v4, %s13491_s9  ;;  %v6333_v57 = vor.u32 %v6331_v29, %v6330_v18  ;;  %v6335_v47 = vrot.slane %v6330_v18, 4  ;;  %v6556_v32 = vld [vmem:[#allocation2 + $0x68] sm:$0x1] }
 0x6c5   : > { %v6305_v19 = vrot.slane %v6303_v0, 7  ;;  %v6306_v38 = vshll.u32 %v11139_v39, 16  ;;  %v6311_v17 = vshrl.u32 %v11140_v63, 16  ;;  %v6916_v40 = vshrl.u32 %v15972_v8, 16 }
 0x6c6   : > { %v6560_v1 = vsel %vm13667_vm10, %v6325_v23, %v6559_v27  ;;  %v6918_v25 = vshll.u32 %v15972_v8, 16  ;;  %v6923_v35 = vshll.u32 %v13066_v6, 16  ;;  %v6627_v41 = vld [vmem:[#allocation2 + $0x48] sm:$0xf]  ;;  %v7158_v24 = vrot.slane %v10810_v13, 1 }
 0x6c7   : > { %6561 = vst [vmem:[#allocation2 + $0x6c] sm:$0xf] %v6560_v1  ;;  %v7159_v46 = vrot.slane %v13066_v6, 1  ;;  %v6675_v37 = vld [vmem:[#allocation2 + $0x48] sm:$0xe]  ;;  %v6334_v3 = vsel %vm13660_vm7, %v6326_v60, %v6333_v57  ;;  %v6564_v12 = vsel %vm13677_vm11, %v6335_v47, %v6563_v43  ;;  %v6308_v55 = vor.u32 %v6306_v38, %v6305_v19 }
 0x6c8   : > { %7199 = vrot.lane.b32.xlu0 %v7151_v58, %s13490_s17  ;;  %v6920_v48 = vrot.slane %v6918_v25, 1  ;;  %v6925_v45 = vrot.slane %v6923_v35, 1  ;;  %v6628_v7 = vld [vmem:[#allocation2 + $0x4c] sm:$0xf]  ;;  %6562 = vst.msk [vmem:[#allocation2 + $0x70] sm:$0xf] %vm659_vm6, %v6334_v3  ;;  %v15986_v61 = vpack.c.bf16 %v17384_v10, %v17384_v10  ;;  %v15990_v50 = vpack.c.bf16 %v17386_v28, %v17386_v28 }
 0x6c9   : > { %6565 = vst [vmem:[#allocation2 + $0x74] sm:$0x1] %v6564_v12  ;;  %v15992_v62 = vcombine.low %v6627_v41, %v6628_v7  ;;  %v13068_v44 = vld [vmem:[#allocation2 + $0x50] ss:$0 sps:$4 sm:$0x11]   ;;  %v7160_v22 = vsel %vm1300_vm2, %v7158_v24, %v7159_v46  ;;  %v10809_v36 = vcombine.low %v6675_v37, %v6628_v7  ;;  %v6309_v33 = vrot.slane %v6305_v19, 4 }
 0x6ca   : > { %v6921_v58 = vor.u32 %v6920_v48, %v6916_v40  ;;  %v6313_v14 = vrot.slane %v6311_v17, 7  ;;  %v6314_v34 = vshll.u32 %v11140_v63, 16  ;;  %v6553_v49 = vsel %vm13667_vm10, %v6308_v55, %v6552_v16  ;;  %v17461_v19 = vld [vmem:[#allocation58_spill] sm:$0xff] }
 0x6cb   : > { %v6904_v10 = vshrl.u32 %v15992_v62, 16  ;;  %v6906_v5 = vshll.u32 %v15992_v62, 16  ;;  %v6911_v28 = vshll.u32 %v13068_v44, 16  ;;  %v7155_v2 = vrot.slane %v10809_v36, 1  ;;  %6554 = vst [vmem:[#allocation2 + $0x60] sm:$0xf] %v6553_v49 }
 0x6cc   : > { %v6926_v27 = vsel %vm993_vm3, %v6921_v58, %v6925_v45  ;;  %v7156_v53 = vrot.slane %v13068_v44, 1  ;;  %v6316_v56 = vor.u32 %v6314_v34, %v6313_v14  ;;  %v6318_v29 = vrot.slane %v6313_v14, 4  ;;  %v6573_v41 = vld [vmem:[#allocation2 + $0x84] sm:$0xf] }
 0x6cd   : > { %7061 = vrot.lane.b32.xlu1 %v6926_v27, %s13491_s9  ;;  %v6908_v39 = vrot.slane %v6906_v5, 1  ;;  %v6913_v18 = vrot.slane %v6911_v28, 1  ;;  %v16003_v4 = vpack.c.bf16 %v17398_v42, %v17398_v42  ;;  %v16007_v23 = vpack.c.bf16 %v17460_v21, %v17460_v21 }
 0x6ce   : > { %v6633_v43 = vld [vmem:[#allocation2 + $0x6c] sm:$0xf]  ;;  %v7157_v60 = vsel %vm1300_vm2, %v7155_v2, %v7156_v53  ;;  %v6317_v0 = vsel %vm13660_vm7, %v6309_v33, %v6316_v56  ;;  %v6557_v6 = vsel %vm13677_vm11, %v6318_v29, %v6556_v32  ;;  %v6354_v13 = vshrl.u32 %v15964_v52, 16  ;;  %v6566_v32 = vld [vmem:[#allocation2 + $0x78] sm:$0xf] }
 0x6cf   : > { %v6678_v63 = vld [vmem:[#allocation2 + $0x6c] sm:$0xe]  ;;  %v6909_v57 = vor.u32 %v6908_v39, %v6904_v10  ;;  %v6634_v47 = vld [vmem:[#allocation2 + $0x70] sm:$0xf]  ;;  %6555 = vst.msk [vmem:[#allocation2 + $0x64] sm:$0xf] %vm659_vm6, %v6317_v0  ;;  %v16020_v38 = vpack.c.bf16 %v17461_v19, %v17461_v19 }
 0x6d0   : > { %6558 = vst [vmem:[#allocation2 + $0x68] sm:$0x1] %v6557_v6  ;;  %v6357_v42 = vshll.u32 %v15964_v52, 16  ;;  %v6362_v1 = vshrl.u32 %v15968_v59, 16  ;;  %v16022_v17 = vcombine.low %v6633_v43, %v6634_v47  ;;  %v10812_v40 = vcombine.low %v6678_v63, %v6634_v47  ;;  %v6577_v52 = vld [vmem:[#allocation2 + $0x8c] sm:$0x1] }
 0x6d1   : > { %v13071_v16 = vld [vmem:[#allocation2 + $0x74] ss:$0 sps:$4 sm:$0x11]   ;;  %v6356_v25 = vrot.slane %v6354_v13, 7  ;;  %v6365_v35 = vshll.u32 %v15968_v59, 16  ;;  %v6914_v24 = vsel %vm993_vm3, %v6909_v57, %v6913_v18  ;;  %7205 = vrot.lane.b32.xlu1 %v7160_v22, %s13490_s17  ;;  %v6337_v37 = vshrl.u32 %v15986_v61, 16 }
 0x6d2   : > { %v6364_v46 = vrot.slane %v6362_v1, 7  ;;  %v6340_v3 = vshll.u32 %v15986_v61, 16  ;;  %7059 = vrot.lane.b32.xlu0 %v6914_v24, %s13491_s9  ;;  %v6940_v12 = vshrl.u32 %v16022_v17, 16  ;;  %v6942_v55 = vshll.u32 %v16022_v17, 16  ;;  %v6631_v45 = vld [vmem:[#allocation2 + $0x60] sm:$0xf] }
 0x6d3   : > { %v6947_v48 = vshll.u32 %v13071_v16, 16  ;;  %v7164_v59 = vrot.slane %v10812_v40, 1  ;;  %v7165_v7 = vrot.slane %v13071_v16, 1  ;;  %v6677_v44 = vld [vmem:[#allocation2 + $0x60] sm:$0xe]  ;;  %v6359_v36 = vor.u32 %v6357_v42, %v6356_v25 }
 0x6d4   : > { %v6360_v33 = vrot.slane %v6356_v25, 4  ;;  %v6367_v22 = vor.u32 %v6365_v35, %v6364_v46  ;;  %v6944_v58 = vrot.slane %v6942_v55, 1  ;;  %v6369_v34 = vrot.slane %v6364_v46, 4  ;;  %v6570_v0 = vld [vmem:[#allocation2 + $0x80] sm:$0x1] }
 0x6d5   : > { %v6949_v14 = vrot.slane %v6947_v48, 1  ;;  %v6339_v49 = vrot.slane %v6337_v37, 7  ;;  %v7166_v61 = vsel %vm1300_vm2, %v7164_v59, %v7165_v7  ;;  %v6574_v5 = vsel %vm13667_vm10, %v6359_v36, %v6573_v41  ;;  %v17462_v7 = vld [vmem:[#allocation59_spill] sm:$0xff] }
 0x6d6   : > { %v6368_v10 = vsel %vm13660_vm7, %v6360_v33, %v6367_v22  ;;  %v6345_v28 = vshrl.u32 %v15990_v50, 16  ;;  %7203 = vrot.lane.b32.xlu0 %v7157_v60, %s13490_s17  ;;  %v6945_v2 = vor.u32 %v6944_v58, %v6940_v12  ;;  %v6632_v27 = vld [vmem:[#allocation2 + $0x64] sm:$0xf]  ;;  %6575 = vst [vmem:[#allocation2 + $0x84] sm:$0xf] %v6574_v5  ;;  %v6578_v53 = vsel %vm13677_vm11, %v6369_v34, %v6577_v52 }
 0x6d7   : > { %6576 = vst.msk [vmem:[#allocation2 + $0x88] sm:$0xf] %vm659_vm6, %v6368_v10  ;;  %v6342_v56 = vor.u32 %v6340_v3, %v6339_v49  ;;  %v6343_v29 = vrot.slane %v6339_v49, 4  ;;  %v16042_v39 = vcombine.low %v6631_v45, %v6632_v27  ;;  %v13073_v18 = vld [vmem:[#allocation2 + $0x68] ss:$0 sps:$4 sm:$0x11]   ;;  %v10811_v43 = vcombine.low %v6677_v44, %v6632_v27 }
 0x6d8   : > { %6579 = vst [vmem:[#allocation2 + $0x8c] sm:$0x1] %v6578_v53  ;;  %v6347_v63 = vrot.slane %v6345_v28, 7  ;;  %v6348_v21 = vshll.u32 %v15990_v50, 16  ;;  %v6950_v60 = vsel %vm993_vm3, %v6945_v2, %v6949_v14  ;;  %v6388_v13 = vshrl.u32 %v16003_v4, 16  ;;  %v17463_v44 = vld [vmem:[#allocation64_spill] sm:$0xff] }
 0x6d9   : > { %v6567_v6 = vsel %vm13667_vm10, %v6342_v56, %v6566_v32  ;;  %v6391_v57 = vshll.u32 %v16003_v4, 16  ;;  %7065 = vrot.lane.b32.xlu1 %v6950_v60, %s13491_s9  ;;  %v6928_v47 = vshrl.u32 %v16042_v39, 16  ;;  %v6930_v42 = vshll.u32 %v16042_v39, 16  ;;  %v6587_v50 = vld [vmem:[#allocation2 + $0x9c] sm:$0xf]  ;;  %v17464_v33 = vld [vmem:[#allocation66_spill] sm:$0xff] }
 0x6da   : > { %v6935_v1 = vshll.u32 %v13073_v18, 16  ;;  %v7161_v19 = vrot.slane %v10811_v43, 1  ;;  %6568 = vst [vmem:[#allocation2 + $0x78] sm:$0xf] %v6567_v6  ;;  %v7162_v16 = vrot.slane %v13073_v18, 1  ;;  %v6350_v40 = vor.u32 %v6348_v21, %v6347_v63 }
 0x6db   : > { %v6352_v25 = vrot.slane %v6347_v63, 4  ;;  %v6390_v35 = vrot.slane %v6388_v13, 7  ;;  %v6932_v41 = vrot.slane %v6930_v42, 1  ;;  %v6396_v46 = vshrl.u32 %v16007_v23, 16  ;;  %v6580_v43 = vld [vmem:[#allocation2 + $0x90] sm:$0xf] }
 0x6dc   : > { %v6937_v24 = vrot.slane %v6935_v1, 1  ;;  %v6399_v4 = vshll.u32 %v16007_v23, 16  ;;  %v7163_v52 = vsel %vm1300_vm2, %v7161_v19, %v7162_v16  ;;  %v6351_v37 = vsel %vm13660_vm7, %v6343_v29, %v6350_v40 }
 0x6dd   : > { %v6571_v3 = vsel %vm13677_vm11, %v6352_v25, %v6570_v0  ;;  %v6393_v12 = vor.u32 %v6391_v57, %v6390_v35  ;;  %v6933_v55 = vor.u32 %v6932_v41, %v6928_v47  ;;  %7209 = vrot.lane.b32.xlu1 %v7166_v61, %s13490_s17  ;;  %v6637_v48 = vld [vmem:[#allocation2 + $0x84] sm:$0xf]  ;;  %6569 = vst.msk [vmem:[#allocation2 + $0x7c] sm:$0xf] %vm659_vm6, %v6351_v37  ;;  %v6394_v34 = vrot.slane %v6390_v35, 4  ;;  %v17465_v41 = vld [vmem:[#allocation60_spill] sm:$0xff] }
 0x6de   : > { %v6638_v45 = vld [vmem:[#allocation2 + $0x88] sm:$0xf]  ;;  %6572 = vst [vmem:[#allocation2 + $0x80] sm:$0x1] %v6571_v3  ;;  %v6680_v59 = vld [vmem:[#allocation2 + $0x84] sm:$0xe]  ;;  %v11148_v23 = vpack.c.bf16 %v17462_v7, %v17462_v7  ;;  %v16066_v36 = vpack.c.bf16 %v17463_v44, %v17463_v44  ;;  %v16070_v22 = vpack.c.bf16 %v17464_v33, %v17464_v33 }
 0x6df   : > { %v16072_v32 = vcombine.low %v6637_v48, %v6638_v45  ;;  %v13076_v58 = vld [vmem:[#allocation2 + $0x8c] ss:$0 sps:$4 sm:$0x11]   ;;  %v10814_v14 = vcombine.low %v6680_v59, %v6638_v45  ;;  %v6588_v49 = vsel %vm13667_vm10, %v6393_v12, %v6587_v50  ;;  %v6591_v61 = vld [vmem:[#allocation2 + $0xa4] sm:$0x1]  ;;  %v6938_v10 = vsel %vm993_vm3, %v6933_v55, %v6937_v24 }
 0x6e0   : > { %v6398_v5 = vrot.slane %v6396_v46, 7  ;;  %6589 = vst [vmem:[#allocation2 + $0x9c] sm:$0xf] %v6588_v49  ;;  %v6371_v28 = vshrl.u32 %v16020_v38, 16  ;;  %v6374_v2 = vshll.u32 %v16020_v38, 16  ;;  %7063 = vrot.lane.b32.xlu0 %v6938_v10, %s13491_s9  ;;  %v6971_v56 = vshll.u32 %v13076_v58, 16 }
 0x6e1   : > { %v6964_v27 = vshrl.u32 %v16072_v32, 16  ;;  %v6966_v53 = vshll.u32 %v16072_v32, 16  ;;  %v6635_v29 = vld [vmem:[#allocation2 + $0x78] sm:$0xf]  ;;  %v7170_v18 = vrot.slane %v10814_v14, 1  ;;  %v7171_v63 = vrot.slane %v13076_v58, 1 }
 0x6e2   : > { %v6679_v21 = vld [vmem:[#allocation2 + $0x78] sm:$0xe]  ;;  %v6401_v0 = vor.u32 %v6399_v4, %v6398_v5  ;;  %v6403_v60 = vrot.slane %v6398_v5, 4  ;;  %v6373_v6 = vrot.slane %v6371_v28, 7  ;;  %v6973_v57 = vrot.slane %v6971_v56, 1 }
 0x6e3   : > { %v6968_v13 = vrot.slane %v6966_v53, 1  ;;  %v6379_v47 = vshrl.u32 %v11148_v23, 16  ;;  %v6382_v42 = vshll.u32 %v11148_v23, 16  ;;  %v7172_v38 = vsel %vm1300_vm2, %v7170_v18, %v7171_v63  ;;  %v6584_v12 = vld [vmem:[#allocation2 + $0x98] sm:$0x1] }
 0x6e4   : > { %v6402_v1 = vsel %vm13660_vm7, %v6394_v34, %v6401_v0  ;;  %v6592_v19 = vsel %vm13677_vm11, %v6403_v60, %v6591_v61  ;;  %v6376_v50 = vor.u32 %v6374_v2, %v6373_v6  ;;  %7207 = vrot.lane.b32.xlu0 %v7163_v52, %s13490_s17  ;;  %v6636_v40 = vld [vmem:[#allocation2 + $0x7c] sm:$0xf]  ;;  %v6377_v25 = vrot.slane %v6373_v6, 4  ;;  %v6601_v10 = vld [vmem:[#allocation2 + $0xb4] sm:$0xf] }
 0x6e5   : > { %v6969_v16 = vor.u32 %v6968_v13, %v6964_v27  ;;  %6590 = vst.msk [vmem:[#allocation2 + $0xa0] sm:$0xf] %vm659_vm6, %v6402_v1  ;;  %6593 = vst [vmem:[#allocation2 + $0xa4] sm:$0x1] %v6592_v19  ;;  %v6381_v35 = vrot.slane %v6379_v47, 7  ;;  %v11151_v24 = vpack.c.bf16 %v17465_v41, %v17465_v41  ;;  %v16091_v46 = vcombine.low %v6635_v29, %v6636_v40 }
 0x6e6   : > { %v13078_v4 = vld [vmem:[#allocation2 + $0x80] ss:$0 sps:$4 sm:$0x11]   ;;  %v10813_v37 = vcombine.low %v6679_v21, %v6636_v40  ;;  %v6581_v3 = vsel %vm13667_vm10, %v6376_v50, %v6580_v43  ;;  %v6422_v52 = vshrl.u32 %v16066_v36, 16  ;;  %v6425_v59 = vshll.u32 %v16066_v36, 16  ;;  %v17466_v21 = vld [vmem:[#allocation61_spill] sm:$0xff] }
 0x6e7   : > { %v6974_v55 = vsel %vm993_vm3, %v6969_v16, %v6973_v57  ;;  %v6384_v48 = vor.u32 %v6382_v42, %v6381_v35  ;;  %v6386_v45 = vrot.slane %v6381_v35, 4  ;;  %6582 = vst [vmem:[#allocation2 + $0x90] sm:$0xf] %v6581_v3  ;;  %v6952_v7 = vshrl.u32 %v16091_v46, 16  ;;  %v6641_v14 = vld [vmem:[#allocation2 + $0x9c] sm:$0xf] }
 0x6e8   : > { %7069 = vrot.lane.b32.xlu1 %v6974_v55, %s13491_s9  ;;  %v6954_v23 = vshll.u32 %v16091_v46, 16  ;;  %v6959_v44 = vshll.u32 %v13078_v4, 16  ;;  %v7167_v33 = vrot.slane %v10813_v37, 1  ;;  %v7168_v58 = vrot.slane %v13078_v4, 1  ;;  %v6682_v28 = vld [vmem:[#allocation2 + $0x9c] sm:$0xe] }
 0x6e9   : > { %v6385_v34 = vsel %vm13660_vm7, %v6377_v25, %v6384_v48  ;;  %v6585_v49 = vsel %vm13677_vm11, %v6386_v45, %v6584_v12  ;;  %v6424_v61 = vrot.slane %v6422_v52, 7  ;;  %v6430_v2 = vshrl.u32 %v16070_v22, 16  ;;  %v6605_v47 = vld [vmem:[#allocation2 + $0xbc] sm:$0x1]  ;;  %v6594_v52 = vld [vmem:[#allocation2 + $0xa8] sm:$0xf] }
 0x6ea   : > { %v6956_v5 = vrot.slane %v6954_v23, 1  ;;  %v6961_v36 = vrot.slane %v6959_v44, 1  ;;  %6583 = vst.msk [vmem:[#allocation2 + $0x94] sm:$0xf] %vm659_vm6, %v6385_v34  ;;  %6586 = vst [vmem:[#allocation2 + $0x98] sm:$0x1] %v6585_v49  ;;  %v7169_v53 = vsel %vm1300_vm2, %v7167_v33, %v7168_v58  ;;  %v11152_v0 = vpack.c.bf16 %v17466_v21, %v17466_v21 }
 0x6eb   : > { %v6433_v27 = vshll.u32 %v16070_v22, 16  ;;  %v6427_v56 = vor.u32 %v6425_v59, %v6424_v61  ;;  %v6428_v29 = vrot.slane %v6424_v61, 4  ;;  %v6432_v63 = vrot.slane %v6430_v2, 7  ;;  %v17467_v44 = vld [vmem:[#allocation63_spill] sm:$0xff]  ;;  %v17468_v58 = vld [vmem:[#allocation65_spill] sm:$0xff] }
 0x6ec   : > { %v6957_v18 = vor.u32 %v6956_v5, %v6952_v7  ;;  %7213 = vrot.lane.b32.xlu1 %v7172_v38, %s13490_s17  ;;  %v6642_v43 = vld [vmem:[#allocation2 + $0xa0] sm:$0xf]  ;;  %v6405_v60 = vshrl.u32 %v11151_v24, 16  ;;  %v13081_v13 = vld [vmem:[#allocation2 + $0xa4] ss:$0 sps:$4 sm:$0x11]   ;;  %v11155_v33 = vpack.c.bf16 %v17467_v44, %v17467_v44 }
 0x6ed   : > { %v16112_v6 = vcombine.low %v6641_v14, %v6642_v43  ;;  %v10816_v57 = vcombine.low %v6682_v28, %v6642_v43  ;;  %v6602_v22 = vsel %vm13667_vm10, %v6427_v56, %v6601_v10  ;;  %v6408_v42 = vshll.u32 %v11151_v24, 16 }
 0x6ee   : > { %v6962_v1 = vsel %vm993_vm3, %v6957_v18, %v6961_v36  ;;  %v6639_v19 = vld [vmem:[#allocation2 + $0x90] sm:$0xf]  ;;  %v6435_v50 = vor.u32 %v6433_v27, %v6432_v63  ;;  %v6437_v38 = vrot.slane %v6432_v63, 4  ;;  %6603 = vst [vmem:[#allocation2 + $0xb4] sm:$0xf] %v6602_v22  ;;  %v6407_v16 = vrot.slane %v6405_v60, 7 }
 0x6ef   : > { %7067 = vrot.lane.b32.xlu0 %v6962_v1, %s13491_s9  ;;  %v6988_v40 = vshrl.u32 %v16112_v6, 16  ;;  %v6990_v25 = vshll.u32 %v16112_v6, 16  ;;  %v6995_v35 = vshll.u32 %v13081_v13, 16  ;;  %v7176_v41 = vrot.slane %v10816_v57, 1  ;;  %v6681_v4 = vld [vmem:[#allocation2 + $0x90] sm:$0xe] }
 0x6f0   : > { %v7177_v37 = vrot.slane %v13081_v13, 1  ;;  %v6436_v24 = vsel %vm13660_vm7, %v6428_v29, %v6435_v50  ;;  %v6606_v3 = vsel %vm13677_vm11, %v6437_v38, %v6605_v47  ;;  %v6410_v12 = vor.u32 %v6408_v42, %v6407_v16 }
 0x6f1   : > { %v6992_v55 = vrot.slane %v6990_v25, 1  ;;  %v6997_v48 = vrot.slane %v6995_v35, 1  ;;  %v6640_v45 = vld [vmem:[#allocation2 + $0x94] sm:$0xf]  ;;  %6604 = vst.msk [vmem:[#allocation2 + $0xb8] sm:$0xf] %vm659_vm6, %v6436_v24  ;;  %v11156_v14 = vpack.c.bf16 %v17468_v58, %v17468_v58 }
 0x6f2   : > { %6607 = vst [vmem:[#allocation2 + $0xbc] sm:$0x1] %v6606_v3  ;;  %v16125_v59 = vcombine.low %v6639_v19, %v6640_v45  ;;  %v13083_v7 = vld [vmem:[#allocation2 + $0x98] ss:$0 sps:$4 sm:$0x11]   ;;  %v10815_v23 = vcombine.low %v6681_v4, %v6640_v45  ;;  %v6413_v49 = vshrl.u32 %v11152_v0, 16  ;;  %v6595_v10 = vsel %vm13667_vm10, %v6410_v12, %v6594_v52 }
 0x6f3   : > { %7211 = vrot.lane.b32.xlu0 %v7169_v53, %s13490_s17  ;;  %v6993_v34 = vor.u32 %v6992_v55, %v6988_v40  ;;  %v6416_v61 = vshll.u32 %v11152_v0, 16  ;;  %v6983_v28 = vshll.u32 %v13083_v7, 16  ;;  %v7178_v2 = vsel %vm1300_vm2, %v7176_v41, %v7177_v37  ;;  %6596 = vst [vmem:[#allocation2 + $0xa8] sm:$0xf] %v6595_v10  ;;  %v6598_v53 = vld [vmem:[#allocation2 + $0xb0] sm:$0x1] }
 0x6f4   : > { %v6976_v5 = vshrl.u32 %v16125_v59, 16  ;;  %v6978_v36 = vshll.u32 %v16125_v59, 16  ;;  %v7173_v56 = vrot.slane %v10815_v23, 1  ;;  %v6411_v29 = vrot.slane %v6407_v16, 4  ;;  %v6608_v41 = vld [vmem:[#allocation2 + $0xc0] sm:$0xf] }
 0x6f5   : > { %v6998_v27 = vsel %vm993_vm3, %v6993_v34, %v6997_v48  ;;  %v6415_v18 = vrot.slane %v6413_v49, 7  ;;  %v6985_v63 = vrot.slane %v6983_v28, 1  ;;  %v6645_v21 = vld [vmem:[#allocation2 + $0xb4] sm:$0xf]  ;;  %v6439_v0 = vshrl.u32 %v11155_v33, 16 }
 0x6f6   : > { %7073 = vrot.lane.b32.xlu1 %v6998_v27, %s13491_s9  ;;  %v6980_v43 = vrot.slane %v6978_v36, 1  ;;  %v6442_v60 = vshll.u32 %v11155_v33, 16  ;;  %v7174_v13 = vrot.slane %v13083_v7, 1  ;;  %v6684_v47 = vld [vmem:[#allocation2 + $0xb4] sm:$0xe]  ;;  %v6447_v42 = vshrl.u32 %v11156_v14, 16 }
 0x6f7   : > { %v6418_v57 = vor.u32 %v6416_v61, %v6415_v18  ;;  %v6420_v22 = vrot.slane %v6415_v18, 4  ;;  %v6441_v50 = vrot.slane %v6439_v0, 7  ;;  %v6450_v38 = vshll.u32 %v11156_v14, 16  ;;  %v6612_v45 = vld [vmem:[#allocation2 + $0xc8] sm:$0x1] }
 0x6f8   : > { %v6981_v1 = vor.u32 %v6980_v43, %v6976_v5  ;;  %v6646_v19 = vld [vmem:[#allocation2 + $0xb8] sm:$0xf]  ;;  %v6449_v3 = vrot.slane %v6447_v42, 7  ;;  %v7175_v7 = vsel %vm1300_vm2, %v7173_v56, %v7174_v13 }
 0x6f9   : > { %v16139_v40 = vcombine.low %v6645_v21, %v6646_v19  ;;  %v13086_v16 = vld [vmem:[#allocation2 + $0xbc] ss:$0 sps:$4 sm:$0x11]   ;;  %v6419_v25 = vsel %vm13660_vm7, %v6411_v29, %v6418_v57  ;;  %v6599_v35 = vsel %vm13677_vm11, %v6420_v22, %v6598_v53  ;;  %v6444_v37 = vor.u32 %v6442_v60, %v6441_v50  ;;  %v6649_v57 = vld [vmem:[#allocation2 + $0xcc] sm:$0xf] }
 0x6fa   : > { %v6986_v4 = vsel %vm993_vm3, %v6981_v1, %v6985_v63  ;;  %7217 = vrot.lane.b32.xlu1 %v7178_v2, %s13490_s17  ;;  %6597 = vst.msk [vmem:[#allocation2 + $0xac] sm:$0xf] %vm659_vm6, %v6419_v25  ;;  %6600 = vst [vmem:[#allocation2 + $0xb0] sm:$0x1] %v6599_v35  ;;  %v6445_v24 = vrot.slane %v6441_v50, 4  ;;  %v7019_v55 = vshll.u32 %v13086_v16, 16  ;;  %v10818_v48 = vcombine.low %v6684_v47, %v6646_v19 }
 0x6fb   : > { %7071 = vrot.lane.b32.xlu0 %v6986_v4, %s13491_s9  ;;  %v7012_v12 = vshrl.u32 %v16139_v40, 16  ;;  %v7014_v52 = vshll.u32 %v16139_v40, 16  ;;  %v6452_v23 = vor.u32 %v6450_v38, %v6449_v3  ;;  %v6454_v44 = vrot.slane %v6449_v3, 4  ;;  %v6643_v10 = vld [vmem:[#allocation2 + $0xa8] sm:$0xf] }
 0x6fc   : > { %v6609_v33 = vsel %vm13667_vm10, %v6444_v37, %v6608_v41  ;;  %v7021_v14 = vrot.slane %v7019_v55, 1  ;;  %v7182_v5 = vrot.slane %v10818_v48, 1  ;;  %v7183_v36 = vrot.slane %v13086_v16, 1  ;;  %v6683_v28 = vld [vmem:[#allocation2 + $0xa8] sm:$0xe] }
 0x6fd   : > { %v7016_v58 = vrot.slane %v7014_v52, 1  ;;  %6610 = vst [vmem:[#allocation2 + $0xc0] sm:$0xf] %v6609_v33  ;;  %v6453_v34 = vsel %vm13660_vm7, %v6445_v24, %v6452_v23  ;;  %v6613_v49 = vsel %vm13677_vm11, %v6454_v44, %v6612_v45  ;;  %v6650_v16 = vld [vmem:[#allocation2 + $0xd0] sm:$0xf] }
 0x6fe   : > { %6611 = vst.msk [vmem:[#allocation2 + $0xc4] sm:$0xf] %vm659_vm6, %v6453_v34  ;;  %6614 = vst [vmem:[#allocation2 + $0xc8] sm:$0x1] %v6613_v49  ;;  %v7184_v53 = vsel %vm1300_vm2, %v7182_v5, %v7183_v36  ;;  %v16170_v35 = vcombine.low %v6649_v57, %v6650_v16  ;;  %v6686_v48 = vld [vmem:[#allocation2 + $0xcc] sm:$0xe] }
 0x6ff   : > { %7215 = vrot.lane.b32.xlu0 %v7175_v7, %s13490_s17  ;;  %v7017_v61 = vor.u32 %v7016_v58, %v7012_v12  ;;  %v13101_v41 = vld [vmem:[#allocation2 + $0xd4] ss:$0 sps:$4 sm:$0x11]   ;;  %v10820_v44 = vcombine.low %v6686_v48, %v6650_v16 }
 0x700   : > { %v7038_v55 = vshll.u32 %v16170_v35, 16  ;;  %v7036_v23 = vshrl.u32 %v16170_v35, 16  ;;  %v7043_v34 = vshll.u32 %v13101_v41, 16 }
 0x701   : > { %v7022_v2 = vsel %vm993_vm3, %v7017_v61, %v7021_v14  ;;  %v6644_v27 = vld [vmem:[#allocation2 + $0xac] sm:$0xf]  ;;  %v13088_v29 = vld [vmem:[#allocation2 + $0xb0] ss:$0 sps:$4 sm:$0x11]   ;;  %v7188_v61 = vrot.slane %v10820_v44, 1 }
 0x702   : > { %7077 = vrot.lane.b32.xlu1 %v7022_v2, %s13491_s9  ;;  %v16162_v56 = vcombine.low %v6643_v10, %v6644_v27  ;;  %v10817_v18 = vcombine.low %v6683_v28, %v6644_v27  ;;  %v7007_v21 = vshll.u32 %v13088_v29, 16  ;;  %v7180_v1 = vrot.slane %v13088_v29, 1 }
 0x703   : > { %v7040_v14 = vrot.slane %v7038_v55, 1  ;;  %v7189_v10 = vrot.slane %v13101_v41, 1  ;;  %v7045_v2 = vrot.slane %v7043_v34, 1 }
 0x704   : > { %v7000_v43 = vshrl.u32 %v16162_v56, 16  ;;  %v7002_v63 = vshll.u32 %v16162_v56, 16  ;;  %v6647_v0 = vld [vmem:[#allocation2 + $0xc0] sm:$0xf]  ;;  %v7179_v60 = vrot.slane %v10817_v18, 1  ;;  %v7009_v47 = vrot.slane %v7007_v21, 1 }
 0x705   : > { %v6685_v13 = vld [vmem:[#allocation2 + $0xc0] sm:$0xe]  ;;  %v6648_v42 = vld [vmem:[#allocation2 + $0xc4] sm:$0xf]  ;;  %v7190_v5 = vsel %vm1300_vm2, %v7188_v61, %v7189_v10  ;;  %v7041_v28 = vor.u32 %v7040_v14, %v7036_v23 }
 0x706   : > { %v7004_v22 = vrot.slane %v7002_v63, 1  ;;  %7221 = vrot.lane.b32.xlu1 %v7184_v53, %s13490_s17  ;;  %v16168_v19 = vcombine.low %v6647_v0, %v6648_v42  ;;  %v13095_v50 = vld [vmem:[#allocation2 + $0xc8] ss:$0 sps:$4 sm:$0x11]   ;;  %v10819_v38 = vcombine.low %v6685_v13, %v6648_v42  ;;  %v7181_v45 = vsel %vm1300_vm2, %v7179_v60, %v7180_v1  ;;  %v13159_v13 = vld [vmem:[%s17198_s1 + $0x180] sm:$0xff]  }
 0x707   : > { %v7031_v24 = vshll.u32 %v13095_v50, 16  ;;  %v7186_v52 = vrot.slane %v13095_v50, 1  ;;  %v13097_v60 = vld [vmem:[%s17198_s1 + $0x188] sm:$0xff]  }
 0x708   : > { %v7005_v25 = vor.u32 %v7004_v22, %v7000_v43  ;;  %v7024_v4 = vshrl.u32 %v16168_v19, 16  ;;  %v7026_v37 = vshll.u32 %v16168_v19, 16  ;;  %v7185_v3 = vrot.slane %v10819_v38, 1 }
 0x709   : > { %v7033_v33 = vrot.slane %v7031_v24, 1  ;;  %v7046_v43 = vsel %vm993_vm3, %v7041_v28, %v7045_v2 }
 0x70a   : > { %v7010_v12 = vsel %vm993_vm3, %v7005_v25, %v7009_v47  ;;  %v7028_v7 = vrot.slane %v7026_v37, 1  ;;  %v7187_v58 = vsel %vm1300_vm2, %v7185_v3, %v7186_v52  ;;  %v16211_v47 = vld [vmem:[%s17198_s1 + $0x198] sm:$0xff]  }
 0x70b   : > { %7075 = vrot.lane.b32.xlu0 %v7010_v12, %s13491_s9  ;;  %7223 = vrot.lane.b32.xlu1 %v7187_v58, %s13490_s17  ;;  %v7192_v29 = vpop.permute.xlu1 %7191 }
 0x70c   : > { %v7029_v49 = vor.u32 %v7028_v7, %v7024_v4 }
 0x70e   : > { %v7034_v36 = vsel %vm993_vm3, %v7029_v49, %v7033_v33 }
 0x70f   : > { %7219 = vrot.lane.b32.xlu0 %v7181_v45, %s13490_s17  ;;  %7225 = vrot.lane.b32.xlu1 %v7190_v5, %s13490_s17 }
 0x710   : > { %v7048_v27 = vpop.permute.xlu0 %7047 }
 0x711   : > { %v7228_v18 = vsel %vm1391_vm12, %v15815_v54, %v7048_v27 }
 0x712   : > { %v7264_v53 = vsel %vm1428_vm13, %v7228_v18, %v7192_v29 }
 0x713   : > { %7079 = vrot.lane.b32.xlu0 %v7034_v36, %s13491_s9  ;;  %11855 = vmatprep.mubr.msk.bf16.mxu0 %vm1483_vm14, %v7264_v53 }
 0x717   : > { %7081 = vrot.lane.b32.xlu0 %v7046_v43, %s13491_s9 }
 0x71c   : > { %v7194_v63 = vpop.permute.xlu1 %7193 }
 0x721   : > { %v7050_v21 = vpop.permute.xlu0 %7049 }
 0x722   : > { %v7230_v0 = vsel %vm1391_vm12, %v15871_v20, %v7050_v21  ;;  %v13098_v20 = vld [vmem:[%s17198_s1 + $0x190] sm:$0xff]  }
 0x723   : > { %v16198_v54 = vsel %vm1428_vm13, %v7230_v0, %v7194_v63 }
 0x724   : > { %11856 = vmatmul.mubr.msk.bf16.vlgmr.msra.gmra.mrb[0].mxu0 %vm1483_vm14, %v16198_v54  ;;  %v7054_v57 = vpop.permute.xlu1 %7053 }
 0x725   : > { %11888 = vmatpush3.bf16.msra.mxu0 %v13159_v13  ;;  %v7234_v42 = vsel %vm1391_vm12, %v15885_v15, %v7054_v57 }
 0x726   : > { %11889 = vmatprep.subr.bf16.mxu0 %v13097_v60 }
 0x728   : > { %v7052_v22 = vpop.permute.xlu0 %7051  ;;  %v7198_v1 = vpop.permute.xlu1 %7197 }
 0x729   : > { %11890 = vmatpush3.bf16.msra.mxu0 %v13097_v60  ;;  %v7232_v50 = vsel %vm1391_vm12, %v15898_v9, %v7052_v22  ;;  %v16222_v25 = vsel %vm1428_vm13, %v7234_v42, %v7198_v1 }
 0x72a   : > { %11891 = vmatprep.subr.bf16.mxu0 %v13098_v20 }
 0x72c   : > { %v7196_v38 = vpop.permute.xlu0 %7195 }
 0x72d   : > { %11892 = vmatpush3.bf16.msra.mxu0 %v13098_v20  ;;  %v16218_v16 = vsel %vm1428_vm13, %v7232_v50, %v7196_v38 }
 0x72e   : > { %11925 = vmatprep.subr.bf16.mxu0 %v16211_v47  ;;  %11859 = vmatprep.mubr.msk.bf16.mxu0 %vm1483_vm14, %v16218_v16  ;;  %v7058_v15 = vpop.permute.xlu1 %7057 }
 0x72f   : > { %11860 = vmatmul.mubr.msk.bf16.gmra.mrb[4].mxu0 %vm1483_vm14, %v16222_v25  ;;  %v7238_v9 = vsel %vm1391_vm12, %v15913_v30, %v7058_v15 }
 0x732   : > { %v7202_v4 = vpop.permute.xlu1 %7201 }
 0x733   : > { %v16236_v12 = vsel %vm1428_vm13, %v7238_v9, %v7202_v4 }
 0x736   : > { %v7056_v41 = vpop.permute.xlu0 %7055 }
 0x737   : > { %v7236_v37 = vsel %vm1391_vm12, %v15939_v51, %v7056_v41  ;;  %v13106_v41 = vld [vmem:[#allocation2 + $0x8] ss:$0 sps:$4 sm:$0x11]  }
 0x73a   : > { %v7200_v24 = vpop.permute.xlu0 %7199 }
 0x73b   : > { %v16233_v3 = vsel %vm1428_vm13, %v7236_v37, %v7200_v24  ;;  %v8777_v24 = vshll.u32 %v13106_v41, 16 }
 0x73c   : > { %11863 = vmatprep.mubr.msk.bf16.mxu0 %vm1483_vm14, %v16233_v3 }
 0x73d   : > { %11864 = vmatmul.mubr.msk.bf16.gmra.mrb[8].mxu0 %vm1483_vm14, %v16236_v12 }
 0x73f   : > { %v7062_v52 = vpop.permute.xlu1 %7061 }
 0x740   : > { %v7242_v30 = vsel %vm1391_vm12, %v15972_v8, %v7062_v52  ;;  %v8607_v52 = vld [vmem:[#allocation2] sm:$0xe] }
 0x743   : > { %v7206_v48 = vpop.permute.xlu1 %7205 }
 0x744   : > { %v7060_v55 = vpop.permute.xlu0 %7059  ;;  %v16250_v23 = vsel %vm1428_vm13, %v7242_v30, %v7206_v48  ;;  %v9076_v48 = vrot.slane %v13106_v41, 1 }
 0x745   : > { %v7240_v51 = vsel %vm1391_vm12, %v15992_v62, %v7060_v55 }
 0x748   : > { %v7204_v45 = vpop.permute.xlu0 %7203 }
 0x749   : > { %v16247_v7 = vsel %vm1428_vm13, %v7240_v51, %v7204_v45  ;;  %v16367_v45 = vld [vmem:[%s17199_s2 + $0x5] ss:$0 sm:$0xff] }
 0x74a   : > { %11867 = vmatprep.mubr.msk.bf16.mxu0 %vm1483_vm14, %v16247_v7 }
 0x74b   : > { %11868 = vmatmul.mubr.msk.bf16.gmra.mrb[12].mxu0 %vm1483_vm14, %v16250_v23  ;;  %v7066_v44 = vpop.permute.xlu1 %7065 }
 0x74c   : > { %v7246_v8 = vsel %vm1391_vm12, %v16022_v17, %v7066_v44 }
 0x74f   : > { %v7210_v58 = vpop.permute.xlu1 %7209 }
 0x750   : > { %v16264_v49 = vsel %vm1428_vm13, %v7246_v8, %v7210_v58  ;;  %v17469_v58 = vld [vmem:[#allocation9_spill] sm:$0xff] }
 0x752   : > { %v7064_v33 = vpop.permute.xlu0 %7063 }
 0x753   : > { %v7244_v62 = vsel %vm1391_vm12, %v16042_v39, %v7064_v33 }
 0x756   : > { %v7208_v14 = vpop.permute.xlu0 %7207 }
 0x757   : > { %v16261_v34 = vsel %vm1428_vm13, %v7244_v62, %v7208_v14 }
 0x758   : > { %11871 = vmatprep.mubr.msk.bf16.mxu0 %vm1483_vm14, %v16261_v34 }
 0x759   : > { %11872 = vmatmul.mubr.msk.bf16.gmra.mrb[16].mxu0 %vm1483_vm14, %v16264_v49 }
 0x75a   : > { %v7070_v61 = vpop.permute.xlu1 %7069 }
 0x75b   : > { %v7250_v17 = vsel %vm1391_vm12, %v16072_v32, %v7070_v61 }
 0x75e   : > { %v7214_v5 = vpop.permute.xlu1 %7213 }
 0x75f   : > { %v7286_v2 = vsel %vm1428_vm13, %v7250_v17, %v7214_v5  ;;  %v17471_v5 = vld [vmem:[#allocation11_spill] sm:$0xff] }
 0x761   : > { %v7068_v10 = vpop.permute.xlu0 %7067 }
 0x762   : > { %v7248_v39 = vsel %vm1391_vm12, %v16091_v46, %v7068_v10 }
 0x765   : > { %v7212_v36 = vpop.permute.xlu0 %7211 }
 0x766   : > { %v7284_v28 = vsel %vm1428_vm13, %v7248_v39, %v7212_v36 }
 0x767   : > { %11875 = vmatprep.mubr.msk.bf16.mxu0 %vm1483_vm14, %v7284_v28 }
 0x768   : > { %11876 = vmatmul.mubr.msk.bf16.gmra.mrb[20].mxu0 %vm1483_vm14, %v7286_v2  ;;  %v7074_v27 = vpop.permute.xlu1 %7073 }
 0x769   : > { %v7254_v18 = vsel %vm1391_vm12, %v16112_v6, %v7074_v27 }
 0x76c   : > { %v7218_v53 = vpop.permute.xlu1 %7217 }
 0x76d   : > { %v7072_v29 = vpop.permute.xlu0 %7071  ;;  %v7290_v63 = vsel %vm1428_vm13, %v7254_v18, %v7218_v53 }
 0x76e   : > { %v7252_v32 = vsel %vm1391_vm12, %v16125_v59, %v7072_v29 }
 0x771   : > { %v7216_v43 = vpop.permute.xlu0 %7215 }
 0x772   : > { %v7288_v46 = vsel %vm1428_vm13, %v7252_v32, %v7216_v43 }
 0x773   : > { %11879 = vmatprep.mubr.msk.bf16.mxu0 %vm1483_vm14, %v7288_v46 }
 0x774   : > { %11880 = vmatmul.mubr.msk.bf16.gmra.mrb[24].mxu0 %vm1483_vm14, %v7290_v63  ;;  %v7078_v21 = vpop.permute.xlu1 %7077 }
 0x775   : > { %v7258_v60 = vsel %vm1391_vm12, %v16139_v40, %v7078_v21  ;;  %v13103_v40 = vld [vmem:[%s17198_s1 + $0x1a0] sm:$0xff]  }
 0x778   : > { %v7222_v13 = vpop.permute.xlu1 %7221 }
 0x779   : > { %v7294_v20 = vsel %vm1428_vm13, %v7258_v60, %v7222_v13 }
 0x77d   : > { %v7076_v0 = vpop.permute.xlu0 %7075 }
 0x77e   : > { %v7256_v6 = vsel %vm1391_vm12, %v16162_v56, %v7076_v0  ;;  %v13104_v56 = vld [vmem:[%s17198_s1 + $0x1a8] sm:$0xff]  }
 0x781   : > { %v7220_v57 = vpop.permute.xlu0 %7219 }
 0x782   : > { %v7292_v59 = vsel %vm1428_vm13, %v7256_v6, %v7220_v57  ;;  %v8448_v6 = vld [vmem:[#allocation2 + $0x18] sm:$0xf] }
 0x783   : > { %11883 = vmatprep.mubr.msk.bf16.mxu0 %vm1483_vm14, %v7292_v59 }
 0x784   : > { %11884 = vmatmul.mubr.msk.bf16.gmra.mrb[28].mxu0 %vm1483_vm14, %v7294_v20 }
 0x785   : > { %11893 = vmatprep.mubr.msk.bf16.mxu0 %vm1483_vm14, %v16198_v54  ;;  %v7080_v54 = vpop.permute.xlu0 %7079 }
 0x786   : > { %v7260_v22 = vsel %vm1391_vm12, %v16168_v19, %v7080_v54 }
 0x789   : > { %v7082_v19 = vpop.permute.xlu0 %7081 }
 0x78a   : > { %v7262_v1 = vsel %vm1391_vm12, %v16170_v35, %v7082_v19  ;;  %v17473_v19 = vld [vmem:[#allocation13_spill] sm:$0xff] }
 0x78c   : > { %11894 = vmatmul.mubr.msk.bf16.vlgmr.msra.gmra.mrb[0].mxu0 %vm1483_vm14, %v16218_v16 }
 0x78d   : > { %11926 = vmatpush3.bf16.msra.mxu0 %v16211_v47  ;;  %11897 = vmatprep.mubr.msk.bf16.mxu0 %vm1483_vm14, %v16222_v25  ;;  %v7224_v47 = vpop.permute.xlu1 %7223 }
 0x78e   : > { %11927 = vmatprep.subr.bf16.mxu0 %v13103_v40  ;;  %v7296_v42 = vsel %vm1428_vm13, %v7260_v22, %v7224_v47  ;;  %v8441_v47 = vld [vmem:[#allocation2 + $0xc] sm:$0xf] }
 0x791   : > { %11928 = vmatpush3.bf16.msra.mxu0 %v13103_v40  ;;  %v7226_v50 = vpop.permute.xlu1 %7225 }
 0x792   : > { %11929 = vmatprep.subr.bf16.mxu0 %v13104_v56  ;;  %v7298_v38 = vsel %vm1428_vm13, %v7262_v1, %v7226_v50 }
 0x794   : > { %11898 = vmatmul.mubr.msk.bf16.gmra.mrb[4].mxu0 %vm1483_vm14, %v16233_v3 }
 0x795   : > { %11901 = vmatprep.mubr.msk.bf16.mxu0 %vm1483_vm14, %v16236_v12  ;;  %11930 = vmatpush3.bf16.msra.mxu0 %v13104_v56 }
 0x79c   : > { %11902 = vmatmul.mubr.msk.bf16.gmra.mrb[8].mxu0 %vm1483_vm14, %v16247_v7 }
 0x79d   : > { %11905 = vmatprep.mubr.msk.bf16.mxu0 %vm1483_vm14, %v16250_v23 }
 0x7a4   : > { %11906 = vmatmul.mubr.msk.bf16.gmra.mrb[12].mxu0 %vm1483_vm14, %v16261_v34 }
 0x7a5   : > { %11909 = vmatprep.mubr.msk.bf16.mxu0 %vm1483_vm14, %v16264_v49 }
 0x7ac   : > { %11910 = vmatmul.mubr.msk.bf16.gmra.mrb[16].mxu0 %vm1483_vm14, %v7284_v28 }
 0x7ad   : > { %11913 = vmatprep.mubr.msk.bf16.mxu0 %vm1483_vm14, %v7286_v2 }
 0x7b4   : > { %11914 = vmatmul.mubr.msk.bf16.gmra.mrb[20].mxu0 %vm1483_vm14, %v7288_v46 }
 0x7b5   : > { %11917 = vmatprep.mubr.msk.bf16.mxu0 %vm1483_vm14, %v7290_v63 }
 0x7bc   : > { %11918 = vmatmul.mubr.msk.bf16.gmra.mrb[24].mxu0 %vm1483_vm14, %v7292_v59 }
 0x7bd   : > { %11921 = vmatprep.mubr.msk.bf16.mxu0 %vm1483_vm14, %v7294_v20 }
 0x7c4   : > { %11922 = vmatmul.mubr.msk.bf16.gmra.mrb[28].mxu0 %vm1483_vm14, %v7296_v42 }
 0x7c5   : > { %11931 = vmatprep.mubr.msk.bf16.mxu0 %vm1483_vm14, %v16218_v16  ;;  %v8553_v16 = vld [vmem:[#allocation2] sm:$0xf] }
 0x7cc   : > { %11932 = vmatmul.mubr.msk.bf16.vlgmr.msra.gmra.mrb[0].mxu0 %vm1483_vm14, %v16222_v25  ;;  %v8554_v25 = vld [vmem:[#allocation2 + $0x4] sm:$0xf] }
 0x7cd   : > { %11935 = vmatprep.mubr.msk.bf16.mxu0 %vm1483_vm14, %v16233_v3  ;;  %v16356_v15 = vcombine.low %v8553_v16, %v8554_v25  ;;  %v10947_v55 = vcombine.low %v8607_v52, %v8554_v25  ;;  %v8452_v25 = vld [vmem:[#allocation2 + $0x20] sm:$0x1] }
 0x7cf   : > { %v8772_v9 = vshll.u32 %v16356_v15, 16  ;;  %v8770_v4 = vshrl.u32 %v16356_v15, 16  ;;  %v9075_v30 = vrot.slane %v10947_v55, 1 }
 0x7d1   : > { %v8774_v37 = vrot.slane %v8772_v9, 1  ;;  %v9077_v51 = vsel %vm1300_vm2, %v9075_v30, %v9076_v48  ;;  %v17474_v9 = vld [vmem:[#allocation14_spill] sm:$0xff] }
 0x7d3   : > { %v8775_v3 = vor.u32 %v8774_v37, %v8770_v4 }
 0x7d4   : > { %11936 = vmatmul.mubr.msk.bf16.gmra.mrb[4].mxu0 %vm1483_vm14, %v16236_v12  ;;  %v8779_v12 = vrot.slane %v8777_v24, 1 }
 0x7d5   : > { %11939 = vmatprep.mubr.msk.bf16.mxu0 %vm1483_vm14, %v16247_v7 }
 0x7d6   : > { %v8780_v35 = vsel %vm993_vm3, %v8775_v3, %v8779_v12  ;;  %v8445_v12 = vld [vmem:[#allocation2 + $0x14] sm:$0x1] }
 0x7d7   : > { %8985 = vrot.lane.b32.xlu0 %v8780_v35, %s13491_s9 }
 0x7db   : > { %9129 = vrot.lane.b32.xlu0 %v9077_v51, %s13490_s17 }
 0x7dc   : > { %11940 = vmatmul.mubr.msk.bf16.gmra.mrb[8].mxu0 %vm1483_vm14, %v16250_v23 }
 0x7dd   : > { %11943 = vmatprep.mubr.msk.bf16.mxu0 %vm1483_vm14, %v16261_v34 }
 0x7e4   : > { %11944 = vmatmul.mubr.msk.bf16.gmra.mrb[12].mxu0 %vm1483_vm14, %v16264_v49  ;;  %v17470_v49 = vld [vmem:[#allocation10_spill] sm:$0xff] }
 0x7e5   : > { %11947 = vmatprep.mubr.msk.bf16.mxu0 %vm1483_vm14, %v7284_v28  ;;  %v17472_v28 = vld [vmem:[#allocation12_spill] sm:$0xff] }
 0x7ec   : > { %11948 = vmatmul.mubr.msk.bf16.gmra.mrb[16].mxu0 %vm1483_vm14, %v7286_v2 }
 0x7ed   : > { %11951 = vmatprep.mubr.msk.bf16.mxu0 %vm1483_vm14, %v7288_v46 }
 0x7f4   : > { %11952 = vmatmul.mubr.msk.bf16.gmra.mrb[20].mxu0 %vm1483_vm14, %v7290_v63 }
 0x7f5   : > { %11955 = vmatprep.mubr.msk.bf16.mxu0 %vm1483_vm14, %v7292_v59 }
 0x7fc   : > { %11956 = vmatmul.mubr.msk.bf16.gmra.mrb[24].mxu0 %vm1483_vm14, %v7294_v20 }
 0x7fd   : > { %11959 = vmatprep.mubr.msk.bf16.mxu0 %vm1483_vm14, %v7296_v42 }
 0x804   : > { %11960 = vmatmul.mubr.msk.bf16.gmra.mrb[28].mxu0 %vm1483_vm14, %v7298_v38 }
 0x89f   : > { %v11933_v7 = vpop.f32.mrb[0].mxu0 }
 0x8a0   : > { %v12371_v23 = vadd.f32 %v11933_v7, %v16367_v45  ;;  %v7815_v44 = vpop.f32.mrb[1].mxu0 }
 0x8a1   : > { %v12372_v33 = vadd.f32 %v16367_v45, %v7815_v44  ;;  %v11934_v8 = vpop.f32.mrb[2].mxu0 }
 0x8a2   : > { %v7976_v62 = vadd.f32 %v12371_v23, %v17469_v58  ;;  %v12373_v14 = vadd.f32 %v11934_v8, %v16367_v45  ;;  %v7818_v34 = vpop.f32.mrb[3].mxu0 }
 0x8a3   : > { %v7974_v61 = vadd.f32 %v12372_v33, %v17470_v49  ;;  %v12374_v10 = vadd.f32 %v16367_v45, %v7818_v34  ;;  %v13148_v34 = vld [vmem:[%s17200_s3 + $0x8] sm:$0xff]  }
 0x8a4   : > { %v11159_v17 = vpack.c.bf16 %v7976_v62, %v7976_v62  ;;  %v7977_v39 = vadd.f32 %v12373_v14, %v17471_v5  ;;  %v13147_v14 = vld [vmem:[%s17200_s3] sm:$0xff]  }
 0x8a5   : > { %v11157_v36 = vpack.c.bf16 %v7974_v61, %v7974_v61  ;;  %v7975_v2 = vadd.f32 %v12374_v10, %v17472_v28  ;;  %11963 = vmatprep.subr.bf16.mxu1 %v13147_v14 }
 0x8a6   : > { %v8139_v27 = vshrl.u32 %v11159_v17, 16  ;;  %v11160_v29 = vpack.c.bf16 %v7977_v39, %v7977_v39  ;;  %v8142_v18 = vshll.u32 %v11159_v17, 16  ;;  %v8462_v39 = vld [vmem:[#allocation2 + $0x30] sm:$0xf]  ;;  %11964 = vmatpush3.bf16.msra.mxu1 %v13147_v14 }
 0x8a7   : > { %v8122_v53 = vshrl.u32 %v11157_v36, 16  ;;  %v8125_v32 = vshll.u32 %v11157_v36, 16  ;;  %v11158_v43 = vpack.c.bf16 %v7975_v2, %v7975_v2  ;;  %v11937_v46 = vpop.f32.mrb[4].mxu0  ;;  %11965 = vmatprep.subr.bf16.mxu1 %v13148_v34 }
 0x8a8   : > { %v8141_v63 = vrot.slane %v8139_v27, 7  ;;  %v8147_v21 = vshrl.u32 %v11160_v29, 16  ;;  %v8150_v0 = vshll.u32 %v11160_v29, 16  ;;  %v12375_v60 = vadd.f32 %v11937_v46, %v16367_v45  ;;  %v7831_v13 = vpop.f32.mrb[5].mxu0  ;;  %v17476_v46 = vld [vmem:[#allocation16_spill] sm:$0xff] }
 0x8a9   : > { %v8124_v57 = vrot.slane %v8122_v53, 7  ;;  %v8130_v59 = vshrl.u32 %v11158_v43, 16  ;;  %v8133_v20 = vshll.u32 %v11158_v43, 16  ;;  %v12376_v40 = vadd.f32 %v16367_v45, %v7831_v13  ;;  %v11938_v56 = vpop.f32.mrb[6].mxu0  ;;  %v8455_v53 = vld [vmem:[#allocation2 + $0x24] sm:$0xf] }
 0x8aa   : > { %v8144_v54 = vor.u32 %v8142_v18, %v8141_v63  ;;  %v8145_v22 = vrot.slane %v8141_v63, 4  ;;  %v8149_v42 = vrot.slane %v8147_v21, 7  ;;  %v7980_v1 = vadd.f32 %v12375_v60, %v17473_v19  ;;  %v7834_v50 = vpop.f32.mrb[7].mxu0  ;;  %v17477_v13 = vld [vmem:[#allocation17_spill] sm:$0xff]  ;;  %11966 = vmatpush3.bf16.msra.mxu1 %v13148_v34 }
 0x8ab   : > { %v8127_v38 = vor.u32 %v8125_v32, %v8124_v57  ;;  %v8128_v16 = vrot.slane %v8124_v57, 4  ;;  %v8132_v41 = vrot.slane %v8130_v59, 7  ;;  %v7978_v4 = vadd.f32 %v12376_v40, %v17474_v9  ;;  %v17475_v32 = vld [vmem:[#allocation15_spill] sm:$0xff]  ;;  %v17478_v57 = vld [vmem:[#allocation18_spill] sm:$0xff] }
 0x8ac   : > { %v8449_v37 = vsel %vm13667_vm10, %v8144_v54, %v8448_v6  ;;  %v8152_v24 = vor.u32 %v8150_v0, %v8149_v42  ;;  %v8154_v3 = vrot.slane %v8149_v42, 4  ;;  %v11163_v52 = vpack.c.bf16 %v7980_v1, %v7980_v1 }
 0x8ad   : > { %8450 = vst [vmem:[#allocation2 + $0x18] sm:$0xf] %v8449_v37  ;;  %v8442_v35 = vsel %vm13667_vm10, %v8127_v38, %v8441_v47  ;;  %v8135_v55 = vor.u32 %v8133_v20, %v8132_v41  ;;  %v8137_v30 = vrot.slane %v8132_v41, 4  ;;  %v11161_v48 = vpack.c.bf16 %v7978_v4, %v7978_v4  ;;  %v8459_v41 = vld [vmem:[#allocation2 + $0x2c] sm:$0x1] }
 0x8ae   : > { %8443 = vst [vmem:[#allocation2 + $0xc] sm:$0xf] %v8442_v35  ;;  %v8153_v51 = vsel %vm13660_vm7, %v8145_v22, %v8152_v24  ;;  %v8453_v7 = vsel %vm13677_vm11, %v8154_v3, %v8452_v25  ;;  %v8173_v23 = vshrl.u32 %v11163_v52, 16  ;;  %v8176_v8 = vshll.u32 %v11163_v52, 16  ;;  %v8466_v25 = vld [vmem:[#allocation2 + $0x38] sm:$0x1] }
 0x8af   : > { %8451 = vst.msk [vmem:[#allocation2 + $0x1c] sm:$0xf] %vm659_vm6, %v8153_v51  ;;  %8454 = vst [vmem:[#allocation2 + $0x20] sm:$0x1] %v8453_v7  ;;  %v8136_v44 = vsel %vm13660_vm7, %v8128_v16, %v8135_v55  ;;  %v8446_v33 = vsel %vm13677_vm11, %v8137_v30, %v8445_v12  ;;  %v8156_v58 = vshrl.u32 %v11161_v48, 16  ;;  %v11941_v62 = vpop.f32.mrb[8].mxu0  ;;  %v12377_v61 = vadd.f32 %v11938_v56, %v16367_v45 }
 0x8b0   : > { %8444 = vst.msk [vmem:[#allocation2 + $0x10] sm:$0xf] %vm659_vm6, %v8136_v44  ;;  %8447 = vst [vmem:[#allocation2 + $0x14] sm:$0x1] %v8446_v33  ;;  %v16401_v49 = vrot.slane %v8173_v23, 7  ;;  %v12378_v10 = vadd.f32 %v16367_v45, %v7834_v50  ;;  %v12379_v17 = vadd.f32 %v11941_v62, %v16367_v45  ;;  %v7847_v5 = vpop.f32.mrb[9].mxu0 }
 0x8b1   : > { %v16406_v36 = vrot.slane %v8156_v58, 7  ;;  %v8159_v28 = vshll.u32 %v11161_v48, 16  ;;  %v12380_v2 = vadd.f32 %v16367_v45, %v7847_v5  ;;  %v11942_v27 = vpop.f32.mrb[10].mxu0  ;;  %v7981_v43 = vadd.f32 %v12377_v61, %v17475_v32  ;;  %v17479_v35 = vld [vmem:[#allocation19_spill] sm:$0xff]  ;;  %v17480_v30 = vld [vmem:[#allocation20_spill] sm:$0xff] }
 0x8b2   : > { %v8178_v29 = vor.u32 %v8176_v8, %v16401_v49  ;;  %v8179_v18 = vrot.slane %v16401_v49, 4  ;;  %v7979_v63 = vadd.f32 %v12378_v10, %v17476_v46  ;;  %v7850_v21 = vpop.f32.mrb[11].mxu0  ;;  %v7984_v6 = vadd.f32 %v12379_v17, %v17477_v13  ;;  %v8476_v23 = vld [vmem:[#allocation2 + $0x48] sm:$0xf]  ;;  %v8469_v61 = vld [vmem:[#allocation2 + $0x3c] sm:$0xf] }
 0x8b3   : > { %v8161_v0 = vor.u32 %v8159_v28, %v16406_v36  ;;  %v8162_v60 = vrot.slane %v16406_v36, 4  ;;  %v7982_v59 = vadd.f32 %v12380_v2, %v17478_v57  ;;  %v11164_v40 = vpack.c.bf16 %v7981_v43, %v7981_v43  ;;  %v17481_v46 = vld [vmem:[#allocation21_spill] sm:$0xff] }
 0x8b4   : > { %v8463_v20 = vsel %vm13667_vm10, %v8178_v29, %v8462_v39  ;;  %v11162_v56 = vpack.c.bf16 %v7979_v63, %v7979_v63  ;;  %v12381_v54 = vadd.f32 %v11942_v27, %v16367_v45  ;;  %v11167_v47 = vpack.c.bf16 %v7984_v6, %v7984_v6 }
 0x8b5   : > { %8464 = vst [vmem:[#allocation2 + $0x30] sm:$0xf] %v8463_v20  ;;  %v8456_v22 = vsel %vm13667_vm10, %v8161_v0, %v8455_v53  ;;  %v11165_v42 = vpack.c.bf16 %v7982_v59, %v7982_v59  ;;  %v12382_v19 = vadd.f32 %v16367_v45, %v7850_v21  ;;  %v8181_v1 = vshrl.u32 %v11164_v40, 16  ;;  %v17482_v21 = vld [vmem:[#allocation22_spill] sm:$0xff] }
 0x8b6   : > { %8457 = vst [vmem:[#allocation2 + $0x24] sm:$0xf] %v8456_v22  ;;  %v8184_v50 = vshll.u32 %v11164_v40, 16  ;;  %v8164_v38 = vshrl.u32 %v11162_v56, 16  ;;  %v8167_v16 = vshll.u32 %v11162_v56, 16  ;;  %v8207_v9 = vshrl.u32 %v11167_v47, 16 }
 0x8b7   : > { %v8210_v4 = vshll.u32 %v11167_v47, 16  ;;  %v8190_v37 = vshrl.u32 %v11165_v42, 16  ;;  %v8193_v24 = vshll.u32 %v11165_v42, 16  ;;  %v11945_v3 = vpop.f32.mrb[12].mxu0  ;;  %v8183_v12 = vrot.slane %v8181_v1, 7  ;;  %v17483_v42 = vld [vmem:[#allocation23_spill] sm:$0xff] }
 0x8b8   : > { %v8166_v52 = vrot.slane %v8164_v38, 7  ;;  %v7985_v55 = vadd.f32 %v12381_v54, %v17479_v35  ;;  %v7983_v48 = vadd.f32 %v12382_v19, %v17480_v30  ;;  %v7863_v51 = vpop.f32.mrb[13].mxu0  ;;  %v16425_v7 = vrot.slane %v8207_v9, 7  ;;  %v16453_v6 = vld [vmem:[#allocation2 + $0x1c] sm:$0xf]  ;;  %v17484_v1 = vld [vmem:[#allocation24_spill] sm:$0xff] }
 0x8b9   : > { %v16427_v44 = vrot.slane %v8190_v37, 7  ;;  %v12383_v33 = vadd.f32 %v11945_v3, %v16367_v45  ;;  %v12384_v8 = vadd.f32 %v16367_v45, %v7863_v51  ;;  %v11946_v58 = vpop.f32.mrb[14].mxu0  ;;  %v8186_v62 = vor.u32 %v8184_v50, %v8183_v12  ;;  %v8480_v54 = vld [vmem:[#allocation2 + $0x50] sm:$0x1]  ;;  %v8557_v38 = vld [vmem:[#allocation2 + $0x18] sm:$0xf] }
 0x8ba   : > { %v8188_v14 = vrot.slane %v8183_v12, 4  ;;  %v8169_v34 = vor.u32 %v8167_v16, %v8166_v52  ;;  %v8171_v49 = vrot.slane %v8166_v52, 4  ;;  %v7866_v10 = vpop.f32.mrb[15].mxu0  ;;  %v8212_v17 = vor.u32 %v8210_v4, %v16425_v7  ;;  %v8473_v9 = vld [vmem:[#allocation2 + $0x44] sm:$0x1] }
 0x8bb   : > { %v8213_v5 = vrot.slane %v16425_v7, 4  ;;  %v8195_v39 = vor.u32 %v8193_v24, %v16427_v44  ;;  %v8196_v36 = vrot.slane %v16427_v44, 4  ;;  %v8187_v28 = vsel %vm13660_vm7, %v8179_v18, %v8186_v62 }
 0x8bc   : > { %v8467_v2 = vsel %vm13677_vm11, %v8188_v14, %v8466_v25  ;;  %v8170_v27 = vsel %vm13660_vm7, %v8162_v60, %v8169_v34  ;;  %v8460_v29 = vsel %vm13677_vm11, %v8171_v49, %v8459_v41  ;;  %8465 = vst.msk [vmem:[#allocation2 + $0x34] sm:$0xf] %vm659_vm6, %v8187_v28  ;;  %v8477_v53 = vsel %vm13667_vm10, %v8212_v17, %v8476_v23  ;;  %v8490_v23 = vld [vmem:[#allocation2 + $0x60] sm:$0xf] }
 0x8bd   : > { %8468 = vst [vmem:[#allocation2 + $0x38] sm:$0x1] %v8467_v2  ;;  %8458 = vst.msk [vmem:[#allocation2 + $0x28] sm:$0xf] %vm659_vm6, %v8170_v27  ;;  %v8470_v18 = vsel %vm13667_vm10, %v8195_v39, %v8469_v61  ;;  %v11168_v32 = vpack.c.bf16 %v7985_v55, %v7985_v55  ;;  %v11166_v43 = vpack.c.bf16 %v7983_v48, %v7983_v48  ;;  %v16479_v27 = vld [vmem:[#allocation2 + $0x10] sm:$0xf] }
 0x8be   : > { %8461 = vst [vmem:[#allocation2 + $0x2c] sm:$0x1] %v8460_v29  ;;  %8478 = vst [vmem:[#allocation2 + $0x48] sm:$0xf] %v8477_v53  ;;  %v7988_v63 = vadd.f32 %v12383_v33, %v17481_v46  ;;  %v7986_v0 = vadd.f32 %v12384_v8, %v17482_v21  ;;  %v12385_v60 = vadd.f32 %v11946_v58, %v16367_v45  ;;  %v8483_v8 = vld [vmem:[#allocation2 + $0x54] sm:$0xf] }
 0x8bf   : > { %8471 = vst [vmem:[#allocation2 + $0x3c] sm:$0xf] %v8470_v18  ;;  %v12386_v13 = vadd.f32 %v16367_v45, %v7866_v10  ;;  %v8215_v57 = vshrl.u32 %v11168_v32, 16  ;;  %v8218_v59 = vshll.u32 %v11168_v32, 16  ;;  %v8198_v20 = vshrl.u32 %v11166_v43, 16  ;;  %v11949_v56 = vpop.f32.mrb[16].mxu0 }
 0x8c0   : > { %v8201_v40 = vshll.u32 %v11166_v43, 16  ;;  %v11171_v22 = vpack.c.bf16 %v7988_v63, %v7988_v63  ;;  %v11169_v47 = vpack.c.bf16 %v7986_v0, %v7986_v0  ;;  %v7989_v19 = vadd.f32 %v12385_v60, %v17483_v42  ;;  %v7879_v16 = vpop.f32.mrb[17].mxu0  ;;  %v16473_v10 = vld [vmem:[#allocation2 + $0x20] ss:$0 sps:$4 sm:$0x11]   ;;  %v17485_v63 = vld [vmem:[#allocation25_spill] sm:$0xff] }
 0x8c1   : > { %v7987_v50 = vadd.f32 %v12386_v13, %v17484_v1  ;;  %v8217_v25 = vrot.slane %v8215_v57, 7  ;;  %v8200_v41 = vrot.slane %v8198_v20, 7  ;;  %v12387_v4 = vadd.f32 %v11949_v56, %v16367_v45  ;;  %v16461_v24 = vpop.f32.mrb[18].mxu0  ;;  %v16475_v17 = vld [vmem:[#allocation2 + $0x14] ss:$0 sps:$4 sm:$0x11]  }
 0x8c2   : > { %v16459_v37 = vcombine.low %v8557_v38, %v16453_v6  ;;  %v8241_v3 = vshrl.u32 %v11171_v22, 16  ;;  %v8244_v12 = vshll.u32 %v11171_v22, 16  ;;  %v8224_v52 = vshrl.u32 %v11169_v47, 16  ;;  %v16463_v55 = vpop.f32.mrb[19].mxu0  ;;  %v8555_v60 = vld [vmem:[#allocation2 + $0xc] sm:$0xf] }
 0x8c3   : > { %v8227_v35 = vshll.u32 %v11169_v47, 16  ;;  %v8220_v30 = vor.u32 %v8218_v59, %v8217_v25  ;;  %v8222_v48 = vrot.slane %v8217_v25, 4  ;;  %v8203_v51 = vor.u32 %v8201_v40, %v8200_v41  ;;  %v8494_v22 = vld [vmem:[#allocation2 + $0x68] sm:$0x1]  ;;  %v8487_v47 = vld [vmem:[#allocation2 + $0x5c] sm:$0x1] }
 0x8c4   : > { %v8205_v7 = vrot.slane %v8200_v41, 4  ;;  %v8243_v44 = vrot.slane %v8241_v3, 7  ;;  %v8226_v33 = vrot.slane %v8224_v52, 7  ;;  %v11172_v58 = vpack.c.bf16 %v7989_v19, %v7989_v19 }
 0x8c5   : > { %v11170_v62 = vpack.c.bf16 %v7987_v50, %v7987_v50  ;;  %v8221_v14 = vsel %vm13660_vm7, %v8213_v5, %v8220_v30  ;;  %v8481_v34 = vsel %vm13677_vm11, %v8222_v48, %v8480_v54  ;;  %v8204_v49 = vsel %vm13660_vm7, %v8196_v36, %v8203_v51  ;;  %v13149_v54 = vld [vmem:[%s17200_s3 + $0x10] sm:$0xff]  }
 0x8c6   : > { %v8474_v61 = vsel %vm13677_vm11, %v8205_v7, %v8473_v9  ;;  %8479 = vst.msk [vmem:[#allocation2 + $0x4c] sm:$0xf] %vm659_vm6, %v8221_v14  ;;  %8482 = vst [vmem:[#allocation2 + $0x50] sm:$0x1] %v8481_v34  ;;  %v8246_v5 = vor.u32 %v8244_v12, %v8243_v44  ;;  %v8247_v39 = vrot.slane %v8243_v44, 4  ;;  %v8229_v28 = vor.u32 %v8227_v35, %v8226_v33 }
 0x8c7   : > { %8472 = vst.msk [vmem:[#allocation2 + $0x40] sm:$0xf] %vm659_vm6, %v8204_v49  ;;  %8475 = vst [vmem:[#allocation2 + $0x44] sm:$0x1] %v8474_v61  ;;  %v8230_v2 = vrot.slane %v8226_v33, 4  ;;  %v8249_v36 = vshrl.u32 %v11172_v58, 16  ;;  %v7992_v21 = vadd.f32 %v12387_v4, %v17485_v63  ;;  %v12388_v19 = vadd.f32 %v16367_v45, %v7879_v16  ;;  %11967 = vmatprep.subr.bf16.mxu1 %v13149_v54 }
 0x8c8   : > { %v8252_v29 = vshll.u32 %v11172_v58, 16  ;;  %v8232_v53 = vshrl.u32 %v11170_v62, 16  ;;  %v8235_v18 = vshll.u32 %v11170_v62, 16  ;;  %v16481_v32 = vpop.f32.mrb[20].mxu0  ;;  %v8491_v43 = vsel %vm13667_vm10, %v8246_v5, %v8490_v23  ;;  %11968 = vmatpush3.bf16.msra.mxu1 %v13149_v54  ;;  %v8504_v23 = vld [vmem:[#allocation2 + $0x78] sm:$0xf] }
 0x8c9   : > { %v8484_v46 = vsel %vm13667_vm10, %v8229_v28, %v8483_v8  ;;  %v8794_v0 = vshrl.u32 %v16459_v37, 16  ;;  %v16489_v13 = vpop.f32.mrb[21].mxu0  ;;  %8492 = vst [vmem:[#allocation2 + $0x60] sm:$0xf] %v8491_v43  ;;  %v8251_v57 = vrot.slane %v8249_v36, 7  ;;  %v8796_v20 = vshll.u32 %v16459_v37, 16 }
 0x8ca   : > { %8485 = vst [vmem:[#allocation2 + $0x54] sm:$0xf] %v8484_v46  ;;  %v8234_v59 = vrot.slane %v8232_v53, 7  ;;  %v8801_v40 = vshll.u32 %v16473_v10, 16  ;;  %v16493_v56 = vpop.f32.mrb[22].mxu0  ;;  %v11175_v42 = vpack.c.bf16 %v7992_v21, %v7992_v21  ;;  %v16500_v1 = vcombine.low %v8555_v60, %v16479_v27  ;;  %v17486_v33 = vld [vmem:[#allocation26_spill] sm:$0xff] }
 0x8cb   : > { %v8789_v50 = vshll.u32 %v16475_v17, 16  ;;  %v16503_v38 = vpop.f32.mrb[23].mxu0  ;;  %v8254_v25 = vor.u32 %v8252_v29, %v8251_v57  ;;  %v8256_v41 = vrot.slane %v8251_v57, 4  ;;  %v8798_v52 = vrot.slane %v8796_v20, 1  ;;  %v16522_v62 = vld [vmem:[%s17200_s3 + $0x18] sm:$0xff]  }
 0x8cc   : > { %v8237_v9 = vor.u32 %v8235_v18, %v8234_v59  ;;  %v8239_v4 = vrot.slane %v8234_v59, 4  ;;  %v8275_v3 = vshrl.u32 %v11175_v42, 16  ;;  %v8278_v12 = vshll.u32 %v11175_v42, 16  ;;  %v8609_v29 = vld [vmem:[#allocation2 + $0x18] sm:$0xe]  ;;  %12001 = vmatprep.subr.bf16.mxu1 %v16522_v62  ;;  %v17487_v18 = vld [vmem:[#allocation27_spill] sm:$0xff] }
 0x8cd   : > { %v8803_v35 = vrot.slane %v8801_v40, 1  ;;  %v8255_v16 = vsel %vm13660_vm7, %v8247_v39, %v8254_v25  ;;  %v8495_v30 = vsel %vm13677_vm11, %v8256_v41, %v8494_v22  ;;  %v8799_v44 = vor.u32 %v8798_v52, %v8794_v0  ;;  %v8497_v40 = vld [vmem:[#allocation2 + $0x6c] sm:$0xf]  ;;  %v16555_v52 = vld [vmem:[#allocation2 + $0x34] sm:$0xf] }
 0x8ce   : > { %v8238_v48 = vsel %vm13660_vm7, %v8230_v2, %v8237_v9  ;;  %v8488_v51 = vsel %vm13677_vm11, %v8239_v4, %v8487_v47  ;;  %8493 = vst.msk [vmem:[#allocation2 + $0x64] sm:$0xf] %vm659_vm6, %v8255_v16  ;;  %8496 = vst [vmem:[#allocation2 + $0x68] sm:$0x1] %v8495_v30  ;;  %v16515_v7 = vrot.slane %v8275_v3, 7  ;;  %v7990_v8 = vadd.f32 %v12388_v19, %v17486_v33 }
 0x8cf   : > { %8486 = vst.msk [vmem:[#allocation2 + $0x58] sm:$0xf] %vm659_vm6, %v8238_v48  ;;  %8489 = vst [vmem:[#allocation2 + $0x5c] sm:$0x1] %v8488_v51  ;;  %v8782_v58 = vshrl.u32 %v16500_v1, 16  ;;  %v8784_v14 = vshll.u32 %v16500_v1, 16  ;;  %v12389_v49 = vadd.f32 %v16461_v24, %v16367_v45  ;;  %v12390_v61 = vadd.f32 %v16367_v45, %v16463_v55 }
 0x8d0   : > { %v8791_v34 = vrot.slane %v8789_v50, 1  ;;  %v16529_v5 = vpop.f32.mrb[24].mxu0  ;;  %v8280_v39 = vor.u32 %v8278_v12, %v16515_v7  ;;  %v8281_v28 = vrot.slane %v16515_v7, 4  ;;  %v8804_v2 = vsel %vm993_vm3, %v8799_v44, %v8803_v35  ;;  %v17488_v55 = vld [vmem:[#allocation28_spill] sm:$0xff] }
 0x8d1   : > { %v11173_v36 = vpack.c.bf16 %v7990_v8, %v7990_v8  ;;  %v16534_v53 = vpop.f32.mrb[25].mxu0  ;;  %8989 = vrot.lane.b32.xlu0 %v8804_v2, %s13491_s9  ;;  %v8786_v24 = vrot.slane %v8784_v14, 1  ;;  %v7993_v43 = vadd.f32 %v12389_v49, %v17487_v18  ;;  %v7991_v46 = vadd.f32 %v12390_v61, %v17488_v55  ;;  %v8608_v19 = vld [vmem:[#allocation2 + $0xc] sm:$0xe]  ;;  %v8501_v14 = vld [vmem:[#allocation2 + $0x74] sm:$0x1] }
 0x8d2   : > { %v10949_v63 = vcombine.low %v8609_v29, %v16453_v6  ;;  %v16541_v21 = vpop.f32.mrb[26].mxu0  ;;  %v8505_v0 = vsel %vm13667_vm10, %v8280_v39, %v8504_v23  ;;  %v9082_v59 = vrot.slane %v16473_v10, 1  ;;  %v10948_v6 = vcombine.low %v8608_v19, %v16479_v27  ;;  %v16552_v9 = vld [vmem:[#allocation2 + $0x38] ss:$0 sps:$4 sm:$0x11]   ;;  %v17489_v23 = vld [vmem:[#allocation29_spill] sm:$0xff] }
 0x8d3   : > { %v8258_v60 = vshrl.u32 %v11173_v36, 16  ;;  %v8261_v57 = vshll.u32 %v11173_v36, 16  ;;  %v16546_v20 = vpop.f32.mrb[27].mxu0  ;;  %8506 = vst [vmem:[#allocation2 + $0x78] sm:$0xf] %v8505_v0  ;;  %v8787_v54 = vor.u32 %v8786_v24, %v8782_v58  ;;  %v11176_v22 = vpack.c.bf16 %v7993_v43, %v7993_v43  ;;  %v17490_v19 = vld [vmem:[#allocation30_spill] sm:$0xff] }
 0x8d4   : > { %v11174_v47 = vpack.c.bf16 %v7991_v46, %v7991_v46  ;;  %v9081_v42 = vrot.slane %v10949_v63, 1  ;;  %v9079_v25 = vrot.slane %v16475_v17, 1  ;;  %v12391_v41 = vadd.f32 %v16481_v32, %v16367_v45  ;;  %v8561_v17 = vld [vmem:[#allocation2 + $0x30] sm:$0xf]  ;;  %v8508_v58 = vld [vmem:[#allocation2 + $0x80] sm:$0x1] }
 0x8d5   : > { %v8260_v50 = vrot.slane %v8258_v60, 7  ;;  %v8792_v10 = vsel %vm993_vm3, %v8787_v54, %v8791_v34  ;;  %v8283_v4 = vshrl.u32 %v11176_v22, 16  ;;  %v8286_v3 = vshll.u32 %v11176_v22, 16  ;;  %v16573_v18 = vld [vmem:[#allocation2 + $0x2c] ss:$0 sps:$4 sm:$0x11]  }
 0x8d6   : > { %v8266_v12 = vshrl.u32 %v11174_v47, 16  ;;  %8987 = vrot.lane.b32.xlu1 %v8792_v10, %s13491_s9  ;;  %v8269_v30 = vshll.u32 %v11174_v47, 16  ;;  %v9083_v27 = vsel %vm1300_vm2, %v9081_v42, %v9082_v59  ;;  %v9078_v32 = vrot.slane %v10948_v6, 1  ;;  %v16580_v60 = vld [vmem:[#allocation2 + $0x28] sm:$0xf] }
 0x8d7   : > { %v8263_v35 = vor.u32 %v8261_v57, %v8260_v50  ;;  %v8264_v16 = vrot.slane %v8260_v50, 4  ;;  %v8285_v48 = vrot.slane %v8283_v4, 7  ;;  %9133 = vrot.lane.b32.xlu0 %v9083_v27, %s13490_s17  ;;  %v7996_v44 = vadd.f32 %v12391_v41, %v17489_v23  ;;  %v16561_v33 = vpop.f32.mrb[28].mxu0  ;;  %v8559_v42 = vld [vmem:[#allocation2 + $0x24] sm:$0xf] }
 0x8d8   : > { %v8268_v51 = vrot.slane %v8266_v12, 7  ;;  %v16566_v34 = vcombine.low %v8561_v17, %v16555_v52  ;;  %v8825_v49 = vshll.u32 %v16552_v9, 16  ;;  %v12392_v61 = vadd.f32 %v16367_v45, %v16489_v13  ;;  %v16571_v39 = vpop.f32.mrb[29].mxu0  ;;  %v8611_v10 = vld [vmem:[#allocation2 + $0x30] sm:$0xe]  ;;  %v17491_v23 = vld [vmem:[#allocation31_spill] sm:$0xff] }
 0x8d9   : > { %v8498_v8 = vsel %vm13667_vm10, %v8263_v35, %v8497_v40  ;;  %v8288_v2 = vor.u32 %v8286_v3, %v8285_v48  ;;  %v8290_v36 = vrot.slane %v8285_v48, 4  ;;  %v16575_v43 = vpop.f32.mrb[30].mxu0  ;;  %v9080_v55 = vsel %vm1300_vm2, %v9078_v32, %v9079_v25 }
 0x8da   : > { %8499 = vst [vmem:[#allocation2 + $0x6c] sm:$0xf] %v8498_v8  ;;  %v8271_v29 = vor.u32 %v8269_v30, %v8268_v51  ;;  %v8273_v24 = vrot.slane %v8268_v51, 4  ;;  %v11179_v46 = vpack.c.bf16 %v7996_v44, %v7996_v44  ;;  %v8818_v63 = vshrl.u32 %v16566_v34, 16  ;;  %v16582_v13 = vpop.f32.mrb[31].mxu0  ;;  %9131 = vrot.lane.b32.xlu1 %v9080_v55, %s13490_s17 }
 0x8db   : > { %v8820_v0 = vshll.u32 %v16566_v34, 16  ;;  %v8289_v57 = vsel %vm13660_vm7, %v8281_v28, %v8288_v2  ;;  %v8509_v59 = vsel %vm13677_vm11, %v8290_v36, %v8508_v58  ;;  %v8827_v47 = vrot.slane %v8825_v49, 1  ;;  %v17492_v58 = vld [vmem:[#allocation32_spill] sm:$0xff] }
 0x8dc   : > { %v8272_v40 = vsel %vm13660_vm7, %v8264_v16, %v8271_v29  ;;  %v8502_v54 = vsel %vm13677_vm11, %v8273_v24, %v8501_v14  ;;  %8507 = vst.msk [vmem:[#allocation2 + $0x7c] sm:$0xf] %vm659_vm6, %v8289_v57  ;;  %8510 = vst [vmem:[#allocation2 + $0x80] sm:$0x1] %v8509_v59  ;;  %v8309_v7 = vshrl.u32 %v11179_v46, 16  ;;  %v8312_v22 = vshll.u32 %v11179_v46, 16 }
 0x8dd   : > { %8500 = vst.msk [vmem:[#allocation2 + $0x70] sm:$0xf] %vm659_vm6, %v8272_v40  ;;  %8503 = vst [vmem:[#allocation2 + $0x74] sm:$0x1] %v8502_v54  ;;  %v8822_v28 = vrot.slane %v8820_v0, 1  ;;  %v7994_v50 = vadd.f32 %v12392_v61, %v17490_v19  ;;  %v16599_v6 = vcombine.low %v8559_v42, %v16580_v60  ;;  %v8813_v25 = vshll.u32 %v16573_v18, 16 }
 0x8de   : > { %v12393_v41 = vadd.f32 %v16493_v56, %v16367_v45  ;;  %v16604_v4 = vrot.slane %v8309_v7, 7  ;;  %v12394_v12 = vadd.f32 %v16367_v45, %v16503_v38  ;;  %v10951_v35 = vcombine.low %v8611_v10, %v16555_v52  ;;  %v8518_v16 = vld [vmem:[#allocation2 + $0x90] sm:$0xf]  ;;  %v8511_v61 = vld [vmem:[#allocation2 + $0x84] sm:$0xf] }
 0x8df   : > { %v8823_v3 = vor.u32 %v8822_v28, %v8818_v63  ;;  %v11177_v30 = vpack.c.bf16 %v7994_v50, %v7994_v50  ;;  %v8806_v27 = vshrl.u32 %v16599_v6, 16  ;;  %v8808_v17 = vshll.u32 %v16599_v6, 16  ;;  %v8610_v24 = vld [vmem:[#allocation2 + $0x24] sm:$0xe]  ;;  %v8522_v10 = vld [vmem:[#allocation2 + $0x98] sm:$0x1] }
 0x8e0   : > { %v8815_v48 = vrot.slane %v8813_v25, 1  ;;  %v8314_v51 = vor.u32 %v8312_v22, %v16604_v4  ;;  %v8315_v56 = vrot.slane %v16604_v4, 4  ;;  %v7997_v44 = vadd.f32 %v12393_v41, %v17491_v23  ;;  %v16621_v57 = vld [vmem:[#allocation2 + $0x50] ss:$0 sps:$4 sm:$0x11]  }
 0x8e1   : > { %v8828_v32 = vsel %vm993_vm3, %v8823_v3, %v8827_v47  ;;  %v8292_v38 = vshrl.u32 %v11177_v30, 16  ;;  %v8295_v8 = vshll.u32 %v11177_v30, 16  ;;  %v8810_v52 = vrot.slane %v8808_v17, 1  ;;  %v16625_v22 = vld [vmem:[#allocation2 + $0x4c] sm:$0xf]  ;;  %v17493_v17 = vld [vmem:[#allocation33_spill] sm:$0xff] }
 0x8e2   : > { %8993 = vrot.lane.b32.xlu0 %v8828_v32, %s13491_s9  ;;  %v7995_v14 = vadd.f32 %v12394_v12, %v17492_v58  ;;  %v8519_v49 = vsel %vm13667_vm10, %v8314_v51, %v8518_v16  ;;  %v11180_v2 = vpack.c.bf16 %v7997_v44, %v7997_v44  ;;  %v9087_v36 = vrot.slane %v10951_v35, 1  ;;  %v8565_v41 = vld [vmem:[#allocation2 + $0x48] sm:$0xf]  ;;  %v8515_v30 = vld [vmem:[#allocation2 + $0x8c] sm:$0x1] }
 0x8e3   : > { %v9088_v29 = vrot.slane %v16552_v9, 1  ;;  %8520 = vst [vmem:[#allocation2 + $0x90] sm:$0xf] %v8519_v49  ;;  %v8294_v55 = vrot.slane %v8292_v38, 7  ;;  %v8811_v46 = vor.u32 %v8810_v52, %v8806_v27  ;;  %v10950_v0 = vcombine.low %v8610_v24, %v16580_v60  ;;  %v16644_v38 = vld [vmem:[#allocation2 + $0x40] sm:$0xf] }
 0x8e4   : > { %v11178_v63 = vpack.c.bf16 %v7995_v14, %v7995_v14  ;;  %v8317_v59 = vshrl.u32 %v11180_v2, 16  ;;  %v8320_v40 = vshll.u32 %v11180_v2, 16  ;;  %v9085_v7 = vrot.slane %v16573_v18, 1 }
 0x8e5   : > { %v9089_v54 = vsel %vm1300_vm2, %v9087_v36, %v9088_v29  ;;  %v8297_v28 = vor.u32 %v8295_v8, %v8294_v55  ;;  %v8298_v47 = vrot.slane %v8294_v55, 4  ;;  %v8816_v9 = vsel %vm993_vm3, %v8811_v46, %v8815_v48  ;;  %v8563_v36 = vld [vmem:[#allocation2 + $0x3c] sm:$0xf] }
 0x8e6   : > { %v8300_v42 = vshrl.u32 %v11178_v63, 16  ;;  %9137 = vrot.lane.b32.xlu0 %v9089_v54, %s13490_s17  ;;  %8991 = vrot.lane.b32.xlu1 %v8816_v9, %s13491_s9  ;;  %v8319_v60 = vrot.slane %v8317_v59, 7  ;;  %v8303_v19 = vshll.u32 %v11178_v63, 16  ;;  %v9084_v50 = vrot.slane %v10950_v0, 1  ;;  %v17494_v0 = vld [vmem:[#allocation34_spill] sm:$0xff] }
 0x8e7   : > { %v12395_v25 = vadd.f32 %v16529_v5, %v16367_v45  ;;  %v8512_v18 = vsel %vm13667_vm10, %v8297_v28, %v8511_v61  ;;  %v16635_v3 = vcombine.low %v8565_v41, %v16625_v22  ;;  %v8849_v12 = vshll.u32 %v16621_v57, 16  ;;  %v16640_v5 = vld [vmem:[#allocation2 + $0x44] ss:$0 sps:$4 sm:$0x11]   ;;  %v8532_v9 = vld [vmem:[#allocation2 + $0xa8] sm:$0xf] }
 0x8e8   : > { %v8302_v4 = vrot.slane %v8300_v42, 7  ;;  %8513 = vst [vmem:[#allocation2 + $0x84] sm:$0xf] %v8512_v18  ;;  %v8322_v35 = vor.u32 %v8320_v40, %v8319_v60  ;;  %v8324_v16 = vrot.slane %v8319_v60, 4  ;;  %v9086_v27 = vsel %vm1300_vm2, %v9084_v50, %v9085_v7  ;;  %v8613_v18 = vld [vmem:[#allocation2 + $0x48] sm:$0xe] }
 0x8e9   : > { %v8000_v48 = vadd.f32 %v12395_v25, %v17493_v17  ;;  %v8842_v23 = vshrl.u32 %v16635_v3, 16  ;;  %v8844_v44 = vshll.u32 %v16635_v3, 16  ;;  %v8851_v14 = vrot.slane %v8849_v12, 1  ;;  %v17496_v25 = vld [vmem:[#allocation36_spill] sm:$0xff]  ;;  %v8525_v17 = vld [vmem:[#allocation2 + $0x9c] sm:$0xf] }
 0x8ea   : > { %v8305_v51 = vor.u32 %v8303_v19, %v8302_v4  ;;  %v8307_v32 = vrot.slane %v8302_v4, 4  ;;  %v8323_v8 = vsel %vm13660_vm7, %v8315_v56, %v8322_v35  ;;  %v8523_v52 = vsel %vm13677_vm11, %v8324_v16, %v8522_v10  ;;  %9135 = vrot.lane.b32.xlu1 %v9086_v27, %s13490_s17  ;;  %v17495_v19 = vld [vmem:[#allocation35_spill] sm:$0xff] }
 0x8eb   : > { %v11183_v58 = vpack.c.bf16 %v8000_v48, %v8000_v48  ;;  %8521 = vst.msk [vmem:[#allocation2 + $0x94] sm:$0xf] %vm659_vm6, %v8323_v8  ;;  %8524 = vst [vmem:[#allocation2 + $0x98] sm:$0x1] %v8523_v52  ;;  %v8846_v2 = vrot.slane %v8844_v44, 1  ;;  %v12396_v56 = vadd.f32 %v16367_v45, %v16534_v53  ;;  %v16660_v55 = vcombine.low %v8563_v36, %v16644_v38 }
 0x8ec   : > { %v8306_v49 = vsel %vm13660_vm7, %v8298_v47, %v8305_v51  ;;  %v8516_v61 = vsel %vm13677_vm11, %v8307_v32, %v8515_v30  ;;  %v8837_v46 = vshll.u32 %v16640_v5, 16  ;;  %v12397_v40 = vadd.f32 %v16541_v21, %v16367_v45 }
 0x8ed   : > { %8514 = vst.msk [vmem:[#allocation2 + $0x88] sm:$0xf] %vm659_vm6, %v8306_v49  ;;  %8517 = vst [vmem:[#allocation2 + $0x8c] sm:$0x1] %v8516_v61  ;;  %v8343_v29 = vshrl.u32 %v11183_v58, 16  ;;  %v8346_v24 = vshll.u32 %v11183_v58, 16  ;;  %v8847_v63 = vor.u32 %v8846_v2, %v8842_v23  ;;  %v7998_v59 = vadd.f32 %v12396_v56, %v17494_v0 }
 0x8ee   : > { %v12398_v53 = vadd.f32 %v16367_v45, %v16546_v20  ;;  %v8830_v7 = vshrl.u32 %v16660_v55, 16  ;;  %v8832_v28 = vshll.u32 %v16660_v55, 16  ;;  %v8839_v47 = vrot.slane %v8837_v46, 1  ;;  %v8612_v23 = vld [vmem:[#allocation2 + $0x3c] sm:$0xe] }
 0x8ef   : > { %v8345_v54 = vrot.slane %v8343_v29, 7  ;;  %v8852_v42 = vsel %vm993_vm3, %v8847_v63, %v8851_v14  ;;  %v11181_v60 = vpack.c.bf16 %v7998_v59, %v7998_v59  ;;  %v8001_v50 = vadd.f32 %v12397_v40, %v17495_v19  ;;  %v16678_v14 = vld [vmem:[#allocation2 + $0x64] sm:$0xf]  ;;  %v8536_v49 = vld [vmem:[#allocation2 + $0xb0] sm:$0x1] }
 0x8f0   : > { %v7999_v41 = vadd.f32 %v12398_v53, %v17496_v25  ;;  %8997 = vrot.lane.b32.xlu0 %v8852_v42, %s13491_s9  ;;  %v8834_v20 = vrot.slane %v8832_v28, 1  ;;  %v10953_v4 = vcombine.low %v8613_v18, %v16625_v22  ;;  %v9094_v32 = vrot.slane %v16621_v57, 1  ;;  %v8569_v46 = vld [vmem:[#allocation2 + $0x60] sm:$0xf]  ;;  %v8575_v26 = vld [vmem:[#allocation2 + $0x84] sm:$0xf] }
 0x8f1   : > { %v8348_v10 = vor.u32 %v8346_v24, %v8345_v54  ;;  %v8349_v21 = vrot.slane %v8345_v54, 4  ;;  %v8326_v12 = vshrl.u32 %v11181_v60, 16  ;;  %v8329_v35 = vshll.u32 %v11181_v60, 16  ;;  %v16691_v53 = vld [vmem:[#allocation2 + $0x68] ss:$0 sps:$4 sm:$0x11]  }
 0x8f2   : > { %v11184_v16 = vpack.c.bf16 %v8001_v50, %v8001_v50  ;;  %v11182_v30 = vpack.c.bf16 %v7999_v41, %v7999_v41  ;;  %v8835_v48 = vor.u32 %v8834_v20, %v8830_v7  ;;  %v9093_v51 = vrot.slane %v10953_v4, 1  ;;  %v17497_v60 = vld [vmem:[#allocation37_spill] sm:$0xff]  ;;  %v16700_v50 = vld [vmem:[#allocation2 + $0x58] sm:$0xf] }
 0x8f3   : > { %v8533_v27 = vsel %vm13667_vm10, %v8348_v10, %v8532_v9  ;;  %v8328_v44 = vrot.slane %v8326_v12, 7  ;;  %v10952_v56 = vcombine.low %v8612_v23, %v16644_v38  ;;  %v9091_v0 = vrot.slane %v16640_v5, 1  ;;  %v16695_v9 = vld [vmem:[#allocation2 + $0x5c] ss:$0 sps:$4 sm:$0x11]  }
 0x8f4   : > { %8534 = vst [vmem:[#allocation2 + $0xa8] sm:$0xf] %v8533_v27  ;;  %v8351_v8 = vshrl.u32 %v11184_v16, 16  ;;  %v8354_v52 = vshll.u32 %v11184_v16, 16  ;;  %v8334_v58 = vshrl.u32 %v11182_v30, 16  ;;  %v8840_v22 = vsel %vm993_vm3, %v8835_v48, %v8839_v47 }
 0x8f5   : > { %v8337_v61 = vshll.u32 %v11182_v30, 16  ;;  %v9095_v2 = vsel %vm1300_vm2, %v9093_v51, %v9094_v32  ;;  %v8331_v36 = vor.u32 %v8329_v35, %v8328_v44  ;;  %v8332_v29 = vrot.slane %v8328_v44, 4  ;;  %8995 = vrot.lane.b32.xlu1 %v8840_v22, %s13491_s9  ;;  %v8529_v47 = vld [vmem:[#allocation2 + $0xa4] sm:$0x1]  ;;  %v8567_v35 = vld [vmem:[#allocation2 + $0x54] sm:$0xf] }
 0x8f6   : > { %v8353_v57 = vrot.slane %v8351_v8, 7  ;;  %v8336_v24 = vrot.slane %v8334_v58, 7  ;;  %9141 = vrot.lane.b32.xlu0 %v9095_v2, %s13490_s17  ;;  %v9090_v63 = vrot.slane %v10952_v56, 1  ;;  %v12399_v59 = vadd.f32 %v16561_v33, %v16367_v45  ;;  %v17498_v44 = vld [vmem:[#allocation38_spill] sm:$0xff] }
 0x8f7   : > { %v16689_v40 = vcombine.low %v8569_v46, %v16678_v14  ;;  %v8526_v38 = vsel %vm13667_vm10, %v8331_v36, %v8525_v17  ;;  %v12400_v12 = vadd.f32 %v16367_v45, %v16571_v39  ;;  %v16718_v30 = vcombine.low %v8567_v35, %v16700_v50  ;;  %v13160_v17 = vld [vmem:[%s17199_s2 + $0x5] ss:$0 sm:$0xff]  ;;  %v8615_v36 = vld [vmem:[#allocation2 + $0x60] sm:$0xe] }
 0x8f8   : > { %v8356_v54 = vor.u32 %v8354_v52, %v8353_v57  ;;  %v8358_v7 = vrot.slane %v8353_v57, 4  ;;  %v8339_v28 = vor.u32 %v8337_v61, %v8336_v24  ;;  %8527 = vst [vmem:[#allocation2 + $0x9c] sm:$0xf] %v8526_v38  ;;  %v8341_v42 = vrot.slane %v8336_v24, 4  ;;  %v17499_v61 = vld [vmem:[#allocation39_spill] sm:$0xff] }
 0x8f9   : > { %v9092_v5 = vsel %vm1300_vm2, %v9090_v63, %v9091_v0  ;;  %v8004_v33 = vadd.f32 %v12399_v59, %v17497_v60  ;;  %v8866_v19 = vshrl.u32 %v16689_v40, 16  ;;  %v8868_v10 = vshll.u32 %v16689_v40, 16  ;;  %v16739_v60 = vld [vmem:[#allocation2 + $0x7c] sm:$0xf] }
 0x8fa   : > { %v8357_v25 = vsel %vm13660_vm7, %v8349_v21, %v8356_v54  ;;  %v8537_v41 = vsel %vm13677_vm11, %v8358_v7, %v8536_v49  ;;  %v8340_v18 = vsel %vm13660_vm7, %v8332_v29, %v8339_v28  ;;  %9139 = vrot.lane.b32.xlu1 %v9092_v5, %s13490_s17  ;;  %v8530_v20 = vsel %vm13677_vm11, %v8341_v42, %v8529_v47  ;;  %v8614_v54 = vld [vmem:[#allocation2 + $0x54] sm:$0xe]  ;;  %v17500_v47 = vld [vmem:[#allocation40_spill] sm:$0xff] }
 0x8fb   : > { %8535 = vst.msk [vmem:[#allocation2 + $0xac] sm:$0xf] %vm659_vm6, %v8357_v25  ;;  %8538 = vst [vmem:[#allocation2 + $0xb0] sm:$0x1] %v8537_v41  ;;  %v11187_v4 = vpack.c.bf16 %v8004_v33, %v8004_v33  ;;  %v8873_v21 = vshll.u32 %v16691_v53, 16  ;;  %v8870_v16 = vrot.slane %v8868_v10, 1  ;;  %v12401_v48 = vadd.f32 %v13160_v17, %v16575_v43 }
 0x8fc   : > { %8528 = vst.msk [vmem:[#allocation2 + $0xa0] sm:$0xf] %vm659_vm6, %v8340_v18  ;;  %8531 = vst [vmem:[#allocation2 + $0xa4] sm:$0x1] %v8530_v20  ;;  %v8861_v27 = vshll.u32 %v16695_v9, 16  ;;  %v8002_v8 = vadd.f32 %v12400_v12, %v17498_v44  ;;  %v8854_v39 = vshrl.u32 %v16718_v30, 16  ;;  %v12402_v56 = vadd.f32 %v13160_v17, %v16582_v13 }
 0x8fd   : > { %v8377_v51 = vshrl.u32 %v11187_v4, 16  ;;  %v8380_v32 = vshll.u32 %v11187_v4, 16  ;;  %v8875_v23 = vrot.slane %v8873_v21, 1  ;;  %v8871_v45 = vor.u32 %v8870_v16, %v8866_v19  ;;  %v8546_v43 = vld [vmem:[#allocation2 + $0xc0] sm:$0xf] }
 0x8fe   : > { %v8856_v52 = vshll.u32 %v16718_v30, 16  ;;  %v8863_v58 = vrot.slane %v8861_v27, 1  ;;  %v11185_v49 = vpack.c.bf16 %v8002_v8, %v8002_v8  ;;  %v8005_v2 = vadd.f32 %v12401_v48, %v17499_v61  ;;  %v8539_v7 = vld [vmem:[#allocation2 + $0xb4] sm:$0xf]  ;;  %v8572_v4 = vld [vmem:[#allocation2 + $0x70] sm:$0xf] }
 0x8ff   : > { %v16728_v22 = vrot.slane %v8377_v51, 7  ;;  %v8876_v29 = vsel %vm993_vm3, %v8871_v45, %v8875_v23  ;;  %v10955_v24 = vcombine.low %v8615_v36, %v16678_v14  ;;  %v9100_v46 = vrot.slane %v16691_v53, 1  ;;  %v16745_v25 = vld [vmem:[#allocation2 + $0x80] ss:$0 sps:$4 sm:$0x11]  }
 0x900   : > { %v8858_v57 = vrot.slane %v8856_v52, 1  ;;  %9001 = vrot.lane.b32.xlu0 %v8876_v29, %s13491_s9  ;;  %v8360_v59 = vshrl.u32 %v11185_v49, 16  ;;  %v8363_v38 = vshll.u32 %v11185_v49, 16  ;;  %v11188_v28 = vpack.c.bf16 %v8005_v2, %v8005_v2  ;;  %v8573_v27 = vld [vmem:[#allocation2 + $0x78] sm:$0xf] }
 0x901   : > { %v8382_v63 = vor.u32 %v8380_v32, %v16728_v22  ;;  %v8383_v0 = vrot.slane %v16728_v22, 4  ;;  %v8003_v42 = vadd.f32 %v12402_v56, %v17500_v47  ;;  %v9099_v5 = vrot.slane %v10955_v24, 1  ;;  %v8571_v51 = vld [vmem:[#allocation2 + $0x6c] sm:$0xf]  ;;  %v8550_v23 = vld [vmem:[#allocation2 + $0xc8] sm:$0x1] }
 0x902   : > { %v8859_v13 = vor.u32 %v8858_v57, %v8854_v39  ;;  %v8362_v53 = vrot.slane %v8360_v59, 7  ;;  %v10954_v33 = vcombine.low %v8614_v54, %v16700_v50  ;;  %v9097_v19 = vrot.slane %v16695_v9, 1  ;;  %v16760_v39 = vld [vmem:[#allocation2 + $0x74] ss:$0 sps:$4 sm:$0x11]  }
 0x903   : > { %v8547_v14 = vsel %vm13667_vm10, %v8382_v63, %v8546_v43  ;;  %v8385_v18 = vshrl.u32 %v11188_v28, 16  ;;  %v8388_v10 = vshll.u32 %v11188_v28, 16  ;;  %v11186_v20 = vpack.c.bf16 %v8003_v42, %v8003_v42  ;;  %v8543_v49 = vld [vmem:[#allocation2 + $0xbc] sm:$0x1]  ;;  %v8617_v43 = vld [vmem:[#allocation2 + $0x78] sm:$0xe] }
 0x904   : > { %8548 = vst [vmem:[#allocation2 + $0xc0] sm:$0xf] %v8547_v14  ;;  %v8864_v41 = vsel %vm993_vm3, %v8859_v13, %v8863_v58  ;;  %v8365_v21 = vor.u32 %v8363_v38, %v8362_v53  ;;  %v8366_v12 = vrot.slane %v8362_v53, 4  ;;  %v9101_v35 = vsel %vm1300_vm2, %v9099_v5, %v9100_v46  ;;  %v8616_v63 = vld [vmem:[#allocation2 + $0x6c] sm:$0xe] }
 0x905   : > { %8999 = vrot.lane.b32.xlu1 %v8864_v41, %s13491_s9  ;;  %v9096_v16 = vrot.slane %v10954_v33, 1  ;;  %v8387_v50 = vrot.slane %v8385_v18, 7  ;;  %v8368_v17 = vshrl.u32 %v11186_v20, 16  ;;  %v8371_v9 = vshll.u32 %v11186_v20, 16  ;;  %9145 = vrot.lane.b32.xlu0 %v9101_v35, %s13490_s17  ;;  %v8578_v59 = vld [vmem:[#allocation2 + $0x94] sm:$0xf] }
 0x906   : > { %v16752_v48 = vcombine.low %v8573_v27, %v16739_v60  ;;  %v8540_v32 = vsel %vm13667_vm10, %v8365_v21, %v8539_v7  ;;  %v8897_v8 = vshll.u32 %v16745_v25, 16  ;;  %v16758_v45 = vcombine.low %v8571_v51, %v8572_v4  ;;  %v16774_v28 = vld [vmem:[#allocation2 + $0x98] ss:$0 sps:$4 sm:$0x11]   ;;  %v8577_v14 = vld [vmem:[#allocation2 + $0x90] sm:$0xf] }
 0x907   : > { %v9098_v44 = vsel %vm1300_vm2, %v9096_v16, %v9097_v19  ;;  %8541 = vst [vmem:[#allocation2 + $0xb4] sm:$0xf] %v8540_v32  ;;  %v8390_v52 = vor.u32 %v8388_v10, %v8387_v50  ;;  %v8392_v58 = vrot.slane %v8387_v50, 4  ;;  %v8370_v22 = vrot.slane %v8368_v17, 7  ;;  %v8576_v53 = vld [vmem:[#allocation2 + $0x88] sm:$0xf] }
 0x908   : > { %v8890_v61 = vshrl.u32 %v16752_v48, 16  ;;  %v8892_v11 = vshll.u32 %v16752_v48, 16  ;;  %v8899_v2 = vrot.slane %v8897_v8, 1  ;;  %v8878_v56 = vshrl.u32 %v16758_v45, 16  ;;  %v8619_v35 = vld [vmem:[#allocation2 + $0x90] sm:$0xe] }
 0x909   : > { %9143 = vrot.lane.b32.xlu1 %v9098_v44, %s13490_s17  ;;  %v8880_v36 = vshll.u32 %v16758_v45, 16  ;;  %v8391_v29 = vsel %vm13660_vm7, %v8383_v0, %v8390_v52  ;;  %v8551_v57 = vsel %vm13677_vm11, %v8392_v58, %v8550_v23  ;;  %v8373_v24 = vor.u32 %v8371_v9, %v8370_v22  ;;  %v16782_v18 = vld [vmem:[#allocation2 + $0x8c] ss:$0 sps:$4 sm:$0x11]   ;;  %v8618_v16 = vld [vmem:[#allocation2 + $0x84] sm:$0xe] }
 0x90a   : > { %v8375_v46 = vrot.slane %v8370_v22, 4  ;;  %8549 = vst.msk [vmem:[#allocation2 + $0xc4] sm:$0xf] %vm659_vm6, %v8391_v29  ;;  %8552 = vst [vmem:[#allocation2 + $0xc8] sm:$0x1] %v8551_v57  ;;  %v8894_v38 = vrot.slane %v8892_v11, 1  ;;  %v10957_v13 = vcombine.low %v8617_v43, %v16739_v60  ;;  %v10956_v5 = vcombine.low %v8616_v63, %v8572_v4 }
 0x90b   : > { %v8882_v54 = vrot.slane %v8880_v36, 1  ;;  %v8885_v7 = vshll.u32 %v16760_v39, 16  ;;  %v8374_v0 = vsel %vm13660_vm7, %v8366_v12, %v8373_v24  ;;  %v9106_v42 = vrot.slane %v16745_v25, 1  ;;  %v8581_v50 = vld [vmem:[#allocation2 + $0xa8] sm:$0xf] }
 0x90c   : > { %v8544_v47 = vsel %vm13677_vm11, %v8375_v46, %v8543_v49  ;;  %8542 = vst.msk [vmem:[#allocation2 + $0xb8] sm:$0xf] %vm659_vm6, %v8374_v0  ;;  %v8895_v33 = vor.u32 %v8894_v38, %v8890_v61  ;;  %v9105_v60 = vrot.slane %v10957_v13, 1  ;;  %v9102_v10 = vrot.slane %v10956_v5, 1  ;;  %v16795_v17 = vld [vmem:[#allocation2 + $0xac] sm:$0xf] }
 0x90d   : > { %8545 = vst [vmem:[#allocation2 + $0xbc] sm:$0x1] %v8544_v47  ;;  %v8883_v19 = vor.u32 %v8882_v54, %v8878_v56  ;;  %v8887_v41 = vrot.slane %v8885_v7, 1  ;;  %v9103_v31 = vrot.slane %v16760_v39, 1  ;;  %v16785_v20 = vcombine.low %v8577_v14, %v8578_v59  ;;  %v8579_v8 = vld [vmem:[#allocation2 + $0x9c] sm:$0xf] }
 0x90e   : > { %v8900_v25 = vsel %vm993_vm3, %v8895_v33, %v8899_v2  ;;  %v8921_v21 = vshll.u32 %v16774_v28, 16  ;;  %v16790_v12 = vcombine.low %v8575_v26, %v8576_v53  ;;  %v16797_v9 = vld [vmem:[#allocation2 + $0xb0] ss:$0 sps:$4 sm:$0x11]   ;;  %v9107_v51 = vsel %vm1300_vm2, %v9105_v60, %v9106_v42  ;;  %v8580_v39 = vld [vmem:[#allocation2 + $0xa0] sm:$0xf] }
 0x90f   : > { %v8888_v4 = vsel %vm993_vm3, %v8883_v19, %v8887_v41  ;;  %9005 = vrot.lane.b32.xlu0 %v8900_v25, %s13491_s9  ;;  %v8916_v27 = vshll.u32 %v16785_v20, 16  ;;  %v8909_v23 = vshll.u32 %v16782_v18, 16  ;;  %v10959_v44 = vcombine.low %v8619_v35, %v8578_v59  ;;  %v16804_v61 = vld [vmem:[#allocation2 + $0xa4] ss:$0 sps:$4 sm:$0x11]  }
 0x910   : > { %9003 = vrot.lane.b32.xlu1 %v8888_v4, %s13491_s9  ;;  %v8904_v32 = vshll.u32 %v16790_v12, 16  ;;  %v9104_v52 = vsel %vm1300_vm2, %v9102_v10, %v9103_v31  ;;  %v8914_v58 = vshrl.u32 %v16785_v20, 16  ;;  %v10958_v49 = vcombine.low %v8618_v16, %v8576_v53  ;;  %v8621_v19 = vld [vmem:[#allocation2 + $0xa8] sm:$0xe]  ;;  %v8585_v41 = vld [vmem:[#allocation2 + $0xc0] sm:$0xf]  ;;  %v8986_v4 = vpop.permute.xlu0 %8985 }
 0x911   : > { %v8918_v22 = vrot.slane %v8916_v27, 1  ;;  %v8923_v11 = vrot.slane %v8921_v21, 1  ;;  %v8902_v2 = vshrl.u32 %v16790_v12, 16  ;;  %v16808_v36 = vcombine.low %v8581_v50, %v16795_v17  ;;  %v16820_v47 = vld [vmem:[#allocation2 + $0xc4] sm:$0xf] }
 0x912   : > { %v8906_v56 = vrot.slane %v8904_v32, 1  ;;  %v9111_v29 = vrot.slane %v10959_v44, 1  ;;  %v9112_v57 = vrot.slane %v16774_v28, 1  ;;  %v16813_v24 = vcombine.low %v8579_v8, %v8580_v39  ;;  %v8620_v31 = vld [vmem:[#allocation2 + $0x9c] sm:$0xe] }
 0x913   : > { %9149 = vrot.lane.b32.xlu0 %v9107_v51, %s13490_s17  ;;  %v8919_v43 = vor.u32 %v8918_v22, %v8914_v58  ;;  %v8911_v63 = vrot.slane %v8909_v23, 1  ;;  %v9109_v59 = vrot.slane %v16782_v18, 1  ;;  %v8940_v38 = vshll.u32 %v16808_v36, 16  ;;  %v8584_v53 = vld [vmem:[#allocation2 + $0xb8] sm:$0xf] }
 0x914   : > { %9147 = vrot.lane.b32.xlu1 %v9104_v52, %s13490_s17  ;;  %v8907_v46 = vor.u32 %v8906_v56, %v8902_v2  ;;  %v9108_v7 = vrot.slane %v10958_v49, 1  ;;  %v8938_v13 = vshrl.u32 %v16808_v36, 16  ;;  %v8945_v0 = vshll.u32 %v16797_v9, 16  ;;  %v8583_v25 = vld [vmem:[#allocation2 + $0xb4] sm:$0xf] }
 0x915   : > { %v8924_v54 = vsel %vm993_vm3, %v8919_v43, %v8923_v11  ;;  %v8942_v28 = vrot.slane %v8940_v38, 1  ;;  %v8928_v5 = vshll.u32 %v16813_v24, 16  ;;  %v8933_v14 = vshll.u32 %v16804_v61, 16  ;;  %v16834_v27 = vld [vmem:[#allocation2 + $0xc8] ss:$0 sps:$4 sm:$0x11]  }
 0x916   : > { %v8912_v42 = vsel %vm993_vm3, %v8907_v46, %v8911_v63  ;;  %v9113_v33 = vsel %vm1300_vm2, %v9111_v29, %v9112_v57  ;;  %v8926_v18 = vshrl.u32 %v16813_v24, 16  ;;  %v16830_v26 = vcombine.low %v8585_v41, %v16820_v47  ;;  %v13144_v8 = vld [vmem:[#allocation2 + $0xbc] ss:$0 sps:$4 sm:$0x11]  }
 0x917   : > { %9009 = vrot.lane.b32.xlu0 %v8924_v54, %s13491_s9  ;;  %v8943_v60 = vor.u32 %v8942_v28, %v8938_v13  ;;  %v8930_v10 = vrot.slane %v8928_v5, 1  ;;  %v9110_v21 = vsel %vm1300_vm2, %v9108_v7, %v9109_v59  ;;  %v10961_v35 = vcombine.low %v8621_v19, %v16795_v17  ;;  %v8622_v7 = vld [vmem:[#allocation2 + $0xb4] sm:$0xe] }
 0x918   : > { %9007 = vrot.lane.b32.xlu1 %v8912_v42, %s13491_s9  ;;  %v10960_v16 = vcombine.low %v8620_v31, %v8580_v39  ;;  %v16836_v50 = vcombine.low %v8583_v25, %v8584_v53  ;;  %v8947_v51 = vrot.slane %v8945_v0, 1  ;;  %v8935_v23 = vrot.slane %v8933_v14, 1  ;;  %v8623_v14 = vld [vmem:[#allocation2 + $0xc0] sm:$0xe]  ;;  %v8624_v31 = vld [vmem:[#allocation2 + $0xcc] sm:$0xe] }
 0x919   : > { %v8931_v32 = vor.u32 %v8930_v10, %v8926_v18  ;;  %v8964_v44 = vshll.u32 %v16830_v26, 16  ;;  %v9118_v52 = vrot.slane %v16797_v9, 1  ;;  %v9115_v58 = vrot.slane %v16804_v61, 1  ;;  %v9130_v61 = vpop.permute.xlu0 %9129  ;;  %v8588_v18 = vld [vmem:[#allocation2 + $0xd0] sm:$0xf] }
 0x91a   : > { %v8948_v17 = vsel %vm993_vm3, %v8943_v60, %v8947_v51  ;;  %v8952_v49 = vshll.u32 %v16836_v50, 16  ;;  %v9117_v11 = vrot.slane %v10961_v35, 1  ;;  %v9114_v2 = vrot.slane %v10960_v16, 1  ;;  %v8587_v60 = vld [vmem:[#allocation2 + $0xcc] sm:$0xf] }
 0x91b   : > { %9153 = vrot.lane.b32.xlu0 %v9113_v33, %s13490_s17  ;;  %v8936_v39 = vsel %vm993_vm3, %v8931_v32, %v8935_v23  ;;  %v8966_v22 = vrot.slane %v8964_v44, 1  ;;  %v8962_v56 = vshrl.u32 %v16830_v26, 16  ;;  %v8969_v43 = vshll.u32 %v16834_v27, 16  ;;  %v13155_v10 = vld [vmem:[#allocation2 + $0xd4] ss:$0 sps:$4 sm:$0x11]  }
 0x91c   : > { %9151 = vrot.lane.b32.xlu1 %v9110_v21, %s13490_s17  ;;  %v8950_v29 = vshrl.u32 %v16836_v50, 16  ;;  %v8954_v57 = vrot.slane %v8952_v49, 1  ;;  %v8957_v46 = vshll.u32 %v13144_v8, 16  ;;  %v9166_v9 = vsel %vm1391_vm12, %v16356_v15, %v8986_v4 }
 0x91d   : > { %v9202_v63 = vsel %vm1428_vm13, %v9166_v9, %v9130_v61  ;;  %v8967_v59 = vor.u32 %v8966_v22, %v8962_v56  ;;  %v9119_v54 = vsel %vm1300_vm2, %v9117_v11, %v9118_v52  ;;  %v9116_v13 = vsel %vm1300_vm2, %v9114_v2, %v9115_v58  ;;  %v13151_v56 = vld [vmem:[%s17200_s3 + $0x20] sm:$0xff]  }
 0x91e   : > { %v8955_v38 = vor.u32 %v8954_v57, %v8950_v29  ;;  %11969 = vmatprep.mubr.msk.bf16.mxu1 %vm1483_vm14, %v9202_v63  ;;  %v8971_v0 = vrot.slane %v8969_v43, 1  ;;  %v8959_v42 = vrot.slane %v8957_v46, 1  ;;  %v10962_v28 = vcombine.low %v8622_v7, %v8584_v53  ;;  %v16901_v46 = vld [vmem:[%s17200_s3 + $0x30] sm:$0xff]  }
 0x91f   : > { %9013 = vrot.lane.b32.xlu0 %v8948_v17, %s13491_s9  ;;  %v9121_v19 = vrot.slane %v13144_v8, 1  ;;  %v10963_v41 = vcombine.low %v8623_v14, %v16820_v47  ;;  %v16864_v53 = vcombine.low %v8587_v60, %v8588_v18  ;;  %v10964_v21 = vcombine.low %v8624_v31, %v8588_v18 }
 0x920   : > { %9011 = vrot.lane.b32.xlu1 %v8936_v39, %s13491_s9  ;;  %v8972_v15 = vsel %vm993_vm3, %v8967_v59, %v8971_v0  ;;  %v8960_v5 = vsel %vm993_vm3, %v8955_v38, %v8959_v42  ;;  %v9120_v33 = vrot.slane %v10962_v28, 1  ;;  %v9124_v47 = vrot.slane %v16834_v27, 1 }
 0x921   : > { %v8974_v25 = vshrl.u32 %v16864_v53, 16  ;;  %v8976_v4 = vshll.u32 %v16864_v53, 16  ;;  %v9123_v16 = vrot.slane %v10963_v41, 1  ;;  %v8981_v51 = vshll.u32 %v13155_v10, 16 }
 0x922   : > { %v9122_v35 = vsel %vm1300_vm2, %v9120_v33, %v9121_v19  ;;  %v9126_v44 = vrot.slane %v10964_v21, 1  ;;  %v9127_v8 = vrot.slane %v13155_v10, 1 }
 0x923   : > { %9157 = vrot.lane.b32.xlu0 %v9119_v54, %s13490_s17  ;;  %v8978_v32 = vrot.slane %v8976_v4, 1  ;;  %v8983_v23 = vrot.slane %v8981_v51, 1  ;;  %v9125_v58 = vsel %vm1300_vm2, %v9123_v16, %v9124_v47 }
 0x924   : > { %9155 = vrot.lane.b32.xlu1 %v9116_v13, %s13490_s17  ;;  %v9128_v39 = vsel %vm1300_vm2, %v9126_v44, %v9127_v8 }
 0x925   : > { %v8979_v52 = vor.u32 %v8978_v32, %v8974_v25 }
 0x927   : > { %9017 = vrot.lane.b32.xlu0 %v8972_v15, %s13491_s9  ;;  %v8984_v17 = vsel %vm993_vm3, %v8979_v52, %v8983_v23 }
 0x928   : > { %9015 = vrot.lane.b32.xlu1 %v8960_v5, %s13491_s9 }
 0x92b   : > { %9019 = vrot.lane.b32.xlu0 %v8984_v17, %s13491_s9  ;;  %s13161_s9 = scalar_lea.vmem %s17146_s14, 2048 }
 0x92c   : > { %9159 = vrot.lane.b32.xlu1 %v9122_v35, %s13490_s17  ;;  %p13162_p13 = scmp.ne.s32.totalorder %s17146_s14, %s13161_s9  ;;  %p13169_p3 = scmp.lt.s32.totalorder %s13167_s23, %s13161_s9 }
 0x92e   : > { %p13163_p0 = pnand %p13162_p13, %p13565_p5  ;;  %p13170_p4 = por %p13169_p3, %p13168_p2 }
 0x930   : > { %9161 = vrot.lane.b32.xlu1 %v9125_v58, %s13490_s17  ;;  %p13164_p1 = pneg %p13163_p0 }
 0x932   : > { %p13171_p7 = pnand %p13170_p4, %p13164_p1 }
 0x934   : > { %9163 = vrot.lane.b32.xlu1 %v9128_v39, %s13490_s17  ;;  %s17144_s17 = scalar_lea.hbm %s17202_s5, %s11221_s13 }
 0x943   : > { %v8990_v27 = vpop.permute.xlu0 %8989 }
 0x944   : > { %v9170_v43 = vsel %vm1391_vm12, %v16459_v37, %v8990_v27 }
 0x948   : > { %v8988_v22 = vpop.permute.xlu1 %8987 }
 0x949   : > { %v9134_v49 = vpop.permute.xlu0 %9133  ;;  %v9168_v11 = vsel %vm1391_vm12, %v16500_v1, %v8988_v22  ;;  %v13152_v1 = vld [vmem:[%s17200_s3 + $0x28] sm:$0xff]  }
 0x94a   : > { %v16888_v57 = vsel %vm1428_vm13, %v9170_v43, %v9134_v49 }
 0x94c   : > { %v9132_v2 = vpop.permute.xlu1 %9131 }
 0x94d   : > { %v16885_v29 = vsel %vm1428_vm13, %v9168_v11, %v9132_v2 }
 0x94e   : > { %11970 = vmatmul.mubr.msk.bf16.vlgmr.msra.gmra.mrb[0].mxu1 %vm1483_vm14, %v16885_v29 }
 0x94f   : > { %12002 = vmatpush3.bf16.msra.mxu1 %v16522_v62  ;;  %11973 = vmatprep.mubr.msk.bf16.mxu1 %vm1483_vm14, %v16888_v57 }
 0x950   : > { %12003 = vmatprep.subr.bf16.mxu1 %v13151_v56 }
 0x953   : > { %12004 = vmatpush3.bf16.msra.mxu1 %v13151_v56 }
 0x954   : > { %v8994_v37 = vpop.permute.xlu0 %8993  ;;  %12005 = vmatprep.subr.bf16.mxu1 %v13152_v1 }
 0x955   : > { %v9174_v59 = vsel %vm1391_vm12, %v16566_v34, %v8994_v37  ;;  %v17047_v37 = vld [vmem:[%s17201_s4] ss:$0 sm:$0xff] }
 0x957   : > { %12006 = vmatpush3.bf16.msra.mxu1 %v13152_v1 }
 0x958   : > { %v8992_v9 = vpop.permute.xlu1 %8991  ;;  %12039 = vmatprep.subr.bf16.mxu1 %v16901_v46  ;;  %v9138_v62 = vpop.permute.xlu0 %9137 }
 0x959   : > { %v9172_v61 = vsel %vm1391_vm12, %v16599_v6, %v8992_v9  ;;  %v16912_v54 = vsel %vm1428_vm13, %v9174_v59, %v9138_v62 }
 0x95c   : > { %v9136_v63 = vpop.permute.xlu1 %9135 }
 0x95d   : > { %v16909_v38 = vsel %vm1428_vm13, %v9172_v61, %v9136_v63 }
 0x95e   : > { %11974 = vmatmul.mubr.msk.bf16.gmra.mrb[4].mxu1 %vm1483_vm14, %v16909_v38 }
 0x95f   : > { %11977 = vmatprep.mubr.msk.bf16.mxu1 %vm1483_vm14, %v16912_v54 }
 0x962   : > { %v8998_v7 = vpop.permute.xlu0 %8997 }
 0x963   : > { %v9178_v34 = vsel %vm1391_vm12, %v16635_v3, %v8998_v7 }
 0x967   : > { %v8996_v13 = vpop.permute.xlu1 %8995 }
 0x968   : > { %v9142_v0 = vpop.permute.xlu0 %9141  ;;  %v9176_v6 = vsel %vm1391_vm12, %v16660_v55, %v8996_v13 }
 0x969   : > { %v16926_v15 = vsel %vm1428_vm13, %v9178_v34, %v9142_v0 }
 0x96c   : > { %v9140_v42 = vpop.permute.xlu1 %9139 }
 0x96d   : > { %v16923_v28 = vsel %vm1428_vm13, %v9176_v6, %v9140_v42 }
 0x96e   : > { %11978 = vmatmul.mubr.msk.bf16.gmra.mrb[8].mxu1 %vm1483_vm14, %v16923_v28 }
 0x96f   : > { %11981 = vmatprep.mubr.msk.bf16.mxu1 %vm1483_vm14, %v16926_v15 }
 0x972   : > { %v9002_v5 = vpop.permute.xlu0 %9001 }
 0x973   : > { %v9182_v3 = vsel %vm1391_vm12, %v16689_v40, %v9002_v5 }
 0x977   : > { %v9000_v14 = vpop.permute.xlu1 %8999  ;;  %v9146_v33 = vpop.permute.xlu0 %9145 }
 0x978   : > { %v9180_v55 = vsel %vm1391_vm12, %v16718_v30, %v9000_v14  ;;  %v16940_v60 = vsel %vm1428_vm13, %v9182_v3, %v9146_v33 }
 0x97b   : > { %v9144_v19 = vpop.permute.xlu1 %9143 }
 0x97c   : > { %v16937_v41 = vsel %vm1428_vm13, %v9180_v55, %v9144_v19 }
 0x97d   : > { %11982 = vmatmul.mubr.msk.bf16.gmra.mrb[12].mxu1 %vm1483_vm14, %v16937_v41 }
 0x97e   : > { %11985 = vmatprep.mubr.msk.bf16.mxu1 %vm1483_vm14, %v16940_v60 }
 0x981   : > { %v9006_v18 = vpop.permute.xlu0 %9005 }
 0x982   : > { %v9004_v10 = vpop.permute.xlu1 %9003  ;;  %v9186_v40 = vsel %vm1391_vm12, %v16752_v48, %v9006_v18 }
 0x983   : > { %v9184_v30 = vsel %vm1391_vm12, %v16758_v45, %v9004_v10 }
 0x985   : > { %v9150_v31 = vpop.permute.xlu0 %9149 }
 0x986   : > { %v9148_v25 = vpop.permute.xlu1 %9147  ;;  %v16954_v21 = vsel %vm1428_vm13, %v9186_v40, %v9150_v31 }
 0x987   : > { %v16951_v4 = vsel %vm1428_vm13, %v9184_v30, %v9148_v25 }
 0x988   : > { %11986 = vmatmul.mubr.msk.bf16.gmra.mrb[16].mxu1 %vm1483_vm14, %v16951_v4 }
 0x989   : > { %11989 = vmatprep.mubr.msk.bf16.mxu1 %vm1483_vm14, %v16954_v21  ;;  %v9010_v35 = vpop.permute.xlu0 %9009 }
 0x98a   : > { %v9008_v16 = vpop.permute.xlu1 %9007  ;;  %v9190_v48 = vsel %vm1391_vm12, %v16785_v20, %v9010_v35 }
 0x98b   : > { %v9188_v45 = vsel %vm1391_vm12, %v16790_v12, %v9008_v16 }
 0x98d   : > { %v9154_v47 = vpop.permute.xlu0 %9153 }
 0x98e   : > { %v9152_v51 = vpop.permute.xlu1 %9151  ;;  %v9226_v23 = vsel %vm1428_vm13, %v9190_v48, %v9154_v47 }
 0x98f   : > { %v9224_v32 = vsel %vm1428_vm13, %v9188_v45, %v9152_v51 }
 0x990   : > { %11990 = vmatmul.mubr.msk.bf16.gmra.mrb[20].mxu1 %vm1483_vm14, %v9224_v32 }
 0x991   : > { %11993 = vmatprep.mubr.msk.bf16.mxu1 %vm1483_vm14, %v9226_v23  ;;  %v9014_v44 = vpop.permute.xlu0 %9013 }
 0x992   : > { %v9012_v8 = vpop.permute.xlu1 %9011  ;;  %v9194_v17 = vsel %vm1391_vm12, %v16808_v36, %v9014_v44  ;;  %v13157_v36 = vld [vmem:[%s17200_s3 + $0x38] sm:$0xff]  }
 0x993   : > { %v9192_v52 = vsel %vm1391_vm12, %v16813_v24, %v9012_v8 }
 0x995   : > { %v9158_v58 = vpop.permute.xlu0 %9157 }
 0x996   : > { %v9156_v12 = vpop.permute.xlu1 %9155  ;;  %v9230_v39 = vsel %vm1428_vm13, %v9194_v17, %v9158_v58 }
 0x997   : > { %v9228_v20 = vsel %vm1428_vm13, %v9192_v52, %v9156_v12 }
 0x998   : > { %11994 = vmatmul.mubr.msk.bf16.gmra.mrb[24].mxu1 %vm1483_vm14, %v9228_v20 }
 0x999   : > { %11997 = vmatprep.mubr.msk.bf16.mxu1 %vm1483_vm14, %v9230_v39  ;;  %v9018_v11 = vpop.permute.xlu0 %9017 }
 0x99a   : > { %v9016_v27 = vpop.permute.xlu1 %9015  ;;  %v9198_v56 = vsel %vm1391_vm12, %v16830_v26, %v9018_v11 }
 0x99b   : > { %v9196_v22 = vsel %vm1391_vm12, %v16836_v50, %v9016_v27  ;;  %v13158_v50 = vld [vmem:[%s17200_s3 + $0x40] sm:$0xff]  }
 0x99d   : > { %v9020_v26 = vpop.permute.xlu0 %9019 }
 0x99e   : > { %v9160_v49 = vpop.permute.xlu1 %9159 }
 0x99f   : > { %v9232_v24 = vsel %vm1428_vm13, %v9196_v22, %v9160_v49 }
 0x9a0   : > { %11998 = vmatmul.mubr.msk.bf16.gmra.mrb[28].mxu1 %vm1483_vm14, %v9232_v24 }
 0x9a1   : > { %12007 = vmatprep.mubr.msk.bf16.mxu1 %vm1483_vm14, %v16885_v29  ;;  %v9200_v29 = vsel %vm1391_vm12, %v16864_v53, %v9020_v26 }
 0x9a2   : > { %v9162_v2 = vpop.permute.xlu1 %9161 }
 0x9a3   : > { %v9234_v43 = vsel %vm1428_vm13, %v9198_v56, %v9162_v2 }
 0x9a8   : > { %12008 = vmatmul.mubr.msk.bf16.vlgmr.msra.gmra.mrb[0].mxu1 %vm1483_vm14, %v16888_v57 }
 0x9a9   : > { %12040 = vmatpush3.bf16.msra.mxu1 %v16901_v46  ;;  %12011 = vmatprep.mubr.msk.bf16.mxu1 %vm1483_vm14, %v16909_v38 }
 0x9aa   : > { %12041 = vmatprep.subr.bf16.mxu1 %v13157_v36 }
 0x9ad   : > { %12042 = vmatpush3.bf16.msra.mxu1 %v13157_v36 }
 0x9ae   : > { %12043 = vmatprep.subr.bf16.mxu1 %v13158_v50 }
 0x9b0   : > { %12012 = vmatmul.mubr.msk.bf16.gmra.mrb[4].mxu1 %vm1483_vm14, %v16912_v54 }
 0x9b1   : > { %12015 = vmatprep.mubr.msk.bf16.mxu1 %vm1483_vm14, %v16923_v28  ;;  %12044 = vmatpush3.bf16.msra.mxu1 %v13158_v50 }
 0x9b8   : > { %12016 = vmatmul.mubr.msk.bf16.gmra.mrb[8].mxu1 %vm1483_vm14, %v16926_v15 }
 0x9b9   : > { %12019 = vmatprep.mubr.msk.bf16.mxu1 %vm1483_vm14, %v16937_v41 }
 0x9c0   : > { %12020 = vmatmul.mubr.msk.bf16.gmra.mrb[12].mxu1 %vm1483_vm14, %v16940_v60 }
 0x9c1   : > { %12023 = vmatprep.mubr.msk.bf16.mxu1 %vm1483_vm14, %v16951_v4 }
 0x9c8   : > { %12024 = vmatmul.mubr.msk.bf16.gmra.mrb[16].mxu1 %vm1483_vm14, %v16954_v21 }
 0x9c9   : > { %12027 = vmatprep.mubr.msk.bf16.mxu1 %vm1483_vm14, %v9224_v32 }
 0x9d0   : > { %12028 = vmatmul.mubr.msk.bf16.gmra.mrb[20].mxu1 %vm1483_vm14, %v9226_v23 }
 0x9d1   : > { %12031 = vmatprep.mubr.msk.bf16.mxu1 %vm1483_vm14, %v9228_v20 }
 0x9d8   : > { %12032 = vmatmul.mubr.msk.bf16.gmra.mrb[24].mxu1 %vm1483_vm14, %v9230_v39 }
 0x9d9   : > { %12035 = vmatprep.mubr.msk.bf16.mxu1 %vm1483_vm14, %v9232_v24 }
 0x9e0   : > { %12036 = vmatmul.mubr.msk.bf16.gmra.mrb[28].mxu1 %vm1483_vm14, %v9234_v43 }
 0x9e1   : > { %12045 = vmatprep.mubr.msk.bf16.mxu1 %vm1483_vm14, %v16888_v57  ;;  %v9164_v57 = vpop.permute.xlu1 %9163 }
 0x9e2   : > { %v9236_v1 = vsel %vm1428_vm13, %v9200_v29, %v9164_v57 }
 0x9e8   : > { %12046 = vmatmul.mubr.msk.bf16.vlgmr.msra.gmra.mrb[0].mxu1 %vm1483_vm14, %v16909_v38 }
 0x9e9   : > { %12049 = vmatprep.mubr.msk.bf16.mxu1 %vm1483_vm14, %v16912_v54 }
 0x9f0   : > { %12050 = vmatmul.mubr.msk.bf16.gmra.mrb[4].mxu1 %vm1483_vm14, %v16923_v28 }
 0x9f1   : > { %12053 = vmatprep.mubr.msk.bf16.mxu1 %vm1483_vm14, %v16926_v15 }
 0x9f8   : > { %12054 = vmatmul.mubr.msk.bf16.gmra.mrb[8].mxu1 %vm1483_vm14, %v16937_v41 }
 0x9f9   : > { %12057 = vmatprep.mubr.msk.bf16.mxu1 %vm1483_vm14, %v16940_v60 }
 0xa00   : > { %12058 = vmatmul.mubr.msk.bf16.gmra.mrb[12].mxu1 %vm1483_vm14, %v16951_v4 }
 0xa01   : > { %12061 = vmatprep.mubr.msk.bf16.mxu1 %vm1483_vm14, %v16954_v21 }
 0xa08   : > { %12062 = vmatmul.mubr.msk.bf16.gmra.mrb[16].mxu1 %vm1483_vm14, %v9224_v32 }
 0xa09   : > { %12065 = vmatprep.mubr.msk.bf16.mxu1 %vm1483_vm14, %v9226_v23 }
 0xa10   : > { %12066 = vmatmul.mubr.msk.bf16.gmra.mrb[20].mxu1 %vm1483_vm14, %v9228_v20 }
 0xa11   : > { %12069 = vmatprep.mubr.msk.bf16.mxu1 %vm1483_vm14, %v9230_v39 }
 0xa18   : > { %12070 = vmatmul.mubr.msk.bf16.gmra.mrb[24].mxu1 %vm1483_vm14, %v9232_v24 }
 0xa19   : > { %12073 = vmatprep.mubr.msk.bf16.mxu1 %vm1483_vm14, %v9234_v43 }
 0xa20   : > { %12074 = vmatmul.mubr.msk.bf16.gmra.mrb[28].mxu1 %vm1483_vm14, %v9236_v1 }
 0xabb   : > { %v12047_v46 = vpop.f32.mrb[0].mxu1 }
 0xabc   : > { %v12403_v9 = vadd.f32 %v12047_v46, %v17047_v37  ;;  %v9753_v62 = vpop.f32.mrb[1].mxu1 }
 0xabd   : > { %v12404_v53 = vadd.f32 %v17047_v37, %v9753_v62  ;;  %v12048_v61 = vpop.f32.mrb[2].mxu1 }
 0xabe   : > { %v11191_v63 = vpack.c.bf16 %v12403_v9, %v12403_v9  ;;  %v12405_v59 = vadd.f32 %v12048_v61, %v17047_v37  ;;  %v9756_v38 = vpop.f32.mrb[3].mxu1 }
 0xabf   : > { %v11189_v54 = vpack.c.bf16 %v12404_v53, %v12404_v53  ;;  %v12406_v7 = vadd.f32 %v17047_v37, %v9756_v38 }
 0xac0   : > { %10043 = vst.msk [vmem:[%s13585_s12 + $0x8] sm:$0xf] %vm10040_vm15, %v11191_v63  ;;  %v11192_v13 = vpack.c.bf16 %v12405_v59, %v12405_v59 }
 0xac1   : > { %10041 = vst.msk [vmem:[%s13585_s12] sm:$0xf] %vm10040_vm15, %v11189_v54  ;;  %v11190_v0 = vpack.c.bf16 %v12406_v7, %v12406_v7 }
 0xac2   : > { %10044 = vst.msk [vmem:[%s13585_s12 + $0xc] sm:$0xf] %vm10040_vm15, %v11192_v13 }
 0xac3   : > { %10042 = vst.msk [vmem:[%s13585_s12 + $0x4] sm:$0xf] %vm10040_vm15, %v11190_v0  ;;  %v12051_v6 = vpop.f32.mrb[4].mxu1 }
 0xac4   : > { %v12407_v42 = vadd.f32 %v12051_v6, %v17047_v37  ;;  %v9769_v34 = vpop.f32.mrb[5].mxu1 }
 0xac5   : > { %v12408_v28 = vadd.f32 %v17047_v37, %v9769_v34  ;;  %v12052_v15 = vpop.f32.mrb[6].mxu1 }
 0xac6   : > { %v11195_v5 = vpack.c.bf16 %v12407_v42, %v12407_v42  ;;  %v12409_v14 = vadd.f32 %v12052_v15, %v17047_v37  ;;  %v9772_v33 = vpop.f32.mrb[7].mxu1 }
 0xac7   : > { %v11193_v55 = vpack.c.bf16 %v12408_v28, %v12408_v28  ;;  %v12410_v19 = vadd.f32 %v17047_v37, %v9772_v33 }
 0xac8   : > { %10047 = vst.msk [vmem:[%s13585_s12 + $0x18] sm:$0xf] %vm10040_vm15, %v11195_v5  ;;  %v11196_v3 = vpack.c.bf16 %v12409_v14, %v12409_v14 }
 0xac9   : > { %10045 = vst.msk [vmem:[%s13585_s12 + $0x10] sm:$0xf] %vm10040_vm15, %v11193_v55  ;;  %v11194_v41 = vpack.c.bf16 %v12410_v19, %v12410_v19 }
 0xaca   : > { %10048 = vst.msk [vmem:[%s13585_s12 + $0x1c] sm:$0xf] %vm10040_vm15, %v11196_v3 }
 0xacb   : > { %10046 = vst.msk [vmem:[%s13585_s12 + $0x14] sm:$0xf] %vm10040_vm15, %v11194_v41  ;;  %v12055_v60 = vpop.f32.mrb[8].mxu1 }
 0xacc   : > { %v12411_v18 = vadd.f32 %v12055_v60, %v17047_v37  ;;  %v9785_v10 = vpop.f32.mrb[9].mxu1 }
 0xacd   : > { %v12412_v30 = vadd.f32 %v17047_v37, %v9785_v10  ;;  %v12056_v31 = vpop.f32.mrb[10].mxu1 }
 0xace   : > { %v11199_v25 = vpack.c.bf16 %v12411_v18, %v12411_v18  ;;  %v12413_v40 = vadd.f32 %v12056_v31, %v17047_v37  ;;  %v9788_v4 = vpop.f32.mrb[11].mxu1 }
 0xacf   : > { %v11197_v21 = vpack.c.bf16 %v12412_v30, %v12412_v30  ;;  %v12414_v35 = vadd.f32 %v17047_v37, %v9788_v4 }
 0xad0   : > { %10051 = vst.msk [vmem:[%s13585_s12 + $0x28] sm:$0xf] %vm10040_vm15, %v11199_v25  ;;  %v11200_v16 = vpack.c.bf16 %v12413_v40, %v12413_v40 }
 0xad1   : > { %10049 = vst.msk [vmem:[%s13585_s12 + $0x20] sm:$0xf] %vm10040_vm15, %v11197_v21  ;;  %v11198_v45 = vpack.c.bf16 %v12414_v35, %v12414_v35 }
 0xad2   : > { %10052 = vst.msk [vmem:[%s13585_s12 + $0x2c] sm:$0xf] %vm10040_vm15, %v11200_v16 }
 0xad3   : > { %10050 = vst.msk [vmem:[%s13585_s12 + $0x24] sm:$0xf] %vm10040_vm15, %v11198_v45  ;;  %v12059_v47 = vpop.f32.mrb[12].mxu1 }
 0xad4   : > { %v12415_v51 = vadd.f32 %v12059_v47, %v17047_v37  ;;  %v9801_v48 = vpop.f32.mrb[13].mxu1 }
 0xad5   : > { %v12416_v32 = vadd.f32 %v17047_v37, %v9801_v48  ;;  %v12060_v23 = vpop.f32.mrb[14].mxu1 }
 0xad6   : > { %v11203_v44 = vpack.c.bf16 %v12415_v51, %v12415_v51  ;;  %v12417_v8 = vadd.f32 %v12060_v23, %v17047_v37  ;;  %v9804_v52 = vpop.f32.mrb[15].mxu1 }
 0xad7   : > { %v11201_v58 = vpack.c.bf16 %v12416_v32, %v12416_v32  ;;  %v12418_v12 = vadd.f32 %v17047_v37, %v9804_v52 }
 0xad8   : > { %10055 = vst.msk [vmem:[%s13585_s12 + $0x38] sm:$0xf] %vm10040_vm15, %v11203_v44  ;;  %v11204_v17 = vpack.c.bf16 %v12417_v8, %v12417_v8 }
 0xad9   : > { %10053 = vst.msk [vmem:[%s13585_s12 + $0x30] sm:$0xf] %vm10040_vm15, %v11201_v58  ;;  %v11202_v20 = vpack.c.bf16 %v12418_v12, %v12418_v12 }
 0xada   : > { %10056 = vst.msk [vmem:[%s13585_s12 + $0x3c] sm:$0xf] %vm10040_vm15, %v11204_v17 }
 0xadb   : > { %10054 = vst.msk [vmem:[%s13585_s12 + $0x34] sm:$0xf] %vm10040_vm15, %v11202_v20  ;;  %v12063_v39 = vpop.f32.mrb[16].mxu1 }
 0xadc   : > { %v12419_v27 = vadd.f32 %v12063_v39, %v17047_v37  ;;  %v9817_v22 = vpop.f32.mrb[17].mxu1 }
 0xadd   : > { %v12420_v49 = vadd.f32 %v17047_v37, %v9817_v22  ;;  %v12064_v24 = vpop.f32.mrb[18].mxu1 }
 0xade   : > { %v11207_v36 = vpack.c.bf16 %v12419_v27, %v12419_v27  ;;  %v12421_v50 = vadd.f32 %v12064_v24, %v17047_v37  ;;  %v9820_v11 = vpop.f32.mrb[19].mxu1 }
 0xadf   : > { %v11205_v2 = vpack.c.bf16 %v12420_v49, %v12420_v49  ;;  %v12422_v56 = vadd.f32 %v17047_v37, %v9820_v11 }
 0xae0   : > { %10059 = vst.msk [vmem:[%s13585_s12 + $0x48] sm:$0xf] %vm10040_vm15, %v11207_v36  ;;  %v11208_v43 = vpack.c.bf16 %v12421_v50, %v12421_v50 }
 0xae1   : > { %10057 = vst.msk [vmem:[%s13585_s12 + $0x40] sm:$0xf] %vm10040_vm15, %v11205_v2  ;;  %v11206_v26 = vpack.c.bf16 %v12422_v56, %v12422_v56 }
 0xae2   : > { %10060 = vst.msk [vmem:[%s13585_s12 + $0x4c] sm:$0xf] %vm10040_vm15, %v11208_v43 }
 0xae3   : > { %10058 = vst.msk [vmem:[%s13585_s12 + $0x44] sm:$0xf] %vm10040_vm15, %v11206_v26  ;;  %v12067_v29 = vpop.f32.mrb[20].mxu1 }
 0xae4   : > { %v12423_v57 = vadd.f32 %v12067_v29, %v17047_v37  ;;  %v9833_v1 = vpop.f32.mrb[21].mxu1 }
 0xae5   : > { %v12424_v46 = vadd.f32 %v17047_v37, %v9833_v1  ;;  %v12068_v9 = vpop.f32.mrb[22].mxu1 }
 0xae6   : > { %v11211_v62 = vpack.c.bf16 %v12423_v57, %v12423_v57  ;;  %v12425_v53 = vadd.f32 %v12068_v9, %v17047_v37  ;;  %v9836_v61 = vpop.f32.mrb[23].mxu1 }
 0xae7   : > { %v11209_v63 = vpack.c.bf16 %v12424_v46, %v12424_v46  ;;  %v12426_v59 = vadd.f32 %v17047_v37, %v9836_v61 }
 0xae8   : > { %10063 = vst.msk [vmem:[%s13585_s12 + $0x58] sm:$0xf] %vm10040_vm15, %v11211_v62  ;;  %v11212_v38 = vpack.c.bf16 %v12425_v53, %v12425_v53 }
 0xae9   : > { %10061 = vst.msk [vmem:[%s13585_s12 + $0x50] sm:$0xf] %vm10040_vm15, %v11209_v63  ;;  %v11210_v54 = vpack.c.bf16 %v12426_v59, %v12426_v59 }
 0xaea   : > { %10064 = vst.msk [vmem:[%s13585_s12 + $0x5c] sm:$0xf] %vm10040_vm15, %v11212_v38 }
 0xaeb   : > { %10062 = vst.msk [vmem:[%s13585_s12 + $0x54] sm:$0xf] %vm10040_vm15, %v11210_v54  ;;  %v12071_v7 = vpop.f32.mrb[24].mxu1 }
 0xaec   : > { %v12427_v13 = vadd.f32 %v12071_v7, %v17047_v37  ;;  %v9849_v0 = vpop.f32.mrb[25].mxu1 }
 0xaed   : > { %v12428_v6 = vadd.f32 %v17047_v37, %v9849_v0  ;;  %v12072_v42 = vpop.f32.mrb[26].mxu1 }
 0xaee   : > { %v11215_v34 = vpack.c.bf16 %v12427_v13, %v12427_v13  ;;  %v12429_v28 = vadd.f32 %v12072_v42, %v17047_v37  ;;  %v9852_v15 = vpop.f32.mrb[27].mxu1 }
 0xaef   : > { %v11213_v5 = vpack.c.bf16 %v12428_v6, %v12428_v6  ;;  %v12430_v14 = vadd.f32 %v17047_v37, %v9852_v15 }
 0xaf0   : > { %10067 = vst.msk [vmem:[%s13585_s12 + $0x68] sm:$0xf] %vm10040_vm15, %v11215_v34  ;;  %v11216_v33 = vpack.c.bf16 %v12429_v28, %v12429_v28 }
 0xaf1   : > { %10065 = vst.msk [vmem:[%s13585_s12 + $0x60] sm:$0xf] %vm10040_vm15, %v11213_v5  ;;  %v11214_v55 = vpack.c.bf16 %v12430_v14, %v12430_v14 }
 0xaf2   : > { %10068 = vst.msk [vmem:[%s13585_s12 + $0x6c] sm:$0xf] %vm10040_vm15, %v11216_v33 }
 0xaf3   : > { %10066 = vst.msk [vmem:[%s13585_s12 + $0x64] sm:$0xf] %vm10040_vm15, %v11214_v55  ;;  %v12075_v19 = vpop.f32.mrb[28].mxu1 }
 0xaf4   : > { %v12431_v3 = vadd.f32 %v12075_v19, %v17047_v37  ;;  %v9865_v41 = vpop.f32.mrb[29].mxu1 }
 0xaf5   : > { %v12432_v60 = vadd.f32 %v17047_v37, %v9865_v41  ;;  %v12076_v18 = vpop.f32.mrb[30].mxu1 }
 0xaf6   : > { %v11219_v10 = vpack.c.bf16 %v12431_v3, %v12431_v3  ;;  %v12433_v30 = vadd.f32 %v12076_v18, %v17047_v37  ;;  %v9868_v31 = vpop.f32.mrb[31].mxu1 }
 0xaf7   : > { %v11217_v25 = vpack.c.bf16 %v12432_v60, %v12432_v60  ;;  %v12434_v40 = vadd.f32 %v17047_v37, %v9868_v31 }
 0xaf8   : > { %10071 = vst.msk [vmem:[%s13585_s12 + $0x78] sm:$0xf] %vm10040_vm15, %v11219_v10  ;;  %v11220_v4 = vpack.c.bf16 %v12433_v30, %v12433_v30 }
 0xaf9   : > { %10069 = vst.msk [vmem:[%s13585_s12 + $0x70] sm:$0xf] %vm10040_vm15, %v11217_v25  ;;  %v11218_v21 = vpack.c.bf16 %v12434_v40, %v12434_v40 }
 0xafa   : > { %10072 = vst.msk [vmem:[%s13585_s12 + $0x7c] sm:$0xf] %vm10040_vm15, %v11220_v4 }
 0xafb   : > { %10070 = vst.msk [vmem:[%s13585_s12 + $0x74] sm:$0xf] %vm10040_vm15, %v11218_v21 }
 0xafc   : > { %13174 = shalt.err (!%p13171_p7)
}
 0xafd   : > { %s13175_s30 = scalar_lea.hbm %s17144_s17, 2048  ;;  %s13179_s6 = scalar_lea.hbm %s17202_s5, 4096 }
 0xafe   : > { %p13176_p8 = scmp.ne.s32.totalorder %s17144_s17, %s13175_s30  ;;  %p13180_p11 = scmp.lt.u32.totalorder %s17144_s17, %s17202_s5 }
 0xaff   : > { %p13181_p12 = scmp.lt.u32.totalorder %s13179_s6, %s13175_s30  ;;  %p13183_p0 = scmp.lt.u32.totalorder %s13175_s30, %s17144_s17 }
 0xb00   : > { %p13177_p9 = pnand %p13176_p8, %p13565_p5 }
 0xb01   : > { %p13182_p13 = por %p13181_p12, %p13180_p11 }
 0xb02   : > { %p13178_p10 = pneg %p13177_p9 }
 0xb03   : > { %p13184_p1 = por %p13183_p0, %p13182_p13 }
 0xb05   : > { %p13185_p2 = pnand %p13184_p1, %p13178_p10 }
 0xb07   : > { %13188 = shalt.err (!%p13185_p2)
}
 0xb08   : > { %s13495_s10 = smov 64   ;;  %s13496_s13 = smov 4  }
 0xb09   : > { %12563 = dma.vmem_to_hbm [thread:$0]  (%p13565_p5), %s17146_s14, 2048, %s17144_s17, %s17156_s22, %s13495_s10, %s13495_s10, %s13496_s13  }
 0xb0a PF: > { %p12569_p3 = scmp.ge.s32.totalorder %s13355_s21, 2  ;;  %s10102_s15 = sand.u32 1, %s13343_s18  }
 0xb0b   : > { %s10103_s11 = scalar_lea.sflag [#allocation4], %s10102_s15 }
 0xb0c   : > { %p12566_p4 = pnand %p12569_p3, %p13569_p6 }
 0xb0e   : > { %13338 = dma.done.wait (!%p12566_p4), %s10103_s11, 2048  }
 0xb0f   : > { %13340 = vsyncadd (!%p12566_p4), %s10103_s11, 4294965248  ;;  %p15_p7 = scmp.ge.s32.totalorder %s13552_s24, 4   ;;  %s17501_s18 = smov %s13347_s19 }
 0xb10   : > { %s17502_s19 = smov %s13351_s20  ;;  %s17503_s20 = smov %s13563_s27 }
 0xb11   : > { %s17504_s21 = smov %s13552_s24  ;;  %17 = sbr.rel (!%p15_p7) target bundleno = 3 (0x3), region = 104 }
 0xb18   :  { %10108 = vsyncpa [#allocation4], 1 }
 0xb19   :  { %10110 = vsyncpa [#allocation4 + $0x1], 1 }

</bundles_post_ra>
